<compile_context>
chip_gen: v6e
topology: v6e:2x2x1
jax: 0.10.0
libtpu: 0.0.40
codegen_flags: <defaults>
</compile_context>

<pallas_src>
import functools

import jax
import jax.numpy as jnp
from jax import lax
from jax.experimental import pallas as pl
from jax.experimental.pallas import tpu as pltpu


# ----------------------------- shared LSTM gate math -----------------------------

def _lstm_gates(gates, H):
    i = jax.nn.sigmoid(gates[:, 0 * H:1 * H])
    f = jax.nn.sigmoid(gates[:, 1 * H:2 * H])
    g = jnp.tanh(gates[:, 2 * H:3 * H])
    o = jax.nn.sigmoid(gates[:, 3 * H:4 * H])
    return i, f, g, o


# ------------------------- fused encoder+decoder kernel -------------------------

def _seq2seq_kernel(enc_emb_ref, dec_emb_ref,
                    enc_wih_ref, enc_whh_ref, enc_b_ref,
                    dec_wie_ref, dec_wif_ref, dec_whh_ref, dec_b_ref,
                    attn_win_ref, attn_woc_ref, attn_woh_ref,
                    out_ref,
                    enc_x_sc, dec_x_sc, ctx_sc, ctx_b16_sc, attn_k_sc,
                    *, gate_dtype):
    f32 = jnp.float32
    bf16 = jnp.bfloat16

    T, B, H = out_ref.shape
    SB = enc_x_sc.shape[0]          # S * B
    S = SB // B

    # ---- hoisted input projections: one big MXU matmul each, bias folded in ----
    enc_x_sc[...] = (jnp.dot(enc_emb_ref[...], enc_wih_ref[...],
                             preferred_element_type=f32) + enc_b_ref[...])
    dec_x_sc[...] = (jnp.dot(dec_emb_ref[...], dec_wie_ref[...],
                             preferred_element_type=f32) + dec_b_ref[...])

    # ---------------------------- encoder recurrence ----------------------------
    def enc_step(t, carry):
        h, c = carry
        r0 = pl.multiple_of(t * B, B)
        gates = enc_x_sc[pl.ds(r0, B), :] + jnp.dot(
            h.astype(bf16), enc_whh_ref[...], preferred_element_type=f32)
        i, f, g, o = _lstm_gates(gates.astype(gate_dtype), H)
        c = f * c + i * g                       # cell state kept in f32
        h = o * jnp.tanh(c)                     # h kept in f32
        ctx_sc[pl.ds(r0, B), :] = h             # context row (t*B + b), f32
        return h, c

    h0 = jnp.zeros((B, H), f32)
    c0 = jnp.zeros((B, H), f32)
    # S=8: fully unrolled (audit spills / drop to unroll=2 if S grows).
    h_enc, c_enc = lax.fori_loop(0, S, enc_step, (h0, c0), unroll=True)

    # ------------- one-time attention precompute (off the per-step chain) -------
    # bf16 context scratch (decoder reads the ref, no long-lived SSA value).
    ctx_b16_sc[...] = ctx_sc[...].astype(bf16)
    # K = attn_win @ ctx^T  ->  (H, S*B); per-step scores are then h @ K.
    attn_k_sc[...] = lax.dot_general(
        attn_win_ref[...], ctx_b16_sc[...],
        (((1,), (1,)), ((), ())),
        preferred_element_type=f32).astype(bf16)

    # -------------------- decoder: input-feed LSTM + attention ------------------
    # block-diagonal validity: context row c = s*B + b belongs to query batch b.
    rows = lax.broadcasted_iota(jnp.int32, (B, SB), 0)
    cols = lax.broadcasted_iota(jnp.int32, (B, SB), 1)
    valid = (cols % B) == rows
    neg = jnp.float32(jnp.finfo(jnp.float32).min / 2)

    def dec_step(t, carry):
        h, c, feed = carry                      # h, c: f32; feed: bf16
        r0 = pl.multiple_of(t * B, B)
        hb = h.astype(bf16)
        # input-feed LSTM: emb part hoisted; two separate dots (no lane concat).
        gates = (dec_x_sc[pl.ds(r0, B), :]
                 + jnp.dot(feed, dec_wif_ref[...], preferred_element_type=f32)
                 + jnp.dot(hb, dec_whh_ref[...], preferred_element_type=f32))
        i, f, g, o = _lstm_gates(gates.astype(gate_dtype), H)
        c = f * c + i * g
        h = o * jnp.tanh(c)
        hb = h.astype(bf16)

        # global attention (Luong "general") via precomputed keys K = W_in @ ctx^T
        scores = jnp.dot(hb, attn_k_sc[...], preferred_element_type=f32)  # (B, S*B)
        scores = jnp.where(valid, scores, neg)
        scores = scores - jnp.max(scores, axis=-1, keepdims=True)
        p = jnp.exp(scores)
        probs = p * pl.reciprocal(jnp.sum(p, axis=-1, keepdims=True), approx=False)
        wctx = jnp.dot(probs.astype(bf16), ctx_b16_sc[...],
                       preferred_element_type=f32)                        # (B, H)
        # attention output: two dots instead of a lane-concat + fused dot.
        out_t = jnp.tanh(
            jnp.dot(wctx.astype(bf16), attn_woc_ref[...], preferred_element_type=f32)
            + jnp.dot(hb, attn_woh_ref[...], preferred_element_type=f32))  # (B, H) f32
        out_ref[t] = out_t
        return h, c, out_t.astype(bf16)         # out_t is the next input-feed

    feed0 = jnp.zeros((B, H), bf16)             # make_init_decoder_output (zeros)
    # T=8: fully unrolled (audit spills / drop to unroll=2 if T grows).
    lax.fori_loop(0, T, dec_step, (h_enc, c_enc, feed0), unroll=True)


# ----------------------------- Seq2SeqModel.forward -----------------------------

def seq2seq_forward(params, src, tgt):
    S, B = src.shape
    T, _ = tgt.shape
    E = params["enc_emb"].shape[1]
    H = params["enc_whh"].shape[0]
    bf16 = jnp.bfloat16

    # bf16 gate nonlinearities only on chips with bf16 VPU/EUP (v6e / v7x);
    # v5e (and older) keep all non-MXU math in f32.
    kind = jax.devices()[0].device_kind.lower()
    gate_dtype = bf16 if any(tag in kind for tag in ("v6", "v7", "7x")) else jnp.float32

    # embedding lookups (gather) stay in XLA; flatten time x batch for the hoisted matmul.
    enc_emb2d = params["enc_emb"][src].reshape(S * B, E).astype(bf16)
    dec_emb2d = params["dec_emb"][tgt].reshape(T * B, E).astype(bf16)

    # bf16 weights for the MXU; recurrent / output weights kept separate (two dots
    # per step instead of per-step lane concatenation).
    enc_wih = params["enc_wih"].astype(bf16)       # (E, 4H)
    enc_whh = params["enc_whh"].astype(bf16)       # (H, 4H)
    dec_wie = params["dec_wie"].astype(bf16)       # (E, 4H)
    dec_wif = params["dec_wif"].astype(bf16)       # (H, 4H)
    dec_whh = params["dec_whh"].astype(bf16)       # (H, 4H)
    attn_win = params["attn_win"].astype(bf16)     # (H, H)
    attn_woc = params["attn_woc"].astype(bf16)     # (H, H)
    attn_woh = params["attn_woh"].astype(bf16)     # (H, H)

    full2 = lambda i: (0, 0)
    full3 = lambda i: (0, 0, 0)

    out = pl.pallas_call(
        functools.partial(_seq2seq_kernel, gate_dtype=gate_dtype),
        out_shape=jax.ShapeDtypeStruct((T, B, H), jnp.float32),
        grid_spec=pltpu.PrefetchScalarGridSpec(
            num_scalar_prefetch=0, grid=(1,),
            in_specs=[pl.BlockSpec((S * B, E), full2),       # enc emb (bf16)
                      pl.BlockSpec((T * B, E), full2),       # dec emb (bf16)
                      pl.BlockSpec((E, 4 * H), full2),       # enc W_ih
                      pl.BlockSpec((H, 4 * H), full2),       # enc W_hh
                      pl.BlockSpec((1, 4 * H), full2),       # enc bias (f32)
                      pl.BlockSpec((E, 4 * H), full2),       # dec W_ie
                      pl.BlockSpec((H, 4 * H), full2),       # dec W_if
                      pl.BlockSpec((H, 4 * H), full2),       # dec W_hh
                      pl.BlockSpec((1, 4 * H), full2),       # dec bias (f32)
                      pl.BlockSpec((H, H), full2),           # attn W_in
                      pl.BlockSpec((H, H), full2),           # attn W_oc
                      pl.BlockSpec((H, H), full2)],          # attn W_oh
            out_specs=pl.BlockSpec((T, B, H), full3),
            scratch_shapes=[
                pltpu.VMEM((S * B, 4 * H), jnp.float32),     # hoisted enc proj
                pltpu.VMEM((T * B, 4 * H), jnp.float32),     # hoisted dec proj
                pltpu.VMEM((S * B, H), jnp.float32),         # encoder context (f32)
                pltpu.VMEM((S * B, H), jnp.bfloat16),        # context, bf16 for MXU
                pltpu.VMEM((H, S * B), jnp.bfloat16)]),      # precomputed attn keys K
        compiler_params=pltpu.CompilerParams(dimension_semantics=("arbitrary",)),
    )(enc_emb2d, dec_emb2d,
      enc_wih, enc_whh, params["enc_b"],
      dec_wie, dec_wif, dec_whh, params["dec_b"],
      attn_win, attn_woc, attn_woh)
    return out                                               # (T, B, H)


# ----------------------------- pure-JAX reference -----------------------------

def ref_forward(params, src, tgt):
    H = params["enc_whh"].shape[0]
    enc_emb = params["enc_emb"][src]
    S, B, _ = enc_emb.shape
    h = jnp.zeros((B, H), jnp.float32)
    c = jnp.zeros((B, H), jnp.float32)
    ctx = []
    for t in range(S):
        g = enc_emb[t] @ params["enc_wih"] + h @ params["enc_whh"] + params["enc_b"]
        i, f, gg, o = _lstm_gates(g, H)
        c = f * c + i * gg
        h = o * jnp.tanh(c)
        ctx.append(h)
    ctx = jnp.stack(ctx)                                     # (S, B, H)

    dec_emb = params["dec_emb"][tgt]
    T = dec_emb.shape[0]
    dh, dc = h, c
    feed = jnp.zeros((B, H), jnp.float32)
    ctx_b = jnp.transpose(ctx, (1, 0, 2))                    # (B, S, H)
    outs = []
    for t in range(T):
        g = (dec_emb[t] @ params["dec_wie"] + feed @ params["dec_wif"]
             + dh @ params["dec_whh"] + params["dec_b"])
        i, f, gg, o = _lstm_gates(g, H)
        dc = f * dc + i * gg
        dh = o * jnp.tanh(dc)
        q = dh @ params["attn_win"]
        sc = jnp.einsum("bh,bsh->bs", q, ctx_b)
        aw = jax.nn.softmax(sc, axis=-1)
        wctx = jnp.einsum("bs,bsh->bh", aw, ctx_b)
        feed = jnp.tanh(wctx @ params["attn_woc"] + dh @ params["attn_woh"])
        outs.append(feed)
    return jnp.stack(outs)


# ----------------------------- setup & run -----------------------------

def init_params(key, V, E, H):
    def u(k, shape):
        return jax.random.uniform(k, shape, jnp.float32, -0.1, 0.1)
    ks = jax.random.split(key, 12)
    return dict(
        enc_emb=u(ks[0], (V, E)),
        enc_wih=u(ks[1], (E, 4 * H)),
        enc_whh=u(ks[2], (H, 4 * H)),
        enc_b=u(ks[3], (1, 4 * H)),
        dec_emb=u(ks[4], (V, E)),
        dec_wie=u(ks[5], (E, 4 * H)),
        dec_wif=u(ks[6], (H, 4 * H)),
        dec_whh=u(ks[7], (H, 4 * H)),
        dec_b=u(ks[8], (1, 4 * H)),
        attn_win=u(ks[9], (H, H)),
        attn_woc=u(ks[10], (H, H)),
        attn_woh=u(ks[11], (H, H)),
    )


if __name__ == "__main__":
    V, E, H = 32, 128, 128      # vocab, embedding dim, hidden dim
    S, T, B = 8, 8, 8           # src len, tgt len, batch

    key = jax.random.PRNGKey(0)
    kp, ks, kt = jax.random.split(key, 3)
    params = init_params(kp, V, E, H)
    src = jax.random.randint(ks, (S, B), 0, V, dtype=jnp.int32)
    tgt = jax.random.randint(kt, (T, B), 0, V, dtype=jnp.int32)

    out = jax.jit(seq2seq_forward)(params, src, tgt)
    out = jax.block_until_ready(out)
    assert out.shape == (T, B, H), out.shape

    # Tolerance covers bf16 MXU operands + (on v6e/v7x) bf16 gate nonlinearities
    # vs. the f32 reference; observed error is well below this bound at these shapes.
    ref = ref_forward(params, src, tgt)
    err = float(jnp.max(jnp.abs(out - ref)))
    if err > 5e-2:
        raise AssertionError(f"kernel mismatch vs reference, max abs err = {err}")
    print("KERNEL_OK")
</pallas_src>

<mosaic_0001>
module attributes {stable_mosaic.version = 11 : i64} {
  func.func @_seq2seq_kernel(%arg0: i32, %arg1: memref<64x128xbf16, #tpu.memory_space<vmem>>, %arg2: memref<64x128xbf16, #tpu.memory_space<vmem>>, %arg3: memref<128x512xbf16, #tpu.memory_space<vmem>>, %arg4: memref<128x512xbf16, #tpu.memory_space<vmem>>, %arg5: memref<1x512xf32, #tpu.memory_space<vmem>>, %arg6: memref<128x512xbf16, #tpu.memory_space<vmem>>, %arg7: memref<128x512xbf16, #tpu.memory_space<vmem>>, %arg8: memref<128x512xbf16, #tpu.memory_space<vmem>>, %arg9: memref<1x512xf32, #tpu.memory_space<vmem>>, %arg10: memref<128x128xbf16, #tpu.memory_space<vmem>>, %arg11: memref<128x128xbf16, #tpu.memory_space<vmem>>, %arg12: memref<128x128xbf16, #tpu.memory_space<vmem>>, %arg13: memref<8x8x128xf32, #tpu.memory_space<vmem>>, %arg14: memref<64x512xf32, #tpu.memory_space<vmem>>, %arg15: memref<64x512xf32, #tpu.memory_space<vmem>>, %arg16: memref<64x128xf32, #tpu.memory_space<vmem>>, %arg17: memref<64x128xbf16, #tpu.memory_space<vmem>>, %arg18: memref<128x64xbf16, #tpu.memory_space<vmem>>) attributes {dimension_semantics = [#tpu.dimension_semantics<arbitrary>], iteration_bounds = array<i64: 1>, scalar_prefetch = 0 : i64, scratch_operands = 5 : i64, tpu.core_type = #tpu.core_type<tc>, window_params = [{pipeline_mode = #tpu.pipeline_mode<synchronous>, transform_indices = @transform_0, window_bounds = array<i64: 64, 128>}, {pipeline_mode = #tpu.pipeline_mode<synchronous>, transform_indices = @transform_1, window_bounds = array<i64: 64, 128>}, {pipeline_mode = #tpu.pipeline_mode<synchronous>, transform_indices = @transform_2, window_bounds = array<i64: 128, 512>}, {pipeline_mode = #tpu.pipeline_mode<synchronous>, transform_indices = @transform_3, window_bounds = array<i64: 128, 512>}, {pipeline_mode = #tpu.pipeline_mode<synchronous>, transform_indices = @transform_4, window_bounds = array<i64: 1, 512>}, {pipeline_mode = #tpu.pipeline_mode<synchronous>, transform_indices = @transform_5, window_bounds = array<i64: 128, 512>}, {pipeline_mode = #tpu.pipeline_mode<synchronous>, transform_indices = @transform_6, window_bounds = array<i64: 128, 512>}, {pipeline_mode = #tpu.pipeline_mode<synchronous>, transform_indices = @transform_7, window_bounds = array<i64: 128, 512>}, {pipeline_mode = #tpu.pipeline_mode<synchronous>, transform_indices = @transform_8, window_bounds = array<i64: 1, 512>}, {pipeline_mode = #tpu.pipeline_mode<synchronous>, transform_indices = @transform_9, window_bounds = array<i64: 128, 128>}, {pipeline_mode = #tpu.pipeline_mode<synchronous>, transform_indices = @transform_10, window_bounds = array<i64: 128, 128>}, {pipeline_mode = #tpu.pipeline_mode<synchronous>, transform_indices = @transform_11, window_bounds = array<i64: 128, 128>}, {pipeline_mode = #tpu.pipeline_mode<synchronous>, transform_indices = @transform_12, window_bounds = array<i64: 8, 8, 128>}]} {
    %c0 = arith.constant 0 : index
    %c0_0 = arith.constant 0 : index
    %0 = vector.load %arg1[%c0, %c0_0] : memref<64x128xbf16, #tpu.memory_space<vmem>>, vector<64x128xbf16>
    %c0_1 = arith.constant 0 : index
    %c0_2 = arith.constant 0 : index
    %1 = vector.load %arg3[%c0_1, %c0_2] : memref<128x512xbf16, #tpu.memory_space<vmem>>, vector<128x512xbf16>
    %cst = arith.constant dense<0.000000e+00> : vector<64x512xf32>
    %2 = tpu.matmul %0, %1, %cst {dimension_numbers = #tpu.dot_dimension_numbers<[1], [0], [0], [1], [0, 0, 1, 1], [], []>} : vector<64x128xbf16>, vector<128x512xbf16>, vector<64x512xf32> -> vector<64x512xf32>
    %c0_3 = arith.constant 0 : index
    %c0_4 = arith.constant 0 : index
    %3 = vector.load %arg5[%c0_3, %c0_4] : memref<1x512xf32, #tpu.memory_space<vmem>>, vector<1x512xf32>
    %4 = vector.broadcast %3 : vector<1x512xf32> to vector<64x512xf32>
    %5 = arith.addf %2, %4 : vector<64x512xf32>
    %c0_5 = arith.constant 0 : index
    %c0_6 = arith.constant 0 : index
    %6 = vector.load %arg14[%c0_5, %c0_6] : memref<64x512xf32, #tpu.memory_space<vmem>>, vector<64x512xf32>
    tpu.vector_store %arg14[%c0_5, %c0_6], %5 {strides = array<i32>} : memref<64x512xf32, #tpu.memory_space<vmem>>, vector<64x512xf32>,
    %c0_7 = arith.constant 0 : index
    %c0_8 = arith.constant 0 : index
    %7 = vector.load %arg2[%c0_7, %c0_8] : memref<64x128xbf16, #tpu.memory_space<vmem>>, vector<64x128xbf16>
    %c0_9 = arith.constant 0 : index
    %c0_10 = arith.constant 0 : index
    %8 = vector.load %arg6[%c0_9, %c0_10] : memref<128x512xbf16, #tpu.memory_space<vmem>>, vector<128x512xbf16>
    %cst_11 = arith.constant dense<0.000000e+00> : vector<64x512xf32>
    %9 = tpu.matmul %7, %8, %cst_11 {dimension_numbers = #tpu.dot_dimension_numbers<[1], [0], [0], [1], [0, 0, 1, 1], [], []>} : vector<64x128xbf16>, vector<128x512xbf16>, vector<64x512xf32> -> vector<64x512xf32>
    %c0_12 = arith.constant 0 : index
    %c0_13 = arith.constant 0 : index
    %10 = vector.load %arg9[%c0_12, %c0_13] : memref<1x512xf32, #tpu.memory_space<vmem>>, vector<1x512xf32>
    %11 = vector.broadcast %10 : vector<1x512xf32> to vector<64x512xf32>
    %12 = arith.addf %9, %11 : vector<64x512xf32>
    %c0_14 = arith.constant 0 : index
    %c0_15 = arith.constant 0 : index
    %13 = vector.load %arg15[%c0_14, %c0_15] : memref<64x512xf32, #tpu.memory_space<vmem>>, vector<64x512xf32>
    tpu.vector_store %arg15[%c0_14, %c0_15], %12 {strides = array<i32>} : memref<64x512xf32, #tpu.memory_space<vmem>>, vector<64x512xf32>,
    %cst_16 = arith.constant 0.000000e+00 : f32
    %14 = vector.broadcast %cst_16 : f32 to vector<8x128xf32>
    %cst_17 = arith.constant 0.000000e+00 : f32
    %15 = vector.broadcast %cst_17 : f32 to vector<8x128xf32>
    %c0_i32 = arith.constant 0 : i32
    %c8_i32 = arith.constant 8 : i32
    %16 = arith.muli %c0_i32, %c8_i32 : i32
    %17 = tpu.assume_multiple %16, 8 : i32
    %18 = arith.index_cast %17 : i32 to index
    %c0_18 = arith.constant 0 : index
    %19 = vector.load %arg14[%18, %c0_18] : memref<64x512xf32, #tpu.memory_space<vmem>>, vector<8x512xf32>
    %20 = arith.truncf %14 : vector<8x128xf32> to vector<8x128xbf16>
    %c0_19 = arith.constant 0 : index
    %c0_20 = arith.constant 0 : index
    %21 = vector.load %arg4[%c0_19, %c0_20] : memref<128x512xbf16, #tpu.memory_space<vmem>>, vector<128x512xbf16>
    %cst_21 = arith.constant dense<0.000000e+00> : vector<8x512xf32>
    %22 = tpu.matmul %20, %21, %cst_21 {dimension_numbers = #tpu.dot_dimension_numbers<[1], [0], [0], [1], [0, 0, 1, 1], [], []>} : vector<8x128xbf16>, vector<128x512xbf16>, vector<8x512xf32> -> vector<8x512xf32>
    %23 = arith.addf %19, %22 : vector<8x512xf32>
    %24 = vector.extract_strided_slice %23 {offsets = [0, 0], sizes = [8, 128], strides = [1, 1]} : vector<8x512xf32> to vector<8x128xf32>
    %25 = arith.negf %24 : vector<8x128xf32>
    %26 = math.exp %25 : vector<8x128xf32>
    %cst_22 = arith.constant 1.000000e+00 : f32
    %27 = vector.broadcast %cst_22 : f32 to vector<8x128xf32>
    %28 = arith.addf %27, %26 : vector<8x128xf32>
    %29 = arith.divf %27, %28 : vector<8x128xf32>
    %30 = vector.extract_strided_slice %23 {offsets = [0, 128], sizes = [8, 128], strides = [1, 1]} : vector<8x512xf32> to vector<8x128xf32>
    %31 = arith.negf %30 : vector<8x128xf32>
    %32 = math.exp %31 : vector<8x128xf32>
    %cst_23 = arith.constant 1.000000e+00 : f32
    %33 = vector.broadcast %cst_23 : f32 to vector<8x128xf32>
    %34 = arith.addf %33, %32 : vector<8x128xf32>
    %35 = arith.divf %33, %34 : vector<8x128xf32>
    %36 = vector.extract_strided_slice %23 {offsets = [0, 256], sizes = [8, 128], strides = [1, 1]} : vector<8x512xf32> to vector<8x128xf32>
    %37 = math.tanh %36 : vector<8x128xf32>
    %38 = vector.extract_strided_slice %23 {offsets = [0, 384], sizes = [8, 128], strides = [1, 1]} : vector<8x512xf32> to vector<8x128xf32>
    %39 = arith.negf %38 : vector<8x128xf32>
    %40 = math.exp %39 : vector<8x128xf32>
    %cst_24 = arith.constant 1.000000e+00 : f32
    %41 = vector.broadcast %cst_24 : f32 to vector<8x128xf32>
    %42 = arith.addf %41, %40 : vector<8x128xf32>
    %43 = arith.divf %41, %42 : vector<8x128xf32>
    %44 = arith.mulf %35, %15 : vector<8x128xf32>
    %45 = arith.mulf %29, %37 : vector<8x128xf32>
    %46 = arith.addf %44, %45 : vector<8x128xf32>
    %47 = math.tanh %46 : vector<8x128xf32>
    %48 = arith.mulf %43, %47 : vector<8x128xf32>
    %49 = arith.index_cast %17 : i32 to index
    %c0_25 = arith.constant 0 : index
    %50 = vector.load %arg16[%49, %c0_25] : memref<64x128xf32, #tpu.memory_space<vmem>>, vector<8x128xf32>
    tpu.vector_store %arg16[%49, %c0_25], %48 {strides = array<i32>} : memref<64x128xf32, #tpu.memory_space<vmem>>, vector<8x128xf32>,
    %c1_i32 = arith.constant 1 : i32
    %c8_i32_26 = arith.constant 8 : i32
    %51 = arith.muli %c1_i32, %c8_i32_26 : i32
    %52 = tpu.assume_multiple %51, 8 : i32
    %53 = arith.index_cast %52 : i32 to index
    %c0_27 = arith.constant 0 : index
    %54 = vector.load %arg14[%53, %c0_27] : memref<64x512xf32, #tpu.memory_space<vmem>>, vector<8x512xf32>
    %55 = arith.truncf %48 : vector<8x128xf32> to vector<8x128xbf16>
    %c0_28 = arith.constant 0 : index
    %c0_29 = arith.constant 0 : index
    %56 = vector.load %arg4[%c0_28, %c0_29] : memref<128x512xbf16, #tpu.memory_space<vmem>>, vector<128x512xbf16>
    %cst_30 = arith.constant dense<0.000000e+00> : vector<8x512xf32>
    %57 = tpu.matmul %55, %56, %cst_30 {dimension_numbers = #tpu.dot_dimension_numbers<[1], [0], [0], [1], [0, 0, 1, 1], [], []>} : vector<8x128xbf16>, vector<128x512xbf16>, vector<8x512xf32> -> vector<8x512xf32>
    %58 = arith.addf %54, %57 : vector<8x512xf32>
    %59 = vector.extract_strided_slice %58 {offsets = [0, 0], sizes = [8, 128], strides = [1, 1]} : vector<8x512xf32> to vector<8x128xf32>
    %60 = arith.negf %59 : vector<8x128xf32>
    %61 = math.exp %60 : vector<8x128xf32>
    %cst_31 = arith.constant 1.000000e+00 : f32
    %62 = vector.broadcast %cst_31 : f32 to vector<8x128xf32>
    %63 = arith.addf %62, %61 : vector<8x128xf32>
    %64 = arith.divf %62, %63 : vector<8x128xf32>
    %65 = vector.extract_strided_slice %58 {offsets = [0, 128], sizes = [8, 128], strides = [1, 1]} : vector<8x512xf32> to vector<8x128xf32>
    %66 = arith.negf %65 : vector<8x128xf32>
    %67 = math.exp %66 : vector<8x128xf32>
    %cst_32 = arith.constant 1.000000e+00 : f32
    %68 = vector.broadcast %cst_32 : f32 to vector<8x128xf32>
    %69 = arith.addf %68, %67 : vector<8x128xf32>
    %70 = arith.divf %68, %69 : vector<8x128xf32>
    %71 = vector.extract_strided_slice %58 {offsets = [0, 256], sizes = [8, 128], strides = [1, 1]} : vector<8x512xf32> to vector<8x128xf32>
    %72 = math.tanh %71 : vector<8x128xf32>
    %73 = vector.extract_strided_slice %58 {offsets = [0, 384], sizes = [8, 128], strides = [1, 1]} : vector<8x512xf32> to vector<8x128xf32>
    %74 = arith.negf %73 : vector<8x128xf32>
    %75 = math.exp %74 : vector<8x128xf32>
    %cst_33 = arith.constant 1.000000e+00 : f32
    %76 = vector.broadcast %cst_33 : f32 to vector<8x128xf32>
    %77 = arith.addf %76, %75 : vector<8x128xf32>
    %78 = arith.divf %76, %77 : vector<8x128xf32>
    %79 = arith.mulf %70, %46 : vector<8x128xf32>
    %80 = arith.mulf %64, %72 : vector<8x128xf32>
    %81 = arith.addf %79, %80 : vector<8x128xf32>
    %82 = math.tanh %81 : vector<8x128xf32>
    %83 = arith.mulf %78, %82 : vector<8x128xf32>
    %84 = arith.index_cast %52 : i32 to index
    %c0_34 = arith.constant 0 : index
    %85 = vector.load %arg16[%84, %c0_34] : memref<64x128xf32, #tpu.memory_space<vmem>>, vector<8x128xf32>
    tpu.vector_store %arg16[%84, %c0_34], %83 {strides = array<i32>} : memref<64x128xf32, #tpu.memory_space<vmem>>, vector<8x128xf32>,
    %c2_i32 = arith.constant 2 : i32
    %c8_i32_35 = arith.constant 8 : i32
    %86 = arith.muli %c2_i32, %c8_i32_35 : i32
    %87 = tpu.assume_multiple %86, 8 : i32
    %88 = arith.index_cast %87 : i32 to index
    %c0_36 = arith.constant 0 : index
    %89 = vector.load %arg14[%88, %c0_36] : memref<64x512xf32, #tpu.memory_space<vmem>>, vector<8x512xf32>
    %90 = arith.truncf %83 : vector<8x128xf32> to vector<8x128xbf16>
    %c0_37 = arith.constant 0 : index
    %c0_38 = arith.constant 0 : index
    %91 = vector.load %arg4[%c0_37, %c0_38] : memref<128x512xbf16, #tpu.memory_space<vmem>>, vector<128x512xbf16>
    %cst_39 = arith.constant dense<0.000000e+00> : vector<8x512xf32>
    %92 = tpu.matmul %90, %91, %cst_39 {dimension_numbers = #tpu.dot_dimension_numbers<[1], [0], [0], [1], [0, 0, 1, 1], [], []>} : vector<8x128xbf16>, vector<128x512xbf16>, vector<8x512xf32> -> vector<8x512xf32>
    %93 = arith.addf %89, %92 : vector<8x512xf32>
    %94 = vector.extract_strided_slice %93 {offsets = [0, 0], sizes = [8, 128], strides = [1, 1]} : vector<8x512xf32> to vector<8x128xf32>
    %95 = arith.negf %94 : vector<8x128xf32>
    %96 = math.exp %95 : vector<8x128xf32>
    %cst_40 = arith.constant 1.000000e+00 : f32
    %97 = vector.broadcast %cst_40 : f32 to vector<8x128xf32>
    %98 = arith.addf %97, %96 : vector<8x128xf32>
    %99 = arith.divf %97, %98 : vector<8x128xf32>
    %100 = vector.extract_strided_slice %93 {offsets = [0, 128], sizes = [8, 128], strides = [1, 1]} : vector<8x512xf32> to vector<8x128xf32>
    %101 = arith.negf %100 : vector<8x128xf32>
    %102 = math.exp %101 : vector<8x128xf32>
    %cst_41 = arith.constant 1.000000e+00 : f32
    %103 = vector.broadcast %cst_41 : f32 to vector<8x128xf32>
    %104 = arith.addf %103, %102 : vector<8x128xf32>
    %105 = arith.divf %103, %104 : vector<8x128xf32>
    %106 = vector.extract_strided_slice %93 {offsets = [0, 256], sizes = [8, 128], strides = [1, 1]} : vector<8x512xf32> to vector<8x128xf32>
    %107 = math.tanh %106 : vector<8x128xf32>
    %108 = vector.extract_strided_slice %93 {offsets = [0, 384], sizes = [8, 128], strides = [1, 1]} : vector<8x512xf32> to vector<8x128xf32>
    %109 = arith.negf %108 : vector<8x128xf32>
    %110 = math.exp %109 : vector<8x128xf32>
    %cst_42 = arith.constant 1.000000e+00 : f32
    %111 = vector.broadcast %cst_42 : f32 to vector<8x128xf32>
    %112 = arith.addf %111, %110 : vector<8x128xf32>
    %113 = arith.divf %111, %112 : vector<8x128xf32>
    %114 = arith.mulf %105, %81 : vector<8x128xf32>
    %115 = arith.mulf %99, %107 : vector<8x128xf32>
    %116 = arith.addf %114, %115 : vector<8x128xf32>
    %117 = math.tanh %116 : vector<8x128xf32>
    %118 = arith.mulf %113, %117 : vector<8x128xf32>
    %119 = arith.index_cast %87 : i32 to index
    %c0_43 = arith.constant 0 : index
    %120 = vector.load %arg16[%119, %c0_43] : memref<64x128xf32, #tpu.memory_space<vmem>>, vector<8x128xf32>
    tpu.vector_store %arg16[%119, %c0_43], %118 {strides = array<i32>} : memref<64x128xf32, #tpu.memory_space<vmem>>, vector<8x128xf32>,
    %c3_i32 = arith.constant 3 : i32
    %c8_i32_44 = arith.constant 8 : i32
    %121 = arith.muli %c3_i32, %c8_i32_44 : i32
    %122 = tpu.assume_multiple %121, 8 : i32
    %123 = arith.index_cast %122 : i32 to index
    %c0_45 = arith.constant 0 : index
    %124 = vector.load %arg14[%123, %c0_45] : memref<64x512xf32, #tpu.memory_space<vmem>>, vector<8x512xf32>
    %125 = arith.truncf %118 : vector<8x128xf32> to vector<8x128xbf16>
    %c0_46 = arith.constant 0 : index
    %c0_47 = arith.constant 0 : index
    %126 = vector.load %arg4[%c0_46, %c0_47] : memref<128x512xbf16, #tpu.memory_space<vmem>>, vector<128x512xbf16>
    %cst_48 = arith.constant dense<0.000000e+00> : vector<8x512xf32>
    %127 = tpu.matmul %125, %126, %cst_48 {dimension_numbers = #tpu.dot_dimension_numbers<[1], [0], [0], [1], [0, 0, 1, 1], [], []>} : vector<8x128xbf16>, vector<128x512xbf16>, vector<8x512xf32> -> vector<8x512xf32>
    %128 = arith.addf %124, %127 : vector<8x512xf32>
    %129 = vector.extract_strided_slice %128 {offsets = [0, 0], sizes = [8, 128], strides = [1, 1]} : vector<8x512xf32> to vector<8x128xf32>
    %130 = arith.negf %129 : vector<8x128xf32>
    %131 = math.exp %130 : vector<8x128xf32>
    %cst_49 = arith.constant 1.000000e+00 : f32
    %132 = vector.broadcast %cst_49 : f32 to vector<8x128xf32>
    %133 = arith.addf %132, %131 : vector<8x128xf32>
    %134 = arith.divf %132, %133 : vector<8x128xf32>
    %135 = vector.extract_strided_slice %128 {offsets = [0, 128], sizes = [8, 128], strides = [1, 1]} : vector<8x512xf32> to vector<8x128xf32>
    %136 = arith.negf %135 : vector<8x128xf32>
    %137 = math.exp %136 : vector<8x128xf32>
    %cst_50 = arith.constant 1.000000e+00 : f32
    %138 = vector.broadcast %cst_50 : f32 to vector<8x128xf32>
    %139 = arith.addf %138, %137 : vector<8x128xf32>
    %140 = arith.divf %138, %139 : vector<8x128xf32>
    %141 = vector.extract_strided_slice %128 {offsets = [0, 256], sizes = [8, 128], strides = [1, 1]} : vector<8x512xf32> to vector<8x128xf32>
    %142 = math.tanh %141 : vector<8x128xf32>
    %143 = vector.extract_strided_slice %128 {offsets = [0, 384], sizes = [8, 128], strides = [1, 1]} : vector<8x512xf32> to vector<8x128xf32>
    %144 = arith.negf %143 : vector<8x128xf32>
    %145 = math.exp %144 : vector<8x128xf32>
    %cst_51 = arith.constant 1.000000e+00 : f32
    %146 = vector.broadcast %cst_51 : f32 to vector<8x128xf32>
    %147 = arith.addf %146, %145 : vector<8x128xf32>
    %148 = arith.divf %146, %147 : vector<8x128xf32>
    %149 = arith.mulf %140, %116 : vector<8x128xf32>
    %150 = arith.mulf %134, %142 : vector<8x128xf32>
    %151 = arith.addf %149, %150 : vector<8x128xf32>
    %152 = math.tanh %151 : vector<8x128xf32>
    %153 = arith.mulf %148, %152 : vector<8x128xf32>
    %154 = arith.index_cast %122 : i32 to index
    %c0_52 = arith.constant 0 : index
    %155 = vector.load %arg16[%154, %c0_52] : memref<64x128xf32, #tpu.memory_space<vmem>>, vector<8x128xf32>
    tpu.vector_store %arg16[%154, %c0_52], %153 {strides = array<i32>} : memref<64x128xf32, #tpu.memory_space<vmem>>, vector<8x128xf32>,
    %c4_i32 = arith.constant 4 : i32
    %c8_i32_53 = arith.constant 8 : i32
    %156 = arith.muli %c4_i32, %c8_i32_53 : i32
    %157 = tpu.assume_multiple %156, 8 : i32
    %158 = arith.index_cast %157 : i32 to index
    %c0_54 = arith.constant 0 : index
    %159 = vector.load %arg14[%158, %c0_54] : memref<64x512xf32, #tpu.memory_space<vmem>>, vector<8x512xf32>
    %160 = arith.truncf %153 : vector<8x128xf32> to vector<8x128xbf16>
    %c0_55 = arith.constant 0 : index
    %c0_56 = arith.constant 0 : index
    %161 = vector.load %arg4[%c0_55, %c0_56] : memref<128x512xbf16, #tpu.memory_space<vmem>>, vector<128x512xbf16>
    %cst_57 = arith.constant dense<0.000000e+00> : vector<8x512xf32>
    %162 = tpu.matmul %160, %161, %cst_57 {dimension_numbers = #tpu.dot_dimension_numbers<[1], [0], [0], [1], [0, 0, 1, 1], [], []>} : vector<8x128xbf16>, vector<128x512xbf16>, vector<8x512xf32> -> vector<8x512xf32>
    %163 = arith.addf %159, %162 : vector<8x512xf32>
    %164 = vector.extract_strided_slice %163 {offsets = [0, 0], sizes = [8, 128], strides = [1, 1]} : vector<8x512xf32> to vector<8x128xf32>
    %165 = arith.negf %164 : vector<8x128xf32>
    %166 = math.exp %165 : vector<8x128xf32>
    %cst_58 = arith.constant 1.000000e+00 : f32
    %167 = vector.broadcast %cst_58 : f32 to vector<8x128xf32>
    %168 = arith.addf %167, %166 : vector<8x128xf32>
    %169 = arith.divf %167, %168 : vector<8x128xf32>
    %170 = vector.extract_strided_slice %163 {offsets = [0, 128], sizes = [8, 128], strides = [1, 1]} : vector<8x512xf32> to vector<8x128xf32>
    %171 = arith.negf %170 : vector<8x128xf32>
    %172 = math.exp %171 : vector<8x128xf32>
    %cst_59 = arith.constant 1.000000e+00 : f32
    %173 = vector.broadcast %cst_59 : f32 to vector<8x128xf32>
    %174 = arith.addf %173, %172 : vector<8x128xf32>
    %175 = arith.divf %173, %174 : vector<8x128xf32>
    %176 = vector.extract_strided_slice %163 {offsets = [0, 256], sizes = [8, 128], strides = [1, 1]} : vector<8x512xf32> to vector<8x128xf32>
    %177 = math.tanh %176 : vector<8x128xf32>
    %178 = vector.extract_strided_slice %163 {offsets = [0, 384], sizes = [8, 128], strides = [1, 1]} : vector<8x512xf32> to vector<8x128xf32>
    %179 = arith.negf %178 : vector<8x128xf32>
    %180 = math.exp %179 : vector<8x128xf32>
    %cst_60 = arith.constant 1.000000e+00 : f32
    %181 = vector.broadcast %cst_60 : f32 to vector<8x128xf32>
    %182 = arith.addf %181, %180 : vector<8x128xf32>
    %183 = arith.divf %181, %182 : vector<8x128xf32>
    %184 = arith.mulf %175, %151 : vector<8x128xf32>
    %185 = arith.mulf %169, %177 : vector<8x128xf32>
    %186 = arith.addf %184, %185 : vector<8x128xf32>
    %187 = math.tanh %186 : vector<8x128xf32>
    %188 = arith.mulf %183, %187 : vector<8x128xf32>
    %189 = arith.index_cast %157 : i32 to index
    %c0_61 = arith.constant 0 : index
    %190 = vector.load %arg16[%189, %c0_61] : memref<64x128xf32, #tpu.memory_space<vmem>>, vector<8x128xf32>
    tpu.vector_store %arg16[%189, %c0_61], %188 {strides = array<i32>} : memref<64x128xf32, #tpu.memory_space<vmem>>, vector<8x128xf32>,
    %c5_i32 = arith.constant 5 : i32
    %c8_i32_62 = arith.constant 8 : i32
    %191 = arith.muli %c5_i32, %c8_i32_62 : i32
    %192 = tpu.assume_multiple %191, 8 : i32
    %193 = arith.index_cast %192 : i32 to index
    %c0_63 = arith.constant 0 : index
    %194 = vector.load %arg14[%193, %c0_63] : memref<64x512xf32, #tpu.memory_space<vmem>>, vector<8x512xf32>
    %195 = arith.truncf %188 : vector<8x128xf32> to vector<8x128xbf16>
    %c0_64 = arith.constant 0 : index
    %c0_65 = arith.constant 0 : index
    %196 = vector.load %arg4[%c0_64, %c0_65] : memref<128x512xbf16, #tpu.memory_space<vmem>>, vector<128x512xbf16>
    %cst_66 = arith.constant dense<0.000000e+00> : vector<8x512xf32>
    %197 = tpu.matmul %195, %196, %cst_66 {dimension_numbers = #tpu.dot_dimension_numbers<[1], [0], [0], [1], [0, 0, 1, 1], [], []>} : vector<8x128xbf16>, vector<128x512xbf16>, vector<8x512xf32> -> vector<8x512xf32>
    %198 = arith.addf %194, %197 : vector<8x512xf32>
    %199 = vector.extract_strided_slice %198 {offsets = [0, 0], sizes = [8, 128], strides = [1, 1]} : vector<8x512xf32> to vector<8x128xf32>
    %200 = arith.negf %199 : vector<8x128xf32>
    %201 = math.exp %200 : vector<8x128xf32>
    %cst_67 = arith.constant 1.000000e+00 : f32
    %202 = vector.broadcast %cst_67 : f32 to vector<8x128xf32>
    %203 = arith.addf %202, %201 : vector<8x128xf32>
    %204 = arith.divf %202, %203 : vector<8x128xf32>
    %205 = vector.extract_strided_slice %198 {offsets = [0, 128], sizes = [8, 128], strides = [1, 1]} : vector<8x512xf32> to vector<8x128xf32>
    %206 = arith.negf %205 : vector<8x128xf32>
    %207 = math.exp %206 : vector<8x128xf32>
    %cst_68 = arith.constant 1.000000e+00 : f32
    %208 = vector.broadcast %cst_68 : f32 to vector<8x128xf32>
    %209 = arith.addf %208, %207 : vector<8x128xf32>
    %210 = arith.divf %208, %209 : vector<8x128xf32>
    %211 = vector.extract_strided_slice %198 {offsets = [0, 256], sizes = [8, 128], strides = [1, 1]} : vector<8x512xf32> to vector<8x128xf32>
    %212 = math.tanh %211 : vector<8x128xf32>
    %213 = vector.extract_strided_slice %198 {offsets = [0, 384], sizes = [8, 128], strides = [1, 1]} : vector<8x512xf32> to vector<8x128xf32>
    %214 = arith.negf %213 : vector<8x128xf32>
    %215 = math.exp %214 : vector<8x128xf32>
    %cst_69 = arith.constant 1.000000e+00 : f32
    %216 = vector.broadcast %cst_69 : f32 to vector<8x128xf32>
    %217 = arith.addf %216, %215 : vector<8x128xf32>
    %218 = arith.divf %216, %217 : vector<8x128xf32>
    %219 = arith.mulf %210, %186 : vector<8x128xf32>
    %220 = arith.mulf %204, %212 : vector<8x128xf32>
    %221 = arith.addf %219, %220 : vector<8x128xf32>
    %222 = math.tanh %221 : vector<8x128xf32>
    %223 = arith.mulf %218, %222 : vector<8x128xf32>
    %224 = arith.index_cast %192 : i32 to index
    %c0_70 = arith.constant 0 : index
    %225 = vector.load %arg16[%224, %c0_70] : memref<64x128xf32, #tpu.memory_space<vmem>>, vector<8x128xf32>
    tpu.vector_store %arg16[%224, %c0_70], %223 {strides = array<i32>} : memref<64x128xf32, #tpu.memory_space<vmem>>, vector<8x128xf32>,
    %c6_i32 = arith.constant 6 : i32
    %c8_i32_71 = arith.constant 8 : i32
    %226 = arith.muli %c6_i32, %c8_i32_71 : i32
    %227 = tpu.assume_multiple %226, 8 : i32
    %228 = arith.index_cast %227 : i32 to index
    %c0_72 = arith.constant 0 : index
    %229 = vector.load %arg14[%228, %c0_72] : memref<64x512xf32, #tpu.memory_space<vmem>>, vector<8x512xf32>
    %230 = arith.truncf %223 : vector<8x128xf32> to vector<8x128xbf16>
    %c0_73 = arith.constant 0 : index
    %c0_74 = arith.constant 0 : index
    %231 = vector.load %arg4[%c0_73, %c0_74] : memref<128x512xbf16, #tpu.memory_space<vmem>>, vector<128x512xbf16>
    %cst_75 = arith.constant dense<0.000000e+00> : vector<8x512xf32>
    %232 = tpu.matmul %230, %231, %cst_75 {dimension_numbers = #tpu.dot_dimension_numbers<[1], [0], [0], [1], [0, 0, 1, 1], [], []>} : vector<8x128xbf16>, vector<128x512xbf16>, vector<8x512xf32> -> vector<8x512xf32>
    %233 = arith.addf %229, %232 : vector<8x512xf32>
    %234 = vector.extract_strided_slice %233 {offsets = [0, 0], sizes = [8, 128], strides = [1, 1]} : vector<8x512xf32> to vector<8x128xf32>
    %235 = arith.negf %234 : vector<8x128xf32>
    %236 = math.exp %235 : vector<8x128xf32>
    %cst_76 = arith.constant 1.000000e+00 : f32
    %237 = vector.broadcast %cst_76 : f32 to vector<8x128xf32>
    %238 = arith.addf %237, %236 : vector<8x128xf32>
    %239 = arith.divf %237, %238 : vector<8x128xf32>
    %240 = vector.extract_strided_slice %233 {offsets = [0, 128], sizes = [8, 128], strides = [1, 1]} : vector<8x512xf32> to vector<8x128xf32>
    %241 = arith.negf %240 : vector<8x128xf32>
    %242 = math.exp %241 : vector<8x128xf32>
    %cst_77 = arith.constant 1.000000e+00 : f32
    %243 = vector.broadcast %cst_77 : f32 to vector<8x128xf32>
    %244 = arith.addf %243, %242 : vector<8x128xf32>
    %245 = arith.divf %243, %244 : vector<8x128xf32>
    %246 = vector.extract_strided_slice %233 {offsets = [0, 256], sizes = [8, 128], strides = [1, 1]} : vector<8x512xf32> to vector<8x128xf32>
    %247 = math.tanh %246 : vector<8x128xf32>
    %248 = vector.extract_strided_slice %233 {offsets = [0, 384], sizes = [8, 128], strides = [1, 1]} : vector<8x512xf32> to vector<8x128xf32>
    %249 = arith.negf %248 : vector<8x128xf32>
    %250 = math.exp %249 : vector<8x128xf32>
    %cst_78 = arith.constant 1.000000e+00 : f32
    %251 = vector.broadcast %cst_78 : f32 to vector<8x128xf32>
    %252 = arith.addf %251, %250 : vector<8x128xf32>
    %253 = arith.divf %251, %252 : vector<8x128xf32>
    %254 = arith.mulf %245, %221 : vector<8x128xf32>
    %255 = arith.mulf %239, %247 : vector<8x128xf32>
    %256 = arith.addf %254, %255 : vector<8x128xf32>
    %257 = math.tanh %256 : vector<8x128xf32>
    %258 = arith.mulf %253, %257 : vector<8x128xf32>
    %259 = arith.index_cast %227 : i32 to index
    %c0_79 = arith.constant 0 : index
    %260 = vector.load %arg16[%259, %c0_79] : memref<64x128xf32, #tpu.memory_space<vmem>>, vector<8x128xf32>
    tpu.vector_store %arg16[%259, %c0_79], %258 {strides = array<i32>} : memref<64x128xf32, #tpu.memory_space<vmem>>, vector<8x128xf32>,
    %c7_i32 = arith.constant 7 : i32
    %c8_i32_80 = arith.constant 8 : i32
    %261 = arith.muli %c7_i32, %c8_i32_80 : i32
    %262 = tpu.assume_multiple %261, 8 : i32
    %263 = arith.index_cast %262 : i32 to index
    %c0_81 = arith.constant 0 : index
    %264 = vector.load %arg14[%263, %c0_81] : memref<64x512xf32, #tpu.memory_space<vmem>>, vector<8x512xf32>
    %265 = arith.truncf %258 : vector<8x128xf32> to vector<8x128xbf16>
    %c0_82 = arith.constant 0 : index
    %c0_83 = arith.constant 0 : index
    %266 = vector.load %arg4[%c0_82, %c0_83] : memref<128x512xbf16, #tpu.memory_space<vmem>>, vector<128x512xbf16>
    %cst_84 = arith.constant dense<0.000000e+00> : vector<8x512xf32>
    %267 = tpu.matmul %265, %266, %cst_84 {dimension_numbers = #tpu.dot_dimension_numbers<[1], [0], [0], [1], [0, 0, 1, 1], [], []>} : vector<8x128xbf16>, vector<128x512xbf16>, vector<8x512xf32> -> vector<8x512xf32>
    %268 = arith.addf %264, %267 : vector<8x512xf32>
    %269 = vector.extract_strided_slice %268 {offsets = [0, 0], sizes = [8, 128], strides = [1, 1]} : vector<8x512xf32> to vector<8x128xf32>
    %270 = arith.negf %269 : vector<8x128xf32>
    %271 = math.exp %270 : vector<8x128xf32>
    %cst_85 = arith.constant 1.000000e+00 : f32
    %272 = vector.broadcast %cst_85 : f32 to vector<8x128xf32>
    %273 = arith.addf %272, %271 : vector<8x128xf32>
    %274 = arith.divf %272, %273 : vector<8x128xf32>
    %275 = vector.extract_strided_slice %268 {offsets = [0, 128], sizes = [8, 128], strides = [1, 1]} : vector<8x512xf32> to vector<8x128xf32>
    %276 = arith.negf %275 : vector<8x128xf32>
    %277 = math.exp %276 : vector<8x128xf32>
    %cst_86 = arith.constant 1.000000e+00 : f32
    %278 = vector.broadcast %cst_86 : f32 to vector<8x128xf32>
    %279 = arith.addf %278, %277 : vector<8x128xf32>
    %280 = arith.divf %278, %279 : vector<8x128xf32>
    %281 = vector.extract_strided_slice %268 {offsets = [0, 256], sizes = [8, 128], strides = [1, 1]} : vector<8x512xf32> to vector<8x128xf32>
    %282 = math.tanh %281 : vector<8x128xf32>
    %283 = vector.extract_strided_slice %268 {offsets = [0, 384], sizes = [8, 128], strides = [1, 1]} : vector<8x512xf32> to vector<8x128xf32>
    %284 = arith.negf %283 : vector<8x128xf32>
    %285 = math.exp %284 : vector<8x128xf32>
    %cst_87 = arith.constant 1.000000e+00 : f32
    %286 = vector.broadcast %cst_87 : f32 to vector<8x128xf32>
    %287 = arith.addf %286, %285 : vector<8x128xf32>
    %288 = arith.divf %286, %287 : vector<8x128xf32>
    %289 = arith.mulf %280, %256 : vector<8x128xf32>
    %290 = arith.mulf %274, %282 : vector<8x128xf32>
    %291 = arith.addf %289, %290 : vector<8x128xf32>
    %292 = math.tanh %291 : vector<8x128xf32>
    %293 = arith.mulf %288, %292 : vector<8x128xf32>
    %294 = arith.index_cast %262 : i32 to index
    %c0_88 = arith.constant 0 : index
    %295 = vector.load %arg16[%294, %c0_88] : memref<64x128xf32, #tpu.memory_space<vmem>>, vector<8x128xf32>
    tpu.vector_store %arg16[%294, %c0_88], %293 {strides = array<i32>} : memref<64x128xf32, #tpu.memory_space<vmem>>, vector<8x128xf32>,
    %c8_i32_89 = arith.constant 8 : i32
    %c0_90 = arith.constant 0 : index
    %c0_91 = arith.constant 0 : index
    %296 = vector.load %arg16[%c0_90, %c0_91] : memref<64x128xf32, #tpu.memory_space<vmem>>, vector<64x128xf32>
    %297 = arith.truncf %296 : vector<64x128xf32> to vector<64x128xbf16>
    %c0_92 = arith.constant 0 : index
    %c0_93 = arith.constant 0 : index
    %298 = vector.load %arg17[%c0_92, %c0_93] : memref<64x128xbf16, #tpu.memory_space<vmem>>, vector<64x128xbf16>
    tpu.vector_store %arg17[%c0_92, %c0_93], %297 {strides = array<i32>} : memref<64x128xbf16, #tpu.memory_space<vmem>>, vector<64x128xbf16>,
    %c0_94 = arith.constant 0 : index
    %c0_95 = arith.constant 0 : index
    %299 = vector.load %arg10[%c0_94, %c0_95] : memref<128x128xbf16, #tpu.memory_space<vmem>>, vector<128x128xbf16>
    %c0_96 = arith.constant 0 : index
    %c0_97 = arith.constant 0 : index
    %300 = vector.load %arg17[%c0_96, %c0_97] : memref<64x128xbf16, #tpu.memory_space<vmem>>, vector<64x128xbf16>
    %cst_98 = arith.constant dense<0.000000e+00> : vector<128x64xf32>
    %301 = tpu.matmul %299, %300, %cst_98 {dimension_numbers = #tpu.dot_dimension_numbers<[1], [1], [0], [0], [0, 0, 1, 0], [], []>} : vector<128x128xbf16>, vector<64x128xbf16>, vector<128x64xf32> -> vector<128x64xf32>
    %302 = arith.truncf %301 : vector<128x64xf32> to vector<128x64xbf16>
    %c0_99 = arith.constant 0 : index
    %c0_100 = arith.constant 0 : index
    %303 = vector.load %arg18[%c0_99, %c0_100] : memref<128x64xbf16, #tpu.memory_space<vmem>>, vector<128x64xbf16>
    tpu.vector_store %arg18[%c0_99, %c0_100], %302 {strides = array<i32>} : memref<128x64xbf16, #tpu.memory_space<vmem>>, vector<128x64xbf16>,
    %304 = tpu.iota {dimensions = array<i32: 0>} : vector<8x64xi32>
    %305 = tpu.iota {dimensions = array<i32: 1>} : vector<8x64xi32>
    %c8_i32_101 = arith.constant 8 : i32
    %c0_i32_102 = arith.constant 0 : i32
    %306 = arith.cmpi eq, %c8_i32_101, %c0_i32_102 : i32
    %c1_i32_103 = arith.constant 1 : i32
    %307 = arith.select %306, %c1_i32_103, %c8_i32_101 : i32
    %308 = vector.broadcast %307 : i32 to vector<8x64xi32>
    %309 = arith.remsi %305, %308 : vector<8x64xi32>
    %c0_i32_104 = arith.constant 0 : i32
    %310 = vector.broadcast %c0_i32_104 : i32 to vector<8x64xi32>
    %311 = arith.cmpi ne, %309, %310 : vector<8x64xi32>
    %c0_i32_105 = arith.constant 0 : i32
    %312 = vector.broadcast %c0_i32_105 : i32 to vector<8x64xi32>
    %313 = arith.cmpi slt, %309, %312 : vector<8x64xi32>
    %c0_i32_106 = arith.constant 0 : i32
    %314 = arith.cmpi slt, %307, %c0_i32_106 : i32
    %315 = vector.broadcast %314 : i1 to vector<8x64xi1>
    %316 = vector.broadcast %315 : vector<8x64xi1> to vector<8x64xi1>
    %317 = arith.xori %313, %316 : vector<8x64xi1>
    %318 = arith.andi %317, %311 : vector<8x64xi1>
    %319 = vector.broadcast %307 : i32 to vector<8x64xi32>
    %320 = arith.addi %309, %319 : vector<8x64xi32>
    %321 = arith.select %318, %320, %309 : vector<8x64xi1>, vector<8x64xi32>
    %322 = arith.cmpi eq, %321, %304 : vector<8x64xi32>
    %cst_107 = arith.constant 0.000000e+00 : bf16
    %323 = vector.broadcast %cst_107 : bf16 to vector<8x128xbf16>
    %cst_108 = arith.constant -1.70141173E+38 : f32
    %c0_i32_109 = arith.constant 0 : i32
    %c8_i32_110 = arith.constant 8 : i32
    %324 = arith.muli %c0_i32_109, %c8_i32_110 : i32
    %325 = tpu.assume_multiple %324, 8 : i32
    %326 = arith.truncf %293 : vector<8x128xf32> to vector<8x128xbf16>
    %327 = arith.index_cast %325 : i32 to index
    %c0_111 = arith.constant 0 : index
    %328 = vector.load %arg15[%327, %c0_111] : memref<64x512xf32, #tpu.memory_space<vmem>>, vector<8x512xf32>
    %c0_112 = arith.constant 0 : index
    %c0_113 = arith.constant 0 : index
    %329 = vector.load %arg7[%c0_112, %c0_113] : memref<128x512xbf16, #tpu.memory_space<vmem>>, vector<128x512xbf16>
    %cst_114 = arith.constant dense<0.000000e+00> : vector<8x512xf32>
    %330 = tpu.matmul %323, %329, %cst_114 {dimension_numbers = #tpu.dot_dimension_numbers<[1], [0], [0], [1], [0, 0, 1, 1], [], []>} : vector<8x128xbf16>, vector<128x512xbf16>, vector<8x512xf32> -> vector<8x512xf32>
    %331 = arith.addf %328, %330 : vector<8x512xf32>
    %c0_115 = arith.constant 0 : index
    %c0_116 = arith.constant 0 : index
    %332 = vector.load %arg8[%c0_115, %c0_116] : memref<128x512xbf16, #tpu.memory_space<vmem>>, vector<128x512xbf16>
    %cst_117 = arith.constant dense<0.000000e+00> : vector<8x512xf32>
    %333 = tpu.matmul %326, %332, %cst_117 {dimension_numbers = #tpu.dot_dimension_numbers<[1], [0], [0], [1], [0, 0, 1, 1], [], []>} : vector<8x128xbf16>, vector<128x512xbf16>, vector<8x512xf32> -> vector<8x512xf32>
    %334 = arith.addf %331, %333 : vector<8x512xf32>
    %335 = vector.extract_strided_slice %334 {offsets = [0, 0], sizes = [8, 128], strides = [1, 1]} : vector<8x512xf32> to vector<8x128xf32>
    %336 = arith.negf %335 : vector<8x128xf32>
    %337 = math.exp %336 : vector<8x128xf32>
    %cst_118 = arith.constant 1.000000e+00 : f32
    %338 = vector.broadcast %cst_118 : f32 to vector<8x128xf32>
    %339 = arith.addf %338, %337 : vector<8x128xf32>
    %340 = arith.divf %338, %339 : vector<8x128xf32>
    %341 = vector.extract_strided_slice %334 {offsets = [0, 128], sizes = [8, 128], strides = [1, 1]} : vector<8x512xf32> to vector<8x128xf32>
    %342 = arith.negf %341 : vector<8x128xf32>
    %343 = math.exp %342 : vector<8x128xf32>
    %cst_119 = arith.constant 1.000000e+00 : f32
    %344 = vector.broadcast %cst_119 : f32 to vector<8x128xf32>
    %345 = arith.addf %344, %343 : vector<8x128xf32>
    %346 = arith.divf %344, %345 : vector<8x128xf32>
    %347 = vector.extract_strided_slice %334 {offsets = [0, 256], sizes = [8, 128], strides = [1, 1]} : vector<8x512xf32> to vector<8x128xf32>
    %348 = math.tanh %347 : vector<8x128xf32>
    %349 = vector.extract_strided_slice %334 {offsets = [0, 384], sizes = [8, 128], strides = [1, 1]} : vector<8x512xf32> to vector<8x128xf32>
    %350 = arith.negf %349 : vector<8x128xf32>
    %351 = math.exp %350 : vector<8x128xf32>
    %cst_120 = arith.constant 1.000000e+00 : f32
    %352 = vector.broadcast %cst_120 : f32 to vector<8x128xf32>
    %353 = arith.addf %352, %351 : vector<8x128xf32>
    %354 = arith.divf %352, %353 : vector<8x128xf32>
    %355 = arith.mulf %346, %291 : vector<8x128xf32>
    %356 = arith.mulf %340, %348 : vector<8x128xf32>
    %357 = arith.addf %355, %356 : vector<8x128xf32>
    %358 = math.tanh %357 : vector<8x128xf32>
    %359 = arith.mulf %354, %358 : vector<8x128xf32>
    %360 = arith.truncf %359 : vector<8x128xf32> to vector<8x128xbf16>
    %c0_121 = arith.constant 0 : index
    %c0_122 = arith.constant 0 : index
    %361 = vector.load %arg18[%c0_121, %c0_122] : memref<128x64xbf16, #tpu.memory_space<vmem>>, vector<128x64xbf16>
    %cst_123 = arith.constant dense<0.000000e+00> : vector<8x64xf32>
    %362 = tpu.matmul %360, %361, %cst_123 {dimension_numbers = #tpu.dot_dimension_numbers<[1], [0], [0], [1], [0, 0, 1, 1], [], []>} : vector<8x128xbf16>, vector<128x64xbf16>, vector<8x64xf32> -> vector<8x64xf32>
    %363 = vector.broadcast %cst_108 : f32 to vector<8x64xf32>
    %364 = arith.select %322, %362, %363 : vector<8x64xi1>, vector<8x64xf32>
    %cst_124 = arith.constant dense<0xFF800000> : vector<8xf32>
    %365 = vector.multi_reduction <maximumf>, %364, %cst_124 [1] : vector<8x64xf32> to vector<8xf32>
    %366 = vector.shape_cast %365 : vector<8xf32> to vector<8x1xf32>
    %367 = vector.broadcast %366 : vector<8x1xf32> to vector<8x64xf32>
    %368 = arith.subf %364, %367 : vector<8x64xf32>
    %369 = math.exp %368 : vector<8x64xf32>
    %cst_125 = arith.constant dense<0.000000e+00> : vector<8xf32>
    %370 = vector.multi_reduction <add>, %369, %cst_125 [1] : vector<8x64xf32> to vector<8xf32>
    %371 = vector.shape_cast %370 : vector<8xf32> to vector<8x1xf32>
    %372 = tpu.reciprocal %371 : vector<8x1xf32> -> vector<8x1xf32>
    %373 = vector.broadcast %372 : vector<8x1xf32> to vector<8x64xf32>
    %374 = arith.mulf %369, %373 : vector<8x64xf32>
    %375 = arith.truncf %374 : vector<8x64xf32> to vector<8x64xbf16>
    %c0_126 = arith.constant 0 : index
    %c0_127 = arith.constant 0 : index
    %376 = vector.load %arg17[%c0_126, %c0_127] : memref<64x128xbf16, #tpu.memory_space<vmem>>, vector<64x128xbf16>
    %cst_128 = arith.constant dense<0.000000e+00> : vector<8x128xf32>
    %377 = tpu.matmul %375, %376, %cst_128 {dimension_numbers = #tpu.dot_dimension_numbers<[1], [0], [0], [1], [0, 0, 1, 1], [], []>} : vector<8x64xbf16>, vector<64x128xbf16>, vector<8x128xf32> -> vector<8x128xf32>
    %378 = arith.truncf %377 : vector<8x128xf32> to vector<8x128xbf16>
    %c0_129 = arith.constant 0 : index
    %c0_130 = arith.constant 0 : index
    %379 = vector.load %arg11[%c0_129, %c0_130] : memref<128x128xbf16, #tpu.memory_space<vmem>>, vector<128x128xbf16>
    %cst_131 = arith.constant dense<0.000000e+00> : vector<8x128xf32>
    %380 = tpu.matmul %378, %379, %cst_131 {dimension_numbers = #tpu.dot_dimension_numbers<[1], [0], [0], [1], [0, 0, 1, 1], [], []>} : vector<8x128xbf16>, vector<128x128xbf16>, vector<8x128xf32> -> vector<8x128xf32>
    %c0_132 = arith.constant 0 : index
    %c0_133 = arith.constant 0 : index
    %381 = vector.load %arg12[%c0_132, %c0_133] : memref<128x128xbf16, #tpu.memory_space<vmem>>, vector<128x128xbf16>
    %cst_134 = arith.constant dense<0.000000e+00> : vector<8x128xf32>
    %382 = tpu.matmul %360, %381, %cst_134 {dimension_numbers = #tpu.dot_dimension_numbers<[1], [0], [0], [1], [0, 0, 1, 1], [], []>} : vector<8x128xbf16>, vector<128x128xbf16>, vector<8x128xf32> -> vector<8x128xf32>
    %383 = arith.addf %380, %382 : vector<8x128xf32>
    %384 = math.tanh %383 : vector<8x128xf32>
    %385 = arith.index_cast %c0_i32_109 : i32 to index
    %c0_135 = arith.constant 0 : index
    %c0_136 = arith.constant 0 : index
    %386 = vector.load %arg13[%385, %c0_135, %c0_136] : memref<8x8x128xf32, #tpu.memory_space<vmem>>, vector<1x8x128xf32>
    %387 = vector.shape_cast %386 : vector<1x8x128xf32> to vector<8x128xf32>
    %388 = vector.shape_cast %384 : vector<8x128xf32> to vector<1x8x128xf32>
    tpu.vector_store %arg13[%385, %c0_135, %c0_136], %388 {strides = array<i32>} : memref<8x8x128xf32, #tpu.memory_space<vmem>>, vector<1x8x128xf32>,
    %389 = arith.truncf %384 : vector<8x128xf32> to vector<8x128xbf16>
    %c1_i32_137 = arith.constant 1 : i32
    %c8_i32_138 = arith.constant 8 : i32
    %390 = arith.muli %c1_i32_137, %c8_i32_138 : i32
    %391 = tpu.assume_multiple %390, 8 : i32
    %392 = arith.truncf %359 : vector<8x128xf32> to vector<8x128xbf16>
    %393 = arith.index_cast %391 : i32 to index
    %c0_139 = arith.constant 0 : index
    %394 = vector.load %arg15[%393, %c0_139] : memref<64x512xf32, #tpu.memory_space<vmem>>, vector<8x512xf32>
    %c0_140 = arith.constant 0 : index
    %c0_141 = arith.constant 0 : index
    %395 = vector.load %arg7[%c0_140, %c0_141] : memref<128x512xbf16, #tpu.memory_space<vmem>>, vector<128x512xbf16>
    %cst_142 = arith.constant dense<0.000000e+00> : vector<8x512xf32>
    %396 = tpu.matmul %389, %395, %cst_142 {dimension_numbers = #tpu.dot_dimension_numbers<[1], [0], [0], [1], [0, 0, 1, 1], [], []>} : vector<8x128xbf16>, vector<128x512xbf16>, vector<8x512xf32> -> vector<8x512xf32>
    %397 = arith.addf %394, %396 : vector<8x512xf32>
    %c0_143 = arith.constant 0 : index
    %c0_144 = arith.constant 0 : index
    %398 = vector.load %arg8[%c0_143, %c0_144] : memref<128x512xbf16, #tpu.memory_space<vmem>>, vector<128x512xbf16>
    %cst_145 = arith.constant dense<0.000000e+00> : vector<8x512xf32>
    %399 = tpu.matmul %392, %398, %cst_145 {dimension_numbers = #tpu.dot_dimension_numbers<[1], [0], [0], [1], [0, 0, 1, 1], [], []>} : vector<8x128xbf16>, vector<128x512xbf16>, vector<8x512xf32> -> vector<8x512xf32>
    %400 = arith.addf %397, %399 : vector<8x512xf32>
    %401 = vector.extract_strided_slice %400 {offsets = [0, 0], sizes = [8, 128], strides = [1, 1]} : vector<8x512xf32> to vector<8x128xf32>
    %402 = arith.negf %401 : vector<8x128xf32>
    %403 = math.exp %402 : vector<8x128xf32>
    %cst_146 = arith.constant 1.000000e+00 : f32
    %404 = vector.broadcast %cst_146 : f32 to vector<8x128xf32>
    %405 = arith.addf %404, %403 : vector<8x128xf32>
    %406 = arith.divf %404, %405 : vector<8x128xf32>
    %407 = vector.extract_strided_slice %400 {offsets = [0, 128], sizes = [8, 128], strides = [1, 1]} : vector<8x512xf32> to vector<8x128xf32>
    %408 = arith.negf %407 : vector<8x128xf32>
    %409 = math.exp %408 : vector<8x128xf32>
    %cst_147 = arith.constant 1.000000e+00 : f32
    %410 = vector.broadcast %cst_147 : f32 to vector<8x128xf32>
    %411 = arith.addf %410, %409 : vector<8x128xf32>
    %412 = arith.divf %410, %411 : vector<8x128xf32>
    %413 = vector.extract_strided_slice %400 {offsets = [0, 256], sizes = [8, 128], strides = [1, 1]} : vector<8x512xf32> to vector<8x128xf32>
    %414 = math.tanh %413 : vector<8x128xf32>
    %415 = vector.extract_strided_slice %400 {offsets = [0, 384], sizes = [8, 128], strides = [1, 1]} : vector<8x512xf32> to vector<8x128xf32>
    %416 = arith.negf %415 : vector<8x128xf32>
    %417 = math.exp %416 : vector<8x128xf32>
    %cst_148 = arith.constant 1.000000e+00 : f32
    %418 = vector.broadcast %cst_148 : f32 to vector<8x128xf32>
    %419 = arith.addf %418, %417 : vector<8x128xf32>
    %420 = arith.divf %418, %419 : vector<8x128xf32>
    %421 = arith.mulf %412, %357 : vector<8x128xf32>
    %422 = arith.mulf %406, %414 : vector<8x128xf32>
    %423 = arith.addf %421, %422 : vector<8x128xf32>
    %424 = math.tanh %423 : vector<8x128xf32>
    %425 = arith.mulf %420, %424 : vector<8x128xf32>
    %426 = arith.truncf %425 : vector<8x128xf32> to vector<8x128xbf16>
    %c0_149 = arith.constant 0 : index
    %c0_150 = arith.constant 0 : index
    %427 = vector.load %arg18[%c0_149, %c0_150] : memref<128x64xbf16, #tpu.memory_space<vmem>>, vector<128x64xbf16>
    %cst_151 = arith.constant dense<0.000000e+00> : vector<8x64xf32>
    %428 = tpu.matmul %426, %427, %cst_151 {dimension_numbers = #tpu.dot_dimension_numbers<[1], [0], [0], [1], [0, 0, 1, 1], [], []>} : vector<8x128xbf16>, vector<128x64xbf16>, vector<8x64xf32> -> vector<8x64xf32>
    %429 = vector.broadcast %cst_108 : f32 to vector<8x64xf32>
    %430 = arith.select %322, %428, %429 : vector<8x64xi1>, vector<8x64xf32>
    %cst_152 = arith.constant dense<0xFF800000> : vector<8xf32>
    %431 = vector.multi_reduction <maximumf>, %430, %cst_152 [1] : vector<8x64xf32> to vector<8xf32>
    %432 = vector.shape_cast %431 : vector<8xf32> to vector<8x1xf32>
    %433 = vector.broadcast %432 : vector<8x1xf32> to vector<8x64xf32>
    %434 = arith.subf %430, %433 : vector<8x64xf32>
    %435 = math.exp %434 : vector<8x64xf32>
    %cst_153 = arith.constant dense<0.000000e+00> : vector<8xf32>
    %436 = vector.multi_reduction <add>, %435, %cst_153 [1] : vector<8x64xf32> to vector<8xf32>
    %437 = vector.shape_cast %436 : vector<8xf32> to vector<8x1xf32>
    %438 = tpu.reciprocal %437 : vector<8x1xf32> -> vector<8x1xf32>
    %439 = vector.broadcast %438 : vector<8x1xf32> to vector<8x64xf32>
    %440 = arith.mulf %435, %439 : vector<8x64xf32>
    %441 = arith.truncf %440 : vector<8x64xf32> to vector<8x64xbf16>
    %c0_154 = arith.constant 0 : index
    %c0_155 = arith.constant 0 : index
    %442 = vector.load %arg17[%c0_154, %c0_155] : memref<64x128xbf16, #tpu.memory_space<vmem>>, vector<64x128xbf16>
    %cst_156 = arith.constant dense<0.000000e+00> : vector<8x128xf32>
    %443 = tpu.matmul %441, %442, %cst_156 {dimension_numbers = #tpu.dot_dimension_numbers<[1], [0], [0], [1], [0, 0, 1, 1], [], []>} : vector<8x64xbf16>, vector<64x128xbf16>, vector<8x128xf32> -> vector<8x128xf32>
    %444 = arith.truncf %443 : vector<8x128xf32> to vector<8x128xbf16>
    %c0_157 = arith.constant 0 : index
    %c0_158 = arith.constant 0 : index
    %445 = vector.load %arg11[%c0_157, %c0_158] : memref<128x128xbf16, #tpu.memory_space<vmem>>, vector<128x128xbf16>
    %cst_159 = arith.constant dense<0.000000e+00> : vector<8x128xf32>
    %446 = tpu.matmul %444, %445, %cst_159 {dimension_numbers = #tpu.dot_dimension_numbers<[1], [0], [0], [1], [0, 0, 1, 1], [], []>} : vector<8x128xbf16>, vector<128x128xbf16>, vector<8x128xf32> -> vector<8x128xf32>
    %c0_160 = arith.constant 0 : index
    %c0_161 = arith.constant 0 : index
    %447 = vector.load %arg12[%c0_160, %c0_161] : memref<128x128xbf16, #tpu.memory_space<vmem>>, vector<128x128xbf16>
    %cst_162 = arith.constant dense<0.000000e+00> : vector<8x128xf32>
    %448 = tpu.matmul %426, %447, %cst_162 {dimension_numbers = #tpu.dot_dimension_numbers<[1], [0], [0], [1], [0, 0, 1, 1], [], []>} : vector<8x128xbf16>, vector<128x128xbf16>, vector<8x128xf32> -> vector<8x128xf32>
    %449 = arith.addf %446, %448 : vector<8x128xf32>
    %450 = math.tanh %449 : vector<8x128xf32>
    %451 = arith.index_cast %c1_i32_137 : i32 to index
    %c0_163 = arith.constant 0 : index
    %c0_164 = arith.constant 0 : index
    %452 = vector.load %arg13[%451, %c0_163, %c0_164] : memref<8x8x128xf32, #tpu.memory_space<vmem>>, vector<1x8x128xf32>
    %453 = vector.shape_cast %452 : vector<1x8x128xf32> to vector<8x128xf32>
    %454 = vector.shape_cast %450 : vector<8x128xf32> to vector<1x8x128xf32>
    tpu.vector_store %arg13[%451, %c0_163, %c0_164], %454 {strides = array<i32>} : memref<8x8x128xf32, #tpu.memory_space<vmem>>, vector<1x8x128xf32>,
    %455 = arith.truncf %450 : vector<8x128xf32> to vector<8x128xbf16>
    %c2_i32_165 = arith.constant 2 : i32
    %c8_i32_166 = arith.constant 8 : i32
    %456 = arith.muli %c2_i32_165, %c8_i32_166 : i32
    %457 = tpu.assume_multiple %456, 8 : i32
    %458 = arith.truncf %425 : vector<8x128xf32> to vector<8x128xbf16>
    %459 = arith.index_cast %457 : i32 to index
    %c0_167 = arith.constant 0 : index
    %460 = vector.load %arg15[%459, %c0_167] : memref<64x512xf32, #tpu.memory_space<vmem>>, vector<8x512xf32>
    %c0_168 = arith.constant 0 : index
    %c0_169 = arith.constant 0 : index
    %461 = vector.load %arg7[%c0_168, %c0_169] : memref<128x512xbf16, #tpu.memory_space<vmem>>, vector<128x512xbf16>
    %cst_170 = arith.constant dense<0.000000e+00> : vector<8x512xf32>
    %462 = tpu.matmul %455, %461, %cst_170 {dimension_numbers = #tpu.dot_dimension_numbers<[1], [0], [0], [1], [0, 0, 1, 1], [], []>} : vector<8x128xbf16>, vector<128x512xbf16>, vector<8x512xf32> -> vector<8x512xf32>
    %463 = arith.addf %460, %462 : vector<8x512xf32>
    %c0_171 = arith.constant 0 : index
    %c0_172 = arith.constant 0 : index
    %464 = vector.load %arg8[%c0_171, %c0_172] : memref<128x512xbf16, #tpu.memory_space<vmem>>, vector<128x512xbf16>
    %cst_173 = arith.constant dense<0.000000e+00> : vector<8x512xf32>
    %465 = tpu.matmul %458, %464, %cst_173 {dimension_numbers = #tpu.dot_dimension_numbers<[1], [0], [0], [1], [0, 0, 1, 1], [], []>} : vector<8x128xbf16>, vector<128x512xbf16>, vector<8x512xf32> -> vector<8x512xf32>
    %466 = arith.addf %463, %465 : vector<8x512xf32>
    %467 = vector.extract_strided_slice %466 {offsets = [0, 0], sizes = [8, 128], strides = [1, 1]} : vector<8x512xf32> to vector<8x128xf32>
    %468 = arith.negf %467 : vector<8x128xf32>
    %469 = math.exp %468 : vector<8x128xf32>
    %cst_174 = arith.constant 1.000000e+00 : f32
    %470 = vector.broadcast %cst_174 : f32 to vector<8x128xf32>
    %471 = arith.addf %470, %469 : vector<8x128xf32>
    %472 = arith.divf %470, %471 : vector<8x128xf32>
    %473 = vector.extract_strided_slice %466 {offsets = [0, 128], sizes = [8, 128], strides = [1, 1]} : vector<8x512xf32> to vector<8x128xf32>
    %474 = arith.negf %473 : vector<8x128xf32>
    %475 = math.exp %474 : vector<8x128xf32>
    %cst_175 = arith.constant 1.000000e+00 : f32
    %476 = vector.broadcast %cst_175 : f32 to vector<8x128xf32>
    %477 = arith.addf %476, %475 : vector<8x128xf32>
    %478 = arith.divf %476, %477 : vector<8x128xf32>
    %479 = vector.extract_strided_slice %466 {offsets = [0, 256], sizes = [8, 128], strides = [1, 1]} : vector<8x512xf32> to vector<8x128xf32>
    %480 = math.tanh %479 : vector<8x128xf32>
    %481 = vector.extract_strided_slice %466 {offsets = [0, 384], sizes = [8, 128], strides = [1, 1]} : vector<8x512xf32> to vector<8x128xf32>
    %482 = arith.negf %481 : vector<8x128xf32>
    %483 = math.exp %482 : vector<8x128xf32>
    %cst_176 = arith.constant 1.000000e+00 : f32
    %484 = vector.broadcast %cst_176 : f32 to vector<8x128xf32>
    %485 = arith.addf %484, %483 : vector<8x128xf32>
    %486 = arith.divf %484, %485 : vector<8x128xf32>
    %487 = arith.mulf %478, %423 : vector<8x128xf32>
    %488 = arith.mulf %472, %480 : vector<8x128xf32>
    %489 = arith.addf %487, %488 : vector<8x128xf32>
    %490 = math.tanh %489 : vector<8x128xf32>
    %491 = arith.mulf %486, %490 : vector<8x128xf32>
    %492 = arith.truncf %491 : vector<8x128xf32> to vector<8x128xbf16>
    %c0_177 = arith.constant 0 : index
    %c0_178 = arith.constant 0 : index
    %493 = vector.load %arg18[%c0_177, %c0_178] : memref<128x64xbf16, #tpu.memory_space<vmem>>, vector<128x64xbf16>
    %cst_179 = arith.constant dense<0.000000e+00> : vector<8x64xf32>
    %494 = tpu.matmul %492, %493, %cst_179 {dimension_numbers = #tpu.dot_dimension_numbers<[1], [0], [0], [1], [0, 0, 1, 1], [], []>} : vector<8x128xbf16>, vector<128x64xbf16>, vector<8x64xf32> -> vector<8x64xf32>
    %495 = vector.broadcast %cst_108 : f32 to vector<8x64xf32>
    %496 = arith.select %322, %494, %495 : vector<8x64xi1>, vector<8x64xf32>
    %cst_180 = arith.constant dense<0xFF800000> : vector<8xf32>
    %497 = vector.multi_reduction <maximumf>, %496, %cst_180 [1] : vector<8x64xf32> to vector<8xf32>
    %498 = vector.shape_cast %497 : vector<8xf32> to vector<8x1xf32>
    %499 = vector.broadcast %498 : vector<8x1xf32> to vector<8x64xf32>
    %500 = arith.subf %496, %499 : vector<8x64xf32>
    %501 = math.exp %500 : vector<8x64xf32>
    %cst_181 = arith.constant dense<0.000000e+00> : vector<8xf32>
    %502 = vector.multi_reduction <add>, %501, %cst_181 [1] : vector<8x64xf32> to vector<8xf32>
    %503 = vector.shape_cast %502 : vector<8xf32> to vector<8x1xf32>
    %504 = tpu.reciprocal %503 : vector<8x1xf32> -> vector<8x1xf32>
    %505 = vector.broadcast %504 : vector<8x1xf32> to vector<8x64xf32>
    %506 = arith.mulf %501, %505 : vector<8x64xf32>
    %507 = arith.truncf %506 : vector<8x64xf32> to vector<8x64xbf16>
    %c0_182 = arith.constant 0 : index
    %c0_183 = arith.constant 0 : index
    %508 = vector.load %arg17[%c0_182, %c0_183] : memref<64x128xbf16, #tpu.memory_space<vmem>>, vector<64x128xbf16>
    %cst_184 = arith.constant dense<0.000000e+00> : vector<8x128xf32>
    %509 = tpu.matmul %507, %508, %cst_184 {dimension_numbers = #tpu.dot_dimension_numbers<[1], [0], [0], [1], [0, 0, 1, 1], [], []>} : vector<8x64xbf16>, vector<64x128xbf16>, vector<8x128xf32> -> vector<8x128xf32>
    %510 = arith.truncf %509 : vector<8x128xf32> to vector<8x128xbf16>
    %c0_185 = arith.constant 0 : index
    %c0_186 = arith.constant 0 : index
    %511 = vector.load %arg11[%c0_185, %c0_186] : memref<128x128xbf16, #tpu.memory_space<vmem>>, vector<128x128xbf16>
    %cst_187 = arith.constant dense<0.000000e+00> : vector<8x128xf32>
    %512 = tpu.matmul %510, %511, %cst_187 {dimension_numbers = #tpu.dot_dimension_numbers<[1], [0], [0], [1], [0, 0, 1, 1], [], []>} : vector<8x128xbf16>, vector<128x128xbf16>, vector<8x128xf32> -> vector<8x128xf32>
    %c0_188 = arith.constant 0 : index
    %c0_189 = arith.constant 0 : index
    %513 = vector.load %arg12[%c0_188, %c0_189] : memref<128x128xbf16, #tpu.memory_space<vmem>>, vector<128x128xbf16>
    %cst_190 = arith.constant dense<0.000000e+00> : vector<8x128xf32>
    %514 = tpu.matmul %492, %513, %cst_190 {dimension_numbers = #tpu.dot_dimension_numbers<[1], [0], [0], [1], [0, 0, 1, 1], [], []>} : vector<8x128xbf16>, vector<128x128xbf16>, vector<8x128xf32> -> vector<8x128xf32>
    %515 = arith.addf %512, %514 : vector<8x128xf32>
    %516 = math.tanh %515 : vector<8x128xf32>
    %517 = arith.index_cast %c2_i32_165 : i32 to index
    %c0_191 = arith.constant 0 : index
    %c0_192 = arith.constant 0 : index
    %518 = vector.load %arg13[%517, %c0_191, %c0_192] : memref<8x8x128xf32, #tpu.memory_space<vmem>>, vector<1x8x128xf32>
    %519 = vector.shape_cast %518 : vector<1x8x128xf32> to vector<8x128xf32>
    %520 = vector.shape_cast %516 : vector<8x128xf32> to vector<1x8x128xf32>
    tpu.vector_store %arg13[%517, %c0_191, %c0_192], %520 {strides = array<i32>} : memref<8x8x128xf32, #tpu.memory_space<vmem>>, vector<1x8x128xf32>,
    %521 = arith.truncf %516 : vector<8x128xf32> to vector<8x128xbf16>
    %c3_i32_193 = arith.constant 3 : i32
    %c8_i32_194 = arith.constant 8 : i32
    %522 = arith.muli %c3_i32_193, %c8_i32_194 : i32
    %523 = tpu.assume_multiple %522, 8 : i32
    %524 = arith.truncf %491 : vector<8x128xf32> to vector<8x128xbf16>
    %525 = arith.index_cast %523 : i32 to index
    %c0_195 = arith.constant 0 : index
    %526 = vector.load %arg15[%525, %c0_195] : memref<64x512xf32, #tpu.memory_space<vmem>>, vector<8x512xf32>
    %c0_196 = arith.constant 0 : index
    %c0_197 = arith.constant 0 : index
    %527 = vector.load %arg7[%c0_196, %c0_197] : memref<128x512xbf16, #tpu.memory_space<vmem>>, vector<128x512xbf16>
    %cst_198 = arith.constant dense<0.000000e+00> : vector<8x512xf32>
    %528 = tpu.matmul %521, %527, %cst_198 {dimension_numbers = #tpu.dot_dimension_numbers<[1], [0], [0], [1], [0, 0, 1, 1], [], []>} : vector<8x128xbf16>, vector<128x512xbf16>, vector<8x512xf32> -> vector<8x512xf32>
    %529 = arith.addf %526, %528 : vector<8x512xf32>
    %c0_199 = arith.constant 0 : index
    %c0_200 = arith.constant 0 : index
    %530 = vector.load %arg8[%c0_199, %c0_200] : memref<128x512xbf16, #tpu.memory_space<vmem>>, vector<128x512xbf16>
    %cst_201 = arith.constant dense<0.000000e+00> : vector<8x512xf32>
    %531 = tpu.matmul %524, %530, %cst_201 {dimension_numbers = #tpu.dot_dimension_numbers<[1], [0], [0], [1], [0, 0, 1, 1], [], []>} : vector<8x128xbf16>, vector<128x512xbf16>, vector<8x512xf32> -> vector<8x512xf32>
    %532 = arith.addf %529, %531 : vector<8x512xf32>
    %533 = vector.extract_strided_slice %532 {offsets = [0, 0], sizes = [8, 128], strides = [1, 1]} : vector<8x512xf32> to vector<8x128xf32>
    %534 = arith.negf %533 : vector<8x128xf32>
    %535 = math.exp %534 : vector<8x128xf32>
    %cst_202 = arith.constant 1.000000e+00 : f32
    %536 = vector.broadcast %cst_202 : f32 to vector<8x128xf32>
    %537 = arith.addf %536, %535 : vector<8x128xf32>
    %538 = arith.divf %536, %537 : vector<8x128xf32>
    %539 = vector.extract_strided_slice %532 {offsets = [0, 128], sizes = [8, 128], strides = [1, 1]} : vector<8x512xf32> to vector<8x128xf32>
    %540 = arith.negf %539 : vector<8x128xf32>
    %541 = math.exp %540 : vector<8x128xf32>
    %cst_203 = arith.constant 1.000000e+00 : f32
    %542 = vector.broadcast %cst_203 : f32 to vector<8x128xf32>
    %543 = arith.addf %542, %541 : vector<8x128xf32>
    %544 = arith.divf %542, %543 : vector<8x128xf32>
    %545 = vector.extract_strided_slice %532 {offsets = [0, 256], sizes = [8, 128], strides = [1, 1]} : vector<8x512xf32> to vector<8x128xf32>
    %546 = math.tanh %545 : vector<8x128xf32>
    %547 = vector.extract_strided_slice %532 {offsets = [0, 384], sizes = [8, 128], strides = [1, 1]} : vector<8x512xf32> to vector<8x128xf32>
    %548 = arith.negf %547 : vector<8x128xf32>
    %549 = math.exp %548 : vector<8x128xf32>
    %cst_204 = arith.constant 1.000000e+00 : f32
    %550 = vector.broadcast %cst_204 : f32 to vector<8x128xf32>
    %551 = arith.addf %550, %549 : vector<8x128xf32>
    %552 = arith.divf %550, %551 : vector<8x128xf32>
    %553 = arith.mulf %544, %489 : vector<8x128xf32>
    %554 = arith.mulf %538, %546 : vector<8x128xf32>
    %555 = arith.addf %553, %554 : vector<8x128xf32>
    %556 = math.tanh %555 : vector<8x128xf32>
    %557 = arith.mulf %552, %556 : vector<8x128xf32>
    %558 = arith.truncf %557 : vector<8x128xf32> to vector<8x128xbf16>
    %c0_205 = arith.constant 0 : index
    %c0_206 = arith.constant 0 : index
    %559 = vector.load %arg18[%c0_205, %c0_206] : memref<128x64xbf16, #tpu.memory_space<vmem>>, vector<128x64xbf16>
    %cst_207 = arith.constant dense<0.000000e+00> : vector<8x64xf32>
    %560 = tpu.matmul %558, %559, %cst_207 {dimension_numbers = #tpu.dot_dimension_numbers<[1], [0], [0], [1], [0, 0, 1, 1], [], []>} : vector<8x128xbf16>, vector<128x64xbf16>, vector<8x64xf32> -> vector<8x64xf32>
    %561 = vector.broadcast %cst_108 : f32 to vector<8x64xf32>
    %562 = arith.select %322, %560, %561 : vector<8x64xi1>, vector<8x64xf32>
    %cst_208 = arith.constant dense<0xFF800000> : vector<8xf32>
    %563 = vector.multi_reduction <maximumf>, %562, %cst_208 [1] : vector<8x64xf32> to vector<8xf32>
    %564 = vector.shape_cast %563 : vector<8xf32> to vector<8x1xf32>
    %565 = vector.broadcast %564 : vector<8x1xf32> to vector<8x64xf32>
    %566 = arith.subf %562, %565 : vector<8x64xf32>
    %567 = math.exp %566 : vector<8x64xf32>
    %cst_209 = arith.constant dense<0.000000e+00> : vector<8xf32>
    %568 = vector.multi_reduction <add>, %567, %cst_209 [1] : vector<8x64xf32> to vector<8xf32>
    %569 = vector.shape_cast %568 : vector<8xf32> to vector<8x1xf32>
    %570 = tpu.reciprocal %569 : vector<8x1xf32> -> vector<8x1xf32>
    %571 = vector.broadcast %570 : vector<8x1xf32> to vector<8x64xf32>
    %572 = arith.mulf %567, %571 : vector<8x64xf32>
    %573 = arith.truncf %572 : vector<8x64xf32> to vector<8x64xbf16>
    %c0_210 = arith.constant 0 : index
    %c0_211 = arith.constant 0 : index
    %574 = vector.load %arg17[%c0_210, %c0_211] : memref<64x128xbf16, #tpu.memory_space<vmem>>, vector<64x128xbf16>
    %cst_212 = arith.constant dense<0.000000e+00> : vector<8x128xf32>
    %575 = tpu.matmul %573, %574, %cst_212 {dimension_numbers = #tpu.dot_dimension_numbers<[1], [0], [0], [1], [0, 0, 1, 1], [], []>} : vector<8x64xbf16>, vector<64x128xbf16>, vector<8x128xf32> -> vector<8x128xf32>
    %576 = arith.truncf %575 : vector<8x128xf32> to vector<8x128xbf16>
    %c0_213 = arith.constant 0 : index
    %c0_214 = arith.constant 0 : index
    %577 = vector.load %arg11[%c0_213, %c0_214] : memref<128x128xbf16, #tpu.memory_space<vmem>>, vector<128x128xbf16>
    %cst_215 = arith.constant dense<0.000000e+00> : vector<8x128xf32>
    %578 = tpu.matmul %576, %577, %cst_215 {dimension_numbers = #tpu.dot_dimension_numbers<[1], [0], [0], [1], [0, 0, 1, 1], [], []>} : vector<8x128xbf16>, vector<128x128xbf16>, vector<8x128xf32> -> vector<8x128xf32>
    %c0_216 = arith.constant 0 : index
    %c0_217 = arith.constant 0 : index
    %579 = vector.load %arg12[%c0_216, %c0_217] : memref<128x128xbf16, #tpu.memory_space<vmem>>, vector<128x128xbf16>
    %cst_218 = arith.constant dense<0.000000e+00> : vector<8x128xf32>
    %580 = tpu.matmul %558, %579, %cst_218 {dimension_numbers = #tpu.dot_dimension_numbers<[1], [0], [0], [1], [0, 0, 1, 1], [], []>} : vector<8x128xbf16>, vector<128x128xbf16>, vector<8x128xf32> -> vector<8x128xf32>
    %581 = arith.addf %578, %580 : vector<8x128xf32>
    %582 = math.tanh %581 : vector<8x128xf32>
    %583 = arith.index_cast %c3_i32_193 : i32 to index
    %c0_219 = arith.constant 0 : index
    %c0_220 = arith.constant 0 : index
    %584 = vector.load %arg13[%583, %c0_219, %c0_220] : memref<8x8x128xf32, #tpu.memory_space<vmem>>, vector<1x8x128xf32>
    %585 = vector.shape_cast %584 : vector<1x8x128xf32> to vector<8x128xf32>
    %586 = vector.shape_cast %582 : vector<8x128xf32> to vector<1x8x128xf32>
    tpu.vector_store %arg13[%583, %c0_219, %c0_220], %586 {strides = array<i32>} : memref<8x8x128xf32, #tpu.memory_space<vmem>>, vector<1x8x128xf32>,
    %587 = arith.truncf %582 : vector<8x128xf32> to vector<8x128xbf16>
    %c4_i32_221 = arith.constant 4 : i32
    %c8_i32_222 = arith.constant 8 : i32
    %588 = arith.muli %c4_i32_221, %c8_i32_222 : i32
    %589 = tpu.assume_multiple %588, 8 : i32
    %590 = arith.truncf %557 : vector<8x128xf32> to vector<8x128xbf16>
    %591 = arith.index_cast %589 : i32 to index
    %c0_223 = arith.constant 0 : index
    %592 = vector.load %arg15[%591, %c0_223] : memref<64x512xf32, #tpu.memory_space<vmem>>, vector<8x512xf32>
    %c0_224 = arith.constant 0 : index
    %c0_225 = arith.constant 0 : index
    %593 = vector.load %arg7[%c0_224, %c0_225] : memref<128x512xbf16, #tpu.memory_space<vmem>>, vector<128x512xbf16>
    %cst_226 = arith.constant dense<0.000000e+00> : vector<8x512xf32>
    %594 = tpu.matmul %587, %593, %cst_226 {dimension_numbers = #tpu.dot_dimension_numbers<[1], [0], [0], [1], [0, 0, 1, 1], [], []>} : vector<8x128xbf16>, vector<128x512xbf16>, vector<8x512xf32> -> vector<8x512xf32>
    %595 = arith.addf %592, %594 : vector<8x512xf32>
    %c0_227 = arith.constant 0 : index
    %c0_228 = arith.constant 0 : index
    %596 = vector.load %arg8[%c0_227, %c0_228] : memref<128x512xbf16, #tpu.memory_space<vmem>>, vector<128x512xbf16>
    %cst_229 = arith.constant dense<0.000000e+00> : vector<8x512xf32>
    %597 = tpu.matmul %590, %596, %cst_229 {dimension_numbers = #tpu.dot_dimension_numbers<[1], [0], [0], [1], [0, 0, 1, 1], [], []>} : vector<8x128xbf16>, vector<128x512xbf16>, vector<8x512xf32> -> vector<8x512xf32>
    %598 = arith.addf %595, %597 : vector<8x512xf32>
    %599 = vector.extract_strided_slice %598 {offsets = [0, 0], sizes = [8, 128], strides = [1, 1]} : vector<8x512xf32> to vector<8x128xf32>
    %600 = arith.negf %599 : vector<8x128xf32>
    %601 = math.exp %600 : vector<8x128xf32>
    %cst_230 = arith.constant 1.000000e+00 : f32
    %602 = vector.broadcast %cst_230 : f32 to vector<8x128xf32>
    %603 = arith.addf %602, %601 : vector<8x128xf32>
    %604 = arith.divf %602, %603 : vector<8x128xf32>
    %605 = vector.extract_strided_slice %598 {offsets = [0, 128], sizes = [8, 128], strides = [1, 1]} : vector<8x512xf32> to vector<8x128xf32>
    %606 = arith.negf %605 : vector<8x128xf32>
    %607 = math.exp %606 : vector<8x128xf32>
    %cst_231 = arith.constant 1.000000e+00 : f32
    %608 = vector.broadcast %cst_231 : f32 to vector<8x128xf32>
    %609 = arith.addf %608, %607 : vector<8x128xf32>
    %610 = arith.divf %608, %609 : vector<8x128xf32>
    %611 = vector.extract_strided_slice %598 {offsets = [0, 256], sizes = [8, 128], strides = [1, 1]} : vector<8x512xf32> to vector<8x128xf32>
    %612 = math.tanh %611 : vector<8x128xf32>
    %613 = vector.extract_strided_slice %598 {offsets = [0, 384], sizes = [8, 128], strides = [1, 1]} : vector<8x512xf32> to vector<8x128xf32>
    %614 = arith.negf %613 : vector<8x128xf32>
    %615 = math.exp %614 : vector<8x128xf32>
    %cst_232 = arith.constant 1.000000e+00 : f32
    %616 = vector.broadcast %cst_232 : f32 to vector<8x128xf32>
    %617 = arith.addf %616, %615 : vector<8x128xf32>
    %618 = arith.divf %616, %617 : vector<8x128xf32>
    %619 = arith.mulf %610, %555 : vector<8x128xf32>
    %620 = arith.mulf %604, %612 : vector<8x128xf32>
    %621 = arith.addf %619, %620 : vector<8x128xf32>
    %622 = math.tanh %621 : vector<8x128xf32>
    %623 = arith.mulf %618, %622 : vector<8x128xf32>
    %624 = arith.truncf %623 : vector<8x128xf32> to vector<8x128xbf16>
    %c0_233 = arith.constant 0 : index
    %c0_234 = arith.constant 0 : index
    %625 = vector.load %arg18[%c0_233, %c0_234] : memref<128x64xbf16, #tpu.memory_space<vmem>>, vector<128x64xbf16>
    %cst_235 = arith.constant dense<0.000000e+00> : vector<8x64xf32>
    %626 = tpu.matmul %624, %625, %cst_235 {dimension_numbers = #tpu.dot_dimension_numbers<[1], [0], [0], [1], [0, 0, 1, 1], [], []>} : vector<8x128xbf16>, vector<128x64xbf16>, vector<8x64xf32> -> vector<8x64xf32>
    %627 = vector.broadcast %cst_108 : f32 to vector<8x64xf32>
    %628 = arith.select %322, %626, %627 : vector<8x64xi1>, vector<8x64xf32>
    %cst_236 = arith.constant dense<0xFF800000> : vector<8xf32>
    %629 = vector.multi_reduction <maximumf>, %628, %cst_236 [1] : vector<8x64xf32> to vector<8xf32>
    %630 = vector.shape_cast %629 : vector<8xf32> to vector<8x1xf32>
    %631 = vector.broadcast %630 : vector<8x1xf32> to vector<8x64xf32>
    %632 = arith.subf %628, %631 : vector<8x64xf32>
    %633 = math.exp %632 : vector<8x64xf32>
    %cst_237 = arith.constant dense<0.000000e+00> : vector<8xf32>
    %634 = vector.multi_reduction <add>, %633, %cst_237 [1] : vector<8x64xf32> to vector<8xf32>
    %635 = vector.shape_cast %634 : vector<8xf32> to vector<8x1xf32>
    %636 = tpu.reciprocal %635 : vector<8x1xf32> -> vector<8x1xf32>
    %637 = vector.broadcast %636 : vector<8x1xf32> to vector<8x64xf32>
    %638 = arith.mulf %633, %637 : vector<8x64xf32>
    %639 = arith.truncf %638 : vector<8x64xf32> to vector<8x64xbf16>
    %c0_238 = arith.constant 0 : index
    %c0_239 = arith.constant 0 : index
    %640 = vector.load %arg17[%c0_238, %c0_239] : memref<64x128xbf16, #tpu.memory_space<vmem>>, vector<64x128xbf16>
    %cst_240 = arith.constant dense<0.000000e+00> : vector<8x128xf32>
    %641 = tpu.matmul %639, %640, %cst_240 {dimension_numbers = #tpu.dot_dimension_numbers<[1], [0], [0], [1], [0, 0, 1, 1], [], []>} : vector<8x64xbf16>, vector<64x128xbf16>, vector<8x128xf32> -> vector<8x128xf32>
    %642 = arith.truncf %641 : vector<8x128xf32> to vector<8x128xbf16>
    %c0_241 = arith.constant 0 : index
    %c0_242 = arith.constant 0 : index
    %643 = vector.load %arg11[%c0_241, %c0_242] : memref<128x128xbf16, #tpu.memory_space<vmem>>, vector<128x128xbf16>
    %cst_243 = arith.constant dense<0.000000e+00> : vector<8x128xf32>
    %644 = tpu.matmul %642, %643, %cst_243 {dimension_numbers = #tpu.dot_dimension_numbers<[1], [0], [0], [1], [0, 0, 1, 1], [], []>} : vector<8x128xbf16>, vector<128x128xbf16>, vector<8x128xf32> -> vector<8x128xf32>
    %c0_244 = arith.constant 0 : index
    %c0_245 = arith.constant 0 : index
    %645 = vector.load %arg12[%c0_244, %c0_245] : memref<128x128xbf16, #tpu.memory_space<vmem>>, vector<128x128xbf16>
    %cst_246 = arith.constant dense<0.000000e+00> : vector<8x128xf32>
    %646 = tpu.matmul %624, %645, %cst_246 {dimension_numbers = #tpu.dot_dimension_numbers<[1], [0], [0], [1], [0, 0, 1, 1], [], []>} : vector<8x128xbf16>, vector<128x128xbf16>, vector<8x128xf32> -> vector<8x128xf32>
    %647 = arith.addf %644, %646 : vector<8x128xf32>
    %648 = math.tanh %647 : vector<8x128xf32>
    %649 = arith.index_cast %c4_i32_221 : i32 to index
    %c0_247 = arith.constant 0 : index
    %c0_248 = arith.constant 0 : index
    %650 = vector.load %arg13[%649, %c0_247, %c0_248] : memref<8x8x128xf32, #tpu.memory_space<vmem>>, vector<1x8x128xf32>
    %651 = vector.shape_cast %650 : vector<1x8x128xf32> to vector<8x128xf32>
    %652 = vector.shape_cast %648 : vector<8x128xf32> to vector<1x8x128xf32>
    tpu.vector_store %arg13[%649, %c0_247, %c0_248], %652 {strides = array<i32>} : memref<8x8x128xf32, #tpu.memory_space<vmem>>, vector<1x8x128xf32>,
    %653 = arith.truncf %648 : vector<8x128xf32> to vector<8x128xbf16>
    %c5_i32_249 = arith.constant 5 : i32
    %c8_i32_250 = arith.constant 8 : i32
    %654 = arith.muli %c5_i32_249, %c8_i32_250 : i32
    %655 = tpu.assume_multiple %654, 8 : i32
    %656 = arith.truncf %623 : vector<8x128xf32> to vector<8x128xbf16>
    %657 = arith.index_cast %655 : i32 to index
    %c0_251 = arith.constant 0 : index
    %658 = vector.load %arg15[%657, %c0_251] : memref<64x512xf32, #tpu.memory_space<vmem>>, vector<8x512xf32>
    %c0_252 = arith.constant 0 : index
    %c0_253 = arith.constant 0 : index
    %659 = vector.load %arg7[%c0_252, %c0_253] : memref<128x512xbf16, #tpu.memory_space<vmem>>, vector<128x512xbf16>
    %cst_254 = arith.constant dense<0.000000e+00> : vector<8x512xf32>
    %660 = tpu.matmul %653, %659, %cst_254 {dimension_numbers = #tpu.dot_dimension_numbers<[1], [0], [0], [1], [0, 0, 1, 1], [], []>} : vector<8x128xbf16>, vector<128x512xbf16>, vector<8x512xf32> -> vector<8x512xf32>
    %661 = arith.addf %658, %660 : vector<8x512xf32>
    %c0_255 = arith.constant 0 : index
    %c0_256 = arith.constant 0 : index
    %662 = vector.load %arg8[%c0_255, %c0_256] : memref<128x512xbf16, #tpu.memory_space<vmem>>, vector<128x512xbf16>
    %cst_257 = arith.constant dense<0.000000e+00> : vector<8x512xf32>
    %663 = tpu.matmul %656, %662, %cst_257 {dimension_numbers = #tpu.dot_dimension_numbers<[1], [0], [0], [1], [0, 0, 1, 1], [], []>} : vector<8x128xbf16>, vector<128x512xbf16>, vector<8x512xf32> -> vector<8x512xf32>
    %664 = arith.addf %661, %663 : vector<8x512xf32>
    %665 = vector.extract_strided_slice %664 {offsets = [0, 0], sizes = [8, 128], strides = [1, 1]} : vector<8x512xf32> to vector<8x128xf32>
    %666 = arith.negf %665 : vector<8x128xf32>
    %667 = math.exp %666 : vector<8x128xf32>
    %cst_258 = arith.constant 1.000000e+00 : f32
    %668 = vector.broadcast %cst_258 : f32 to vector<8x128xf32>
    %669 = arith.addf %668, %667 : vector<8x128xf32>
    %670 = arith.divf %668, %669 : vector<8x128xf32>
    %671 = vector.extract_strided_slice %664 {offsets = [0, 128], sizes = [8, 128], strides = [1, 1]} : vector<8x512xf32> to vector<8x128xf32>
    %672 = arith.negf %671 : vector<8x128xf32>
    %673 = math.exp %672 : vector<8x128xf32>
    %cst_259 = arith.constant 1.000000e+00 : f32
    %674 = vector.broadcast %cst_259 : f32 to vector<8x128xf32>
    %675 = arith.addf %674, %673 : vector<8x128xf32>
    %676 = arith.divf %674, %675 : vector<8x128xf32>
    %677 = vector.extract_strided_slice %664 {offsets = [0, 256], sizes = [8, 128], strides = [1, 1]} : vector<8x512xf32> to vector<8x128xf32>
    %678 = math.tanh %677 : vector<8x128xf32>
    %679 = vector.extract_strided_slice %664 {offsets = [0, 384], sizes = [8, 128], strides = [1, 1]} : vector<8x512xf32> to vector<8x128xf32>
    %680 = arith.negf %679 : vector<8x128xf32>
    %681 = math.exp %680 : vector<8x128xf32>
    %cst_260 = arith.constant 1.000000e+00 : f32
    %682 = vector.broadcast %cst_260 : f32 to vector<8x128xf32>
    %683 = arith.addf %682, %681 : vector<8x128xf32>
    %684 = arith.divf %682, %683 : vector<8x128xf32>
    %685 = arith.mulf %676, %621 : vector<8x128xf32>
    %686 = arith.mulf %670, %678 : vector<8x128xf32>
    %687 = arith.addf %685, %686 : vector<8x128xf32>
    %688 = math.tanh %687 : vector<8x128xf32>
    %689 = arith.mulf %684, %688 : vector<8x128xf32>
    %690 = arith.truncf %689 : vector<8x128xf32> to vector<8x128xbf16>
    %c0_261 = arith.constant 0 : index
    %c0_262 = arith.constant 0 : index
    %691 = vector.load %arg18[%c0_261, %c0_262] : memref<128x64xbf16, #tpu.memory_space<vmem>>, vector<128x64xbf16>
    %cst_263 = arith.constant dense<0.000000e+00> : vector<8x64xf32>
    %692 = tpu.matmul %690, %691, %cst_263 {dimension_numbers = #tpu.dot_dimension_numbers<[1], [0], [0], [1], [0, 0, 1, 1], [], []>} : vector<8x128xbf16>, vector<128x64xbf16>, vector<8x64xf32> -> vector<8x64xf32>
    %693 = vector.broadcast %cst_108 : f32 to vector<8x64xf32>
    %694 = arith.select %322, %692, %693 : vector<8x64xi1>, vector<8x64xf32>
    %cst_264 = arith.constant dense<0xFF800000> : vector<8xf32>
    %695 = vector.multi_reduction <maximumf>, %694, %cst_264 [1] : vector<8x64xf32> to vector<8xf32>
    %696 = vector.shape_cast %695 : vector<8xf32> to vector<8x1xf32>
    %697 = vector.broadcast %696 : vector<8x1xf32> to vector<8x64xf32>
    %698 = arith.subf %694, %697 : vector<8x64xf32>
    %699 = math.exp %698 : vector<8x64xf32>
    %cst_265 = arith.constant dense<0.000000e+00> : vector<8xf32>
    %700 = vector.multi_reduction <add>, %699, %cst_265 [1] : vector<8x64xf32> to vector<8xf32>
    %701 = vector.shape_cast %700 : vector<8xf32> to vector<8x1xf32>
    %702 = tpu.reciprocal %701 : vector<8x1xf32> -> vector<8x1xf32>
    %703 = vector.broadcast %702 : vector<8x1xf32> to vector<8x64xf32>
    %704 = arith.mulf %699, %703 : vector<8x64xf32>
    %705 = arith.truncf %704 : vector<8x64xf32> to vector<8x64xbf16>
    %c0_266 = arith.constant 0 : index
    %c0_267 = arith.constant 0 : index
    %706 = vector.load %arg17[%c0_266, %c0_267] : memref<64x128xbf16, #tpu.memory_space<vmem>>, vector<64x128xbf16>
    %cst_268 = arith.constant dense<0.000000e+00> : vector<8x128xf32>
    %707 = tpu.matmul %705, %706, %cst_268 {dimension_numbers = #tpu.dot_dimension_numbers<[1], [0], [0], [1], [0, 0, 1, 1], [], []>} : vector<8x64xbf16>, vector<64x128xbf16>, vector<8x128xf32> -> vector<8x128xf32>
    %708 = arith.truncf %707 : vector<8x128xf32> to vector<8x128xbf16>
    %c0_269 = arith.constant 0 : index
    %c0_270 = arith.constant 0 : index
    %709 = vector.load %arg11[%c0_269, %c0_270] : memref<128x128xbf16, #tpu.memory_space<vmem>>, vector<128x128xbf16>
    %cst_271 = arith.constant dense<0.000000e+00> : vector<8x128xf32>
    %710 = tpu.matmul %708, %709, %cst_271 {dimension_numbers = #tpu.dot_dimension_numbers<[1], [0], [0], [1], [0, 0, 1, 1], [], []>} : vector<8x128xbf16>, vector<128x128xbf16>, vector<8x128xf32> -> vector<8x128xf32>
    %c0_272 = arith.constant 0 : index
    %c0_273 = arith.constant 0 : index
    %711 = vector.load %arg12[%c0_272, %c0_273] : memref<128x128xbf16, #tpu.memory_space<vmem>>, vector<128x128xbf16>
    %cst_274 = arith.constant dense<0.000000e+00> : vector<8x128xf32>
    %712 = tpu.matmul %690, %711, %cst_274 {dimension_numbers = #tpu.dot_dimension_numbers<[1], [0], [0], [1], [0, 0, 1, 1], [], []>} : vector<8x128xbf16>, vector<128x128xbf16>, vector<8x128xf32> -> vector<8x128xf32>
    %713 = arith.addf %710, %712 : vector<8x128xf32>
    %714 = math.tanh %713 : vector<8x128xf32>
    %715 = arith.index_cast %c5_i32_249 : i32 to index
    %c0_275 = arith.constant 0 : index
    %c0_276 = arith.constant 0 : index
    %716 = vector.load %arg13[%715, %c0_275, %c0_276] : memref<8x8x128xf32, #tpu.memory_space<vmem>>, vector<1x8x128xf32>
    %717 = vector.shape_cast %716 : vector<1x8x128xf32> to vector<8x128xf32>
    %718 = vector.shape_cast %714 : vector<8x128xf32> to vector<1x8x128xf32>
    tpu.vector_store %arg13[%715, %c0_275, %c0_276], %718 {strides = array<i32>} : memref<8x8x128xf32, #tpu.memory_space<vmem>>, vector<1x8x128xf32>,
    %719 = arith.truncf %714 : vector<8x128xf32> to vector<8x128xbf16>
    %c6_i32_277 = arith.constant 6 : i32
    %c8_i32_278 = arith.constant 8 : i32
    %720 = arith.muli %c6_i32_277, %c8_i32_278 : i32
    %721 = tpu.assume_multiple %720, 8 : i32
    %722 = arith.truncf %689 : vector<8x128xf32> to vector<8x128xbf16>
    %723 = arith.index_cast %721 : i32 to index
    %c0_279 = arith.constant 0 : index
    %724 = vector.load %arg15[%723, %c0_279] : memref<64x512xf32, #tpu.memory_space<vmem>>, vector<8x512xf32>
    %c0_280 = arith.constant 0 : index
    %c0_281 = arith.constant 0 : index
    %725 = vector.load %arg7[%c0_280, %c0_281] : memref<128x512xbf16, #tpu.memory_space<vmem>>, vector<128x512xbf16>
    %cst_282 = arith.constant dense<0.000000e+00> : vector<8x512xf32>
    %726 = tpu.matmul %719, %725, %cst_282 {dimension_numbers = #tpu.dot_dimension_numbers<[1], [0], [0], [1], [0, 0, 1, 1], [], []>} : vector<8x128xbf16>, vector<128x512xbf16>, vector<8x512xf32> -> vector<8x512xf32>
    %727 = arith.addf %724, %726 : vector<8x512xf32>
    %c0_283 = arith.constant 0 : index
    %c0_284 = arith.constant 0 : index
    %728 = vector.load %arg8[%c0_283, %c0_284] : memref<128x512xbf16, #tpu.memory_space<vmem>>, vector<128x512xbf16>
    %cst_285 = arith.constant dense<0.000000e+00> : vector<8x512xf32>
    %729 = tpu.matmul %722, %728, %cst_285 {dimension_numbers = #tpu.dot_dimension_numbers<[1], [0], [0], [1], [0, 0, 1, 1], [], []>} : vector<8x128xbf16>, vector<128x512xbf16>, vector<8x512xf32> -> vector<8x512xf32>
    %730 = arith.addf %727, %729 : vector<8x512xf32>
    %731 = vector.extract_strided_slice %730 {offsets = [0, 0], sizes = [8, 128], strides = [1, 1]} : vector<8x512xf32> to vector<8x128xf32>
    %732 = arith.negf %731 : vector<8x128xf32>
    %733 = math.exp %732 : vector<8x128xf32>
    %cst_286 = arith.constant 1.000000e+00 : f32
    %734 = vector.broadcast %cst_286 : f32 to vector<8x128xf32>
    %735 = arith.addf %734, %733 : vector<8x128xf32>
    %736 = arith.divf %734, %735 : vector<8x128xf32>
    %737 = vector.extract_strided_slice %730 {offsets = [0, 128], sizes = [8, 128], strides = [1, 1]} : vector<8x512xf32> to vector<8x128xf32>
    %738 = arith.negf %737 : vector<8x128xf32>
    %739 = math.exp %738 : vector<8x128xf32>
    %cst_287 = arith.constant 1.000000e+00 : f32
    %740 = vector.broadcast %cst_287 : f32 to vector<8x128xf32>
    %741 = arith.addf %740, %739 : vector<8x128xf32>
    %742 = arith.divf %740, %741 : vector<8x128xf32>
    %743 = vector.extract_strided_slice %730 {offsets = [0, 256], sizes = [8, 128], strides = [1, 1]} : vector<8x512xf32> to vector<8x128xf32>
    %744 = math.tanh %743 : vector<8x128xf32>
    %745 = vector.extract_strided_slice %730 {offsets = [0, 384], sizes = [8, 128], strides = [1, 1]} : vector<8x512xf32> to vector<8x128xf32>
    %746 = arith.negf %745 : vector<8x128xf32>
    %747 = math.exp %746 : vector<8x128xf32>
    %cst_288 = arith.constant 1.000000e+00 : f32
    %748 = vector.broadcast %cst_288 : f32 to vector<8x128xf32>
    %749 = arith.addf %748, %747 : vector<8x128xf32>
    %750 = arith.divf %748, %749 : vector<8x128xf32>
    %751 = arith.mulf %742, %687 : vector<8x128xf32>
    %752 = arith.mulf %736, %744 : vector<8x128xf32>
    %753 = arith.addf %751, %752 : vector<8x128xf32>
    %754 = math.tanh %753 : vector<8x128xf32>
    %755 = arith.mulf %750, %754 : vector<8x128xf32>
    %756 = arith.truncf %755 : vector<8x128xf32> to vector<8x128xbf16>
    %c0_289 = arith.constant 0 : index
    %c0_290 = arith.constant 0 : index
    %757 = vector.load %arg18[%c0_289, %c0_290] : memref<128x64xbf16, #tpu.memory_space<vmem>>, vector<128x64xbf16>
    %cst_291 = arith.constant dense<0.000000e+00> : vector<8x64xf32>
    %758 = tpu.matmul %756, %757, %cst_291 {dimension_numbers = #tpu.dot_dimension_numbers<[1], [0], [0], [1], [0, 0, 1, 1], [], []>} : vector<8x128xbf16>, vector<128x64xbf16>, vector<8x64xf32> -> vector<8x64xf32>
    %759 = vector.broadcast %cst_108 : f32 to vector<8x64xf32>
    %760 = arith.select %322, %758, %759 : vector<8x64xi1>, vector<8x64xf32>
    %cst_292 = arith.constant dense<0xFF800000> : vector<8xf32>
    %761 = vector.multi_reduction <maximumf>, %760, %cst_292 [1] : vector<8x64xf32> to vector<8xf32>
    %762 = vector.shape_cast %761 : vector<8xf32> to vector<8x1xf32>
    %763 = vector.broadcast %762 : vector<8x1xf32> to vector<8x64xf32>
    %764 = arith.subf %760, %763 : vector<8x64xf32>
    %765 = math.exp %764 : vector<8x64xf32>
    %cst_293 = arith.constant dense<0.000000e+00> : vector<8xf32>
    %766 = vector.multi_reduction <add>, %765, %cst_293 [1] : vector<8x64xf32> to vector<8xf32>
    %767 = vector.shape_cast %766 : vector<8xf32> to vector<8x1xf32>
    %768 = tpu.reciprocal %767 : vector<8x1xf32> -> vector<8x1xf32>
    %769 = vector.broadcast %768 : vector<8x1xf32> to vector<8x64xf32>
    %770 = arith.mulf %765, %769 : vector<8x64xf32>
    %771 = arith.truncf %770 : vector<8x64xf32> to vector<8x64xbf16>
    %c0_294 = arith.constant 0 : index
    %c0_295 = arith.constant 0 : index
    %772 = vector.load %arg17[%c0_294, %c0_295] : memref<64x128xbf16, #tpu.memory_space<vmem>>, vector<64x128xbf16>
    %cst_296 = arith.constant dense<0.000000e+00> : vector<8x128xf32>
    %773 = tpu.matmul %771, %772, %cst_296 {dimension_numbers = #tpu.dot_dimension_numbers<[1], [0], [0], [1], [0, 0, 1, 1], [], []>} : vector<8x64xbf16>, vector<64x128xbf16>, vector<8x128xf32> -> vector<8x128xf32>
    %774 = arith.truncf %773 : vector<8x128xf32> to vector<8x128xbf16>
    %c0_297 = arith.constant 0 : index
    %c0_298 = arith.constant 0 : index
    %775 = vector.load %arg11[%c0_297, %c0_298] : memref<128x128xbf16, #tpu.memory_space<vmem>>, vector<128x128xbf16>
    %cst_299 = arith.constant dense<0.000000e+00> : vector<8x128xf32>
    %776 = tpu.matmul %774, %775, %cst_299 {dimension_numbers = #tpu.dot_dimension_numbers<[1], [0], [0], [1], [0, 0, 1, 1], [], []>} : vector<8x128xbf16>, vector<128x128xbf16>, vector<8x128xf32> -> vector<8x128xf32>
    %c0_300 = arith.constant 0 : index
    %c0_301 = arith.constant 0 : index
    %777 = vector.load %arg12[%c0_300, %c0_301] : memref<128x128xbf16, #tpu.memory_space<vmem>>, vector<128x128xbf16>
    %cst_302 = arith.constant dense<0.000000e+00> : vector<8x128xf32>
    %778 = tpu.matmul %756, %777, %cst_302 {dimension_numbers = #tpu.dot_dimension_numbers<[1], [0], [0], [1], [0, 0, 1, 1], [], []>} : vector<8x128xbf16>, vector<128x128xbf16>, vector<8x128xf32> -> vector<8x128xf32>
    %779 = arith.addf %776, %778 : vector<8x128xf32>
    %780 = math.tanh %779 : vector<8x128xf32>
    %781 = arith.index_cast %c6_i32_277 : i32 to index
    %c0_303 = arith.constant 0 : index
    %c0_304 = arith.constant 0 : index
    %782 = vector.load %arg13[%781, %c0_303, %c0_304] : memref<8x8x128xf32, #tpu.memory_space<vmem>>, vector<1x8x128xf32>
    %783 = vector.shape_cast %782 : vector<1x8x128xf32> to vector<8x128xf32>
    %784 = vector.shape_cast %780 : vector<8x128xf32> to vector<1x8x128xf32>
    tpu.vector_store %arg13[%781, %c0_303, %c0_304], %784 {strides = array<i32>} : memref<8x8x128xf32, #tpu.memory_space<vmem>>, vector<1x8x128xf32>,
    %785 = arith.truncf %780 : vector<8x128xf32> to vector<8x128xbf16>
    %c7_i32_305 = arith.constant 7 : i32
    %c8_i32_306 = arith.constant 8 : i32
    %786 = arith.muli %c7_i32_305, %c8_i32_306 : i32
    %787 = tpu.assume_multiple %786, 8 : i32
    %788 = arith.truncf %755 : vector<8x128xf32> to vector<8x128xbf16>
    %789 = arith.index_cast %787 : i32 to index
    %c0_307 = arith.constant 0 : index
    %790 = vector.load %arg15[%789, %c0_307] : memref<64x512xf32, #tpu.memory_space<vmem>>, vector<8x512xf32>
    %c0_308 = arith.constant 0 : index
    %c0_309 = arith.constant 0 : index
    %791 = vector.load %arg7[%c0_308, %c0_309] : memref<128x512xbf16, #tpu.memory_space<vmem>>, vector<128x512xbf16>
    %cst_310 = arith.constant dense<0.000000e+00> : vector<8x512xf32>
    %792 = tpu.matmul %785, %791, %cst_310 {dimension_numbers = #tpu.dot_dimension_numbers<[1], [0], [0], [1], [0, 0, 1, 1], [], []>} : vector<8x128xbf16>, vector<128x512xbf16>, vector<8x512xf32> -> vector<8x512xf32>
    %793 = arith.addf %790, %792 : vector<8x512xf32>
    %c0_311 = arith.constant 0 : index
    %c0_312 = arith.constant 0 : index
    %794 = vector.load %arg8[%c0_311, %c0_312] : memref<128x512xbf16, #tpu.memory_space<vmem>>, vector<128x512xbf16>
    %cst_313 = arith.constant dense<0.000000e+00> : vector<8x512xf32>
    %795 = tpu.matmul %788, %794, %cst_313 {dimension_numbers = #tpu.dot_dimension_numbers<[1], [0], [0], [1], [0, 0, 1, 1], [], []>} : vector<8x128xbf16>, vector<128x512xbf16>, vector<8x512xf32> -> vector<8x512xf32>
    %796 = arith.addf %793, %795 : vector<8x512xf32>
    %797 = vector.extract_strided_slice %796 {offsets = [0, 0], sizes = [8, 128], strides = [1, 1]} : vector<8x512xf32> to vector<8x128xf32>
    %798 = arith.negf %797 : vector<8x128xf32>
    %799 = math.exp %798 : vector<8x128xf32>
    %cst_314 = arith.constant 1.000000e+00 : f32
    %800 = vector.broadcast %cst_314 : f32 to vector<8x128xf32>
    %801 = arith.addf %800, %799 : vector<8x128xf32>
    %802 = arith.divf %800, %801 : vector<8x128xf32>
    %803 = vector.extract_strided_slice %796 {offsets = [0, 128], sizes = [8, 128], strides = [1, 1]} : vector<8x512xf32> to vector<8x128xf32>
    %804 = arith.negf %803 : vector<8x128xf32>
    %805 = math.exp %804 : vector<8x128xf32>
    %cst_315 = arith.constant 1.000000e+00 : f32
    %806 = vector.broadcast %cst_315 : f32 to vector<8x128xf32>
    %807 = arith.addf %806, %805 : vector<8x128xf32>
    %808 = arith.divf %806, %807 : vector<8x128xf32>
    %809 = vector.extract_strided_slice %796 {offsets = [0, 256], sizes = [8, 128], strides = [1, 1]} : vector<8x512xf32> to vector<8x128xf32>
    %810 = math.tanh %809 : vector<8x128xf32>
    %811 = vector.extract_strided_slice %796 {offsets = [0, 384], sizes = [8, 128], strides = [1, 1]} : vector<8x512xf32> to vector<8x128xf32>
    %812 = arith.negf %811 : vector<8x128xf32>
    %813 = math.exp %812 : vector<8x128xf32>
    %cst_316 = arith.constant 1.000000e+00 : f32
    %814 = vector.broadcast %cst_316 : f32 to vector<8x128xf32>
    %815 = arith.addf %814, %813 : vector<8x128xf32>
    %816 = arith.divf %814, %815 : vector<8x128xf32>
    %817 = arith.mulf %808, %753 : vector<8x128xf32>
    %818 = arith.mulf %802, %810 : vector<8x128xf32>
    %819 = arith.addf %817, %818 : vector<8x128xf32>
    %820 = math.tanh %819 : vector<8x128xf32>
    %821 = arith.mulf %816, %820 : vector<8x128xf32>
    %822 = arith.truncf %821 : vector<8x128xf32> to vector<8x128xbf16>
    %c0_317 = arith.constant 0 : index
    %c0_318 = arith.constant 0 : index
    %823 = vector.load %arg18[%c0_317, %c0_318] : memref<128x64xbf16, #tpu.memory_space<vmem>>, vector<128x64xbf16>
    %cst_319 = arith.constant dense<0.000000e+00> : vector<8x64xf32>
    %824 = tpu.matmul %822, %823, %cst_319 {dimension_numbers = #tpu.dot_dimension_numbers<[1], [0], [0], [1], [0, 0, 1, 1], [], []>} : vector<8x128xbf16>, vector<128x64xbf16>, vector<8x64xf32> -> vector<8x64xf32>
    %825 = vector.broadcast %cst_108 : f32 to vector<8x64xf32>
    %826 = arith.select %322, %824, %825 : vector<8x64xi1>, vector<8x64xf32>
    %cst_320 = arith.constant dense<0xFF800000> : vector<8xf32>
    %827 = vector.multi_reduction <maximumf>, %826, %cst_320 [1] : vector<8x64xf32> to vector<8xf32>
    %828 = vector.shape_cast %827 : vector<8xf32> to vector<8x1xf32>
    %829 = vector.broadcast %828 : vector<8x1xf32> to vector<8x64xf32>
    %830 = arith.subf %826, %829 : vector<8x64xf32>
    %831 = math.exp %830 : vector<8x64xf32>
    %cst_321 = arith.constant dense<0.000000e+00> : vector<8xf32>
    %832 = vector.multi_reduction <add>, %831, %cst_321 [1] : vector<8x64xf32> to vector<8xf32>
    %833 = vector.shape_cast %832 : vector<8xf32> to vector<8x1xf32>
    %834 = tpu.reciprocal %833 : vector<8x1xf32> -> vector<8x1xf32>
    %835 = vector.broadcast %834 : vector<8x1xf32> to vector<8x64xf32>
    %836 = arith.mulf %831, %835 : vector<8x64xf32>
    %837 = arith.truncf %836 : vector<8x64xf32> to vector<8x64xbf16>
    %c0_322 = arith.constant 0 : index
    %c0_323 = arith.constant 0 : index
    %838 = vector.load %arg17[%c0_322, %c0_323] : memref<64x128xbf16, #tpu.memory_space<vmem>>, vector<64x128xbf16>
    %cst_324 = arith.constant dense<0.000000e+00> : vector<8x128xf32>
    %839 = tpu.matmul %837, %838, %cst_324 {dimension_numbers = #tpu.dot_dimension_numbers<[1], [0], [0], [1], [0, 0, 1, 1], [], []>} : vector<8x64xbf16>, vector<64x128xbf16>, vector<8x128xf32> -> vector<8x128xf32>
    %840 = arith.truncf %839 : vector<8x128xf32> to vector<8x128xbf16>
    %c0_325 = arith.constant 0 : index
    %c0_326 = arith.constant 0 : index
    %841 = vector.load %arg11[%c0_325, %c0_326] : memref<128x128xbf16, #tpu.memory_space<vmem>>, vector<128x128xbf16>
    %cst_327 = arith.constant dense<0.000000e+00> : vector<8x128xf32>
    %842 = tpu.matmul %840, %841, %cst_327 {dimension_numbers = #tpu.dot_dimension_numbers<[1], [0], [0], [1], [0, 0, 1, 1], [], []>} : vector<8x128xbf16>, vector<128x128xbf16>, vector<8x128xf32> -> vector<8x128xf32>
    %c0_328 = arith.constant 0 : index
    %c0_329 = arith.constant 0 : index
    %843 = vector.load %arg12[%c0_328, %c0_329] : memref<128x128xbf16, #tpu.memory_space<vmem>>, vector<128x128xbf16>
    %cst_330 = arith.constant dense<0.000000e+00> : vector<8x128xf32>
    %844 = tpu.matmul %822, %843, %cst_330 {dimension_numbers = #tpu.dot_dimension_numbers<[1], [0], [0], [1], [0, 0, 1, 1], [], []>} : vector<8x128xbf16>, vector<128x128xbf16>, vector<8x128xf32> -> vector<8x128xf32>
    %845 = arith.addf %842, %844 : vector<8x128xf32>
    %846 = math.tanh %845 : vector<8x128xf32>
    %847 = arith.index_cast %c7_i32_305 : i32 to index
    %c0_331 = arith.constant 0 : index
    %c0_332 = arith.constant 0 : index
    %848 = vector.load %arg13[%847, %c0_331, %c0_332] : memref<8x8x128xf32, #tpu.memory_space<vmem>>, vector<1x8x128xf32>
    %849 = vector.shape_cast %848 : vector<1x8x128xf32> to vector<8x128xf32>
    %850 = vector.shape_cast %846 : vector<8x128xf32> to vector<1x8x128xf32>
    tpu.vector_store %arg13[%847, %c0_331, %c0_332], %850 {strides = array<i32>} : memref<8x8x128xf32, #tpu.memory_space<vmem>>, vector<1x8x128xf32>,
    %851 = arith.truncf %846 : vector<8x128xf32> to vector<8x128xbf16>
    %c8_i32_333 = arith.constant 8 : i32
    return
  }
  func.func @transform_0(%arg0: i32) -> (i32, i32) {
    %c0_i32 = arith.constant 0 : i32
    %c0_i32_0 = arith.constant 0 : i32
    %c0_i32_1 = arith.constant 0 : i32
    return %c0_i32, %c0_i32_0 : i32, i32
  }
  func.func @transform_1(%arg0: i32) -> (i32, i32) {
    %c0_i32 = arith.constant 0 : i32
    %c0_i32_0 = arith.constant 0 : i32
    %c0_i32_1 = arith.constant 0 : i32
    return %c0_i32, %c0_i32_0 : i32, i32
  }
  func.func @transform_2(%arg0: i32) -> (i32, i32) {
    %c0_i32 = arith.constant 0 : i32
    %c0_i32_0 = arith.constant 0 : i32
    %c0_i32_1 = arith.constant 0 : i32
    return %c0_i32, %c0_i32_0 : i32, i32
  }
  func.func @transform_3(%arg0: i32) -> (i32, i32) {
    %c0_i32 = arith.constant 0 : i32
    %c0_i32_0 = arith.constant 0 : i32
    %c0_i32_1 = arith.constant 0 : i32
    return %c0_i32, %c0_i32_0 : i32, i32
  }
  func.func @transform_4(%arg0: i32) -> (i32, i32) {
    %c0_i32 = arith.constant 0 : i32
    %c0_i32_0 = arith.constant 0 : i32
    %c0_i32_1 = arith.constant 0 : i32
    return %c0_i32, %c0_i32_0 : i32, i32
  }
  func.func @transform_5(%arg0: i32) -> (i32, i32) {
    %c0_i32 = arith.constant 0 : i32
    %c0_i32_0 = arith.constant 0 : i32
    %c0_i32_1 = arith.constant 0 : i32
    return %c0_i32, %c0_i32_0 : i32, i32
  }
  func.func @transform_6(%arg0: i32) -> (i32, i32) {
    %c0_i32 = arith.constant 0 : i32
    %c0_i32_0 = arith.constant 0 : i32
    %c0_i32_1 = arith.constant 0 : i32
    return %c0_i32, %c0_i32_0 : i32, i32
  }
  func.func @transform_7(%arg0: i32) -> (i32, i32) {
    %c0_i32 = arith.constant 0 : i32
    %c0_i32_0 = arith.constant 0 : i32
    %c0_i32_1 = arith.constant 0 : i32
    return %c0_i32, %c0_i32_0 : i32, i32
  }
  func.func @transform_8(%arg0: i32) -> (i32, i32) {
    %c0_i32 = arith.constant 0 : i32
    %c0_i32_0 = arith.constant 0 : i32
    %c0_i32_1 = arith.constant 0 : i32
    return %c0_i32, %c0_i32_0 : i32, i32
  }
  func.func @transform_9(%arg0: i32) -> (i32, i32) {
    %c0_i32 = arith.constant 0 : i32
    %c0_i32_0 = arith.constant 0 : i32
    %c0_i32_1 = arith.constant 0 : i32
    return %c0_i32, %c0_i32_0 : i32, i32
  }
  func.func @transform_10(%arg0: i32) -> (i32, i32) {
    %c0_i32 = arith.constant 0 : i32
    %c0_i32_0 = arith.constant 0 : i32
    %c0_i32_1 = arith.constant 0 : i32
    return %c0_i32, %c0_i32_0 : i32, i32
  }
  func.func @transform_11(%arg0: i32) -> (i32, i32) {
    %c0_i32 = arith.constant 0 : i32
    %c0_i32_0 = arith.constant 0 : i32
    %c0_i32_1 = arith.constant 0 : i32
    return %c0_i32, %c0_i32_0 : i32, i32
  }
  func.func @transform_12(%arg0: i32) -> (i32, i32, i32) {
    %c0_i32 = arith.constant 0 : i32
    %c0_i32_0 = arith.constant 0 : i32
    %c0_i32_1 = arith.constant 0 : i32
    %c0_i32_2 = arith.constant 0 : i32
    return %c0_i32, %c0_i32_0, %c0_i32_1 : i32, i32, i32
  }
}

</mosaic_0001>

<bundles_post_ra>
// kernel: seq2seq_forward.1
= control target key start
LH: loop header
LB: loop body
LE: loop exit
PB: predicated region body
PF: predicated region fallthrough
CT: control target
= control target key end

     0   :  { %v18977_v2 = vmov 0   ;;  %s18963_s0 = inlined_call_operand.vmem [shape: bf16[64,128], index: 0, kind: input, shape index: {}]   ;;  %s18964_s1 = inlined_call_operand.vmem [shape: bf16[64,128], index: 1, kind: input, shape index: {}]   ;;  %s18965_s2 = inlined_call_operand.vmem [shape: bf16[128,512], index: 2, kind: input, shape index: {}]   ;;  %s18966_s3 = inlined_call_operand.vmem [shape: bf16[128,512], index: 3, kind: input, shape index: {}]   ;;  %s18967_s4 = inlined_call_operand.vmem [shape: f32[1,512], index: 4, kind: input, shape index: {}]   ;;  %s18968_s5 = inlined_call_operand.vmem [shape: bf16[128,512], index: 5, kind: input, shape index: {}]   ;;  %s18969_s6 = inlined_call_operand.vmem [shape: bf16[128,512], index: 6, kind: input, shape index: {}]   ;;  %s18970_s7 = inlined_call_operand.vmem [shape: bf16[128,512], index: 7, kind: input, shape index: {}]   ;;  %s18971_s8 = inlined_call_operand.vmem [shape: f32[1,512], index: 8, kind: input, shape index: {}]   ;;  %s18972_s9 = inlined_call_operand.vmem [shape: bf16[128,128], index: 9, kind: input, shape index: {}]   ;;  %s18973_s10 = inlined_call_operand.vmem [shape: bf16[128,128], index: 10, kind: input, shape index: {}]   ;;  %s18974_s11 = inlined_call_operand.vmem [shape: bf16[128,128], index: 11, kind: input, shape index: {}]   ;;  %s18975_s12 = inlined_call_operand.hbm [shape: f32[8,8,128], index: 12, kind: output, shape index: {}]  }
   0x1   :  { %v13767_v0 = vld [vmem:[%s18965_s2 + $0xe4] ss:$16 sps:$4 sm:$0xff]   ;;  %v13769_v1 = vld [vmem:[%s18965_s2 + $0xec] ss:$16 sps:$4 sm:$0xff]   ;;  %321 = vmatprep.mubr.bf16.mxu0 %v18977_v2  ;;  %394 = vmatprep.mubr.bf16.mxu1 %v18977_v2  ;;  %v13771_v3 = vld [vmem:[%s18965_s2 + $0xe0] ss:$16 sps:$4 sm:$0xff]  }
   0x2   :  { %289 = vmatprep.subr.bf16.mxu0 %v13767_v0  ;;  %v13772_v4 = vld [vmem:[%s18965_s2 + $0xe8] ss:$16 sps:$4 sm:$0xff]   ;;  %362 = vmatprep.subr.bf16.mxu1 %v13769_v1  ;;  %v13773_v5 = vld [vmem:[%s18965_s2 + $0xc4] ss:$16 sps:$4 sm:$0xff]   ;;  %v13775_v6 = vld [vmem:[%s18965_s2 + $0xcc] ss:$16 sps:$4 sm:$0xff]  }
   0x3   :  { %290 = vmatpush1.bf16.msra.mxu0 %v13771_v3  ;;  %363 = vmatpush1.bf16.msra.mxu1 %v13772_v4  ;;  %v13777_v7 = vld [vmem:[%s18965_s2 + $0xc0] ss:$16 sps:$4 sm:$0xff]   ;;  %v13778_v8 = vld [vmem:[%s18965_s2 + $0xc8] ss:$16 sps:$4 sm:$0xff]   ;;  %v13779_v9 = vld [vmem:[%s18965_s2 + $0xa4] ss:$16 sps:$4 sm:$0xff]  }
   0x4   :  { %291 = vmatprep.subr.bf16.mxu0 %v13773_v5  ;;  %364 = vmatprep.subr.bf16.mxu1 %v13775_v6  ;;  %v13781_v10 = vld [vmem:[%s18965_s2 + $0xac] ss:$16 sps:$4 sm:$0xff]   ;;  %v13783_v11 = vld [vmem:[%s18965_s2 + $0xa0] ss:$16 sps:$4 sm:$0xff]   ;;  %v13784_v12 = vld [vmem:[%s18965_s2 + $0xa8] ss:$16 sps:$4 sm:$0xff]  }
   0x5   :  { %v13785_v13 = vld [vmem:[%s18965_s2 + $0x84] ss:$16 sps:$4 sm:$0xff]   ;;  %v13787_v14 = vld [vmem:[%s18965_s2 + $0x8c] ss:$16 sps:$4 sm:$0xff]   ;;  %v13789_v15 = vld [vmem:[%s18965_s2 + $0x80] ss:$16 sps:$4 sm:$0xff]  }
   0x6   :  { %v13790_v16 = vld [vmem:[%s18965_s2 + $0x88] ss:$16 sps:$4 sm:$0xff]   ;;  %v13791_v17 = vld [vmem:[%s18965_s2 + $0x64] ss:$16 sps:$4 sm:$0xff]   ;;  %v13793_v18 = vld [vmem:[%s18965_s2 + $0x6c] ss:$16 sps:$4 sm:$0xff]  }
   0x7   :  { %292 = vmatpush1.bf16.msra.mxu0 %v13777_v7  ;;  %365 = vmatpush1.bf16.msra.mxu1 %v13778_v8  ;;  %v13795_v19 = vld [vmem:[%s18965_s2 + $0x60] ss:$16 sps:$4 sm:$0xff]   ;;  %v13796_v20 = vld [vmem:[%s18965_s2 + $0x68] ss:$16 sps:$4 sm:$0xff]   ;;  %v13797_v21 = vld [vmem:[%s18965_s2 + $0x44] ss:$16 sps:$4 sm:$0xff]  }
   0x8   :  { %293 = vmatprep.subr.bf16.mxu0 %v13779_v9  ;;  %366 = vmatprep.subr.bf16.mxu1 %v13781_v10  ;;  %v13799_v22 = vld [vmem:[%s18965_s2 + $0x4c] ss:$16 sps:$4 sm:$0xff]   ;;  %v13801_v23 = vld [vmem:[%s18965_s2 + $0x40] ss:$16 sps:$4 sm:$0xff]   ;;  %v13802_v24 = vld [vmem:[%s18965_s2 + $0x48] ss:$16 sps:$4 sm:$0xff]  }
   0x9   :  { %v13803_v25 = vld [vmem:[%s18965_s2 + $0x24] ss:$16 sps:$4 sm:$0xff]   ;;  %v13805_v26 = vld [vmem:[%s18965_s2 + $0x2c] ss:$16 sps:$4 sm:$0xff]   ;;  %v13807_v27 = vld [vmem:[%s18965_s2 + $0x20] ss:$16 sps:$4 sm:$0xff]  }
   0xa   :  { %v13808_v28 = vld [vmem:[%s18965_s2 + $0x28] ss:$16 sps:$4 sm:$0xff]   ;;  %v13809_v29 = vld [vmem:[%s18965_s2 + $0x4] ss:$16 sps:$4 sm:$0xff]   ;;  %v13811_v30 = vld [vmem:[%s18965_s2 + $0xc] ss:$16 sps:$4 sm:$0xff]  }
   0xb   :  { %294 = vmatpush1.bf16.msra.mxu0 %v13783_v11  ;;  %367 = vmatpush1.bf16.msra.mxu1 %v13784_v12  ;;  %v13813_v31 = vld [vmem:[%s18965_s2] ss:$16 sps:$4 sm:$0xff]   ;;  %v13814_v32 = vld [vmem:[%s18965_s2 + $0x8] ss:$16 sps:$4 sm:$0xff]   ;;  %v13818_v33 = vld [vmem:[%s18968_s5 + $0xe4] ss:$16 sps:$4 sm:$0xff]  }
   0xc   :  { %295 = vmatprep.subr.bf16.mxu0 %v13785_v13  ;;  %368 = vmatprep.subr.bf16.mxu1 %v13787_v14  ;;  %v13821_v34 = vld [vmem:[%s18968_s5 + $0xec] ss:$16 sps:$4 sm:$0xff]   ;;  %v13815_v35 = vld [vmem:[%s18963_s0] sm:$0xff]   ;;  %v13819_v37 = vld [vmem:[%s18968_s5 + $0xe8] ss:$16 sps:$4 sm:$0xff]  }
   0xd   :  { %v13816_v36 = vld [vmem:[%s18968_s5 + $0xe0] ss:$16 sps:$4 sm:$0xff]   ;;  %v13824_v38 = vld [vmem:[%s18968_s5 + $0xc4] ss:$16 sps:$4 sm:$0xff]   ;;  %v13827_v39 = vld [vmem:[%s18968_s5 + $0xcc] ss:$16 sps:$4 sm:$0xff]  }
   0xe   :  { %v13822_v40 = vld [vmem:[%s18968_s5 + $0xc0] ss:$16 sps:$4 sm:$0xff]   ;;  %v13825_v41 = vld [vmem:[%s18968_s5 + $0xc8] ss:$16 sps:$4 sm:$0xff]   ;;  %v13831_v42 = vld [vmem:[%s18968_s5 + $0xa4] ss:$16 sps:$4 sm:$0xff]  }
   0xf   :  { %296 = vmatpush1.bf16.msra.mxu0 %v13789_v15  ;;  %369 = vmatpush1.bf16.msra.mxu1 %v13790_v16  ;;  %v13834_v43 = vld [vmem:[%s18968_s5 + $0xac] ss:$16 sps:$4 sm:$0xff]   ;;  %v13829_v45 = vld [vmem:[%s18968_s5 + $0xa0] ss:$16 sps:$4 sm:$0xff]   ;;  %v13832_v46 = vld [vmem:[%s18968_s5 + $0xa8] ss:$16 sps:$4 sm:$0xff]  }
  0x10   :  { %297 = vmatprep.subr.bf16.mxu0 %v13791_v17  ;;  %370 = vmatprep.subr.bf16.mxu1 %v13793_v18  ;;  %v13828_v44 = vld [vmem:[%s18963_s0 + $0x8] sm:$0xff]   ;;  %v13837_v47 = vld [vmem:[%s18968_s5 + $0x84] ss:$16 sps:$4 sm:$0xff]   ;;  %v13835_v49 = vld [vmem:[%s18968_s5 + $0x80] ss:$16 sps:$4 sm:$0xff]  }
  0x11   :  { %v13840_v48 = vld [vmem:[%s18968_s5 + $0x8c] ss:$16 sps:$4 sm:$0xff]   ;;  %v13838_v50 = vld [vmem:[%s18968_s5 + $0x88] ss:$16 sps:$4 sm:$0xff]   ;;  %v13844_v51 = vld [vmem:[%s18968_s5 + $0x64] ss:$16 sps:$4 sm:$0xff]  }
  0x12   :  { %v13847_v52 = vld [vmem:[%s18968_s5 + $0x6c] ss:$16 sps:$4 sm:$0xff]   ;;  %v13841_v53 = vld [vmem:[%s18963_s0 + $0x10] sm:$0xff]   ;;  %v13845_v55 = vld [vmem:[%s18968_s5 + $0x68] ss:$16 sps:$4 sm:$0xff]  }
  0x13   :  { %298 = vmatpush1.bf16.msra.mxu0 %v13795_v19  ;;  %371 = vmatpush1.bf16.msra.mxu1 %v13796_v20  ;;  %v13842_v54 = vld [vmem:[%s18968_s5 + $0x60] ss:$16 sps:$4 sm:$0xff]   ;;  %v13850_v56 = vld [vmem:[%s18968_s5 + $0x44] ss:$16 sps:$4 sm:$0xff]   ;;  %v13853_v57 = vld [vmem:[%s18968_s5 + $0x4c] ss:$16 sps:$4 sm:$0xff]  }
  0x14   :  { %299 = vmatprep.subr.bf16.mxu0 %v13797_v21  ;;  %372 = vmatprep.subr.bf16.mxu1 %v13799_v22  ;;  %v13848_v58 = vld [vmem:[%s18968_s5 + $0x40] ss:$16 sps:$4 sm:$0xff]   ;;  %v13851_v59 = vld [vmem:[%s18968_s5 + $0x48] ss:$16 sps:$4 sm:$0xff]   ;;  %v13857_v60 = vld [vmem:[%s18968_s5 + $0x24] ss:$16 sps:$4 sm:$0xff]  }
  0x15   :  { %v13860_v61 = vld [vmem:[%s18968_s5 + $0x2c] ss:$16 sps:$4 sm:$0xff]   ;;  %v13855_v63 = vld [vmem:[%s18968_s5 + $0x20] ss:$16 sps:$4 sm:$0xff]   ;;  %v13858_v0 = vld [vmem:[%s18968_s5 + $0x28] ss:$16 sps:$4 sm:$0xff]  }
  0x16   :  { %v13854_v62 = vld [vmem:[%s18963_s0 + $0x18] sm:$0xff]   ;;  %v13863_v1 = vld [vmem:[%s18968_s5 + $0x4] ss:$16 sps:$4 sm:$0xff]   ;;  %v13861_v4 = vld [vmem:[%s18968_s5] ss:$16 sps:$4 sm:$0xff]  }
  0x17   :  { %300 = vmatpush1.bf16.msra.mxu0 %v13801_v23  ;;  %373 = vmatpush1.bf16.msra.mxu1 %v13802_v24  ;;  %v13866_v3 = vld [vmem:[%s18968_s5 + $0xc] ss:$16 sps:$4 sm:$0xff]   ;;  %v13864_v5 = vld [vmem:[%s18968_s5 + $0x8] ss:$16 sps:$4 sm:$0xff]   ;;  %v15325_v6 = vld [vmem:[%s18966_s3 + $0xe4] ss:$16 sps:$4 sm:$0xff]  }
  0x18   :  { %301 = vmatprep.subr.bf16.mxu0 %v13803_v25  ;;  %374 = vmatprep.subr.bf16.mxu1 %v13805_v26  ;;  %v15330_v7 = vld [vmem:[%s18966_s3 + $0xec] ss:$16 sps:$4 sm:$0xff]   ;;  %v13867_v8 = vld [vmem:[%s18964_s1] sm:$0xff]   ;;  %v15345_v10 = vld [vmem:[%s18966_s3 + $0xe8] ss:$16 sps:$4 sm:$0xff]  }
  0x19   :  { %v15340_v9 = vld [vmem:[%s18966_s3 + $0xe0] ss:$16 sps:$4 sm:$0xff]   ;;  %v15352_v11 = vld [vmem:[%s18966_s3 + $0xc4] ss:$16 sps:$4 sm:$0xff]   ;;  %v15357_v12 = vld [vmem:[%s18966_s3 + $0xcc] ss:$16 sps:$4 sm:$0xff]  }
  0x1a   :  { %v15362_v13 = vld [vmem:[%s18966_s3 + $0xc0] ss:$16 sps:$4 sm:$0xff]   ;;  %v15367_v14 = vld [vmem:[%s18966_s3 + $0xc8] ss:$16 sps:$4 sm:$0xff]   ;;  %v15374_v15 = vld [vmem:[%s18966_s3 + $0xa4] ss:$16 sps:$4 sm:$0xff]  }
  0x1b   :  { %302 = vmatpush1.bf16.msra.mxu0 %v13807_v27  ;;  %375 = vmatpush1.bf16.msra.mxu1 %v13808_v28  ;;  %v15381_v16 = vld [vmem:[%s18966_s3 + $0xac] ss:$16 sps:$4 sm:$0xff]   ;;  %v15391_v18 = vld [vmem:[%s18966_s3 + $0xa0] ss:$16 sps:$4 sm:$0xff]   ;;  %v15396_v19 = vld [vmem:[%s18966_s3 + $0xa8] ss:$16 sps:$4 sm:$0xff]  }
  0x1c   :  { %303 = vmatprep.subr.bf16.mxu0 %v13809_v29  ;;  %376 = vmatprep.subr.bf16.mxu1 %v13811_v30  ;;  %v13880_v17 = vld [vmem:[%s18964_s1 + $0x8] sm:$0xff]   ;;  %v15401_v20 = vld [vmem:[%s18966_s3 + $0x84] ss:$16 sps:$4 sm:$0xff]   ;;  %v15415_v22 = vld [vmem:[%s18966_s3 + $0x80] ss:$16 sps:$4 sm:$0xff]  }
  0x1d   :  { %v15408_v21 = vld [vmem:[%s18966_s3 + $0x8c] ss:$16 sps:$4 sm:$0xff]   ;;  %v15420_v23 = vld [vmem:[%s18966_s3 + $0x88] ss:$16 sps:$4 sm:$0xff]   ;;  %v15425_v24 = vld [vmem:[%s18966_s3 + $0x64] ss:$16 sps:$4 sm:$0xff]  }
  0x1e   :  { %v15430_v25 = vld [vmem:[%s18966_s3 + $0x6c] ss:$16 sps:$4 sm:$0xff]   ;;  %v13893_v26 = vld [vmem:[%s18964_s1 + $0x10] sm:$0xff]   ;;  %v13897_v28 = vld [vmem:[%s18966_s3 + $0x68] ss:$16 sps:$4 sm:$0xff]  }
  0x1f   :  { %304 = vmatpush1.bf16.msra.mxu0 %v13813_v31  ;;  %377 = vmatpush1.bf16.msra.mxu1 %v13814_v32  ;;  %v13894_v27 = vld [vmem:[%s18966_s3 + $0x60] ss:$16 sps:$4 sm:$0xff]   ;;  %v13902_v29 = vld [vmem:[%s18966_s3 + $0x44] ss:$16 sps:$4 sm:$0xff]   ;;  %v13905_v30 = vld [vmem:[%s18966_s3 + $0x4c] ss:$16 sps:$4 sm:$0xff]  }
  0x20   :  { %713 = vmatprep.subr.bf16.mxu0 %v13818_v33  ;;  %786 = vmatprep.subr.bf16.mxu1 %v13821_v34  ;;  %v13900_v31 = vld [vmem:[%s18966_s3 + $0x40] ss:$16 sps:$4 sm:$0xff]   ;;  %v13903_v32 = vld [vmem:[%s18966_s3 + $0x48] ss:$16 sps:$4 sm:$0xff]   ;;  %v13909_v33 = vld [vmem:[%s18966_s3 + $0x24] ss:$16 sps:$4 sm:$0xff]  }
  0x21   :  { %v13912_v34 = vld [vmem:[%s18966_s3 + $0x2c] ss:$16 sps:$4 sm:$0xff]  }
  0x22   :  { %322 = vmatmul.mubr.bf16.vlgmr.msra.gmra.mxu0 %v13815_v35  ;;  %395 = vmatmul.mubr.bf16.vlgmr.msra.gmra.mxu1 %v13815_v35  ;;  %v13906_v35 = vld [vmem:[%s18964_s1 + $0x18] sm:$0xff]  }
  0x23   :  { %714 = vmatpush1.bf16.msra.mxu0 %v13816_v36  ;;  %787 = vmatpush1.bf16.msra.mxu1 %v13819_v37  ;;  %v13907_v36 = vld [vmem:[%s18966_s3 + $0x20] ss:$16 sps:$4 sm:$0xff]   ;;  %v13910_v37 = vld [vmem:[%s18966_s3 + $0x28] ss:$16 sps:$4 sm:$0xff]  }
  0x24   :  { %715 = vmatprep.subr.bf16.mxu0 %v13824_v38  ;;  %788 = vmatprep.subr.bf16.mxu1 %v13827_v39  ;;  %v13915_v38 = vld [vmem:[%s18966_s3 + $0x4] ss:$16 sps:$4 sm:$0xff]   ;;  %v13918_v39 = vld [vmem:[%s18966_s3 + $0xc] ss:$16 sps:$4 sm:$0xff]  }
  0x25   :  { %331 = vmatprep.mubr.bf16.mxu0 %v18977_v2  ;;  %404 = vmatprep.mubr.bf16.mxu1 %v18977_v2 }
  0x27   :  { %716 = vmatpush1.bf16.msra.mxu0 %v13822_v40  ;;  %789 = vmatpush1.bf16.msra.mxu1 %v13825_v41  ;;  %v13913_v40 = vld [vmem:[%s18966_s3] ss:$16 sps:$4 sm:$0xff]   ;;  %v13916_v41 = vld [vmem:[%s18966_s3 + $0x8] ss:$16 sps:$4 sm:$0xff]  }
  0x28   :  { %717 = vmatprep.subr.bf16.mxu0 %v13831_v42  ;;  %790 = vmatprep.subr.bf16.mxu1 %v13834_v43  ;;  %v18976_v42 = vlaneseq }
  0x2a   :  { %332 = vmatmul.mubr.bf16.gmra.mxu0 %v13828_v44  ;;  %405 = vmatmul.mubr.bf16.gmra.mxu1 %v13828_v44  ;;  %v15519_v43 = vshrl.u32 %v18976_v42, 7 }
  0x2b   :  { %718 = vmatpush1.bf16.msra.mxu0 %v13829_v45  ;;  %791 = vmatpush1.bf16.msra.mxu1 %v13832_v46  ;;  %v83_v45 = vld [vmem:[%s18967_s4] sm:$0xf] }
  0x2c   :  { %719 = vmatprep.subr.bf16.mxu0 %v13837_v47  ;;  %792 = vmatprep.subr.bf16.mxu1 %v13840_v48  ;;  %18984 = vst [vmem:[#allocation10_spill] sm:$0xff] %v15519_v43  ;;  %v95_v44 = vsub.s32 2, %v15519_v43  ;;  %v87_v46 = vsub.s32 0, %v15519_v43  ;;  %v91_v47 = vsub.s32 1, %v15519_v43 }
  0x2d   :  { %341 = vmatprep.mubr.bf16.mxu0 %v18977_v2  ;;  %414 = vmatprep.mubr.bf16.mxu1 %v18977_v2 }
  0x2f   :  { %720 = vmatpush1.bf16.msra.mxu0 %v13835_v49  ;;  %793 = vmatpush1.bf16.msra.mxu1 %v13838_v50  ;;  %v99_v50 = vsub.s32 3, %v15519_v43 }
  0x30   :  { %721 = vmatprep.subr.bf16.mxu0 %v13844_v51  ;;  %794 = vmatprep.subr.bf16.mxu1 %v13847_v52  ;;  %v15532_v51 = vrot.slane %v83_v45, %v95_v44 }
  0x32   :  { %342 = vmatmul.mubr.bf16.gmra.mxu0 %v13841_v53  ;;  %415 = vmatmul.mubr.bf16.gmra.mxu1 %v13841_v53 }
  0x33   :  { %722 = vmatpush1.bf16.msra.mxu0 %v13842_v54  ;;  %795 = vmatpush1.bf16.msra.mxu1 %v13845_v55  ;;  %v15538_v54 = vrot.slane %v83_v45, %v87_v46 }
  0x34   :  { %723 = vmatprep.subr.bf16.mxu0 %v13850_v56  ;;  %796 = vmatprep.subr.bf16.mxu1 %v13853_v57 }
  0x35   :  { %351 = vmatprep.mubr.bf16.mxu0 %v18977_v2  ;;  %424 = vmatprep.mubr.bf16.mxu1 %v18977_v2 }
  0x37   :  { %724 = vmatpush1.bf16.msra.mxu0 %v13848_v58  ;;  %797 = vmatpush1.bf16.msra.mxu1 %v13851_v59 }
  0x38   :  { %725 = vmatprep.subr.bf16.mxu0 %v13857_v60  ;;  %798 = vmatprep.subr.bf16.mxu1 %v13860_v61 }
  0x3a   :  { %352 = vmatmul.mubr.bf16.gmra.mxu0 %v13854_v62  ;;  %425 = vmatmul.mubr.bf16.gmra.mxu1 %v13854_v62 }
  0x3b   :  { %726 = vmatpush1.bf16.msra.mxu0 %v13855_v63  ;;  %799 = vmatpush1.bf16.msra.mxu1 %v13858_v0  ;;  %v15550_v63 = vrot.slane %v83_v45, %v91_v47  ;;  %v15552_v0 = vrot.slane %v83_v45, %v99_v50 }
  0x3c   :  { %727 = vmatprep.subr.bf16.mxu0 %v13863_v1  ;;  %800 = vmatprep.subr.bf16.mxu1 %v13866_v3 }
  0x3d   :  { %745 = vmatprep.mubr.bf16.mxu0 %v18977_v2  ;;  %818 = vmatprep.mubr.bf16.mxu1 %v18977_v2 }
  0x3f   :  { %728 = vmatpush1.bf16.msra.mxu0 %v13861_v4  ;;  %801 = vmatpush1.bf16.msra.mxu1 %v13864_v5 }
  0x40   :  { %1090 = vmatprep.subr.bf16.mxu0 %v15325_v6  ;;  %1131 = vmatprep.subr.bf16.mxu1 %v15330_v7 }
  0x42   :  { %746 = vmatmul.mubr.bf16.vlgmr.msra.gmra.mxu0 %v13867_v8  ;;  %819 = vmatmul.mubr.bf16.vlgmr.msra.gmra.mxu1 %v13867_v8 }
  0x43   :  { %1091 = vmatpush1.bf16.msra.mxu0 %v15340_v9  ;;  %1132 = vmatpush1.bf16.msra.mxu1 %v15345_v10 }
  0x44   :  { %1092 = vmatprep.subr.bf16.mxu0 %v15352_v11  ;;  %1133 = vmatprep.subr.bf16.mxu1 %v15357_v12 }
  0x45   :  { %755 = vmatprep.mubr.bf16.mxu0 %v18977_v2  ;;  %828 = vmatprep.mubr.bf16.mxu1 %v18977_v2 }
  0x47   :  { %1093 = vmatpush1.bf16.msra.mxu0 %v15362_v13  ;;  %1134 = vmatpush1.bf16.msra.mxu1 %v15367_v14 }
  0x48   :  { %1094 = vmatprep.subr.bf16.mxu0 %v15374_v15  ;;  %1135 = vmatprep.subr.bf16.mxu1 %v15381_v16 }
  0x4a   :  { %756 = vmatmul.mubr.bf16.gmra.mxu0 %v13880_v17  ;;  %829 = vmatmul.mubr.bf16.gmra.mxu1 %v13880_v17 }
  0x4b   :  { %1095 = vmatpush1.bf16.msra.mxu0 %v15391_v18  ;;  %1136 = vmatpush1.bf16.msra.mxu1 %v15396_v19 }
  0x4c   :  { %1096 = vmatprep.subr.bf16.mxu0 %v15401_v20  ;;  %1137 = vmatprep.subr.bf16.mxu1 %v15408_v21 }
  0x4d   :  { %765 = vmatprep.mubr.bf16.mxu0 %v18977_v2  ;;  %838 = vmatprep.mubr.bf16.mxu1 %v18977_v2 }
  0x4f   :  { %1097 = vmatpush1.bf16.msra.mxu0 %v15415_v22  ;;  %1138 = vmatpush1.bf16.msra.mxu1 %v15420_v23 }
  0x50   :  { %1098 = vmatprep.subr.bf16.mxu0 %v15425_v24  ;;  %1139 = vmatprep.subr.bf16.mxu1 %v15430_v25 }
  0x52   :  { %766 = vmatmul.mubr.bf16.gmra.mxu0 %v13893_v26  ;;  %839 = vmatmul.mubr.bf16.gmra.mxu1 %v13893_v26 }
  0x53   :  { %1099 = vmatpush1.bf16.msra.mxu0 %v13894_v27  ;;  %1140 = vmatpush1.bf16.msra.mxu1 %v13897_v28 }
  0x54   :  { %1100 = vmatprep.subr.bf16.mxu0 %v13902_v29  ;;  %1141 = vmatprep.subr.bf16.mxu1 %v13905_v30 }
  0x55   :  { %775 = vmatprep.mubr.bf16.mxu0 %v18977_v2  ;;  %848 = vmatprep.mubr.bf16.mxu1 %v18977_v2 }
  0x57   :  { %1101 = vmatpush1.bf16.msra.mxu0 %v13900_v31  ;;  %1142 = vmatpush1.bf16.msra.mxu1 %v13903_v32 }
  0x58   :  { %1102 = vmatprep.subr.bf16.mxu0 %v13909_v33  ;;  %1143 = vmatprep.subr.bf16.mxu1 %v13912_v34 }
  0x5a   :  { %776 = vmatmul.mubr.bf16.gmra.mxu0 %v13906_v35  ;;  %849 = vmatmul.mubr.bf16.gmra.mxu1 %v13906_v35 }
  0x5b   :  { %1103 = vmatpush1.bf16.msra.mxu0 %v13907_v36  ;;  %1144 = vmatpush1.bf16.msra.mxu1 %v13910_v37 }
  0x5c   :  { %1104 = vmatprep.subr.bf16.mxu0 %v13915_v38  ;;  %1145 = vmatprep.subr.bf16.mxu1 %v13918_v39 }
  0x5d   :  { %1122 = vmatprep.mubr.bf16.mxu0 %v18977_v2  ;;  %1163 = vmatprep.mubr.bf16.mxu1 %v18977_v2 }
  0x5f   :  { %1105 = vmatpush1.bf16.msra.mxu0 %v13913_v40  ;;  %1146 = vmatpush1.bf16.msra.mxu1 %v13916_v41 }
  0x60   :  { %1401 = vmatprep.subr.bf16.mxu0 %v15325_v6  ;;  %1442 = vmatprep.subr.bf16.mxu1 %v15330_v7 }
  0x62   :  { %1123 = vmatmul.mubr.bf16.vlgmr.msra.gmra.mxu0 %v18977_v2  ;;  %1164 = vmatmul.mubr.bf16.vlgmr.msra.gmra.mxu1 %v18977_v2 }
  0x63   :  { %1402 = vmatpush1.bf16.msra.mxu0 %v15340_v9  ;;  %1443 = vmatpush1.bf16.msra.mxu1 %v15345_v10 }
  0x64   :  { %1403 = vmatprep.subr.bf16.mxu0 %v15352_v11  ;;  %1444 = vmatprep.subr.bf16.mxu1 %v15357_v12 }
  0x65   :  { %1433 = vmatprep.mubr.bf16.mxu0 %v18977_v2  ;;  %1474 = vmatprep.mubr.bf16.mxu1 %v18977_v2 }
  0x67   :  { %1404 = vmatpush1.bf16.msra.mxu0 %v15362_v13  ;;  %1445 = vmatpush1.bf16.msra.mxu1 %v15367_v14 }
  0x68   :  { %1405 = vmatprep.subr.bf16.mxu0 %v15374_v15  ;;  %1446 = vmatprep.subr.bf16.mxu1 %v15381_v16 }
  0x6b   :  { %1406 = vmatpush1.bf16.msra.mxu0 %v15391_v18  ;;  %1447 = vmatpush1.bf16.msra.mxu1 %v15396_v19 }
  0x6c   :  { %1407 = vmatprep.subr.bf16.mxu0 %v15401_v20  ;;  %1448 = vmatprep.subr.bf16.mxu1 %v15408_v21 }
  0x6f   :  { %1408 = vmatpush1.bf16.msra.mxu0 %v15415_v22  ;;  %1449 = vmatpush1.bf16.msra.mxu1 %v15420_v23 }
  0x70   :  { %1409 = vmatprep.subr.bf16.mxu0 %v15425_v24  ;;  %1450 = vmatprep.subr.bf16.mxu1 %v15430_v25 }
  0x73   :  { %1410 = vmatpush1.bf16.msra.mxu0 %v13894_v27  ;;  %1451 = vmatpush1.bf16.msra.mxu1 %v13897_v28 }
  0x74   :  { %1411 = vmatprep.subr.bf16.mxu0 %v13902_v29  ;;  %1452 = vmatprep.subr.bf16.mxu1 %v13905_v30  ;;  %v507_v30 = vld [vmem:[%s18971_s8] sm:$0xf] }
  0x75   :  { %v520_v45 = vrot.slane %v507_v30, %v95_v44 }
  0x77   :  { %1412 = vmatpush1.bf16.msra.mxu0 %v13900_v31  ;;  %1453 = vmatpush1.bf16.msra.mxu1 %v13903_v32 }
  0x78   :  { %1413 = vmatprep.subr.bf16.mxu0 %v13909_v33  ;;  %1454 = vmatprep.subr.bf16.mxu1 %v13912_v34 }
  0x7b   :  { %1414 = vmatpush1.bf16.msra.mxu0 %v13907_v36  ;;  %1455 = vmatpush1.bf16.msra.mxu1 %v13910_v37 }
  0x7c   :  { %1415 = vmatprep.subr.bf16.mxu0 %v13915_v38  ;;  %1456 = vmatprep.subr.bf16.mxu1 %v13918_v39 }
  0x7f   :  { %1416 = vmatpush1.bf16.msra.mxu0 %v13913_v40  ;;  %1457 = vmatpush1.bf16.msra.mxu1 %v13916_v41  ;;  %v512_v41 = vrot.slane %v507_v30, %v87_v46 }
  0x80   :  { %1713 = vmatprep.subr.bf16.mxu0 %v15325_v6  ;;  %1754 = vmatprep.subr.bf16.mxu1 %v15330_v7 }
  0xe2   :  { %v15527_v48 = vpop.f32.mrf.mxu0  ;;  %v15529_v49 = vpop.f32.mrf.mxu1 }
  0xe4   :  { %v15534_v52 = vpop.f32.mrf.mxu0  ;;  %v15536_v53 = vpop.f32.mrf.mxu1 }
  0xe6   :  { %v327_v55 = vpop.f32.mrf.mxu0  ;;  %v400_v56 = vpop.f32.mrf.mxu1 }
  0xe7   :  { %v15541_v57 = vadd.f32 %v327_v55, %v15538_v54  ;;  %v15544_v58 = vadd.f32 %v400_v56, %v15532_v51 }
  0xe8   :  { %v15546_v59 = vpop.f32.mrf.mxu0  ;;  %v15548_v60 = vpop.f32.mrf.mxu1 }
  0xea   :  { %v333_v61 = vpop.f32.mrf.mxu0  ;;  %v406_v62 = vpop.f32.mrf.mxu1 }
  0xeb   :  { %v15555_v1 = vadd.f32 %v333_v61, %v15538_v54  ;;  %v15558_v3 = vadd.f32 %v406_v62, %v15532_v51  ;;  %v15623_v61 = vrot.slane %v507_v30, %v91_v47  ;;  %v15625_v62 = vrot.slane %v507_v30, %v99_v50 }
  0xec   :  { %v335_v4 = vpop.f32.mrf.mxu0  ;;  %v408_v5 = vpop.f32.mrf.mxu1 }
  0xed   :  { %v15561_v6 = vadd.f32 %v335_v4, %v15550_v63  ;;  %v15564_v7 = vadd.f32 %v408_v5, %v15552_v0  ;;  %18998 = vst [vmem:[#allocation24_spill] sm:$0xff] %v15623_v61  ;;  %18999 = vst [vmem:[#allocation25_spill] sm:$0xff] %v15625_v62 }
  0xee   :  { %v337_v8 = vpop.f32.mrf.mxu0  ;;  %v410_v9 = vpop.f32.mrf.mxu1 }
  0xef   :  { %v15567_v10 = vadd.f32 %v337_v8, %v15538_v54  ;;  %v15570_v11 = vadd.f32 %v410_v9, %v15532_v51 }
  0xf0   :  { %v15572_v12 = vpop.f32.mrf.mxu0  ;;  %v15574_v13 = vpop.f32.mrf.mxu1 }
  0xf2   :  { %v343_v14 = vpop.f32.mrf.mxu0  ;;  %v416_v15 = vpop.f32.mrf.mxu1 }
  0xf3   :  { %v15577_v16 = vadd.f32 %v343_v14, %v15538_v54  ;;  %v15580_v17 = vadd.f32 %v416_v15, %v15532_v51 }
  0xf4   :  { %v345_v18 = vpop.f32.mrf.mxu0  ;;  %v418_v19 = vpop.f32.mrf.mxu1 }
  0xf5   :  { %18985 = vst [vmem:[#allocation11_spill] sm:$0xff] %v15580_v17  ;;  %v15583_v20 = vadd.f32 %v345_v18, %v15550_v63  ;;  %v15586_v21 = vadd.f32 %v418_v19, %v15552_v0 }
  0xf6   :  { %v347_v22 = vpop.f32.mrf.mxu0  ;;  %v420_v23 = vpop.f32.mrf.mxu1 }
  0xf7   :  { %v15589_v24 = vadd.f32 %v347_v22, %v15538_v54  ;;  %v15592_v25 = vadd.f32 %v420_v23, %v15532_v51 }
  0xf8   :  { %v15594_v26 = vpop.f32.mrf.mxu0  ;;  %v15596_v27 = vpop.f32.mrf.mxu1 }
  0xf9   :  { %18986 = vst [vmem:[#allocation12_spill] sm:$0xff] %v15589_v24  ;;  %18987 = vst [vmem:[#allocation13_spill] sm:$0xff] %v15592_v25 }
  0xfa   :  { %18988 = vst [vmem:[#allocation14_spill] sm:$0xff] %v15594_v26  ;;  %18989 = vst [vmem:[#allocation15_spill] sm:$0xff] %v15596_v27  ;;  %v353_v28 = vpop.f32.mrf.mxu0  ;;  %v426_v29 = vpop.f32.mrf.mxu1 }
  0xfb   :  { %v15602_v31 = vadd.f32 %v353_v28, %v15538_v54  ;;  %v15605_v32 = vadd.f32 %v426_v29, %v15532_v51 }
  0xfc   :  { %v355_v33 = vpop.f32.mrf.mxu0  ;;  %v428_v34 = vpop.f32.mrf.mxu1 }
  0xfd   :  { %18990 = vst [vmem:[#allocation16_spill] sm:$0xff] %v15602_v31  ;;  %18991 = vst [vmem:[#allocation17_spill] sm:$0xff] %v15605_v32  ;;  %v15608_v35 = vadd.f32 %v355_v33, %v15550_v63  ;;  %v15611_v36 = vadd.f32 %v428_v34, %v15552_v0 }
  0xfe   :  { %v357_v37 = vpop.f32.mrf.mxu0  ;;  %v430_v38 = vpop.f32.mrf.mxu1 }
  0xff   :  { %18992 = vst [vmem:[#allocation18_spill] sm:$0xff] %v15608_v35  ;;  %18993 = vst [vmem:[#allocation19_spill] sm:$0xff] %v15611_v36  ;;  %v15614_v39 = vadd.f32 %v357_v37, %v15538_v54  ;;  %v15617_v40 = vadd.f32 %v430_v38, %v15532_v51 }
 0x100   :  { %v15619_v55 = vpop.f32.mrf.mxu0  ;;  %v15621_v56 = vpop.f32.mrf.mxu1 }
 0x101   :  { %18994 = vst [vmem:[#allocation20_spill] sm:$0xff] %v15614_v39  ;;  %18995 = vst [vmem:[#allocation21_spill] sm:$0xff] %v15617_v40 }
 0x102   :  { %18996 = vst [vmem:[#allocation22_spill] sm:$0xff] %v15619_v55  ;;  %18997 = vst [vmem:[#allocation23_spill] sm:$0xff] %v15621_v56  ;;  %v747_v4 = vpop.f32.mrf.mxu0  ;;  %v820_v5 = vpop.f32.mrf.mxu1 }
 0x103   :  { %v15627_v8 = vadd.f32 %v747_v4, %v512_v41  ;;  %v15629_v9 = vadd.f32 %v820_v5, %v520_v45 }
 0x104   :  { %v749_v14 = vpop.f32.mrf.mxu0  ;;  %v822_v15 = vpop.f32.mrf.mxu1 }
 0x105   :  { %19000 = vst [vmem:[#allocation26_spill] sm:$0xff] %v15627_v8  ;;  %19001 = vst [vmem:[#allocation27_spill] sm:$0xff] %v15629_v9  ;;  %v15632_v18 = vadd.f32 %v749_v14, %v15623_v61  ;;  %v15635_v44 = vadd.f32 %v822_v15, %v15625_v62 }
 0x106   :  { %v751_v46 = vpop.f32.mrf.mxu0  ;;  %v824_v19 = vpop.f32.mrf.mxu1 }
 0x107   :  { %19002 = vst [vmem:[#allocation28_spill] sm:$0xff] %v15632_v18  ;;  %19003 = vst [vmem:[#allocation29_spill] sm:$0xff] %v15635_v44  ;;  %v15637_v47 = vadd.f32 %v751_v46, %v512_v41  ;;  %v15639_v50 = vadd.f32 %v824_v19, %v520_v45 }
 0x108   :  { %v15641_v22 = vpop.f32.mrf.mxu0  ;;  %v15643_v23 = vpop.f32.mrf.mxu1 }
 0x109   :  { %19004 = vst [vmem:[#allocation30_spill] sm:$0xff] %v15637_v47  ;;  %19005 = vst [vmem:[#allocation31_spill] sm:$0xff] %v15639_v50 }
 0x10a   :  { %19006 = vst [vmem:[#allocation32_spill] sm:$0xff] %v15641_v22  ;;  %19007 = vst [vmem:[#allocation33_spill] sm:$0xff] %v15643_v23  ;;  %v757_v28 = vpop.f32.mrf.mxu0  ;;  %v830_v29 = vpop.f32.mrf.mxu1 }
 0x10b   :  { %v15645_v30 = vadd.f32 %v757_v28, %v512_v41  ;;  %v15647_v33 = vadd.f32 %v830_v29, %v520_v45 }
 0x10c   :  { %v759_v34 = vpop.f32.mrf.mxu0  ;;  %v832_v37 = vpop.f32.mrf.mxu1 }
 0x10d   :  { %19008 = vst [vmem:[#allocation34_spill] sm:$0xff] %v15645_v30  ;;  %19009 = vst [vmem:[#allocation35_spill] sm:$0xff] %v15647_v33  ;;  %v15650_v38 = vadd.f32 %v759_v34, %v15623_v61  ;;  %v15653_v4 = vadd.f32 %v832_v37, %v15625_v62 }
 0x10e   :  { %v761_v5 = vpop.f32.mrf.mxu0  ;;  %v834_v14 = vpop.f32.mrf.mxu1 }
 0x10f   :  { %19010 = vst [vmem:[#allocation36_spill] sm:$0xff] %v15650_v38  ;;  %19011 = vst [vmem:[#allocation37_spill] sm:$0xff] %v15653_v4  ;;  %v15655_v15 = vadd.f32 %v761_v5, %v512_v41  ;;  %v15657_v46 = vadd.f32 %v834_v14, %v520_v45 }
 0x110   :  { %v15659_v19 = vpop.f32.mrf.mxu0  ;;  %v15661_v28 = vpop.f32.mrf.mxu1 }
 0x111   :  { %19012 = vst [vmem:[#allocation38_spill] sm:$0xff] %v15655_v15  ;;  %19013 = vst [vmem:[#allocation39_spill] sm:$0xff] %v15657_v46 }
 0x112   :  { %19014 = vst [vmem:[#allocation40_spill] sm:$0xff] %v15659_v19  ;;  %19015 = vst [vmem:[#allocation41_spill] sm:$0xff] %v15661_v28  ;;  %v767_v29 = vpop.f32.mrf.mxu0  ;;  %v840_v42 = vpop.f32.mrf.mxu1 }
 0x113   :  { %v15663_v2 = vadd.f32 %v767_v29, %v512_v41  ;;  %v15665_v33 = vadd.f32 %v840_v42, %v520_v45 }
 0x114   :  { %v769_v34 = vpop.f32.mrf.mxu0  ;;  %v842_v38 = vpop.f32.mrf.mxu1 }
 0x115   :  { %19016 = vst [vmem:[#allocation42_spill] sm:$0xff] %v15663_v2  ;;  %19017 = vst [vmem:[#allocation43_spill] sm:$0xff] %v15665_v33  ;;  %v15668_v37 = vadd.f32 %v769_v34, %v15623_v61  ;;  %v15671_v5 = vadd.f32 %v842_v38, %v15625_v62 }
 0x116   :  { %v771_v14 = vpop.f32.mrf.mxu0  ;;  %v844_v46 = vpop.f32.mrf.mxu1 }
 0x117   :  { %19018 = vst [vmem:[#allocation44_spill] sm:$0xff] %v15668_v37  ;;  %19019 = vst [vmem:[#allocation45_spill] sm:$0xff] %v15671_v5  ;;  %v15673_v15 = vadd.f32 %v771_v14, %v512_v41  ;;  %v15675_v19 = vadd.f32 %v844_v46, %v520_v45 }
 0x119   :  { %19020 = vst [vmem:[#allocation46_spill] sm:$0xff] %v15673_v15  ;;  %19021 = vst [vmem:[#allocation47_spill] sm:$0xff] %v15675_v19 }
 0x11a   :  { %17 = vsyncpa [#allocation8], 0  ;;  %v15677_v28 = vpop.f32.mrf.mxu0  ;;  %v15679_v29 = vpop.f32.mrf.mxu1  ;;  %v15964_v30 = vld [vmem:[%s18966_s3 + $0x24] ss:$16 sps:$4 sm:$0xff]   ;;  %v15969_v50 = vld [vmem:[%s18966_s3 + $0x2c] ss:$16 sps:$4 sm:$0xff]  }
 0x11b   :  { %19022 = vst [vmem:[#allocation48_spill] sm:$0xff] %v15677_v28  ;;  %19023 = vst [vmem:[#allocation49_spill] sm:$0xff] %v15679_v29  ;;  %v15976_v23 = vld [vmem:[%s18966_s3 + $0x20] ss:$16 sps:$4 sm:$0xff]   ;;  %v15988_v47 = vld [vmem:[%s18966_s3 + $0x4] ss:$16 sps:$4 sm:$0xff]  }
 0x11c   :  { %v777_v42 = vpop.f32.mrf.mxu0  ;;  %v850_v33 = vpop.f32.mrf.mxu1  ;;  %v15993_v22 = vld [vmem:[%s18966_s3 + $0xc] ss:$16 sps:$4 sm:$0xff]   ;;  %v16005_v43 = vld [vmem:[%s18966_s3 + $0x8] ss:$16 sps:$4 sm:$0xff]   ;;  %vm15041_vm0 = vmmov 0   ;;  %vm3690_vm1 = vcmask 519168  }
 0x11d   :  { %v15681_v2 = vadd.f32 %v777_v42, %v512_v41  ;;  %v15683_v34 = vadd.f32 %v850_v33, %v520_v45  ;;  %v324_v33 = vadd.f32 %v15527_v48, %v15538_v54  ;;  %v399_v48 = vadd.f32 %v15536_v53, %v15552_v0 }
 0x11e   :  { %v779_v37 = vpop.f32.mrf.mxu0  ;;  %v852_v38 = vpop.f32.mrf.mxu1  ;;  %vm4417_vm3 = vcmask 523264  }
 0x11f   :  { %19024 = vst [vmem:[#allocation50_spill] sm:$0xff] %v15681_v2  ;;  %19025 = vst [vmem:[#allocation51_spill] sm:$0xff] %v15683_v34  ;;  %v15686_v5 = vadd.f32 %v779_v37, %v15623_v61  ;;  %v15689_v14 = vadd.f32 %v852_v38, %v15625_v62  ;;  %v326_v37 = vadd.f32 %v15534_v52, %v15550_v63  ;;  %v15981_v62 = vld [vmem:[%s18966_s3 + $0x28] ss:$16 sps:$4 sm:$0xff]   ;;  %v16000_v61 = vld [vmem:[%s18966_s3] ss:$16 sps:$4 sm:$0xff]  }
 0x120   :  { %v781_v46 = vpop.f32.mrf.mxu0  ;;  %v854_v19 = vpop.f32.mrf.mxu1 }
 0x121   :  { %19026 = vst [vmem:[#allocation52_spill] sm:$0xff] %v15686_v5  ;;  %19027 = vst [vmem:[#allocation53_spill] sm:$0xff] %v15689_v14  ;;  %v15691_v15 = vadd.f32 %v781_v46, %v512_v41  ;;  %v15693_v28 = vadd.f32 %v854_v19, %v520_v45 }
 0x122   :  { %v15695_v29 = vpop.f32.mrf.mxu0  ;;  %v15697_v42 = vpop.f32.mrf.mxu1 }
 0x123   :  { %19028 = vst [vmem:[#allocation54_spill] sm:$0xff] %v15691_v15  ;;  %19029 = vst [vmem:[#allocation55_spill] sm:$0xff] %v15693_v28 }
 0x124   :  { %19030 = vst [vmem:[#allocation56_spill] sm:$0xff] %v15695_v29  ;;  %19031 = vst [vmem:[#allocation57_spill] sm:$0xff] %v15697_v42  ;;  %v1124_v34 = vpop.f32.mrf.mxu0  ;;  %v1165_v2 = vpop.f32.mrf.mxu1  ;;  %v397_v42 = vadd.f32 %v15529_v49, %v15532_v51 }
 0x125   :  { %v1172_v38 = vadd.f32 %v1124_v34, %v324_v33 }
 0x126   :  { %v1126_v14 = vpop.f32.mrf.mxu0  ;;  %v1167_v5 = vpop.f32.mrf.mxu1  ;;  %v1174_v52 = vadd.f32 %v1165_v2, %v397_v42  ;;  %v14987_v42 = vld [vmem:[%s18966_s3 + $0xe0] ss:$16 sps:$4 sm:$0xff]  }
 0x127   :  { %v11794_v4 = vmul.f32 -1.442695, %v1172_v38  ;;  %v1173_v41 = vadd.f32 %v1126_v14, %v326_v37  ;;  %v1175_v54 = vadd.f32 %v1167_v5, %v399_v48  ;;  %v14990_v48 = vld [vmem:[%s18966_s3 + $0xcc] ss:$16 sps:$4 sm:$0xff]  }
 0x128   :  { %v1128_v46 = vpop.f32.mrf.mxu0  ;;  %v1169_v45 = vpop.f32.mrf.mxu1 }
 0x129   :  { %14683 = vpow2.f32 %v11794_v4  ;;  %v11795_v19 = vmul.f32 -1.442695, %v1173_v41  ;;  %v11796_v34 = vmul.f32 -1.442695, %v1175_v54  ;;  %v14988_v45 = vld [vmem:[%s18966_s3 + $0xe8] ss:$16 sps:$4 sm:$0xff]  }
 0x12a   :  { %v1129_v28 = vpop.f32.mrf.mxu0  ;;  %v1170_v15 = vpop.f32.mrf.mxu1  ;;  %v19032_v54 = vmov 0  }
 0x12b   :  { %14685 = vpow2.f32 %v11795_v19  ;;  %v14989_v19 = vld [vmem:[%s18966_s3 + $0xc4] ss:$16 sps:$4 sm:$0xff]  }
 0x12c   :  { %14687 = vtanh.f32 %v1174_v52  ;;  %v14991_v52 = vld [vmem:[%s18966_s3 + $0xc0] ss:$16 sps:$4 sm:$0xff]  }
 0x12d   :  { %14689 = vpow2.f32 %v11796_v34  ;;  %v14992_v34 = vld [vmem:[%s18966_s3 + $0xc8] ss:$16 sps:$4 sm:$0xff]  }
 0x136   :  { %v14684_v33 = vpop.eup %14683 }
 0x137   :  { %v1179_v29 = vadd.f32 1.0, %v14684_v33  ;;  %v14993_v33 = vld [vmem:[%s18966_s3 + $0xa4] ss:$16 sps:$4 sm:$0xff]  }
 0x138   :  { %v14686_v14 = vpop.eup %14685 }
 0x139   :  { %14691 = vrcp.f32 %v1179_v29  ;;  %v1185_v4 = vadd.f32 1.0, %v14686_v14  ;;  %v14688_v28 = vpop.eup %14687  ;;  %v14994_v14 = vld [vmem:[%s18966_s3 + $0xac] ss:$16 sps:$4 sm:$0xff]  }
 0x13a   :  { %v14690_v15 = vpop.eup %14689 }
 0x13b   :  { %14693 = vrcp.f32 %v1185_v4  ;;  %v1192_v53 = vadd.f32 1.0, %v14690_v15  ;;  %v14995_v4 = vld [vmem:[%s18966_s3 + $0xa0] ss:$16 sps:$4 sm:$0xff]   ;;  %v14997_v15 = vld [vmem:[%s18966_s3 + $0x84] ss:$16 sps:$4 sm:$0xff]  }
 0x13d   :  { %14695 = vrcp.f32 %v1192_v53  ;;  %v15001_v53 = vld [vmem:[%s18966_s3 + $0x64] ss:$16 sps:$4 sm:$0xff]  }
 0x146   :  { %v14692_v37 = vpop.eup %14691 }
 0x147   :  { %v1196_v38 = vmul.f32 %v14692_v37, %v14688_v28  ;;  %v14996_v28 = vld [vmem:[%s18966_s3 + $0xa8] ss:$16 sps:$4 sm:$0xff]   ;;  %v14998_v37 = vld [vmem:[%s18966_s3 + $0x8c] ss:$16 sps:$4 sm:$0xff]  }
 0x148   :  { %v14694_v41 = vpop.eup %14693 }
 0x149   :  { %v1195_v5 = vmul.f32 0.0, %v14694_v41  ;;  %v15000_v41 = vld [vmem:[%s18966_s3 + $0x88] ss:$16 sps:$4 sm:$0xff]  }
 0x14a   :  { %v14696_v2 = vpop.eup %14695 }
 0x14b   :  { %v15707_v46 = vadd.f32 %v1196_v38, %v1195_v5  ;;  %v14999_v38 = vld [vmem:[%s18966_s3 + $0x80] ss:$16 sps:$4 sm:$0xff]   ;;  %v15002_v5 = vld [vmem:[%s18966_s3 + $0x6c] ss:$16 sps:$4 sm:$0xff]  }
 0x14d   :  { %14697 = vtanh.f32 %v15707_v46 }
 0x15a   :  { %v14698_v49 = vpop.eup %14697 }
 0x15b   :  { %v15710_v51 = vmul.f32 %v14698_v49, %v14696_v2  ;;  %v15003_v2 = vld [vmem:[%s18966_s3 + $0x60] ss:$16 sps:$4 sm:$0xff]   ;;  %v15004_v49 = vld [vmem:[%s18966_s3 + $0x68] ss:$16 sps:$4 sm:$0xff]  }
 0x15d   :  { %v1208_v29 = vpack.c.bf16 %v15710_v51, %v15710_v51 }
 0x15f   :  { %1434 = vmatmul.mubr.bf16.vlgmr.msra.gmra.mxu0 %v1208_v29  ;;  %1475 = vmatmul.mubr.bf16.vlgmr.msra.gmra.mxu1 %v1208_v29  ;;  %v15005_v29 = vld [vmem:[%s18966_s3 + $0x44] ss:$16 sps:$4 sm:$0xff]  }
 0x160   :  { %1714 = vmatpush1.bf16.msra.mxu0 %v14987_v42  ;;  %1755 = vmatpush1.bf16.msra.mxu1 %v14988_v45  ;;  %v15006_v42 = vld [vmem:[%s18966_s3 + $0x4c] ss:$16 sps:$4 sm:$0xff]   ;;  %v15007_v45 = vld [vmem:[%s18966_s3 + $0x40] ss:$16 sps:$4 sm:$0xff]  }
 0x161   :  { %1715 = vmatprep.subr.bf16.mxu0 %v14989_v19  ;;  %1756 = vmatprep.subr.bf16.mxu1 %v14990_v48  ;;  %v15008_v19 = vld [vmem:[%s18966_s3 + $0x48] ss:$16 sps:$4 sm:$0xff]   ;;  %v15009_v48 = vld [vmem:[%s18966_s3 + $0x24] ss:$16 sps:$4 sm:$0xff]  }
 0x162   :  { %1745 = vmatprep.mubr.bf16.mxu0 %v19032_v54  ;;  %1786 = vmatprep.mubr.bf16.mxu1 %v19032_v54 }
 0x164   :  { %1716 = vmatpush1.bf16.msra.mxu0 %v14991_v52  ;;  %1757 = vmatpush1.bf16.msra.mxu1 %v14992_v34  ;;  %v15010_v52 = vld [vmem:[%s18966_s3 + $0x2c] ss:$16 sps:$4 sm:$0xff]   ;;  %v15011_v34 = vld [vmem:[%s18966_s3 + $0x20] ss:$16 sps:$4 sm:$0xff]  }
 0x165   :  { %1717 = vmatprep.subr.bf16.mxu0 %v14993_v33  ;;  %1758 = vmatprep.subr.bf16.mxu1 %v14994_v14  ;;  %v15012_v33 = vld [vmem:[%s18966_s3 + $0x28] ss:$16 sps:$4 sm:$0xff]   ;;  %v15013_v14 = vld [vmem:[%s18966_s3 + $0x4] ss:$16 sps:$4 sm:$0xff]  }
 0x168   :  { %1718 = vmatpush1.bf16.msra.mxu0 %v14995_v4  ;;  %1759 = vmatpush1.bf16.msra.mxu1 %v14996_v28  ;;  %v15014_v4 = vld [vmem:[%s18966_s3 + $0xc] ss:$16 sps:$4 sm:$0xff]   ;;  %v15015_v28 = vld [vmem:[%s18966_s3] ss:$16 sps:$4 sm:$0xff]  }
 0x169   :  { %1719 = vmatprep.subr.bf16.mxu0 %v14997_v15  ;;  %1760 = vmatprep.subr.bf16.mxu1 %v14998_v37  ;;  %v15016_v15 = vld [vmem:[%s18966_s3 + $0x8] ss:$16 sps:$4 sm:$0xff]  }
 0x16c   :  { %1720 = vmatpush1.bf16.msra.mxu0 %v14999_v38  ;;  %1761 = vmatpush1.bf16.msra.mxu1 %v15000_v41  ;;  %v330_v41 = vadd.f32 %v15546_v59, %v15550_v63 }
 0x16d   :  { %1721 = vmatprep.subr.bf16.mxu0 %v15001_v53  ;;  %1762 = vmatprep.subr.bf16.mxu1 %v15002_v5 }
 0x170   :  { %1722 = vmatpush1.bf16.msra.mxu0 %v15003_v2  ;;  %1763 = vmatpush1.bf16.msra.mxu1 %v15004_v49 }
 0x171   :  { %1723 = vmatprep.subr.bf16.mxu0 %v15005_v29  ;;  %1764 = vmatprep.subr.bf16.mxu1 %v15006_v42 }
 0x174   :  { %1724 = vmatpush1.bf16.msra.mxu0 %v15007_v45  ;;  %1765 = vmatpush1.bf16.msra.mxu1 %v15008_v19 }
 0x175   :  { %1725 = vmatprep.subr.bf16.mxu0 %v15009_v48  ;;  %1766 = vmatprep.subr.bf16.mxu1 %v15010_v52 }
 0x178   :  { %1726 = vmatpush1.bf16.msra.mxu0 %v15011_v34  ;;  %1767 = vmatpush1.bf16.msra.mxu1 %v15012_v33  ;;  %v403_v34 = vadd.f32 %v15548_v60, %v15552_v0 }
 0x179   :  { %1727 = vmatprep.subr.bf16.mxu0 %v15013_v14  ;;  %1768 = vmatprep.subr.bf16.mxu1 %v15014_v4 }
 0x17c   :  { %1728 = vmatpush1.bf16.msra.mxu0 %v15015_v28  ;;  %1769 = vmatpush1.bf16.msra.mxu1 %v15016_v15 }
 0x21f   :  { %v1435_v37 = vpop.f32.mrf.mxu0  ;;  %v1476_v38 = vpop.f32.mrf.mxu1 }
 0x220   :  { %v1483_v53 = vadd.f32 %v1435_v37, %v15541_v57  ;;  %v1485_v14 = vadd.f32 %v1476_v38, %v15544_v58 }
 0x221   :  { %v1437_v5 = vpop.f32.mrf.mxu0  ;;  %v1478_v2 = vpop.f32.mrf.mxu1 }
 0x222   :  { %v11829_v49 = vmul.f32 -1.442695, %v1483_v53  ;;  %v1484_v29 = vadd.f32 %v1437_v5, %v330_v41  ;;  %v1486_v33 = vadd.f32 %v1478_v2, %v403_v34  ;;  %v15846_v34 = vld [vmem:[%s18966_s3 + $0xc4] ss:$16 sps:$4 sm:$0xff]  }
 0x223   :  { %v1439_v42 = vpop.f32.mrf.mxu0  ;;  %v1480_v45 = vpop.f32.mrf.mxu1 }
 0x224   :  { %14699 = vpow2.f32 %v11829_v49  ;;  %v11830_v19 = vmul.f32 -1.442695, %v1484_v29  ;;  %v11831_v59 = vmul.f32 -1.442695, %v1486_v33  ;;  %v15851_v33 = vld [vmem:[%s18966_s3 + $0xcc] ss:$16 sps:$4 sm:$0xff]  }
 0x225   :  { %v1440_v48 = vpop.f32.mrf.mxu0  ;;  %v1481_v52 = vpop.f32.mrf.mxu1 }
 0x226   :  { %14701 = vpow2.f32 %v11830_v19  ;;  %v15827_v48 = vld [vmem:[%s18966_s3 + $0xec] ss:$16 sps:$4 sm:$0xff]   ;;  %v15837_v52 = vld [vmem:[%s18966_s3 + $0xe8] ss:$16 sps:$4 sm:$0xff]  }
 0x227   :  { %14703 = vtanh.f32 %v1485_v14  ;;  %2066 = vmatprep.subr.bf16.mxu1 %v15827_v48  ;;  %v15856_v14 = vld [vmem:[%s18966_s3 + $0xc0] ss:$16 sps:$4 sm:$0xff]  }
 0x228   :  { %14705 = vpow2.f32 %v11831_v59  ;;  %v15861_v59 = vld [vmem:[%s18966_s3 + $0xc8] ss:$16 sps:$4 sm:$0xff]  }
 0x231   :  { %v14700_v4 = vpop.eup %14699 }
 0x232   :  { %v1490_v57 = vadd.f32 1.0, %v14700_v4  ;;  %v15870_v4 = vld [vmem:[%s18966_s3 + $0xa4] ss:$16 sps:$4 sm:$0xff]  }
 0x233   :  { %v14702_v28 = vpop.eup %14701 }
 0x234   :  { %14707 = vrcp.f32 %v1490_v57  ;;  %v1496_v15 = vadd.f32 1.0, %v14702_v28  ;;  %v14704_v37 = vpop.eup %14703  ;;  %v15875_v57 = vld [vmem:[%s18966_s3 + $0xac] ss:$16 sps:$4 sm:$0xff]   ;;  %v15880_v28 = vld [vmem:[%s18966_s3 + $0xa0] ss:$16 sps:$4 sm:$0xff]  }
 0x235   :  { %v14706_v41 = vpop.eup %14705 }
 0x236   :  { %14709 = vrcp.f32 %v1496_v15  ;;  %v1503_v29 = vadd.f32 1.0, %v14706_v41  ;;  %v15885_v15 = vld [vmem:[%s18966_s3 + $0xa8] ss:$16 sps:$4 sm:$0xff]   ;;  %v15899_v41 = vld [vmem:[%s18966_s3 + $0x8c] ss:$16 sps:$4 sm:$0xff]  }
 0x238   :  { %14711 = vrcp.f32 %v1503_v29  ;;  %v15921_v29 = vld [vmem:[%s18966_s3 + $0x6c] ss:$16 sps:$4 sm:$0xff]  }
 0x241   :  { %v14708_v53 = vpop.eup %14707 }
 0x242   :  { %v1507_v5 = vmul.f32 %v14708_v53, %v14704_v37  ;;  %v15894_v37 = vld [vmem:[%s18966_s3 + $0x84] ss:$16 sps:$4 sm:$0xff]   ;;  %v15904_v53 = vld [vmem:[%s18966_s3 + $0x80] ss:$16 sps:$4 sm:$0xff]  }
 0x243   :  { %v14710_v49 = vpop.eup %14709 }
 0x244   :  { %v1506_v60 = vmul.f32 %v14710_v49, %v15707_v46  ;;  %v15822_v46 = vld [vmem:[%s18966_s3 + $0xe4] ss:$16 sps:$4 sm:$0xff]  }
 0x245   :  { %v14712_v58 = vpop.eup %14711  ;;  %2025 = vmatprep.subr.bf16.mxu0 %v15822_v46  ;;  %v15916_v49 = vld [vmem:[%s18966_s3 + $0x64] ss:$16 sps:$4 sm:$0xff]  }
 0x246   :  { %v15813_v2 = vadd.f32 %v1507_v5, %v1506_v60  ;;  %v15909_v5 = vld [vmem:[%s18966_s3 + $0x88] ss:$16 sps:$4 sm:$0xff]   ;;  %v15928_v60 = vld [vmem:[%s18966_s3 + $0x60] ss:$16 sps:$4 sm:$0xff]  }
 0x248   :  { %14713 = vtanh.f32 %v15813_v2 }
 0x255   :  { %v14714_v38 = vpop.eup %14713 }
 0x256   :  { %v1510_v42 = vmul.f32 %v14714_v38, %v14712_v58  ;;  %v15933_v58 = vld [vmem:[%s18966_s3 + $0x68] ss:$16 sps:$4 sm:$0xff]   ;;  %v15940_v38 = vld [vmem:[%s18966_s3 + $0x44] ss:$16 sps:$4 sm:$0xff]  }
 0x258   :  { %v1520_v45 = vpack.c.bf16 %v1510_v42, %v1510_v42  ;;  %v12873_v19 = vpack.c.bf16 %v1510_v42, %v15710_v51  ;;  %v15832_v51 = vld [vmem:[%s18966_s3 + $0xe0] ss:$16 sps:$4 sm:$0xff]   ;;  %v15945_v42 = vld [vmem:[%s18966_s3 + $0x4c] ss:$16 sps:$4 sm:$0xff]  }
 0x25a   :  { %1746 = vmatmul.mubr.bf16.vlgmr.msra.gmra.mxu0 %v1520_v45  ;;  %12874 = vst [vmem:[#allocation5] sm:$0xff] %v12873_v19   ;;  %1787 = vmatmul.mubr.bf16.vlgmr.msra.gmra.mxu1 %v1520_v45  ;;  %v15952_v45 = vld [vmem:[%s18966_s3 + $0x40] ss:$16 sps:$4 sm:$0xff]   ;;  %v15957_v19 = vld [vmem:[%s18966_s3 + $0x48] ss:$16 sps:$4 sm:$0xff]  }
 0x25b   :  { %2057 = vmatprep.mubr.bf16.mxu0 %v19032_v54  ;;  %2098 = vmatprep.mubr.bf16.mxu1 %v19032_v54 }
 0x25c   :  { %2026 = vmatpush1.bf16.msra.mxu0 %v15832_v51  ;;  %2067 = vmatpush1.bf16.msra.mxu1 %v15837_v52 }
 0x25d   :  { %2027 = vmatprep.subr.bf16.mxu0 %v15846_v34  ;;  %2068 = vmatprep.subr.bf16.mxu1 %v15851_v33 }
 0x260   :  { %2028 = vmatpush1.bf16.msra.mxu0 %v15856_v14  ;;  %2069 = vmatpush1.bf16.msra.mxu1 %v15861_v59 }
 0x261   :  { %2029 = vmatprep.subr.bf16.mxu0 %v15870_v4  ;;  %2070 = vmatprep.subr.bf16.mxu1 %v15875_v57 }
 0x264   :  { %2030 = vmatpush1.bf16.msra.mxu0 %v15880_v28  ;;  %2071 = vmatpush1.bf16.msra.mxu1 %v15885_v15 }
 0x265   :  { %2031 = vmatprep.subr.bf16.mxu0 %v15894_v37  ;;  %2072 = vmatprep.subr.bf16.mxu1 %v15899_v41 }
 0x268   :  { %2032 = vmatpush1.bf16.msra.mxu0 %v15904_v53  ;;  %2073 = vmatpush1.bf16.msra.mxu1 %v15909_v5 }
 0x269   :  { %2033 = vmatprep.subr.bf16.mxu0 %v15916_v49  ;;  %2074 = vmatprep.subr.bf16.mxu1 %v15921_v29 }
 0x26c   :  { %2034 = vmatpush1.bf16.msra.mxu0 %v15928_v60  ;;  %2075 = vmatpush1.bf16.msra.mxu1 %v15933_v58 }
 0x26d   :  { %2035 = vmatprep.subr.bf16.mxu0 %v15940_v38  ;;  %2076 = vmatprep.subr.bf16.mxu1 %v15945_v42 }
 0x270   :  { %2036 = vmatpush1.bf16.msra.mxu0 %v15952_v45  ;;  %2077 = vmatpush1.bf16.msra.mxu1 %v15957_v19 }
 0x271   :  { %2037 = vmatprep.subr.bf16.mxu0 %v15964_v30  ;;  %2078 = vmatprep.subr.bf16.mxu1 %v15969_v50 }
 0x274   :  { %2038 = vmatpush1.bf16.msra.mxu0 %v15976_v23  ;;  %2079 = vmatpush1.bf16.msra.mxu1 %v15981_v62 }
 0x275   :  { %2039 = vmatprep.subr.bf16.mxu0 %v15988_v47  ;;  %2080 = vmatprep.subr.bf16.mxu1 %v15993_v22 }
 0x278   :  { %2040 = vmatpush1.bf16.msra.mxu0 %v16000_v61  ;;  %2081 = vmatpush1.bf16.msra.mxu1 %v16005_v43 }
 0x279   :  { %2337 = vmatprep.subr.bf16.mxu0 %v15822_v46  ;;  %2378 = vmatprep.subr.bf16.mxu1 %v15827_v48 }
 0x31a   :  { %v1747_v44 = vpop.f32.mrf.mxu0  ;;  %v1788_v9 = vpop.f32.mrf.mxu1 }
 0x31b   :  { %v1795_v18 = vadd.f32 %v1747_v44, %v15555_v1  ;;  %v1797_v27 = vadd.f32 %v1788_v9, %v15558_v3 }
 0x31c   :  { %v1749_v8 = vpop.f32.mrf.mxu0  ;;  %v1790_v40 = vpop.f32.mrf.mxu1 }
 0x31d   :  { %v11864_v56 = vmul.f32 -1.442695, %v1795_v18  ;;  %v1796_v39 = vadd.f32 %v1749_v8, %v15561_v6  ;;  %v1798_v25 = vadd.f32 %v1790_v40, %v15564_v7  ;;  %v340_v40 = vadd.f32 %v15572_v12, %v15550_v63 }
 0x31e   :  { %v1751_v55 = vpop.f32.mrf.mxu0  ;;  %v1792_v32 = vpop.f32.mrf.mxu1 }
 0x31f   :  { %14715 = vpow2.f32 %v11864_v56  ;;  %v11865_v36 = vmul.f32 -1.442695, %v1796_v39  ;;  %v11866_v24 = vmul.f32 -1.442695, %v1798_v25 }
 0x320   :  { %v1752_v35 = vpop.f32.mrf.mxu0  ;;  %v1793_v31 = vpop.f32.mrf.mxu1 }
 0x321   :  { %14717 = vpow2.f32 %v11865_v36 }
 0x322   :  { %14719 = vtanh.f32 %v1797_v27 }
 0x323   :  { %14721 = vpow2.f32 %v11866_v24 }
 0x32c   :  { %v14716_v26 = vpop.eup %14715 }
 0x32d   :  { %v1802_v17 = vadd.f32 1.0, %v14716_v26 }
 0x32e   :  { %v14718_v1 = vpop.eup %14717 }
 0x32f   :  { %14723 = vrcp.f32 %v1802_v17  ;;  %v1808_v18 = vadd.f32 1.0, %v14718_v1  ;;  %v14720_v6 = vpop.eup %14719 }
 0x330   :  { %v14722_v32 = vpop.eup %14721 }
 0x331   :  { %14725 = vrcp.f32 %v1808_v18  ;;  %v1815_v31 = vadd.f32 1.0, %v14722_v32 }
 0x333   :  { %14727 = vrcp.f32 %v1815_v31 }
 0x33c   :  { %v14724_v55 = vpop.eup %14723 }
 0x33d   :  { %v1819_v39 = vmul.f32 %v14724_v55, %v14720_v6 }
 0x33e   :  { %v14726_v35 = vpop.eup %14725 }
 0x33f   :  { %v1818_v36 = vmul.f32 %v14726_v35, %v15813_v2 }
 0x340   :  { %v14728_v3 = vpop.eup %14727 }
 0x341   :  { %v16018_v7 = vadd.f32 %v1819_v39, %v1818_v36  ;;  %v413_v39 = vadd.f32 %v15574_v13, %v15552_v0 }
 0x343   :  { %14729 = vtanh.f32 %v16018_v7 }
 0x350   :  { %v14730_v25 = vpop.eup %14729 }
 0x351   :  { %v16021_v26 = vmul.f32 %v14730_v25, %v14728_v3 }
 0x353   :  { %v1832_v17 = vpack.c.bf16 %v16021_v26, %v16021_v26 }
 0x355   :  { %2058 = vmatmul.mubr.bf16.vlgmr.msra.gmra.mxu0 %v1832_v17  ;;  %2099 = vmatmul.mubr.bf16.vlgmr.msra.gmra.mxu1 %v1832_v17 }
 0x356   :  { %2338 = vmatpush1.bf16.msra.mxu0 %v15832_v51  ;;  %2379 = vmatpush1.bf16.msra.mxu1 %v15837_v52 }
 0x357   :  { %2339 = vmatprep.subr.bf16.mxu0 %v15846_v34  ;;  %2380 = vmatprep.subr.bf16.mxu1 %v15851_v33 }
 0x358   :  { %2369 = vmatprep.mubr.bf16.mxu0 %v19032_v54  ;;  %2410 = vmatprep.mubr.bf16.mxu1 %v19032_v54 }
 0x35a   :  { %2340 = vmatpush1.bf16.msra.mxu0 %v15856_v14  ;;  %2381 = vmatpush1.bf16.msra.mxu1 %v15861_v59 }
 0x35b   :  { %2341 = vmatprep.subr.bf16.mxu0 %v15870_v4  ;;  %2382 = vmatprep.subr.bf16.mxu1 %v15875_v57 }
 0x35e   :  { %2342 = vmatpush1.bf16.msra.mxu0 %v15880_v28  ;;  %2383 = vmatpush1.bf16.msra.mxu1 %v15885_v15 }
 0x35f   :  { %2343 = vmatprep.subr.bf16.mxu0 %v15894_v37  ;;  %2384 = vmatprep.subr.bf16.mxu1 %v15899_v41 }
 0x362   :  { %2344 = vmatpush1.bf16.msra.mxu0 %v15904_v53  ;;  %2385 = vmatpush1.bf16.msra.mxu1 %v15909_v5 }
 0x363   :  { %2345 = vmatprep.subr.bf16.mxu0 %v15916_v49  ;;  %2386 = vmatprep.subr.bf16.mxu1 %v15921_v29 }
 0x366   :  { %2346 = vmatpush1.bf16.msra.mxu0 %v15928_v60  ;;  %2387 = vmatpush1.bf16.msra.mxu1 %v15933_v58 }
 0x367   :  { %2347 = vmatprep.subr.bf16.mxu0 %v15940_v38  ;;  %2388 = vmatprep.subr.bf16.mxu1 %v15945_v42 }
 0x36a   :  { %2348 = vmatpush1.bf16.msra.mxu0 %v15952_v45  ;;  %2389 = vmatpush1.bf16.msra.mxu1 %v15957_v19 }
 0x36b   :  { %2349 = vmatprep.subr.bf16.mxu0 %v15964_v30  ;;  %2390 = vmatprep.subr.bf16.mxu1 %v15969_v50 }
 0x36e   :  { %2350 = vmatpush1.bf16.msra.mxu0 %v15976_v23  ;;  %2391 = vmatpush1.bf16.msra.mxu1 %v15981_v62 }
 0x36f   :  { %2351 = vmatprep.subr.bf16.mxu0 %v15988_v47  ;;  %2392 = vmatprep.subr.bf16.mxu1 %v15993_v22 }
 0x372   :  { %2352 = vmatpush1.bf16.msra.mxu0 %v16000_v61  ;;  %2393 = vmatpush1.bf16.msra.mxu1 %v16005_v43 }
 0x373   :  { %2649 = vmatprep.subr.bf16.mxu0 %v15822_v46  ;;  %2690 = vmatprep.subr.bf16.mxu1 %v15827_v48 }
 0x415   :  { %v2059_v24 = vpop.f32.mrf.mxu0  ;;  %v2100_v27 = vpop.f32.mrf.mxu1 }
 0x416   :  { %v2107_v56 = vadd.f32 %v2059_v24, %v15567_v10  ;;  %v2109_v31 = vadd.f32 %v2100_v27, %v15570_v11 }
 0x417   :  { %v2061_v8 = vpop.f32.mrf.mxu0  ;;  %v2102_v9 = vpop.f32.mrf.mxu1 }
 0x418   :  { %v11899_v44 = vmul.f32 -1.442695, %v2107_v56  ;;  %v2108_v2 = vadd.f32 %v2061_v8, %v340_v40  ;;  %v2110_v35 = vadd.f32 %v2102_v9, %v413_v39 }
 0x419   :  { %v2063_v1 = vpop.f32.mrf.mxu0  ;;  %v2104_v18 = vpop.f32.mrf.mxu1 }
 0x41a   :  { %14731 = vpow2.f32 %v11899_v44  ;;  %v11900_v6 = vmul.f32 -1.442695, %v2108_v2  ;;  %v11901_v12 = vmul.f32 -1.442695, %v2110_v35 }
 0x41b   :  { %v2064_v32 = vpop.f32.mrf.mxu0  ;;  %v2105_v55 = vpop.f32.mrf.mxu1 }
 0x41c   :  { %14733 = vpow2.f32 %v11900_v6 }
 0x41d   :  { %14735 = vtanh.f32 %v2109_v31 }
 0x41e   :  { %14737 = vpow2.f32 %v11901_v12 }
 0x427   :  { %v14732_v36 = vpop.eup %14731 }
 0x428   :  { %v2114_v10 = vadd.f32 1.0, %v14732_v36 }
 0x429   :  { %v14734_v3 = vpop.eup %14733 }
 0x42a   :  { %14739 = vrcp.f32 %v2114_v10  ;;  %v2120_v25 = vadd.f32 1.0, %v14734_v3  ;;  %v14736_v17 = vpop.eup %14735 }
 0x42b   :  { %v14738_v24 = vpop.eup %14737 }
 0x42c   :  { %14741 = vrcp.f32 %v2120_v25  ;;  %v2127_v44 = vadd.f32 1.0, %v14738_v24  ;;  %v19033_v25 = vld [vmem:[#allocation11_spill] sm:$0xff] }
 0x42e   :  { %14743 = vrcp.f32 %v2127_v44 }
 0x437   :  { %v14740_v40 = vpop.eup %14739 }
 0x438   :  { %v2131_v56 = vmul.f32 %v14740_v40, %v14736_v17 }
 0x439   :  { %v14742_v8 = vpop.eup %14741 }
 0x43a   :  { %v2130_v13 = vmul.f32 %v14742_v8, %v16018_v7 }
 0x43b   :  { %v14744_v11 = vpop.eup %14743 }
 0x43c   :  { %v16066_v9 = vadd.f32 %v2131_v56, %v2130_v13 }
 0x43e   :  { %14745 = vtanh.f32 %v16066_v9 }
 0x44b   :  { %v14746_v27 = vpop.eup %14745 }
 0x44c   :  { %v2134_v2 = vmul.f32 %v14746_v27, %v14744_v11 }
 0x44e   :  { %v2144_v1 = vpack.c.bf16 %v2134_v2, %v2134_v2  ;;  %v12878_v18 = vpack.c.bf16 %v2134_v2, %v16021_v26 }
 0x450   :  { %2370 = vmatmul.mubr.bf16.vlgmr.msra.gmra.mxu0 %v2144_v1  ;;  %12890 = vst [vmem:[#allocation5 + $0x8] sm:$0xff] %v12878_v18   ;;  %2411 = vmatmul.mubr.bf16.vlgmr.msra.gmra.mxu1 %v2144_v1 }
 0x451   :  { %2650 = vmatpush1.bf16.msra.mxu0 %v15832_v51  ;;  %2691 = vmatpush1.bf16.msra.mxu1 %v15837_v52 }
 0x452   :  { %2651 = vmatprep.subr.bf16.mxu0 %v15846_v34  ;;  %2692 = vmatprep.subr.bf16.mxu1 %v15851_v33 }
 0x453   :  { %2681 = vmatprep.mubr.bf16.mxu0 %v19032_v54  ;;  %2722 = vmatprep.mubr.bf16.mxu1 %v19032_v54 }
 0x455   :  { %2652 = vmatpush1.bf16.msra.mxu0 %v15856_v14  ;;  %2693 = vmatpush1.bf16.msra.mxu1 %v15861_v59 }
 0x456   :  { %2653 = vmatprep.subr.bf16.mxu0 %v15870_v4  ;;  %2694 = vmatprep.subr.bf16.mxu1 %v15875_v57 }
 0x459   :  { %2654 = vmatpush1.bf16.msra.mxu0 %v15880_v28  ;;  %2695 = vmatpush1.bf16.msra.mxu1 %v15885_v15 }
 0x45a   :  { %2655 = vmatprep.subr.bf16.mxu0 %v15894_v37  ;;  %2696 = vmatprep.subr.bf16.mxu1 %v15899_v41 }
 0x45d   :  { %2656 = vmatpush1.bf16.msra.mxu0 %v15904_v53  ;;  %2697 = vmatpush1.bf16.msra.mxu1 %v15909_v5 }
 0x45e   :  { %2657 = vmatprep.subr.bf16.mxu0 %v15916_v49  ;;  %2698 = vmatprep.subr.bf16.mxu1 %v15921_v29 }
 0x461   :  { %2658 = vmatpush1.bf16.msra.mxu0 %v15928_v60  ;;  %2699 = vmatpush1.bf16.msra.mxu1 %v15933_v58 }
 0x462   :  { %2659 = vmatprep.subr.bf16.mxu0 %v15940_v38  ;;  %2700 = vmatprep.subr.bf16.mxu1 %v15945_v42 }
 0x465   :  { %2660 = vmatpush1.bf16.msra.mxu0 %v15952_v45  ;;  %2701 = vmatpush1.bf16.msra.mxu1 %v15957_v19 }
 0x466   :  { %2661 = vmatprep.subr.bf16.mxu0 %v15964_v30  ;;  %2702 = vmatprep.subr.bf16.mxu1 %v15969_v50 }
 0x469   :  { %2662 = vmatpush1.bf16.msra.mxu0 %v15976_v23  ;;  %2703 = vmatpush1.bf16.msra.mxu1 %v15981_v62 }
 0x46a   :  { %2663 = vmatprep.subr.bf16.mxu0 %v15988_v47  ;;  %2704 = vmatprep.subr.bf16.mxu1 %v15993_v22 }
 0x46d   :  { %2664 = vmatpush1.bf16.msra.mxu0 %v16000_v61  ;;  %2705 = vmatpush1.bf16.msra.mxu1 %v16005_v43 }
 0x46e   :  { %2961 = vmatprep.subr.bf16.mxu0 %v15822_v46  ;;  %3002 = vmatprep.subr.bf16.mxu1 %v15827_v48 }
 0x510   :  { %v2371_v7 = vpop.f32.mrf.mxu0  ;;  %v2412_v26 = vpop.f32.mrf.mxu1 }
 0x511   :  { %v2419_v6 = vadd.f32 %v2371_v7, %v15577_v16  ;;  %v2421_v48 = vadd.f32 %v2412_v26, %v19033_v25  ;;  %v13975_v25 = vld [vmem:[%s18966_s3 + $0xcc] ss:$16 sps:$4 sm:$0xff]  }
 0x512   :  { %v2373_v32 = vpop.f32.mrf.mxu0  ;;  %v2414_v55 = vpop.f32.mrf.mxu1 }
 0x513   :  { %v11934_v39 = vmul.f32 -1.442695, %v2419_v6  ;;  %v2420_v35 = vadd.f32 %v2373_v32, %v15583_v20  ;;  %v2422_v46 = vadd.f32 %v2414_v55, %v15586_v21 }
 0x514   :  { %v2375_v31 = vpop.f32.mrf.mxu0  ;;  %v2416_v12 = vpop.f32.mrf.mxu1 }
 0x515   :  { %14747 = vpow2.f32 %v11934_v39  ;;  %v11935_v36 = vmul.f32 -1.442695, %v2420_v35  ;;  %v11936_v17 = vmul.f32 -1.442695, %v2422_v46  ;;  %v13970_v46 = vld [vmem:[%s18966_s3 + $0xe0] ss:$16 sps:$4 sm:$0xff]  }
 0x516   :  { %v2376_v10 = vpop.f32.mrf.mxu0  ;;  %v2417_v3 = vpop.f32.mrf.mxu1 }
 0x517   :  { %14749 = vpow2.f32 %v11935_v36  ;;  %v13969_v36 = vld [vmem:[%s18966_s3 + $0xec] ss:$16 sps:$4 sm:$0xff]   ;;  %v13967_v10 = vld [vmem:[%s18966_s3 + $0xe8] ss:$16 sps:$4 sm:$0xff]   ;;  %v13972_v3 = vld [vmem:[%s18966_s3 + $0xe4] ss:$16 sps:$4 sm:$0xff]  }
 0x518   :  { %14751 = vtanh.f32 %v2421_v48  ;;  %v13973_v48 = vld [vmem:[%s18966_s3 + $0xc8] ss:$16 sps:$4 sm:$0xff]  }
 0x519   :  { %14753 = vpow2.f32 %v11936_v17  ;;  %v13978_v17 = vld [vmem:[%s18966_s3 + $0xc4] ss:$16 sps:$4 sm:$0xff]  }
 0x522   :  { %v14748_v24 = vpop.eup %14747 }
 0x523   :  { %v2426_v40 = vadd.f32 1.0, %v14748_v24  ;;  %v13976_v24 = vld [vmem:[%s18966_s3 + $0xc0] ss:$16 sps:$4 sm:$0xff]  }
 0x524   :  { %v14750_v16 = vpop.eup %14749 }
 0x525   :  { %14755 = vrcp.f32 %v2426_v40  ;;  %v2432_v56 = vadd.f32 1.0, %v14750_v16  ;;  %v14752_v20 = vpop.eup %14751  ;;  %v13981_v40 = vld [vmem:[%s18966_s3 + $0xac] ss:$16 sps:$4 sm:$0xff]   ;;  %v13979_v16 = vld [vmem:[%s18966_s3 + $0xa8] ss:$16 sps:$4 sm:$0xff]  }
 0x526   :  { %v14754_v8 = vpop.eup %14753 }
 0x527   :  { %14757 = vrcp.f32 %v2432_v56  ;;  %v2439_v27 = vadd.f32 1.0, %v14754_v8  ;;  %v13984_v56 = vld [vmem:[%s18966_s3 + $0xa4] ss:$16 sps:$4 sm:$0xff]   ;;  %v13987_v8 = vld [vmem:[%s18966_s3 + $0x8c] ss:$16 sps:$4 sm:$0xff]  }
 0x529   :  { %14759 = vrcp.f32 %v2439_v27  ;;  %v13993_v27 = vld [vmem:[%s18966_s3 + $0x6c] ss:$16 sps:$4 sm:$0xff]  }
 0x532   :  { %v14756_v44 = vpop.eup %14755 }
 0x533   :  { %v2443_v13 = vmul.f32 %v14756_v44, %v14752_v20  ;;  %v13982_v20 = vld [vmem:[%s18966_s3 + $0xa0] ss:$16 sps:$4 sm:$0xff]   ;;  %v13985_v44 = vld [vmem:[%s18966_s3 + $0x88] ss:$16 sps:$4 sm:$0xff]  }
 0x534   :  { %v14758_v11 = vpop.eup %14757 }
 0x535   :  { %v2442_v2 = vmul.f32 %v14758_v11, %v16066_v9  ;;  %v13988_v11 = vld [vmem:[%s18966_s3 + $0x80] ss:$16 sps:$4 sm:$0xff]  }
 0x536   :  { %v14760_v1 = vpop.eup %14759 }
 0x537   :  { %v16109_v21 = vadd.f32 %v2443_v13, %v2442_v2  ;;  %v13990_v13 = vld [vmem:[%s18966_s3 + $0x84] ss:$16 sps:$4 sm:$0xff]   ;;  %v13991_v2 = vld [vmem:[%s18966_s3 + $0x68] ss:$16 sps:$4 sm:$0xff]  }
 0x539   :  { %14761 = vtanh.f32 %v16109_v21 }
 0x546   :  { %v14762_v18 = vpop.eup %14761 }
 0x547   :  { %v16112_v7 = vmul.f32 %v14762_v18, %v14760_v1  ;;  %v13994_v1 = vld [vmem:[%s18966_s3 + $0x60] ss:$16 sps:$4 sm:$0xff]   ;;  %v13999_v18 = vld [vmem:[%s18966_s3 + $0x4c] ss:$16 sps:$4 sm:$0xff]  }
 0x549   :  { %v2456_v26 = vpack.c.bf16 %v16112_v7, %v16112_v7 }
 0x54b   :  { %2682 = vmatmul.mubr.bf16.vlgmr.msra.gmra.mxu0 %v2456_v26  ;;  %2723 = vmatmul.mubr.bf16.vlgmr.msra.gmra.mxu1 %v2456_v26  ;;  %v13997_v26 = vld [vmem:[%s18966_s3 + $0x48] ss:$16 sps:$4 sm:$0xff]  }
 0x54c   :  { %2962 = vmatpush1.bf16.msra.mxu0 %v15832_v51  ;;  %3003 = vmatpush1.bf16.msra.mxu1 %v15837_v52 }
 0x54d   :  { %2963 = vmatprep.subr.bf16.mxu0 %v15846_v34  ;;  %3004 = vmatprep.subr.bf16.mxu1 %v15851_v33  ;;  %v19034_v34 = vld [vmem:[#allocation14_spill] sm:$0xff] }
 0x54e   :  { %2993 = vmatprep.mubr.bf16.mxu0 %v19032_v54  ;;  %3034 = vmatprep.mubr.bf16.mxu1 %v19032_v54  ;;  %v350_v33 = vadd.f32 %v19034_v34, %v15550_v63  ;;  %v14008_v34 = vld [vmem:[%s18966_s3 + $0x24] ss:$16 sps:$4 sm:$0xff]  }
 0x550   :  { %2964 = vmatpush1.bf16.msra.mxu0 %v15856_v14  ;;  %3005 = vmatpush1.bf16.msra.mxu1 %v15861_v59 }
 0x551   :  { %2965 = vmatprep.subr.bf16.mxu0 %v15870_v4  ;;  %3006 = vmatprep.subr.bf16.mxu1 %v15875_v57 }
 0x554   :  { %2966 = vmatpush1.bf16.msra.mxu0 %v15880_v28  ;;  %3007 = vmatpush1.bf16.msra.mxu1 %v15885_v15 }
 0x555   :  { %2967 = vmatprep.subr.bf16.mxu0 %v15894_v37  ;;  %3008 = vmatprep.subr.bf16.mxu1 %v15899_v41  ;;  %v19037_v37 = vld [vmem:[#allocation13_spill] sm:$0xff] }
 0x558   :  { %2968 = vmatpush1.bf16.msra.mxu0 %v15904_v53  ;;  %3009 = vmatpush1.bf16.msra.mxu1 %v15909_v5 }
 0x559   :  { %2969 = vmatprep.subr.bf16.mxu0 %v15916_v49  ;;  %3010 = vmatprep.subr.bf16.mxu1 %v15921_v29 }
 0x55c   :  { %2970 = vmatpush1.bf16.msra.mxu0 %v15928_v60  ;;  %3011 = vmatpush1.bf16.msra.mxu1 %v15933_v58 }
 0x55d   :  { %2971 = vmatprep.subr.bf16.mxu0 %v15940_v38  ;;  %3012 = vmatprep.subr.bf16.mxu1 %v15945_v42 }
 0x560   :  { %2972 = vmatpush1.bf16.msra.mxu0 %v15952_v45  ;;  %3013 = vmatpush1.bf16.msra.mxu1 %v15957_v19 }
 0x561   :  { %2973 = vmatprep.subr.bf16.mxu0 %v15964_v30  ;;  %3014 = vmatprep.subr.bf16.mxu1 %v15969_v50  ;;  %v19035_v30 = vld [vmem:[#allocation12_spill] sm:$0xff] }
 0x564   :  { %2974 = vmatpush1.bf16.msra.mxu0 %v15976_v23  ;;  %3015 = vmatpush1.bf16.msra.mxu1 %v15981_v62 }
 0x565   :  { %2975 = vmatprep.subr.bf16.mxu0 %v15988_v47  ;;  %3016 = vmatprep.subr.bf16.mxu1 %v15993_v22 }
 0x568   :  { %2976 = vmatpush1.bf16.msra.mxu0 %v16000_v61  ;;  %3017 = vmatpush1.bf16.msra.mxu1 %v16005_v43  ;;  %v19036_v43 = vld [vmem:[#allocation15_spill] sm:$0xff] }
 0x569   :  { %v423_v61 = vadd.f32 %v19036_v43, %v15552_v0  ;;  %3314 = vmatprep.subr.bf16.mxu1 %v13969_v36  ;;  %3273 = vmatprep.subr.bf16.mxu0 %v13972_v3 }
 0x60b   :  { %v2683_v51 = vpop.f32.mrf.mxu0  ;;  %v2724_v52 = vpop.f32.mrf.mxu1 }
 0x60c   :  { %v2731_v14 = vadd.f32 %v2683_v51, %v19035_v30  ;;  %v2733_v41 = vadd.f32 %v2724_v52, %v19037_v37  ;;  %v14000_v51 = vld [vmem:[%s18966_s3 + $0x40] ss:$16 sps:$4 sm:$0xff]   ;;  %v14005_v52 = vld [vmem:[%s18966_s3 + $0x2c] ss:$16 sps:$4 sm:$0xff]  }
 0x60d   :  { %v2685_v50 = vpop.f32.mrf.mxu0  ;;  %v2726_v59 = vpop.f32.mrf.mxu1  ;;  %v14006_v30 = vld [vmem:[%s18966_s3 + $0x20] ss:$16 sps:$4 sm:$0xff]  }
 0x60e   :  { %v11969_v23 = vmul.f32 -1.442695, %v2731_v14  ;;  %v2732_v4 = vadd.f32 %v2685_v50, %v350_v33  ;;  %v2734_v15 = vadd.f32 %v2726_v59, %v423_v61  ;;  %v14003_v33 = vld [vmem:[%s18966_s3 + $0x28] ss:$16 sps:$4 sm:$0xff]   ;;  %v14011_v14 = vld [vmem:[%s18966_s3 + $0xc] ss:$16 sps:$4 sm:$0xff]  }
 0x60f   :  { %v2687_v62 = vpop.f32.mrf.mxu0  ;;  %v2728_v57 = vpop.f32.mrf.mxu1  ;;  %v14014_v50 = vld [vmem:[%s18966_s3 + $0x4] ss:$16 sps:$4 sm:$0xff]   ;;  %v14009_v59 = vld [vmem:[%s18966_s3 + $0x8] ss:$16 sps:$4 sm:$0xff]  }
 0x610   :  { %14763 = vpow2.f32 %v11969_v23  ;;  %v11970_v47 = vmul.f32 -1.442695, %v2732_v4  ;;  %v11971_v53 = vmul.f32 -1.442695, %v2734_v15  ;;  %v14012_v23 = vld [vmem:[%s18966_s3] ss:$16 sps:$4 sm:$0xff]  }
 0x611   :  { %v2688_v22 = vpop.f32.mrf.mxu0  ;;  %v2729_v28 = vpop.f32.mrf.mxu1  ;;  %v14017_v4 = vld [vmem:[%s18969_s6 + $0xe4] ss:$16 sps:$4 sm:$0xff]  }
 0x612   :  { %14765 = vpow2.f32 %v11970_v47  ;;  %v19038_v47 = vld [vmem:[#allocation16_spill] sm:$0xff]  ;;  %v19039_v15 = vld [vmem:[#allocation18_spill] sm:$0xff] }
 0x613   :  { %14767 = vtanh.f32 %v2733_v41 }
 0x614   :  { %14769 = vpow2.f32 %v11971_v53 }
 0x61d   :  { %v14764_v5 = vpop.eup %14763 }
 0x61e   :  { %v2738_v49 = vadd.f32 1.0, %v14764_v5 }
 0x61f   :  { %v14766_v29 = vpop.eup %14765 }
 0x620   :  { %14771 = vrcp.f32 %v2738_v49  ;;  %v2744_v60 = vadd.f32 1.0, %v14766_v29  ;;  %v14768_v58 = vpop.eup %14767 }
 0x621   :  { %v14770_v38 = vpop.eup %14769 }
 0x622   :  { %14773 = vrcp.f32 %v2744_v60  ;;  %v2751_v9 = vadd.f32 1.0, %v14770_v38  ;;  %v19040_v60 = vld [vmem:[#allocation19_spill] sm:$0xff]  ;;  %v19041_v38 = vld [vmem:[#allocation17_spill] sm:$0xff] }
 0x624   :  { %14775 = vrcp.f32 %v2751_v9 }
 0x62d   :  { %v14772_v42 = vpop.eup %14771 }
 0x62e   :  { %v2755_v45 = vmul.f32 %v14772_v42, %v14768_v58 }
 0x62f   :  { %v14774_v19 = vpop.eup %14773 }
 0x630   :  { %v2754_v6 = vmul.f32 %v14774_v19, %v16109_v21  ;;  %v13996_v21 = vld [vmem:[%s18966_s3 + $0x64] ss:$16 sps:$4 sm:$0xff]  }
 0x631   :  { %v14776_v55 = vpop.eup %14775 }
 0x632   :  { %v16155_v32 = vadd.f32 %v2755_v45, %v2754_v6 }
 0x634   :  { %14777 = vtanh.f32 %v16155_v32 }
 0x641   :  { %v14778_v39 = vpop.eup %14777 }
 0x642   :  { %v2758_v35 = vmul.f32 %v14778_v39, %v14776_v55 }
 0x644   :  { %v2768_v31 = vpack.c.bf16 %v2758_v35, %v2758_v35  ;;  %v12883_v12 = vpack.c.bf16 %v2758_v35, %v16112_v7  ;;  %v14002_v7 = vld [vmem:[%s18966_s3 + $0x44] ss:$16 sps:$4 sm:$0xff]  }
 0x646   :  { %2994 = vmatmul.mubr.bf16.vlgmr.msra.gmra.mxu0 %v2768_v31  ;;  %12891 = vst [vmem:[#allocation5 + $0x10] sm:$0xff] %v12883_v12   ;;  %3035 = vmatmul.mubr.bf16.vlgmr.msra.gmra.mxu1 %v2768_v31 }
 0x647   :  { %3305 = vmatprep.mubr.bf16.mxu0 %v19032_v54  ;;  %3346 = vmatprep.mubr.bf16.mxu1 %v19032_v54 }
 0x648   :  { %3315 = vmatpush1.bf16.msra.mxu1 %v13967_v10  ;;  %3274 = vmatpush1.bf16.msra.mxu0 %v13970_v46 }
 0x649   :  { %3316 = vmatprep.subr.bf16.mxu1 %v13975_v25  ;;  %3275 = vmatprep.subr.bf16.mxu0 %v13978_v17 }
 0x64c   :  { %3317 = vmatpush1.bf16.msra.mxu1 %v13973_v48  ;;  %3276 = vmatpush1.bf16.msra.mxu0 %v13976_v24  ;;  %v14015_v24 = vld [vmem:[%s18969_s6 + $0xe0] ss:$16 sps:$4 sm:$0xff]  }
 0x64d   :  { %3318 = vmatprep.subr.bf16.mxu1 %v13981_v40  ;;  %3277 = vmatprep.subr.bf16.mxu0 %v13984_v56  ;;  %v14023_v56 = vld [vmem:[%s18969_s6 + $0xa4] ss:$16 sps:$4 sm:$0xff]  }
 0x650   :  { %3319 = vmatpush1.bf16.msra.mxu1 %v13979_v16  ;;  %3278 = vmatpush1.bf16.msra.mxu0 %v13982_v20  ;;  %v14018_v16 = vld [vmem:[%s18969_s6 + $0xc0] ss:$16 sps:$4 sm:$0xff]  }
 0x651   :  { %3320 = vmatprep.subr.bf16.mxu1 %v13987_v8  ;;  %3279 = vmatprep.subr.bf16.mxu0 %v13990_v13  ;;  %v14021_v20 = vld [vmem:[%s18969_s6 + $0xa0] ss:$16 sps:$4 sm:$0xff]   ;;  %v14026_v8 = vld [vmem:[%s18969_s6 + $0x84] ss:$16 sps:$4 sm:$0xff]  }
 0x652   :  { %v14029_v13 = vld [vmem:[%s18969_s6 + $0x64] ss:$16 sps:$4 sm:$0xff]  }
 0x654   :  { %3321 = vmatpush1.bf16.msra.mxu1 %v13985_v44  ;;  %3280 = vmatpush1.bf16.msra.mxu0 %v13988_v11  ;;  %v14024_v44 = vld [vmem:[%s18969_s6 + $0x80] ss:$16 sps:$4 sm:$0xff]  }
 0x655   :  { %3322 = vmatprep.subr.bf16.mxu1 %v13993_v27  ;;  %3281 = vmatprep.subr.bf16.mxu0 %v13996_v21  ;;  %v14027_v11 = vld [vmem:[%s18969_s6 + $0x60] ss:$16 sps:$4 sm:$0xff]   ;;  %v14032_v27 = vld [vmem:[%s18969_s6 + $0x44] ss:$16 sps:$4 sm:$0xff]  }
 0x656   :  { %v14035_v21 = vld [vmem:[%s18969_s6 + $0x24] ss:$16 sps:$4 sm:$0xff]  }
 0x658   :  { %3323 = vmatpush1.bf16.msra.mxu1 %v13991_v2  ;;  %3282 = vmatpush1.bf16.msra.mxu0 %v13994_v1  ;;  %v14030_v2 = vld [vmem:[%s18969_s6 + $0x40] ss:$16 sps:$4 sm:$0xff]  }
 0x659   :  { %3324 = vmatprep.subr.bf16.mxu1 %v13999_v18  ;;  %3283 = vmatprep.subr.bf16.mxu0 %v14002_v7  ;;  %v14033_v1 = vld [vmem:[%s18969_s6 + $0x20] ss:$16 sps:$4 sm:$0xff]   ;;  %v14038_v18 = vld [vmem:[%s18969_s6 + $0x4] ss:$16 sps:$4 sm:$0xff]  }
 0x65a   :  { %v14036_v7 = vld [vmem:[%s18969_s6] ss:$16 sps:$4 sm:$0xff]  }
 0x65c   :  { %3325 = vmatpush1.bf16.msra.mxu1 %v13997_v26  ;;  %3284 = vmatpush1.bf16.msra.mxu0 %v14000_v51  ;;  %v14041_v26 = vld [vmem:[%s18970_s7 + $0xe4] ss:$16 sps:$4 sm:$0xff]   ;;  %v14039_v51 = vld [vmem:[%s18970_s7 + $0xe0] ss:$16 sps:$4 sm:$0xff]  }
 0x65d   :  { %3326 = vmatprep.subr.bf16.mxu1 %v14005_v52  ;;  %3285 = vmatprep.subr.bf16.mxu0 %v14008_v34  ;;  %v14044_v52 = vld [vmem:[%s18970_s7 + $0xc4] ss:$16 sps:$4 sm:$0xff]   ;;  %v14042_v34 = vld [vmem:[%s18970_s7 + $0xc0] ss:$16 sps:$4 sm:$0xff]  }
 0x660   :  { %3327 = vmatpush1.bf16.msra.mxu1 %v14003_v33  ;;  %3286 = vmatpush1.bf16.msra.mxu0 %v14006_v30  ;;  %v14047_v33 = vld [vmem:[%s18970_s7 + $0xa4] ss:$16 sps:$4 sm:$0xff]   ;;  %v14045_v30 = vld [vmem:[%s18970_s7 + $0xa0] ss:$16 sps:$4 sm:$0xff]  }
 0x661   :  { %3328 = vmatprep.subr.bf16.mxu1 %v14011_v14  ;;  %3287 = vmatprep.subr.bf16.mxu0 %v14014_v50  ;;  %v14050_v14 = vld [vmem:[%s18970_s7 + $0x84] ss:$16 sps:$4 sm:$0xff]   ;;  %v14048_v50 = vld [vmem:[%s18970_s7 + $0x80] ss:$16 sps:$4 sm:$0xff]  }
 0x664   :  { %3329 = vmatpush1.bf16.msra.mxu1 %v14009_v59  ;;  %3288 = vmatpush1.bf16.msra.mxu0 %v14012_v23  ;;  %v14053_v59 = vld [vmem:[%s18970_s7 + $0x64] ss:$16 sps:$4 sm:$0xff]   ;;  %v14051_v23 = vld [vmem:[%s18970_s7 + $0x60] ss:$16 sps:$4 sm:$0xff]  }
 0x665   :  { %3923 = vmatprep.subr.bf16.mxu1 %v14017_v4  ;;  %v14056_v4 = vld [vmem:[%s18970_s7 + $0x44] ss:$16 sps:$4 sm:$0xff]  }
 0x706   :  { %v2995_v62 = vpop.f32.mrf.mxu0  ;;  %v3036_v57 = vpop.f32.mrf.mxu1 }
 0x707   :  { %v3043_v22 = vadd.f32 %v2995_v62, %v19038_v47  ;;  %v3045_v42 = vadd.f32 %v3036_v57, %v19041_v38  ;;  %v14054_v62 = vld [vmem:[%s18970_s7 + $0x40] ss:$16 sps:$4 sm:$0xff]   ;;  %v14059_v57 = vld [vmem:[%s18970_s7 + $0x24] ss:$16 sps:$4 sm:$0xff]  }
 0x708   :  { %v2997_v28 = vpop.f32.mrf.mxu0  ;;  %v3038_v43 = vpop.f32.mrf.mxu1  ;;  %v14057_v47 = vld [vmem:[%s18970_s7 + $0x20] ss:$16 sps:$4 sm:$0xff]  }
 0x709   :  { %v12004_v61 = vmul.f32 -1.442695, %v3043_v22  ;;  %v3044_v37 = vadd.f32 %v2997_v28, %v19039_v15  ;;  %v3046_v58 = vadd.f32 %v3038_v43, %v19040_v60  ;;  %v14062_v22 = vld [vmem:[%s18970_s7 + $0x4] ss:$16 sps:$4 sm:$0xff]   ;;  %v14060_v28 = vld [vmem:[%s18970_s7] ss:$16 sps:$4 sm:$0xff]  }
 0x70a   :  { %v2999_v41 = vpop.f32.mrf.mxu0  ;;  %v3040_v53 = vpop.f32.mrf.mxu1  ;;  %v14067_v43 = vld [vmem:[%s18972_s9] sm:$0xff]  }
 0x70b   :  { %14779 = vpow2.f32 %v12004_v61  ;;  %v12005_v5 = vmul.f32 -1.442695, %v3044_v37  ;;  %v12006_v45 = vmul.f32 -1.442695, %v3046_v58  ;;  %v19042_v37 = vld [vmem:[#allocation22_spill] sm:$0xff]  ;;  %v19043_v53 = vld [vmem:[#allocation20_spill] sm:$0xff] }
 0x70c   :  { %v3000_v49 = vpop.f32.mrf.mxu0  ;;  %v3041_v29 = vpop.f32.mrf.mxu1  ;;  %v360_v41 = vadd.f32 %v19042_v37, %v15550_v63  ;;  %v16463_v37 = vld [vmem:[%s18969_s6 + $0x68] ss:$16 sps:$4 sm:$0xff]  }
 0x70d   :  { %14781 = vpow2.f32 %v12005_v5 }
 0x70e   :  { %14783 = vtanh.f32 %v3045_v42 }
 0x70f   :  { %14785 = vpow2.f32 %v12006_v45 }
 0x718   :  { %v14780_v19 = vpop.eup %14779 }
 0x719   :  { %v3050_v9 = vadd.f32 1.0, %v14780_v19 }
 0x71a   :  { %v14782_v6 = vpop.eup %14781 }
 0x71b   :  { %14787 = vrcp.f32 %v3050_v9  ;;  %v3056_v55 = vadd.f32 1.0, %v14782_v6  ;;  %v14784_v39 = vpop.eup %14783  ;;  %v19044_v6 = vld [vmem:[#allocation23_spill] sm:$0xff] }
 0x71c   :  { %v14786_v35 = vpop.eup %14785 }
 0x71d   :  { %14789 = vrcp.f32 %v3056_v55  ;;  %v3063_v10 = vadd.f32 1.0, %v14786_v35  ;;  %v433_v55 = vadd.f32 %v19044_v6, %v15552_v0  ;;  %v19045_v35 = vld [vmem:[#allocation21_spill] sm:$0xff] }
 0x71e   :  { %v16538_v6 = vld [vmem:[%s18970_s7 + $0xac] ss:$16 sps:$4 sm:$0xff]  }
 0x71f   :  { %14791 = vrcp.f32 %v3063_v10 }
 0x728   :  { %v14788_v31 = vpop.eup %14787 }
 0x729   :  { %v3067_v12 = vmul.f32 %v14788_v31, %v14784_v39 }
 0x72a   :  { %v14790_v36 = vpop.eup %14789 }
 0x72b   :  { %v3066_v3 = vmul.f32 %v14790_v36, %v16155_v32  ;;  %v14020_v32 = vld [vmem:[%s18969_s6 + $0xc4] ss:$16 sps:$4 sm:$0xff]  }
 0x72c   :  { %v14792_v25 = vpop.eup %14791 }
 0x72d   :  { %v16265_v46 = vadd.f32 %v3067_v12, %v3066_v3 }
 0x72f   :  { %14793 = vtanh.f32 %v16265_v46 }
 0x73c   :  { %v14794_v48 = vpop.eup %14793 }
 0x73d   :  { %v16268_v17 = vmul.f32 %v14794_v48, %v14792_v25 }
 0x73f   :  { %v3080_v40 = vpack.c.bf16 %v16268_v17, %v16268_v17 }
 0x741   :  { %3306 = vmatmul.mubr.bf16.vlgmr.msra.gmra.mxu0 %v3080_v40  ;;  %3347 = vmatmul.mubr.bf16.vlgmr.msra.gmra.mxu1 %v3080_v40  ;;  %v19046_v40 = vld [vmem:[#allocation26_spill] sm:$0xff] }
 0x742   :  { %3924 = vmatpush1.bf16.msra.mxu1 %v14015_v24  ;;  %3955 = vmatprep.mubr.bf16.mxu1 %v19032_v54 }
 0x743   :  { %3925 = vmatprep.subr.bf16.mxu1 %v14020_v32  ;;  %13169 = vmatprep.mubr.bf16.mxu0 %v14067_v43  ;;  %v16448_v43 = vld [vmem:[%s18969_s6 + $0x88] ss:$16 sps:$4 sm:$0xff]  }
 0x746   :  { %3926 = vmatpush1.bf16.msra.mxu1 %v14018_v16 }
 0x747   :  { %3927 = vmatprep.subr.bf16.mxu1 %v14023_v56 }
 0x74a   :  { %3928 = vmatpush1.bf16.msra.mxu1 %v14021_v20  ;;  %v19047_v20 = vld [vmem:[#allocation28_spill] sm:$0xff] }
 0x74b   :  { %3929 = vmatprep.subr.bf16.mxu1 %v14026_v8 }
 0x74e   :  { %3930 = vmatpush1.bf16.msra.mxu1 %v14024_v44 }
 0x74f   :  { %3931 = vmatprep.subr.bf16.mxu1 %v14029_v13 }
 0x752   :  { %3932 = vmatpush1.bf16.msra.mxu1 %v14027_v11 }
 0x753   :  { %3933 = vmatprep.subr.bf16.mxu1 %v14032_v27 }
 0x756   :  { %3934 = vmatpush1.bf16.msra.mxu1 %v14030_v2  ;;  %v15040_v2 = vmov 0.0  }
 0x757   :  { %3935 = vmatprep.subr.bf16.mxu1 %v14035_v21 }
 0x75a   :  { %3936 = vmatpush1.bf16.msra.mxu1 %v14033_v1 }
 0x75b   :  { %3937 = vmatprep.subr.bf16.mxu1 %v14038_v18 }
 0x75e   :  { %3938 = vmatpush1.bf16.msra.mxu1 %v14036_v7 }
 0x75f   :  { %4201 = vmatprep.subr.bf16.mxu1 %v14041_v26 }
 0x761   :  { %3956 = vmatmul.mubr.bf16.vlgmr.msra.gmra.mxu1 %v19032_v54 }
 0x762   :  { %4233 = vmatprep.mubr.bf16.mxu1 %v19032_v54  ;;  %4202 = vmatpush1.bf16.msra.mxu1 %v14039_v51 }
 0x763   :  { %4203 = vmatprep.subr.bf16.mxu1 %v14044_v52 }
 0x766   :  { %4204 = vmatpush1.bf16.msra.mxu1 %v14042_v34  ;;  %v14064_v34 = vld [vmem:[#allocation5 + $0x10] sm:$0xff]  }
 0x767   :  { %4205 = vmatprep.subr.bf16.mxu1 %v14047_v33  ;;  %v14065_v33 = vld [vmem:[#allocation5 + $0x8] sm:$0xff]  }
 0x76a   :  { %4206 = vmatpush1.bf16.msra.mxu1 %v14045_v30  ;;  %v14066_v30 = vld [vmem:[#allocation5] sm:$0xff]  }
 0x76b   :  { %4207 = vmatprep.subr.bf16.mxu1 %v14050_v14  ;;  %v14068_v14 = vld [vmem:[%s18972_s9 + $0x8] sm:$0xff]  }
 0x76e   :  { %4208 = vmatpush1.bf16.msra.mxu1 %v14048_v50  ;;  %v16404_v50 = vld [vmem:[%s18969_s6 + $0xe8] ss:$16 sps:$4 sm:$0xff]  }
 0x76f   :  { %4209 = vmatprep.subr.bf16.mxu1 %v14053_v59  ;;  %v14075_v59 = vld [vmem:[%s18972_s9 + $0x10] sm:$0xff]  }
 0x772   :  { %4210 = vmatpush1.bf16.msra.mxu1 %v14051_v23  ;;  %v16412_v23 = vld [vmem:[%s18969_s6 + $0xcc] ss:$16 sps:$4 sm:$0xff]  }
 0x773   :  { %4211 = vmatprep.subr.bf16.mxu1 %v14056_v4  ;;  %v16418_v4 = vld [vmem:[%s18969_s6 + $0xc8] ss:$16 sps:$4 sm:$0xff]  }
 0x776   :  { %4212 = vmatpush1.bf16.msra.mxu1 %v14054_v62  ;;  %v16424_v62 = vld [vmem:[%s18969_s6 + $0xac] ss:$16 sps:$4 sm:$0xff]  }
 0x777   :  { %4213 = vmatprep.subr.bf16.mxu1 %v14059_v57  ;;  %v14076_v57 = vld [vmem:[%s18972_s9 + $0x18] sm:$0xff]  }
 0x77a   :  { %4214 = vmatpush1.bf16.msra.mxu1 %v14057_v47  ;;  %v16433_v47 = vld [vmem:[%s18969_s6 + $0xa8] ss:$16 sps:$4 sm:$0xff]  }
 0x77b   :  { %4215 = vmatprep.subr.bf16.mxu1 %v14062_v22  ;;  %v14083_v22 = vld [vmem:[%s18972_s9 + $0x20] sm:$0xff]  }
 0x77e   :  { %4216 = vmatpush1.bf16.msra.mxu1 %v14060_v28  ;;  %v16442_v28 = vld [vmem:[%s18969_s6 + $0x8c] ss:$16 sps:$4 sm:$0xff]  }
 0x77f   :  { %13185 = vmatprep.subr.bf16.mxu1 %v15040_v2 }
 0x801   :  { %v3307_v61 = vpop.f32.mrf.mxu0  ;;  %v3348_v15 = vpop.f32.mrf.mxu1 }
 0x802   :  { %v3355_v5 = vadd.f32 %v3307_v61, %v19043_v53  ;;  %v3357_v31 = vadd.f32 %v3348_v15, %v19045_v35  ;;  %v16454_v61 = vld [vmem:[%s18969_s6 + $0x6c] ss:$16 sps:$4 sm:$0xff]   ;;  %v16556_v35 = vld [vmem:[%s18970_s7 + $0x88] ss:$16 sps:$4 sm:$0xff]  }
 0x803   :  { %v3309_v49 = vpop.f32.mrf.mxu0  ;;  %v3350_v29 = vpop.f32.mrf.mxu1  ;;  %v14084_v15 = vld [vmem:[%s18972_s9 + $0x28] sm:$0xff]  }
 0x804   :  { %v12039_v60 = vmul.f32 -1.442695, %v3355_v5  ;;  %v3356_v58 = vadd.f32 %v3309_v49, %v360_v41  ;;  %v3358_v39 = vadd.f32 %v3350_v29, %v433_v55  ;;  %v14091_v41 = vld [vmem:[%s18972_s9 + $0x30] sm:$0xff]   ;;  %v16472_v53 = vld [vmem:[%s18969_s6 + $0x4c] ss:$16 sps:$4 sm:$0xff]  }
 0x805   :  { %v3311_v38 = vpop.f32.mrf.mxu0  ;;  %v3352_v42 = vpop.f32.mrf.mxu1  ;;  %v16478_v5 = vld [vmem:[%s18969_s6 + $0x48] ss:$16 sps:$4 sm:$0xff]   ;;  %v16484_v49 = vld [vmem:[%s18969_s6 + $0x2c] ss:$16 sps:$4 sm:$0xff]  }
 0x806   :  { %14795 = vpow2.f32 %v12039_v60  ;;  %v12040_v45 = vmul.f32 -1.442695, %v3356_v58  ;;  %v12041_v63 = vmul.f32 -1.442695, %v3358_v39  ;;  %v14092_v29 = vld [vmem:[%s18972_s9 + $0x38] sm:$0xff]  }
 0x807   :  { %v3312_v19 = vpop.f32.mrf.mxu0  ;;  %v3353_v9 = vpop.f32.mrf.mxu1  ;;  %v16493_v60 = vld [vmem:[%s18969_s6 + $0x28] ss:$16 sps:$4 sm:$0xff]   ;;  %v16499_v58 = vld [vmem:[%s18969_s6 + $0xc] ss:$16 sps:$4 sm:$0xff]  }
 0x808   :  { %14797 = vpow2.f32 %v12040_v45  ;;  %v16505_v38 = vld [vmem:[%s18969_s6 + $0x8] ss:$16 sps:$4 sm:$0xff]   ;;  %v16512_v42 = vld [vmem:[%s18970_s7 + $0xec] ss:$16 sps:$4 sm:$0xff]  }
 0x809   :  { %14799 = vtanh.f32 %v3357_v31  ;;  %v16518_v45 = vld [vmem:[%s18970_s7 + $0xe8] ss:$16 sps:$4 sm:$0xff]   ;;  %v16524_v19 = vld [vmem:[%s18970_s7 + $0xcc] ss:$16 sps:$4 sm:$0xff]  }
 0x80a   :  { %14801 = vpow2.f32 %v12041_v63  ;;  %v16531_v9 = vld [vmem:[%s18970_s7 + $0xc8] ss:$16 sps:$4 sm:$0xff]   ;;  %v16550_v39 = vld [vmem:[%s18970_s7 + $0x8c] ss:$16 sps:$4 sm:$0xff]  }
 0x80b   :  { %v16544_v55 = vld [vmem:[%s18970_s7 + $0xa8] ss:$16 sps:$4 sm:$0xff]   ;;  %v16562_v31 = vld [vmem:[%s18970_s7 + $0x6c] ss:$16 sps:$4 sm:$0xff]  }
 0x80c   :  { %v16568_v63 = vld [vmem:[%s18970_s7 + $0x68] ss:$16 sps:$4 sm:$0xff]  }
 0x813   :  { %v14796_v12 = vpop.eup %14795 }
 0x814   :  { %v3362_v36 = vadd.f32 1.0, %v14796_v12  ;;  %v16574_v12 = vld [vmem:[%s18970_s7 + $0x4c] ss:$16 sps:$4 sm:$0xff]  }
 0x815   :  { %v14798_v10 = vpop.eup %14797 }
 0x816   :  { %14803 = vrcp.f32 %v3362_v36  ;;  %v3368_v3 = vadd.f32 1.0, %v14798_v10  ;;  %v14800_v25 = vpop.eup %14799  ;;  %v16580_v36 = vld [vmem:[%s18970_s7 + $0x48] ss:$16 sps:$4 sm:$0xff]   ;;  %v16586_v10 = vld [vmem:[%s18970_s7 + $0x2c] ss:$16 sps:$4 sm:$0xff]  }
 0x817   :  { %v14802_v24 = vpop.eup %14801 }
 0x818   :  { %14805 = vrcp.f32 %v3368_v3  ;;  %v3375_v13 = vadd.f32 1.0, %v14802_v24  ;;  %v16592_v3 = vld [vmem:[%s18970_s7 + $0x28] ss:$16 sps:$4 sm:$0xff]  }
 0x81a   :  { %14807 = vrcp.f32 %v3375_v13 }
 0x821   :  { %v3957_v48 = vpop.f32.mrf.mxu1 }
 0x822   :  { %v16378_v32 = vadd.f32 %v3957_v48, %v19046_v40  ;;  %v16604_v48 = vld [vmem:[%s18970_s7 + $0x8] ss:$16 sps:$4 sm:$0xff]   ;;  %v14124_v40 = vld [vmem:[#allocation5 + $0x10] sm:$0xff]  }
 0x823   :  { %v14804_v16 = vpop.eup %14803  ;;  %v3959_v0 = vpop.f32.mrf.mxu1 }
 0x824   :  { %v3379_v56 = vmul.f32 %v14804_v16, %v14800_v25  ;;  %v16381_v8 = vadd.f32 %v3959_v0, %v19047_v20  ;;  %v16598_v25 = vld [vmem:[%s18970_s7 + $0xc] ss:$16 sps:$4 sm:$0xff]   ;;  %v14126_v0 = vld [vmem:[#allocation5] sm:$0xff]  }
 0x825   :  { %v14806_v44 = vpop.eup %14805  ;;  %v3961_v11 = vpop.f32.mrf.mxu1  ;;  %v14125_v16 = vld [vmem:[#allocation5 + $0x8] sm:$0xff]  }
 0x826   :  { %v3378_v27 = vmul.f32 %v14806_v44, %v16265_v46 }
 0x827   :  { %v3962_v21 = vpop.f32.mrf.mxu1  ;;  %v14808_v18 = vpop.eup %14807 }
 0x828   :  { %v16385_v1 = vadd.f32 %v3379_v56, %v3378_v27 }
 0x82a   :  { %14809 = vtanh.f32 %v16385_v1 }
 0x837   :  { %v14810_v7 = vpop.eup %14809 }
 0x838   :  { %v3382_v26 = vmul.f32 %v14810_v7, %v14808_v18 }
 0x83a   :  { %v12888_v51 = vpack.c.bf16 %v3382_v26, %v16268_v17  ;;  %v16389_v52 = vpack.c.bf16 %v3382_v26, %v3382_v26  ;;  %v16395_v17 = vld [vmem:[%s18969_s6 + $0xec] ss:$16 sps:$4 sm:$0xff]  }
 0x83c   :  { %12892 = vst [vmem:[#allocation5 + $0x18] sm:$0xff] %v12888_v51   ;;  %4234 = vmatmul.mubr.bf16.vlgmr.msra.gmra.mxu1 %v16389_v52 }
 0x83d   :  { %13201 = vmatprep.mubr.msk.bf16.mxu1 %vm15041_vm0, %v15040_v2 }
 0x843   :  { %v14063_v46 = vld [vmem:[#allocation5 + $0x18] sm:$0xff]  }
 0x844   :  { %13161 = vmatprep.subr.bf16.mxu0 %v14063_v46  ;;  %v14123_v24 = vld [vmem:[#allocation5 + $0x18] sm:$0xff]  }
 0x845   :  { %13162 = vmatpush3.bf16.xpose.msra.mxu0 %v14063_v46 }
 0x846   :  { %13163 = vmatprep.subr.bf16.mxu0 %v14064_v34 }
 0x84d   :  { %13164 = vmatpush3.bf16.xpose.msra.mxu0 %v14064_v34 }
 0x84e   :  { %13165 = vmatprep.subr.bf16.mxu0 %v14065_v33 }
 0x855   :  { %13166 = vmatpush3.bf16.xpose.msra.mxu0 %v14065_v33 }
 0x856   :  { %13167 = vmatprep.subr.bf16.mxu0 %v14066_v30 }
 0x85d   :  { %13168 = vmatpush3.bf16.xpose.msra.mxu0 %v14066_v30 }
 0x85e   :  { %3964 = vmatprep.subr.bf16.mxu0 %v16395_v17 }
 0x864   :  { %13170 = vmatmul.mubr.bf16.vlgmr.msra.gmra.mxu0 %v14068_v14 }
 0x865   :  { %3965 = vmatpush1.bf16.msra.mxu0 %v16404_v50  ;;  %13173 = vmatprep.mubr.bf16.mxu0 %v14075_v59 }
 0x866   :  { %3966 = vmatprep.subr.bf16.mxu0 %v16412_v23 }
 0x869   :  { %3967 = vmatpush1.bf16.msra.mxu0 %v16418_v4 }
 0x86a   :  { %3968 = vmatprep.subr.bf16.mxu0 %v16424_v62 }
 0x86c   :  { %13174 = vmatmul.mubr.bf16.gmra.mxu0 %v14076_v57 }
 0x86d   :  { %3969 = vmatpush1.bf16.msra.mxu0 %v16433_v47  ;;  %13177 = vmatprep.mubr.bf16.mxu0 %v14083_v22 }
 0x86e   :  { %3970 = vmatprep.subr.bf16.mxu0 %v16442_v28 }
 0x871   :  { %3971 = vmatpush1.bf16.msra.mxu0 %v16448_v43 }
 0x872   :  { %3972 = vmatprep.subr.bf16.mxu0 %v16454_v61 }
 0x874   :  { %13178 = vmatmul.mubr.bf16.gmra.mxu0 %v14084_v15 }
 0x875   :  { %3973 = vmatpush1.bf16.msra.mxu0 %v16463_v37  ;;  %13181 = vmatprep.mubr.bf16.mxu0 %v14091_v41 }
 0x876   :  { %3974 = vmatprep.subr.bf16.mxu0 %v16472_v53 }
 0x879   :  { %3975 = vmatpush1.bf16.msra.mxu0 %v16478_v5 }
 0x87a   :  { %3976 = vmatprep.subr.bf16.mxu0 %v16484_v49 }
 0x87c   :  { %13182 = vmatmul.mubr.bf16.gmra.mxu0 %v14092_v29 }
 0x87d   :  { %3977 = vmatpush1.bf16.msra.mxu0 %v16493_v60  ;;  %3996 = vmatprep.mubr.bf16.mxu0 %v19032_v54 }
 0x87e   :  { %3978 = vmatprep.subr.bf16.mxu0 %v16499_v58 }
 0x881   :  { %3979 = vmatpush1.bf16.msra.mxu0 %v16505_v38 }
 0x882   :  { %4242 = vmatprep.subr.bf16.mxu0 %v16512_v42 }
 0x884   :  { %3997 = vmatmul.mubr.bf16.vlgmr.msra.gmra.mxu0 %v19032_v54 }
 0x885   :  { %4243 = vmatpush1.bf16.msra.mxu0 %v16518_v45  ;;  %4274 = vmatprep.mubr.bf16.mxu0 %v19032_v54 }
 0x886   :  { %4244 = vmatprep.subr.bf16.mxu0 %v16524_v19 }
 0x889   :  { %4245 = vmatpush1.bf16.msra.mxu0 %v16531_v9 }
 0x88a   :  { %4246 = vmatprep.subr.bf16.mxu0 %v16538_v6 }
 0x88d   :  { %4247 = vmatpush1.bf16.msra.mxu0 %v16544_v55 }
 0x88e   :  { %4248 = vmatprep.subr.bf16.mxu0 %v16550_v39 }
 0x891   :  { %4249 = vmatpush1.bf16.msra.mxu0 %v16556_v35 }
 0x892   :  { %4250 = vmatprep.subr.bf16.mxu0 %v16562_v31 }
 0x895   :  { %4251 = vmatpush1.bf16.msra.mxu0 %v16568_v63 }
 0x896   :  { %4252 = vmatprep.subr.bf16.mxu0 %v16574_v12 }
 0x899   :  { %4253 = vmatpush1.bf16.msra.mxu0 %v16580_v36 }
 0x89a   :  { %4254 = vmatprep.subr.bf16.mxu0 %v16586_v10 }
 0x89d   :  { %4255 = vmatpush1.bf16.msra.mxu0 %v16592_v3 }
 0x89e   :  { %4256 = vmatprep.subr.bf16.mxu0 %v16598_v25 }
 0x8a1   :  { %4257 = vmatpush1.bf16.msra.mxu0 %v16604_v48 }
 0x8a2   :  { %13205 = vmatprep.subr.bf16.mxu0 %v15040_v2 }
 0x8a4   :  { %4275 = vmatmul.mubr.bf16.vlgmr.msra.gmra.mxu0 %v16389_v52 }
 0x8a5   :  { %13206 = vmatpush3.bf16.msra.mxu0 %v14123_v24  ;;  %13213 = vmatprep.mubr.msk.bf16.mxu0 %vm15041_vm0, %v15040_v2 }
 0x8a6   :  { %13207 = vmatprep.subr.bf16.mxu0 %v15040_v2 }
 0x8a9   :  { %13208 = vmatpush3.bf16.msra.mxu0 %v14124_v40 }
 0x8aa   :  { %13209 = vmatprep.subr.bf16.mxu0 %v15040_v2 }
 0x8ad   :  { %13210 = vmatpush3.bf16.msra.mxu0 %v14125_v16 }
 0x8ae   :  { %13211 = vmatprep.subr.bf16.mxu0 %v15040_v2 }
 0x8b1   :  { %13212 = vmatpush3.bf16.msra.mxu0 %v14126_v0 }
 0x8b2   :  { %13237 = vmatprep.subr.bf16.mxu0 %v15040_v2 }
 0x8fc   :  { %v4235_v56 = vpop.f32.mrf.mxu1 }
 0x8fd   :  { %v4283_v20 = vadd.f32 %v4235_v56, %v16378_v32 }
 0x8fe   :  { %v4237_v44 = vpop.f32.mrf.mxu1 }
 0x8ff   :  { %v4284_v13 = vadd.f32 %v4237_v44, %v16381_v8 }
 0x900   :  { %v4239_v11 = vpop.f32.mrf.mxu1 }
 0x902   :  { %v4240_v27 = vpop.f32.mrf.mxu1 }
 0x924   :  { %v13171_v21 = vpop.f32.mrf.mxu0 }
 0x925   :  { %v12856_v18 = vpack.c.bf16 %v13171_v21, %v13171_v21 }
 0x926   :  { %v3563_v7 = vpop.f32.mrf.mxu0 }
 0x927   :  { %3693 = vst.msk [vmem:[#allocation6 + $0x8] sm:$0xf] %vm3690_vm1, %v12856_v18  ;;  %v12854_v26 = vpack.c.bf16 %v3563_v7, %v3563_v7 }
 0x928   :  { %v13172_v32 = vpop.f32.mrf.mxu0 }
 0x929   :  { %3691 = vst.msk [vmem:[#allocation6] sm:$0xf] %vm3690_vm1, %v12854_v26  ;;  %v12857_v51 = vpack.c.bf16 %v13172_v32, %v13172_v32 }
 0x92a   :  { %v3566_v52 = vpop.f32.mrf.mxu0 }
 0x92b   :  { %3694 = vst.msk [vmem:[#allocation6 + $0xc] sm:$0xf] %vm3690_vm1, %v12857_v51  ;;  %v12855_v46 = vpack.c.bf16 %v3566_v52, %v3566_v52 }
 0x92c   :  { %v13175_v34 = vpop.f32.mrf.mxu0 }
 0x92d   :  { %3692 = vst.msk [vmem:[#allocation6 + $0x4] sm:$0xf] %vm3690_vm1, %v12855_v46  ;;  %v12860_v8 = vpack.c.bf16 %v13175_v34, %v13175_v34 }
 0x92e   :  { %v3579_v33 = vpop.f32.mrf.mxu0 }
 0x92f   :  { %3697 = vst.msk [vmem:[#allocation6 + $0x18] sm:$0xf] %vm3690_vm1, %v12860_v8  ;;  %v12858_v30 = vpack.c.bf16 %v3579_v33, %v3579_v33  ;;  %v12142_v33 = vmul.f32 -1.442695, %v4283_v20 }
 0x930   :  { %v13176_v14 = vpop.f32.mrf.mxu0 }
 0x931   :  { %3695 = vst.msk [vmem:[#allocation6 + $0x10] sm:$0xf] %vm3690_vm1, %v12858_v30  ;;  %v12861_v59 = vpack.c.bf16 %v13176_v14, %v13176_v14  ;;  %v12143_v30 = vmul.f32 -1.442695, %v4284_v13 }
 0x932   :  { %v3582_v57 = vpop.f32.mrf.mxu0 }
 0x933   :  { %3698 = vst.msk [vmem:[#allocation6 + $0x1c] sm:$0xf] %vm3690_vm1, %v12861_v59  ;;  %v12859_v22 = vpack.c.bf16 %v3582_v57, %v3582_v57  ;;  %14811 = vpow2.f32 %v12143_v30 }
 0x934   :  { %v13179_v15 = vpop.f32.mrf.mxu0  ;;  %14813 = vpow2.f32 %v12142_v33 }
 0x935   :  { %3696 = vst.msk [vmem:[#allocation6 + $0x14] sm:$0xf] %vm3690_vm1, %v12859_v22  ;;  %v12864_v41 = vpack.c.bf16 %v13179_v15, %v13179_v15 }
 0x936   :  { %v3595_v29 = vpop.f32.mrf.mxu0 }
 0x937   :  { %3701 = vst.msk [vmem:[#allocation6 + $0x28] sm:$0xf] %vm3690_vm1, %v12864_v41  ;;  %v12862_v24 = vpack.c.bf16 %v3595_v29, %v3595_v29 }
 0x938   :  { %v13180_v40 = vpop.f32.mrf.mxu0 }
 0x939   :  { %3699 = vst.msk [vmem:[#allocation6 + $0x20] sm:$0xf] %vm3690_vm1, %v12862_v24  ;;  %v12865_v16 = vpack.c.bf16 %v13180_v40, %v13180_v40  ;;  %v14133_v24 = vld [vmem:[#allocation6 + $0x8] sm:$0xff]  }
 0x93a   :  { %v3598_v0 = vpop.f32.mrf.mxu0  ;;  %v14131_v22 = vld [vmem:[#allocation6 + $0x18] sm:$0xff]   ;;  %v19048_v40 = vld [vmem:[#allocation27_spill] sm:$0xff] }
 0x93b   :  { %3702 = vst.msk [vmem:[#allocation6 + $0x2c] sm:$0xf] %vm3690_vm1, %v12865_v16  ;;  %v12863_v56 = vpack.c.bf16 %v3598_v0, %v3598_v0 }
 0x93c   :  { %v13183_v44 = vpop.f32.mrf.mxu0  ;;  %v14132_v13 = vld [vmem:[#allocation6 + $0x10] sm:$0xff]  }
 0x93d   :  { %3700 = vst.msk [vmem:[#allocation6 + $0x24] sm:$0xf] %vm3690_vm1, %v12863_v56  ;;  %v12868_v11 = vpack.c.bf16 %v13183_v44, %v13183_v44  ;;  %v19049_v56 = vld [vmem:[#allocation29_spill] sm:$0xff] }
 0x93e   :  { %v3611_v27 = vpop.f32.mrf.mxu0 }
 0x93f   :  { %3705 = vst.msk [vmem:[#allocation6 + $0x38] sm:$0xf] %vm3690_vm1, %v12868_v11  ;;  %v12866_v21 = vpack.c.bf16 %v3611_v27, %v3611_v27 }
 0x940   :  { %v13184_v18 = vpop.f32.mrf.mxu0  ;;  %v14812_v20 = vpop.eup %14811 }
 0x941   :  { %3703 = vst.msk [vmem:[#allocation6 + $0x30] sm:$0xf] %vm3690_vm1, %v12866_v21  ;;  %v12869_v7 = vpack.c.bf16 %v13184_v18, %v13184_v18  ;;  %v14814_v15 = vpop.eup %14813  ;;  %v4296_v41 = vadd.f32 1.0, %v14812_v20  ;;  %v14134_v21 = vld [vmem:[#allocation6] sm:$0xff]   ;;  %v14135_v20 = vld [vmem:[%s18974_s11 + $0x38] sm:$0xff]  }
 0x942   :  { %v3614_v26 = vpop.f32.mrf.mxu0  ;;  %v14129_v59 = vld [vmem:[#allocation6 + $0x28] sm:$0xff]   ;;  %v4290_v29 = vadd.f32 1.0, %v14814_v15 }
 0x943   :  { %3706 = vst.msk [vmem:[#allocation6 + $0x3c] sm:$0xf] %vm3690_vm1, %v12869_v7  ;;  %v12867_v32 = vpack.c.bf16 %v3614_v26, %v3614_v26  ;;  %14815 = vrcp.f32 %v4296_v41  ;;  %v14137_v15 = vld [vmem:[%s18974_s11 + $0x28] sm:$0xff]   ;;  %v14138_v41 = vld [vmem:[%s18974_s11 + $0x20] sm:$0xff]  }
 0x944   :  { %v3998_v51 = vpop.f32.mrf.mxu0  ;;  %v14130_v57 = vld [vmem:[#allocation6 + $0x20] sm:$0xff]   ;;  %14817 = vrcp.f32 %v4290_v29  ;;  %v14139_v29 = vld [vmem:[%s18974_s11 + $0x18] sm:$0xff]  }
 0x945   :  { %3704 = vst.msk [vmem:[#allocation6 + $0x34] sm:$0xf] %vm3690_vm1, %v12867_v32  ;;  %v4007_v16 = vadd.f32 %v3998_v51, %v19048_v40  ;;  %v14141_v40 = vld [vmem:[%s18974_s11 + $0x8] sm:$0xff]  }
 0x946   :  { %v4000_v52 = vpop.f32.mrf.mxu0 }
 0x947   :  { %v4008_v44 = vadd.f32 %v4000_v52, %v19049_v56 }
 0x948   :  { %v4002_v46 = vpop.f32.mrf.mxu0 }
 0x94a   :  { %v4003_v34 = vpop.f32.mrf.mxu0  ;;  %v14127_v8 = vld [vmem:[#allocation6 + $0x38] sm:$0xff]  }
 0x94b   :  { %13186 = vmatpush3.bf16.msra.mxu1 %v14127_v8 }
 0x94c   :  { %13187 = vmatprep.subr.bf16.mxu1 %v15040_v2  ;;  %v14128_v14 = vld [vmem:[#allocation6 + $0x30] sm:$0xff]  }
 0x94f   :  { %13188 = vmatpush3.bf16.msra.mxu1 %v14128_v14 }
 0x950   :  { %13189 = vmatprep.subr.bf16.mxu1 %v15040_v2  ;;  %v14816_v51 = vpop.eup %14815 }
 0x951   :  { %v14818_v46 = vpop.eup %14817  ;;  %v4306_v52 = vmul.f32 %v14816_v51, %v16385_v1  ;;  %v14136_v1 = vld [vmem:[%s18974_s11 + $0x30] sm:$0xff]  }
 0x953   :  { %13190 = vmatpush3.bf16.msra.mxu1 %v14129_v59 }
 0x954   :  { %13191 = vmatprep.subr.bf16.mxu1 %v15040_v2 }
 0x957   :  { %13192 = vmatpush3.bf16.msra.mxu1 %v14130_v57 }
 0x958   :  { %13193 = vmatprep.subr.bf16.mxu1 %v15040_v2 }
 0x95b   :  { %13194 = vmatpush3.bf16.msra.mxu1 %v14131_v22 }
 0x95c   :  { %13195 = vmatprep.subr.bf16.mxu1 %v15040_v2 }
 0x95f   :  { %13196 = vmatpush3.bf16.msra.mxu1 %v14132_v13 }
 0x960   :  { %13197 = vmatprep.subr.bf16.mxu1 %v15040_v2 }
 0x963   :  { %13198 = vmatpush3.bf16.msra.mxu1 %v14133_v24  ;;  %v14140_v24 = vld [vmem:[%s18974_s11 + $0x10] sm:$0xff]  }
 0x964   :  { %v4276_v0 = vpop.f32.mrf.mxu0  ;;  %13199 = vmatprep.subr.bf16.mxu1 %v15040_v2 }
 0x965   :  { %v4285_v11 = vadd.f32 %v4276_v0, %v4007_v16  ;;  %v14142_v16 = vld [vmem:[%s18974_s11] sm:$0xff]   ;;  %v19050_v0 = vlaneseq }
 0x966   :  { %v4278_v27 = vpop.f32.mrf.mxu0 }
 0x967   :  { %14819 = vtanh.f32 %v4285_v11  ;;  %v4286_v18 = vadd.f32 %v4278_v27, %v4008_v44  ;;  %13200 = vmatpush3.bf16.msra.mxu1 %v14134_v21  ;;  %v3710_v56 = vand.u32 127, %v19050_v0  ;;  %v19051_v11 = vld [vmem:[#allocation10_spill] sm:$0xff]  ;;  %v14147_v0 = vld [vmem:[%s18973_s10 + $0x18] sm:$0xff]   ;;  %v14676_v27 = vld [vmem:[%s18973_s10 + $0x30] sm:$0xff]  }
 0x968   :  { %v4280_v7 = vpop.f32.mrf.mxu0  ;;  %13217 = vmatprep.subr.bf16.mxu1 %v15040_v2 }
 0x969   :  { %v12144_v26 = vmul.f32 -1.442695, %v4286_v18  ;;  %v3715_v44 = vand.u32 7, %v3710_v56  ;;  %v14148_v56 = vld [vmem:[%s18973_s10 + $0x10] sm:$0xff]  }
 0x96a   :  { %v4281_v32 = vpop.f32.mrf.mxu0 }
 0x96b   :  { %14821 = vpow2.f32 %v12144_v26  ;;  %vm16690_vm2 = vcmp.eq.s32.totalorder %v3715_v44, %v19051_v11  ;;  %v14149_v44 = vld [vmem:[%s18973_s10 + $0x8] sm:$0xff]   ;;  %v14150_v11 = vld [vmem:[%s18973_s10] sm:$0xff]  }
 0x974   :  { %v14820_v34 = vpop.eup %14819 }
 0x975   :  { %v4307_v8 = vmul.f32 %v14820_v34, %v14818_v46 }
 0x977   :  { %v16647_v33 = vadd.f32 %v4307_v8, %v4306_v52 }
 0x978   :  { %v14822_v30 = vpop.eup %14821 }
 0x979   :  { %v4303_v14 = vadd.f32 1.0, %v14822_v30  ;;  %14823 = vtanh.f32 %v16647_v33 }
 0x97b   :  { %14825 = vrcp.f32 %v4303_v14 }
 0x986   :  { %v14824_v59 = vpop.eup %14823 }
 0x988   :  { %v14826_v57 = vpop.eup %14825 }
 0x989   :  { %v4310_v22 = vmul.f32 %v14826_v57, %v14824_v59 }
 0x98b   :  { %v16653_v13 = vpack.c.bf16 %v4310_v22, %v4310_v22 }
 0x98d   :  { %13202 = vmatmul.mubr.bf16.vlgmr.msra.gmra.mxu1 %v16653_v13 }
 0x98e   :  { %13218 = vmatpush3.bf16.msra.mxu1 %v14135_v20  ;;  %13233 = vmatprep.mubr.msk.bf16.mxu1 %vm15041_vm0, %v15040_v2 }
 0x98f   :  { %13219 = vmatprep.subr.bf16.mxu1 %v15040_v2 }
 0x992   :  { %13220 = vmatpush3.bf16.msra.mxu1 %v14136_v1 }
 0x993   :  { %13221 = vmatprep.subr.bf16.mxu1 %v15040_v2 }
 0x996   :  { %13222 = vmatpush3.bf16.msra.mxu1 %v14137_v15 }
 0x997   :  { %13223 = vmatprep.subr.bf16.mxu1 %v15040_v2 }
 0x99a   :  { %13224 = vmatpush3.bf16.msra.mxu1 %v14138_v41  ;;  %v14143_v41 = vld [vmem:[%s18973_s10 + $0x38] sm:$0xff]  }
 0x99b   :  { %13225 = vmatprep.subr.bf16.mxu1 %v15040_v2 }
 0x99e   :  { %13226 = vmatpush3.bf16.msra.mxu1 %v14139_v29 }
 0x99f   :  { %13227 = vmatprep.subr.bf16.mxu1 %v15040_v2 }
 0x9a2   :  { %13228 = vmatpush3.bf16.msra.mxu1 %v14140_v24  ;;  %v14144_v24 = vld [vmem:[%s18973_s10 + $0x30] sm:$0xff]  }
 0x9a3   :  { %13229 = vmatprep.subr.bf16.mxu1 %v15040_v2 }
 0x9a6   :  { %13230 = vmatpush3.bf16.msra.mxu1 %v14141_v40  ;;  %v14145_v40 = vld [vmem:[%s18973_s10 + $0x28] sm:$0xff]  }
 0x9a7   :  { %13231 = vmatprep.subr.bf16.mxu1 %v15040_v2 }
 0x9aa   :  { %13232 = vmatpush3.bf16.msra.mxu1 %v14142_v16  ;;  %v14146_v16 = vld [vmem:[%s18973_s10 + $0x20] sm:$0xff]  }
 0x9ad   :  { %13234 = vmatmul.mubr.bf16.vlgmr.msra.gmra.mxu1 %v16653_v13 }
 0x9ae   :  { %4947 = vmatprep.mubr.bf16.mxu1 %v19032_v54 }
 0xa4d   :  { %v4410_v21 = vpop.f32.mrf.mxu1 }
 0xa4e   :  { %v4416_v18 = vsel %vm16690_vm2, %v4410_v21, -1.7014117e+38  ;;  %v16738_v21 = vld [vmem:[%s18969_s6 + $0xe0] ss:$16 sps:$4 sm:$0xff]  }
 0xa4f   :  { %v13203_v7 = vpop.f32.mrf.mxu1  ;;  %v4418_v26 = vsel %vm4417_vm3, %v4416_v18, -inf }
 0xa50   :  { %4419 = vmax.xlane.f32.xlu0 %v4418_v26  ;;  %v16748_v7 = vld [vmem:[%s18969_s6 + $0xc4] ss:$16 sps:$4 sm:$0xff]  }
 0xa51   :  { %v4413_v32 = vpop.f32.mrf.mxu1  ;;  %v16761_v26 = vld [vmem:[%s18969_s6 + $0xa4] ss:$16 sps:$4 sm:$0xff]  }
 0xa52   :  { %v16767_v32 = vld [vmem:[%s18969_s6 + $0xa0] ss:$16 sps:$4 sm:$0xff]  }
 0xa53   :  { %v13204_v51 = vpop.f32.mrf.mxu1 }
 0xa54   :  { %v16773_v51 = vld [vmem:[%s18969_s6 + $0x84] ss:$16 sps:$4 sm:$0xff]  }
 0xa6d   :  { %v16697_v46 = vpop.f32.mrf.mxu1 }
 0xa6f   :  { %v13235_v34 = vpop.f32.mrf.mxu1 }
 0xa70   :  { %v16779_v34 = vld [vmem:[%s18969_s6 + $0x80] ss:$16 sps:$4 sm:$0xff]  }
 0xa71   :  { %v4623_v52 = vpop.f32.mrf.mxu1 }
 0xa73   :  { %v13236_v8 = vpop.f32.mrf.mxu1 }
 0xad9   :  { %v4420_v30 = vpop.xlane.xlu0 %4419 }
 0xada   :  { %v4421_v14 = vsub.f32 %v4416_v18, %v4420_v30  ;;  %v16743_v18 = vld [vmem:[%s18969_s6 + $0xe4] ss:$16 sps:$4 sm:$0xff]  }
 0xadb   :  { %4915 = vmatprep.subr.bf16.mxu1 %v16743_v18 }
 0xadc   :  { %v4422_v59 = vmul.f32 1.442695, %v4421_v14  ;;  %4916 = vmatpush1.bf16.msra.mxu1 %v16738_v21 }
 0xadd   :  { %4917 = vmatprep.subr.bf16.mxu1 %v16748_v7 }
 0xade   :  { %14827 = vpow2.f32 %v4422_v59 }
 0xaeb   :  { %v14828_v57 = vpop.eup %14827 }
 0xaec   :  { %v4424_v22 = vsel %vm4417_vm3, %v14828_v57, 0.0 }
 0xaed   :  { %4425 = vadd.xlane.f32.xlu0 %v4424_v22  ;;  %v16863_v22 = vld [vmem:[%s18970_s7 + $0xc4] ss:$16 sps:$4 sm:$0xff]  }
 0xb76   :  { %v4426_v20 = vpop.xlane.xlu0 %4425 }
 0xb77   :  { %14829 = vrcp.f32 %v4426_v20  ;;  %v16877_v20 = vld [vmem:[%s18970_s7 + $0xa4] ss:$16 sps:$4 sm:$0xff]  }
 0xb84   :  { %v14830_v1 = vpop.eup %14829 }
 0xb85   :  { %v4428_v15 = vmul.f32 %v14830_v1, %v14828_v57  ;;  %v14200_v1 = vld [vmem:[#allocation5 + $0x18] sm:$0xff]  }
 0xb87   :  { %v4429_v29 = vpack.c.bf16 %v4428_v15, %v4428_v15  ;;  %v14205_v15 = vld [vmem:[#allocation6 + $0x20] sm:$0xff]  }
 0xb89   :  { %13214 = vmatmul.mubr.msk.bf16.vlgmr.msra.gmra.mxu0 %vm4417_vm3, %v4429_v29  ;;  %v14207_v29 = vld [vmem:[#allocation6 + $0x18] sm:$0xff]  }
 0xb8a   :  { %13238 = vmatpush3.bf16.msra.mxu0 %v14143_v41  ;;  %13253 = vmatprep.mubr.msk.bf16.mxu0 %vm15041_vm0, %v15040_v2  ;;  %v14206_v41 = vld [vmem:[#allocation5] sm:$0xff]  }
 0xb8b   :  { %13239 = vmatprep.subr.bf16.mxu0 %v15040_v2 }
 0xb8e   :  { %13240 = vmatpush3.bf16.msra.mxu0 %v14144_v24  ;;  %v14208_v24 = vld [vmem:[#allocation6 + $0x10] sm:$0xff]  }
 0xb8f   :  { %13241 = vmatprep.subr.bf16.mxu0 %v15040_v2 }
 0xb92   :  { %13242 = vmatpush3.bf16.msra.mxu0 %v14145_v40  ;;  %v14209_v40 = vld [vmem:[#allocation6 + $0x8] sm:$0xff]  }
 0xb93   :  { %13243 = vmatprep.subr.bf16.mxu0 %v15040_v2 }
 0xb96   :  { %13244 = vmatpush3.bf16.msra.mxu0 %v14146_v16  ;;  %v14210_v16 = vld [vmem:[#allocation6] sm:$0xff]  }
 0xb97   :  { %13245 = vmatprep.subr.bf16.mxu0 %v15040_v2 }
 0xb9a   :  { %13246 = vmatpush3.bf16.msra.mxu0 %v14147_v0 }
 0xb9b   :  { %13247 = vmatprep.subr.bf16.mxu0 %v15040_v2 }
 0xb9e   :  { %13248 = vmatpush3.bf16.msra.mxu0 %v14148_v56 }
 0xb9f   :  { %13249 = vmatprep.subr.bf16.mxu0 %v15040_v2 }
 0xba2   :  { %13250 = vmatpush3.bf16.msra.mxu0 %v14149_v44 }
 0xba3   :  { %13251 = vmatprep.subr.bf16.mxu0 %v15040_v2 }
 0xba6   :  { %13252 = vmatpush3.bf16.msra.mxu0 %v14150_v11 }
 0xba7   :  { %4956 = vmatprep.subr.bf16.mxu0 %v16395_v17  ;;  %v16755_v17 = vld [vmem:[%s18969_s6 + $0xc0] ss:$16 sps:$4 sm:$0xff]  }
 0xba8   :  { %4918 = vmatpush1.bf16.msra.mxu1 %v16755_v17 }
 0xba9   :  { %4919 = vmatprep.subr.bf16.mxu1 %v16761_v26 }
 0xbac   :  { %4920 = vmatpush1.bf16.msra.mxu1 %v16767_v32 }
 0xbad   :  { %4921 = vmatprep.subr.bf16.mxu1 %v16773_v51 }
 0xbb0   :  { %4922 = vmatpush1.bf16.msra.mxu1 %v16779_v34 }
 0xc49   :  { %v4499_v52 = vpop.f32.mrf.mxu0 }
 0xc4a   :  { %v4505_v8 = vpack.c.bf16 %v4499_v52, %v4499_v52 }
 0xc4b   :  { %v13215_v30 = vpop.f32.mrf.mxu0 }
 0xc4c   :  { %13254 = vmatmul.mubr.bf16.vlgmr.msra.gmra.mxu0 %v4505_v8 }
 0xc4d   :  { %v4502_v14 = vpop.f32.mrf.mxu0  ;;  %4957 = vmatpush1.bf16.msra.mxu0 %v16404_v50  ;;  %4988 = vmatprep.mubr.bf16.mxu0 %v19032_v54  ;;  %v16803_v50 = vld [vmem:[%s18969_s6 + $0x64] ss:$16 sps:$4 sm:$0xff]  }
 0xc4e   :  { %4958 = vmatprep.subr.bf16.mxu0 %v16412_v23  ;;  %v16808_v23 = vld [vmem:[%s18969_s6 + $0x60] ss:$16 sps:$4 sm:$0xff]   ;;  %4923 = vmatprep.subr.bf16.mxu1 %v16803_v50 }
 0xc4f   :  { %v13216_v59 = vpop.f32.mrf.mxu0  ;;  %4924 = vmatpush1.bf16.msra.mxu1 %v16808_v23 }
 0xc50   :  { %v19054_v59 = vld [vmem:[#allocation24_spill] sm:$0xff] }
 0xc51   :  { %4959 = vmatpush1.bf16.msra.mxu0 %v16418_v4  ;;  %v16815_v4 = vld [vmem:[%s18969_s6 + $0x44] ss:$16 sps:$4 sm:$0xff]  }
 0xc52   :  { %4960 = vmatprep.subr.bf16.mxu0 %v16424_v62  ;;  %v16820_v62 = vld [vmem:[%s18969_s6 + $0x40] ss:$16 sps:$4 sm:$0xff]   ;;  %4925 = vmatprep.subr.bf16.mxu1 %v16815_v4 }
 0xc53   :  { %4926 = vmatpush1.bf16.msra.mxu1 %v16820_v62 }
 0xc55   :  { %4961 = vmatpush1.bf16.msra.mxu0 %v16433_v47  ;;  %v16827_v47 = vld [vmem:[%s18969_s6 + $0x24] ss:$16 sps:$4 sm:$0xff]  }
 0xc56   :  { %4962 = vmatprep.subr.bf16.mxu0 %v16442_v28  ;;  %v16832_v28 = vld [vmem:[%s18969_s6 + $0x20] ss:$16 sps:$4 sm:$0xff]   ;;  %4927 = vmatprep.subr.bf16.mxu1 %v16827_v47 }
 0xc57   :  { %4928 = vmatpush1.bf16.msra.mxu1 %v16832_v28 }
 0xc59   :  { %4963 = vmatpush1.bf16.msra.mxu0 %v16448_v43  ;;  %v16839_v43 = vld [vmem:[%s18969_s6 + $0x4] ss:$16 sps:$4 sm:$0xff]  }
 0xc5a   :  { %4964 = vmatprep.subr.bf16.mxu0 %v16454_v61  ;;  %v16844_v61 = vld [vmem:[%s18969_s6] ss:$16 sps:$4 sm:$0xff]   ;;  %4929 = vmatprep.subr.bf16.mxu1 %v16839_v43 }
 0xc5b   :  { %4930 = vmatpush1.bf16.msra.mxu1 %v16844_v61 }
 0xc5d   :  { %4965 = vmatpush1.bf16.msra.mxu0 %v16463_v37  ;;  %v16851_v37 = vld [vmem:[%s18970_s7 + $0xe4] ss:$16 sps:$4 sm:$0xff]  }
 0xc5e   :  { %4966 = vmatprep.subr.bf16.mxu0 %v16472_v53  ;;  %5193 = vmatprep.subr.bf16.mxu1 %v16851_v37 }
 0xc61   :  { %4967 = vmatpush1.bf16.msra.mxu0 %v16478_v5 }
 0xc62   :  { %4968 = vmatprep.subr.bf16.mxu0 %v16484_v49 }
 0xc65   :  { %4969 = vmatpush1.bf16.msra.mxu0 %v16493_v60 }
 0xc66   :  { %4970 = vmatprep.subr.bf16.mxu0 %v16499_v58 }
 0xc69   :  { %4971 = vmatpush1.bf16.msra.mxu0 %v16505_v38 }
 0xc6a   :  { %5234 = vmatprep.subr.bf16.mxu0 %v16512_v42  ;;  %v16858_v42 = vld [vmem:[%s18970_s7 + $0xe0] ss:$16 sps:$4 sm:$0xff]  }
 0xd0c   :  { %v4708_v53 = vpop.f32.mrf.mxu0 }
 0xd0d   :  { %v4709_v5 = vadd.f32 %v4708_v53, %v16697_v46  ;;  %v16870_v46 = vld [vmem:[%s18970_s7 + $0xc0] ss:$16 sps:$4 sm:$0xff]  }
 0xd0e   :  { %v13255_v49 = vpop.f32.mrf.mxu0  ;;  %v19055_v53 = vld [vmem:[#allocation32_spill] sm:$0xff] }
 0xd0f   :  { %14831 = vtanh.f32 %v4709_v5  ;;  %v754_v5 = vadd.f32 %v19055_v53, %v19054_v59  ;;  %v19056_v49 = vld [vmem:[#allocation30_spill] sm:$0xff] }
 0xd10   :  { %v4711_v60 = vpop.f32.mrf.mxu0 }
 0xd12   :  { %v13256_v58 = vpop.f32.mrf.mxu0 }
 0xd1c   :  { %v14832_v38 = vpop.eup %14831 }
 0xd1d   :  { %4715 = vst [vmem:[#allocation7] sm:$0xff] %v14832_v38  ;;  %v4716_v57 = vpack.c.bf16 %v14832_v38, %v14832_v38 }
 0xd1f   :  { %4948 = vmatmul.mubr.bf16.vlgmr.msra.gmra.mxu1 %v4716_v57  ;;  %4989 = vmatmul.mubr.bf16.vlgmr.msra.gmra.mxu0 %v4716_v57 }
 0xd20   :  { %5194 = vmatpush1.bf16.msra.mxu1 %v16858_v42  ;;  %5235 = vmatpush1.bf16.msra.mxu0 %v16518_v45  ;;  %v16886_v45 = vld [vmem:[%s18970_s7 + $0xa0] ss:$16 sps:$4 sm:$0xff]  }
 0xd21   :  { %5195 = vmatprep.subr.bf16.mxu1 %v16863_v22  ;;  %5236 = vmatprep.subr.bf16.mxu0 %v16524_v19  ;;  %v16893_v19 = vld [vmem:[%s18970_s7 + $0x84] ss:$16 sps:$4 sm:$0xff]  }
 0xd22   :  { %5225 = vmatprep.mubr.bf16.mxu1 %v19032_v54  ;;  %5266 = vmatprep.mubr.bf16.mxu0 %v19032_v54 }
 0xd24   :  { %5196 = vmatpush1.bf16.msra.mxu1 %v16870_v46  ;;  %5237 = vmatpush1.bf16.msra.mxu0 %v16531_v9  ;;  %v16900_v9 = vld [vmem:[%s18970_s7 + $0x80] ss:$16 sps:$4 sm:$0xff]  }
 0xd25   :  { %5197 = vmatprep.subr.bf16.mxu1 %v16877_v20  ;;  %5238 = vmatprep.subr.bf16.mxu0 %v16538_v6  ;;  %v16907_v6 = vld [vmem:[%s18970_s7 + $0x64] ss:$16 sps:$4 sm:$0xff]  }
 0xd28   :  { %5198 = vmatpush1.bf16.msra.mxu1 %v16886_v45  ;;  %5239 = vmatpush1.bf16.msra.mxu0 %v16544_v55  ;;  %v16914_v55 = vld [vmem:[%s18970_s7 + $0x60] ss:$16 sps:$4 sm:$0xff]  }
 0xd29   :  { %5199 = vmatprep.subr.bf16.mxu1 %v16893_v19  ;;  %5240 = vmatprep.subr.bf16.mxu0 %v16550_v39  ;;  %v16921_v39 = vld [vmem:[%s18970_s7 + $0x44] ss:$16 sps:$4 sm:$0xff]  }
 0xd2c   :  { %5200 = vmatpush1.bf16.msra.mxu1 %v16900_v9  ;;  %5241 = vmatpush1.bf16.msra.mxu0 %v16556_v35  ;;  %v16928_v35 = vld [vmem:[%s18970_s7 + $0x40] ss:$16 sps:$4 sm:$0xff]  }
 0xd2d   :  { %5201 = vmatprep.subr.bf16.mxu1 %v16907_v6  ;;  %5242 = vmatprep.subr.bf16.mxu0 %v16562_v31  ;;  %v16935_v31 = vld [vmem:[%s18970_s7 + $0x24] ss:$16 sps:$4 sm:$0xff]  }
 0xd30   :  { %5202 = vmatpush1.bf16.msra.mxu1 %v16914_v55  ;;  %5243 = vmatpush1.bf16.msra.mxu0 %v16568_v63  ;;  %v16942_v63 = vld [vmem:[%s18970_s7 + $0x20] ss:$16 sps:$4 sm:$0xff]  }
 0xd31   :  { %5203 = vmatprep.subr.bf16.mxu1 %v16921_v39  ;;  %5244 = vmatprep.subr.bf16.mxu0 %v16574_v12  ;;  %v16949_v12 = vld [vmem:[%s18970_s7 + $0x4] ss:$16 sps:$4 sm:$0xff]  }
 0xd34   :  { %5204 = vmatpush1.bf16.msra.mxu1 %v16928_v35  ;;  %5245 = vmatpush1.bf16.msra.mxu0 %v16580_v36  ;;  %v16956_v36 = vld [vmem:[%s18970_s7] ss:$16 sps:$4 sm:$0xff]  }
 0xd35   :  { %5205 = vmatprep.subr.bf16.mxu1 %v16935_v31  ;;  %5246 = vmatprep.subr.bf16.mxu0 %v16586_v10  ;;  %v14199_v10 = vld [vmem:[#allocation6 + $0x38] sm:$0xff]  }
 0xd38   :  { %5206 = vmatpush1.bf16.msra.mxu1 %v16942_v63  ;;  %5247 = vmatpush1.bf16.msra.mxu0 %v16592_v3  ;;  %v14201_v3 = vld [vmem:[#allocation6 + $0x30] sm:$0xff]  }
 0xd39   :  { %5207 = vmatprep.subr.bf16.mxu1 %v16949_v12  ;;  %5248 = vmatprep.subr.bf16.mxu0 %v16598_v25  ;;  %v14202_v25 = vld [vmem:[#allocation5 + $0x10] sm:$0xff]  }
 0xd3c   :  { %5208 = vmatpush1.bf16.msra.mxu1 %v16956_v36  ;;  %5249 = vmatpush1.bf16.msra.mxu0 %v16604_v48  ;;  %v14203_v48 = vld [vmem:[#allocation6 + $0x28] sm:$0xff]  }
 0xd3d   :  { %13257 = vmatprep.subr.bf16.mxu1 %v15040_v2  ;;  %13277 = vmatprep.subr.bf16.mxu0 %v15040_v2 }
 0xd3f   :  { %5226 = vmatmul.mubr.bf16.vlgmr.msra.gmra.mxu1 %v16653_v13  ;;  %5267 = vmatmul.mubr.bf16.vlgmr.msra.gmra.mxu0 %v16653_v13  ;;  %v14204_v13 = vld [vmem:[#allocation5 + $0x8] sm:$0xff]  }
 0xd40   :  { %13258 = vmatpush3.bf16.msra.mxu1 %v14199_v10  ;;  %13278 = vmatpush3.bf16.msra.mxu0 %v14200_v1 }
 0xd41   :  { %13259 = vmatprep.subr.bf16.mxu1 %v15040_v2  ;;  %13279 = vmatprep.subr.bf16.mxu0 %v15040_v2 }
 0xd42   :  { %13273 = vmatprep.mubr.msk.bf16.mxu1 %vm15041_vm0, %v15040_v2  ;;  %13285 = vmatprep.mubr.msk.bf16.mxu0 %vm15041_vm0, %v15040_v2 }
 0xd44   :  { %13260 = vmatpush3.bf16.msra.mxu1 %v14201_v3  ;;  %13280 = vmatpush3.bf16.msra.mxu0 %v14202_v25 }
 0xd45   :  { %13261 = vmatprep.subr.bf16.mxu1 %v15040_v2  ;;  %13281 = vmatprep.subr.bf16.mxu0 %v15040_v2 }
 0xd48   :  { %13262 = vmatpush3.bf16.msra.mxu1 %v14203_v48  ;;  %13282 = vmatpush3.bf16.msra.mxu0 %v14204_v13 }
 0xd49   :  { %13263 = vmatprep.subr.bf16.mxu1 %v15040_v2  ;;  %13283 = vmatprep.subr.bf16.mxu0 %v15040_v2 }
 0xd4c   :  { %13264 = vmatpush3.bf16.msra.mxu1 %v14205_v15  ;;  %13284 = vmatpush3.bf16.msra.mxu0 %v14206_v41 }
 0xd4d   :  { %13265 = vmatprep.subr.bf16.mxu1 %v15040_v2  ;;  %13289 = vmatprep.subr.bf16.mxu0 %v15040_v2 }
 0xd50   :  { %13266 = vmatpush3.bf16.msra.mxu1 %v14207_v29 }
 0xd51   :  { %13267 = vmatprep.subr.bf16.mxu1 %v15040_v2 }
 0xd54   :  { %13268 = vmatpush3.bf16.msra.mxu1 %v14208_v24 }
 0xd55   :  { %13269 = vmatprep.subr.bf16.mxu1 %v15040_v2 }
 0xd58   :  { %13270 = vmatpush3.bf16.msra.mxu1 %v14209_v40  ;;  %v19057_v40 = vld [vmem:[#allocation25_spill] sm:$0xff] }
 0xd59   :  { %13271 = vmatprep.subr.bf16.mxu1 %v15040_v2 }
 0xd5c   :  { %13272 = vmatpush3.bf16.msra.mxu1 %v14210_v16  ;;  %v19058_v16 = vld [vmem:[#allocation33_spill] sm:$0xff] }
 0xd5d   :  { %13309 = vmatprep.subr.bf16.mxu1 %v15040_v2 }
 0xddf   :  { %v4949_v0 = vpop.f32.mrf.mxu1  ;;  %v4990_v56 = vpop.f32.mrf.mxu0 }
 0xde0   :  { %v4997_v60 = vadd.f32 %v4949_v0, %v19056_v49 }
 0xde1   :  { %v4951_v44 = vpop.f32.mrf.mxu1  ;;  %v4992_v11 = vpop.f32.mrf.mxu0 }
 0xde2   :  { %v4998_v57 = vadd.f32 %v4951_v44, %v754_v5 }
 0xde3   :  { %v4953_v52 = vpop.f32.mrf.mxu1  ;;  %v4994_v8 = vpop.f32.mrf.mxu0 }
 0xde4   :  { %v827_v52 = vadd.f32 %v19058_v16, %v19057_v40 }
 0xde5   :  { %v4954_v30 = vpop.f32.mrf.mxu1  ;;  %v4995_v14 = vpop.f32.mrf.mxu0 }
 0xde6   :  { %v5000_v8 = vadd.f32 %v4992_v11, %v827_v52  ;;  %v19059_v30 = vld [vmem:[#allocation31_spill] sm:$0xff] }
 0xde7   :  { %v4999_v14 = vadd.f32 %v4990_v56, %v19059_v30 }
 0xdff   :  { %v5227_v58 = vpop.f32.mrf.mxu1  ;;  %v5268_v38 = vpop.f32.mrf.mxu0 }
 0xe00   :  { %v5275_v10 = vadd.f32 %v5227_v58, %v4997_v60  ;;  %v5277_v44 = vadd.f32 %v5268_v38, %v4999_v14 }
 0xe01   :  { %v5229_v1 = vpop.f32.mrf.mxu1  ;;  %v5270_v3 = vpop.f32.mrf.mxu0 }
 0xe02   :  { %v12238_v25 = vmul.f32 -1.442695, %v5275_v10  ;;  %v5276_v48 = vadd.f32 %v5229_v1, %v4998_v57  ;;  %v5278_v0 = vadd.f32 %v5270_v3, %v5000_v8 }
 0xe03   :  { %v5231_v13 = vpop.f32.mrf.mxu1  ;;  %v5272_v15 = vpop.f32.mrf.mxu0 }
 0xe04   :  { %14833 = vpow2.f32 %v12238_v25  ;;  %v12239_v41 = vmul.f32 -1.442695, %v5276_v48  ;;  %v12240_v53 = vmul.f32 -1.442695, %v5278_v0 }
 0xe05   :  { %v5232_v29 = vpop.f32.mrf.mxu1  ;;  %v5273_v24 = vpop.f32.mrf.mxu0 }
 0xe06   :  { %14835 = vpow2.f32 %v12239_v41 }
 0xe07   :  { %14837 = vtanh.f32 %v5277_v44 }
 0xe08   :  { %14839 = vpow2.f32 %v12240_v53 }
 0xe11   :  { %v14834_v5 = vpop.eup %14833 }
 0xe12   :  { %v5282_v49 = vadd.f32 1.0, %v14834_v5  ;;  %v14219_v5 = vld [vmem:[%s18973_s10 + $0x38] sm:$0xff]  }
 0xe13   :  { %v14836_v60 = vpop.eup %14835 }
 0xe14   :  { %14841 = vrcp.f32 %v5282_v49  ;;  %v5288_v58 = vadd.f32 1.0, %v14836_v60  ;;  %v14838_v57 = vpop.eup %14837  ;;  %v14220_v49 = vld [vmem:[%s18973_s10 + $0x30] sm:$0xff]   ;;  %v14221_v60 = vld [vmem:[%s18973_s10 + $0x28] sm:$0xff]  }
 0xe15   :  { %v14840_v10 = vpop.eup %14839 }
 0xe16   :  { %14843 = vrcp.f32 %v5288_v58  ;;  %v5295_v13 = vadd.f32 1.0, %v14840_v10  ;;  %v14222_v58 = vld [vmem:[%s18973_s10 + $0x20] sm:$0xff]   ;;  %v14224_v10 = vld [vmem:[%s18973_s10 + $0x10] sm:$0xff]  }
 0xe18   :  { %14845 = vrcp.f32 %v5295_v13 }
 0xe21   :  { %v14842_v1 = vpop.eup %14841 }
 0xe22   :  { %v5299_v25 = vmul.f32 %v14842_v1, %v14838_v57  ;;  %v14223_v57 = vld [vmem:[%s18973_s10 + $0x18] sm:$0xff]   ;;  %v14225_v1 = vld [vmem:[%s18973_s10 + $0x8] sm:$0xff]  }
 0xe23   :  { %v14844_v48 = vpop.eup %14843 }
 0xe24   :  { %v5298_v11 = vmul.f32 %v14844_v48, %v16647_v33 }
 0xe25   :  { %v14846_v56 = vpop.eup %14845 }
 0xe26   :  { %v16989_v3 = vadd.f32 %v5299_v25, %v5298_v11  ;;  %v14211_v11 = vld [vmem:[%s18974_s11 + $0x38] sm:$0xff]  }
 0xe28   :  { %14847 = vtanh.f32 %v16989_v3 }
 0xe35   :  { %v14848_v38 = vpop.eup %14847 }
 0xe36   :  { %v5302_v15 = vmul.f32 %v14848_v38, %v14846_v56  ;;  %v14212_v38 = vld [vmem:[%s18974_s11 + $0x30] sm:$0xff]  }
 0xe38   :  { %v16992_v41 = vpack.c.bf16 %v5302_v15, %v5302_v15  ;;  %v14213_v15 = vld [vmem:[%s18974_s11 + $0x28] sm:$0xff]  }
 0xe3a   :  { %13274 = vmatmul.mubr.bf16.vlgmr.msra.gmra.mxu1 %v16992_v41 }
 0xe3b   :  { %13325 = vmatprep.mubr.msk.bf16.mxu1 %vm15041_vm0, %v15040_v2  ;;  %13310 = vmatpush3.bf16.msra.mxu1 %v14219_v5  ;;  %v17166_v5 = vld [vmem:[%s18969_s6 + $0x28] ss:$16 sps:$4 sm:$0xff]  }
 0xe3c   :  { %13311 = vmatprep.subr.bf16.mxu1 %v15040_v2 }
 0xe3f   :  { %13312 = vmatpush3.bf16.msra.mxu1 %v14220_v49  ;;  %v17173_v49 = vld [vmem:[%s18969_s6 + $0xc] ss:$16 sps:$4 sm:$0xff]  }
 0xe40   :  { %13313 = vmatprep.subr.bf16.mxu1 %v15040_v2 }
 0xe43   :  { %13314 = vmatpush3.bf16.msra.mxu1 %v14221_v60  ;;  %v17178_v60 = vld [vmem:[%s18969_s6 + $0x8] ss:$16 sps:$4 sm:$0xff]  }
 0xe44   :  { %13315 = vmatprep.subr.bf16.mxu1 %v15040_v2 }
 0xe47   :  { %13316 = vmatpush3.bf16.msra.mxu1 %v14222_v58  ;;  %v17185_v58 = vld [vmem:[%s18970_s7 + $0xec] ss:$16 sps:$4 sm:$0xff]  }
 0xe48   :  { %13317 = vmatprep.subr.bf16.mxu1 %v15040_v2 }
 0xe4b   :  { %13318 = vmatpush3.bf16.msra.mxu1 %v14223_v57 }
 0xe4c   :  { %13319 = vmatprep.subr.bf16.mxu1 %v15040_v2 }
 0xe4f   :  { %13320 = vmatpush3.bf16.msra.mxu1 %v14224_v10 }
 0xe50   :  { %13321 = vmatprep.subr.bf16.mxu1 %v15040_v2 }
 0xe53   :  { %13322 = vmatpush3.bf16.msra.mxu1 %v14225_v1 }
 0xe54   :  { %13323 = vmatprep.subr.bf16.mxu1 %v15040_v2 }
 0xefa   :  { %v5402_v29 = vpop.f32.mrf.mxu1 }
 0xefb   :  { %v5408_v24 = vsel %vm16690_vm2, %v5402_v29, -1.7014117e+38  ;;  %v14214_v29 = vld [vmem:[%s18974_s11 + $0x20] sm:$0xff]  }
 0xefc   :  { %v13275_v33 = vpop.f32.mrf.mxu1  ;;  %v5409_v16 = vsel %vm4417_vm3, %v5408_v24, -inf }
 0xefd   :  { %5410 = vmax.xlane.f32.xlu1 %v5409_v16  ;;  %v14216_v33 = vld [vmem:[%s18974_s11 + $0x10] sm:$0xff]   ;;  %v14217_v16 = vld [vmem:[%s18974_s11 + $0x8] sm:$0xff]  }
 0xefe   :  { %v5405_v52 = vpop.f32.mrf.mxu1 }
 0xeff   :  { %v14218_v52 = vld [vmem:[%s18974_s11] sm:$0xff]  }
 0xf00   :  { %v13276_v8 = vpop.f32.mrf.mxu1 }
 0xf86   :  { %v5411_v0 = vpop.xlane.xlu1 %5410 }
 0xf87   :  { %v5412_v30 = vsub.f32 %v5408_v24, %v5411_v0  ;;  %v14215_v24 = vld [vmem:[%s18974_s11 + $0x18] sm:$0xff]  }
 0xf88   :  { %v17137_v0 = vld [vmem:[%s18969_s6 + $0x6c] ss:$16 sps:$4 sm:$0xff]  }
 0xf89   :  { %v5413_v14 = vmul.f32 1.442695, %v5412_v30  ;;  %v17142_v30 = vld [vmem:[%s18969_s6 + $0x68] ss:$16 sps:$4 sm:$0xff]  }
 0xf8b   :  { %14849 = vpow2.f32 %v5413_v14  ;;  %v17149_v14 = vld [vmem:[%s18969_s6 + $0x4c] ss:$16 sps:$4 sm:$0xff]  }
 0xf98   :  { %v14850_v44 = vpop.eup %14849 }
 0xf99   :  { %v5415_v53 = vsel %vm4417_vm3, %v14850_v44, 0.0 }
 0xf9a   :  { %5416 = vadd.xlane.f32.xlu1 %v5415_v53  ;;  %v17161_v53 = vld [vmem:[%s18969_s6 + $0x2c] ss:$16 sps:$4 sm:$0xff]  }
0x1023   :  { %v5417_v25 = vpop.xlane.xlu1 %5416 }
0x1024   :  { %14851 = vrcp.f32 %v5417_v25 }
0x1031   :  { %v14852_v48 = vpop.eup %14851 }
0x1032   :  { %v5419_v13 = vmul.f32 %v14852_v48, %v14850_v44  ;;  %v17154_v44 = vld [vmem:[%s18969_s6 + $0x48] ss:$16 sps:$4 sm:$0xff]  }
0x1034   :  { %v5420_v56 = vpack.c.bf16 %v5419_v13, %v5419_v13 }
0x1036   :  { %13286 = vmatmul.mubr.msk.bf16.vlgmr.msra.gmra.mxu0 %vm4417_vm3, %v5420_v56 }
0x1037   :  { %13290 = vmatpush3.bf16.msra.mxu0 %v14211_v11  ;;  %13305 = vmatprep.mubr.msk.bf16.mxu0 %vm15041_vm0, %v15040_v2  ;;  %v17191_v11 = vld [vmem:[%s18970_s7 + $0xe8] ss:$16 sps:$4 sm:$0xff]  }
0x1038   :  { %13291 = vmatprep.subr.bf16.mxu0 %v15040_v2 }
0x103b   :  { %13292 = vmatpush3.bf16.msra.mxu0 %v14212_v38  ;;  %v17196_v38 = vld [vmem:[%s18970_s7 + $0xcc] ss:$16 sps:$4 sm:$0xff]  }
0x103c   :  { %13293 = vmatprep.subr.bf16.mxu0 %v15040_v2 }
0x103f   :  { %13294 = vmatpush3.bf16.msra.mxu0 %v14213_v15  ;;  %v17203_v15 = vld [vmem:[%s18970_s7 + $0xc8] ss:$16 sps:$4 sm:$0xff]  }
0x1040   :  { %13295 = vmatprep.subr.bf16.mxu0 %v15040_v2 }
0x1043   :  { %13296 = vmatpush3.bf16.msra.mxu0 %v14214_v29  ;;  %v17210_v29 = vld [vmem:[%s18970_s7 + $0xac] ss:$16 sps:$4 sm:$0xff]  }
0x1044   :  { %13297 = vmatprep.subr.bf16.mxu0 %v15040_v2 }
0x1047   :  { %13298 = vmatpush3.bf16.msra.mxu0 %v14215_v24  ;;  %v14280_v24 = vld [vmem:[#allocation5 + $0x8] sm:$0xff]  }
0x1048   :  { %13299 = vmatprep.subr.bf16.mxu0 %v15040_v2 }
0x104b   :  { %13300 = vmatpush3.bf16.msra.mxu0 %v14216_v33  ;;  %v14281_v33 = vld [vmem:[#allocation6 + $0x20] sm:$0xff]  }
0x104c   :  { %13301 = vmatprep.subr.bf16.mxu0 %v15040_v2 }
0x104f   :  { %13302 = vmatpush3.bf16.msra.mxu0 %v14217_v16  ;;  %v14282_v16 = vld [vmem:[#allocation5] sm:$0xff]  }
0x1050   :  { %13303 = vmatprep.subr.bf16.mxu0 %v15040_v2 }
0x1053   :  { %13304 = vmatpush3.bf16.msra.mxu0 %v14218_v52  ;;  %v14283_v52 = vld [vmem:[#allocation6 + $0x18] sm:$0xff]  }
0x1054   :  { %5907 = vmatprep.subr.bf16.mxu0 %v16743_v18  ;;  %v17088_v18 = vld [vmem:[%s18969_s6 + $0xec] ss:$16 sps:$4 sm:$0xff]  }
0x1056   :  { %13306 = vmatmul.mubr.bf16.vlgmr.msra.gmra.mxu0 %v16992_v41 }
0x1057   :  { %5908 = vmatpush1.bf16.msra.mxu0 %v16738_v21  ;;  %5939 = vmatprep.mubr.bf16.mxu0 %v19032_v54  ;;  %v14226_v21 = vld [vmem:[%s18973_s10] sm:$0xff]  }
0x1058   :  { %5909 = vmatprep.subr.bf16.mxu0 %v16748_v7  ;;  %13324 = vmatpush3.bf16.msra.mxu1 %v14226_v21  ;;  %v14284_v21 = vld [vmem:[#allocation6 + $0x10] sm:$0xff]  }
0x1059   :  { %5948 = vmatprep.subr.bf16.mxu1 %v17088_v18 }
0x105b   :  { %5910 = vmatpush1.bf16.msra.mxu0 %v16755_v17  ;;  %v17094_v17 = vld [vmem:[%s18969_s6 + $0xe8] ss:$16 sps:$4 sm:$0xff]  }
0x105c   :  { %5911 = vmatprep.subr.bf16.mxu0 %v16761_v26 }
0x105f   :  { %5912 = vmatpush1.bf16.msra.mxu0 %v16767_v32  ;;  %v17099_v32 = vld [vmem:[%s18969_s6 + $0xcc] ss:$16 sps:$4 sm:$0xff]  }
0x1060   :  { %5913 = vmatprep.subr.bf16.mxu0 %v16773_v51 }
0x1063   :  { %5914 = vmatpush1.bf16.msra.mxu0 %v16779_v34 }
0x1064   :  { %5915 = vmatprep.subr.bf16.mxu0 %v16803_v50  ;;  %v17105_v50 = vld [vmem:[%s18969_s6 + $0xc8] ss:$16 sps:$4 sm:$0xff]  }
0x1067   :  { %5916 = vmatpush1.bf16.msra.mxu0 %v16808_v23  ;;  %v17112_v23 = vld [vmem:[%s18969_s6 + $0xac] ss:$16 sps:$4 sm:$0xff]  }
0x1068   :  { %5917 = vmatprep.subr.bf16.mxu0 %v16815_v4 }
0x106b   :  { %5918 = vmatpush1.bf16.msra.mxu0 %v16820_v62  ;;  %v17118_v62 = vld [vmem:[%s18969_s6 + $0xa8] ss:$16 sps:$4 sm:$0xff]  }
0x106c   :  { %5919 = vmatprep.subr.bf16.mxu0 %v16827_v47  ;;  %v17124_v47 = vld [vmem:[%s18969_s6 + $0x8c] ss:$16 sps:$4 sm:$0xff]  }
0x106f   :  { %5920 = vmatpush1.bf16.msra.mxu0 %v16832_v28  ;;  %v17130_v28 = vld [vmem:[%s18969_s6 + $0x88] ss:$16 sps:$4 sm:$0xff]  }
0x1070   :  { %5921 = vmatprep.subr.bf16.mxu0 %v16839_v43 }
0x1073   :  { %5922 = vmatpush1.bf16.msra.mxu0 %v16844_v61 }
0x1074   :  { %6185 = vmatprep.subr.bf16.mxu0 %v16851_v37 }
0x10f6   :  { %v5490_v7 = vpop.f32.mrf.mxu0 }
0x10f7   :  { %v5496_v26 = vpack.c.bf16 %v5490_v7, %v5490_v7  ;;  %v14285_v7 = vld [vmem:[#allocation6 + $0x8] sm:$0xff]  }
0x10f8   :  { %v13287_v51 = vpop.f32.mrf.mxu0 }
0x10f9   :  { %13326 = vmatmul.mubr.bf16.vlgmr.msra.gmra.mxu1 %v5496_v26  ;;  %v14286_v26 = vld [vmem:[#allocation6] sm:$0xff]  }
0x10fa   :  { %v5493_v34 = vpop.f32.mrf.mxu0  ;;  %5949 = vmatpush1.bf16.msra.mxu1 %v17094_v17  ;;  %5980 = vmatprep.mubr.bf16.mxu1 %v19032_v54 }
0x10fb   :  { %5950 = vmatprep.subr.bf16.mxu1 %v17099_v32 }
0x10fc   :  { %v13288_v4 = vpop.f32.mrf.mxu0 }
0x10fe   :  { %5951 = vmatpush1.bf16.msra.mxu1 %v17105_v50 }
0x10ff   :  { %5952 = vmatprep.subr.bf16.mxu1 %v17112_v23 }
0x1102   :  { %5953 = vmatpush1.bf16.msra.mxu1 %v17118_v62 }
0x1103   :  { %5954 = vmatprep.subr.bf16.mxu1 %v17124_v47 }
0x1106   :  { %5955 = vmatpush1.bf16.msra.mxu1 %v17130_v28 }
0x1107   :  { %5956 = vmatprep.subr.bf16.mxu1 %v17137_v0 }
0x110a   :  { %5957 = vmatpush1.bf16.msra.mxu1 %v17142_v30 }
0x110b   :  { %5958 = vmatprep.subr.bf16.mxu1 %v17149_v14 }
0x110e   :  { %5959 = vmatpush1.bf16.msra.mxu1 %v17154_v44 }
0x110f   :  { %5960 = vmatprep.subr.bf16.mxu1 %v17161_v53 }
0x1112   :  { %5961 = vmatpush1.bf16.msra.mxu1 %v17166_v5 }
0x1113   :  { %5962 = vmatprep.subr.bf16.mxu1 %v17173_v49 }
0x1116   :  { %v5611_v43 = vpop.f32.mrf.mxu0  ;;  %5963 = vmatpush1.bf16.msra.mxu1 %v17178_v60 }
0x1117   :  { %6226 = vmatprep.subr.bf16.mxu1 %v17185_v58 }
0x1118   :  { %v13307_v61 = vpop.f32.mrf.mxu0 }
0x111a   :  { %v5614_v37 = vpop.f32.mrf.mxu0 }
0x111c   :  { %v13308_v8 = vpop.f32.mrf.mxu0 }
0x11b9   :  { %v5699_v57 = vpop.f32.mrf.mxu1 }
0x11ba   :  { %v5700_v10 = vadd.f32 %v5699_v57, %v5611_v43 }
0x11bb   :  { %v13327_v1 = vpop.f32.mrf.mxu1 }
0x11bc   :  { %14853 = vtanh.f32 %v5700_v10  ;;  %v19060_v10 = vld [vmem:[#allocation34_spill] sm:$0xff] }
0x11bd   :  { %v5702_v25 = vpop.f32.mrf.mxu1 }
0x11bf   :  { %v13328_v48 = vpop.f32.mrf.mxu1 }
0x11c9   :  { %v14854_v13 = vpop.eup %14853 }
0x11ca   :  { %5707 = vst [vmem:[#allocation7 + $0x8] sm:$0xff] %v14854_v13  ;;  %v5708_v56 = vpack.c.bf16 %v14854_v13, %v14854_v13  ;;  %v19061_v13 = vld [vmem:[#allocation36_spill] sm:$0xff] }
0x11cc   :  { %5940 = vmatmul.mubr.bf16.vlgmr.msra.gmra.mxu0 %v5708_v56  ;;  %5981 = vmatmul.mubr.bf16.vlgmr.msra.gmra.mxu1 %v5708_v56 }
0x11cd   :  { %6186 = vmatpush1.bf16.msra.mxu0 %v16858_v42  ;;  %6227 = vmatpush1.bf16.msra.mxu1 %v17191_v11  ;;  %v17219_v42 = vld [vmem:[%s18970_s7 + $0xa8] ss:$16 sps:$4 sm:$0xff]  }
0x11ce   :  { %6187 = vmatprep.subr.bf16.mxu0 %v16863_v22  ;;  %6228 = vmatprep.subr.bf16.mxu1 %v17196_v38  ;;  %v17226_v22 = vld [vmem:[%s18970_s7 + $0x8c] ss:$16 sps:$4 sm:$0xff]  }
0x11cf   :  { %6217 = vmatprep.mubr.bf16.mxu0 %v19032_v54  ;;  %6258 = vmatprep.mubr.bf16.mxu1 %v19032_v54 }
0x11d1   :  { %6188 = vmatpush1.bf16.msra.mxu0 %v16870_v46  ;;  %6229 = vmatpush1.bf16.msra.mxu1 %v17203_v15  ;;  %v17233_v46 = vld [vmem:[%s18970_s7 + $0x88] ss:$16 sps:$4 sm:$0xff]  }
0x11d2   :  { %6189 = vmatprep.subr.bf16.mxu0 %v16877_v20  ;;  %6230 = vmatprep.subr.bf16.mxu1 %v17210_v29  ;;  %v17240_v20 = vld [vmem:[%s18970_s7 + $0x6c] ss:$16 sps:$4 sm:$0xff]  }
0x11d5   :  { %6190 = vmatpush1.bf16.msra.mxu0 %v16886_v45  ;;  %6231 = vmatpush1.bf16.msra.mxu1 %v17219_v42  ;;  %v17247_v45 = vld [vmem:[%s18970_s7 + $0x68] ss:$16 sps:$4 sm:$0xff]  }
0x11d6   :  { %6191 = vmatprep.subr.bf16.mxu0 %v16893_v19  ;;  %6232 = vmatprep.subr.bf16.mxu1 %v17226_v22  ;;  %v17254_v19 = vld [vmem:[%s18970_s7 + $0x4c] ss:$16 sps:$4 sm:$0xff]  }
0x11d9   :  { %6192 = vmatpush1.bf16.msra.mxu0 %v16900_v9  ;;  %6233 = vmatpush1.bf16.msra.mxu1 %v17233_v46  ;;  %v17261_v9 = vld [vmem:[%s18970_s7 + $0x48] ss:$16 sps:$4 sm:$0xff]  }
0x11da   :  { %6193 = vmatprep.subr.bf16.mxu0 %v16907_v6  ;;  %6234 = vmatprep.subr.bf16.mxu1 %v17240_v20  ;;  %v17268_v6 = vld [vmem:[%s18970_s7 + $0x2c] ss:$16 sps:$4 sm:$0xff]  }
0x11dd   :  { %6194 = vmatpush1.bf16.msra.mxu0 %v16914_v55  ;;  %6235 = vmatpush1.bf16.msra.mxu1 %v17247_v45  ;;  %v17275_v55 = vld [vmem:[%s18970_s7 + $0x28] ss:$16 sps:$4 sm:$0xff]  }
0x11de   :  { %6195 = vmatprep.subr.bf16.mxu0 %v16921_v39  ;;  %6236 = vmatprep.subr.bf16.mxu1 %v17254_v19  ;;  %v17282_v39 = vld [vmem:[%s18970_s7 + $0xc] ss:$16 sps:$4 sm:$0xff]  }
0x11e1   :  { %6196 = vmatpush1.bf16.msra.mxu0 %v16928_v35  ;;  %6237 = vmatpush1.bf16.msra.mxu1 %v17261_v9  ;;  %v17289_v35 = vld [vmem:[%s18970_s7 + $0x8] ss:$16 sps:$4 sm:$0xff]  }
0x11e2   :  { %6197 = vmatprep.subr.bf16.mxu0 %v16935_v31  ;;  %6238 = vmatprep.subr.bf16.mxu1 %v17268_v6  ;;  %v14275_v31 = vld [vmem:[#allocation6 + $0x38] sm:$0xff]  }
0x11e5   :  { %6198 = vmatpush1.bf16.msra.mxu0 %v16942_v63  ;;  %6239 = vmatpush1.bf16.msra.mxu1 %v17275_v55  ;;  %v14276_v63 = vld [vmem:[#allocation5 + $0x18] sm:$0xff]  }
0x11e6   :  { %6199 = vmatprep.subr.bf16.mxu0 %v16949_v12  ;;  %6240 = vmatprep.subr.bf16.mxu1 %v17282_v39  ;;  %v14277_v12 = vld [vmem:[#allocation6 + $0x30] sm:$0xff]  }
0x11e9   :  { %6200 = vmatpush1.bf16.msra.mxu0 %v16956_v36  ;;  %6241 = vmatpush1.bf16.msra.mxu1 %v17289_v35  ;;  %v14278_v36 = vld [vmem:[#allocation5 + $0x10] sm:$0xff]  }
0x11ea   :  { %13329 = vmatprep.subr.bf16.mxu0 %v15040_v2  ;;  %13349 = vmatprep.subr.bf16.mxu1 %v15040_v2 }
0x11ec   :  { %6218 = vmatmul.mubr.bf16.vlgmr.msra.gmra.mxu0 %v16992_v41  ;;  %6259 = vmatmul.mubr.bf16.vlgmr.msra.gmra.mxu1 %v16992_v41  ;;  %v14279_v41 = vld [vmem:[#allocation6 + $0x28] sm:$0xff]  }
0x11ed   :  { %13330 = vmatpush3.bf16.msra.mxu0 %v14275_v31  ;;  %13350 = vmatpush3.bf16.msra.mxu1 %v14276_v63 }
0x11ee   :  { %13331 = vmatprep.subr.bf16.mxu0 %v15040_v2  ;;  %13351 = vmatprep.subr.bf16.mxu1 %v15040_v2 }
0x11ef   :  { %13345 = vmatprep.mubr.msk.bf16.mxu0 %vm15041_vm0, %v15040_v2  ;;  %13357 = vmatprep.mubr.msk.bf16.mxu1 %vm15041_vm0, %v15040_v2 }
0x11f1   :  { %13332 = vmatpush3.bf16.msra.mxu0 %v14277_v12  ;;  %13352 = vmatpush3.bf16.msra.mxu1 %v14278_v36 }
0x11f2   :  { %13333 = vmatprep.subr.bf16.mxu0 %v15040_v2  ;;  %13353 = vmatprep.subr.bf16.mxu1 %v15040_v2 }
0x11f5   :  { %13334 = vmatpush3.bf16.msra.mxu0 %v14279_v41  ;;  %13354 = vmatpush3.bf16.msra.mxu1 %v14280_v24 }
0x11f6   :  { %13335 = vmatprep.subr.bf16.mxu0 %v15040_v2  ;;  %13355 = vmatprep.subr.bf16.mxu1 %v15040_v2 }
0x11f9   :  { %13336 = vmatpush3.bf16.msra.mxu0 %v14281_v33  ;;  %13356 = vmatpush3.bf16.msra.mxu1 %v14282_v16 }
0x11fa   :  { %13337 = vmatprep.subr.bf16.mxu0 %v15040_v2  ;;  %13361 = vmatprep.subr.bf16.mxu1 %v15040_v2 }
0x11fd   :  { %13338 = vmatpush3.bf16.msra.mxu0 %v14283_v52 }
0x11fe   :  { %13339 = vmatprep.subr.bf16.mxu0 %v15040_v2 }
0x1201   :  { %13340 = vmatpush3.bf16.msra.mxu0 %v14284_v21 }
0x1202   :  { %13341 = vmatprep.subr.bf16.mxu0 %v15040_v2 }
0x1205   :  { %13342 = vmatpush3.bf16.msra.mxu0 %v14285_v7  ;;  %v19062_v7 = vld [vmem:[#allocation37_spill] sm:$0xff] }
0x1206   :  { %13343 = vmatprep.subr.bf16.mxu0 %v15040_v2 }
0x1209   :  { %13344 = vmatpush3.bf16.msra.mxu0 %v14286_v26 }
0x120a   :  { %13381 = vmatprep.subr.bf16.mxu0 %v15040_v2 }
0x128c   :  { %v5941_v51 = vpop.f32.mrf.mxu0  ;;  %v5982_v34 = vpop.f32.mrf.mxu1 }
0x128d   :  { %v5989_v1 = vadd.f32 %v5941_v51, %v19060_v10  ;;  %v19063_v51 = vld [vmem:[#allocation35_spill] sm:$0xff] }
0x128e   :  { %v5943_v4 = vpop.f32.mrf.mxu0  ;;  %v5984_v43 = vpop.f32.mrf.mxu1 }
0x128f   :  { %v5990_v56 = vadd.f32 %v5943_v4, %v19061_v13  ;;  %v5992_v26 = vadd.f32 %v5984_v43, %v19062_v7 }
0x1290   :  { %v5945_v61 = vpop.f32.mrf.mxu0  ;;  %v5986_v37 = vpop.f32.mrf.mxu1 }
0x1291   :  { %v5991_v37 = vadd.f32 %v5982_v34, %v19063_v51 }
0x1292   :  { %v5946_v8 = vpop.f32.mrf.mxu0  ;;  %v5987_v57 = vpop.f32.mrf.mxu1 }
0x12ac   :  { %v6219_v25 = vpop.f32.mrf.mxu0  ;;  %v6260_v48 = vpop.f32.mrf.mxu1 }
0x12ad   :  { %v6267_v31 = vadd.f32 %v6219_v25, %v5989_v1  ;;  %v6269_v8 = vadd.f32 %v6260_v48, %v5991_v37 }
0x12ae   :  { %v6221_v63 = vpop.f32.mrf.mxu0  ;;  %v6262_v12 = vpop.f32.mrf.mxu1 }
0x12af   :  { %v12334_v36 = vmul.f32 -1.442695, %v6267_v31  ;;  %v6268_v41 = vadd.f32 %v6221_v63, %v5990_v56  ;;  %v6270_v61 = vadd.f32 %v6262_v12, %v5992_v26 }
0x12b0   :  { %v6223_v24 = vpop.f32.mrf.mxu0  ;;  %v6264_v33 = vpop.f32.mrf.mxu1 }
0x12b1   :  { %14855 = vpow2.f32 %v12334_v36  ;;  %v12335_v16 = vmul.f32 -1.442695, %v6268_v41  ;;  %v12336_v57 = vmul.f32 -1.442695, %v6270_v61 }
0x12b2   :  { %v6224_v52 = vpop.f32.mrf.mxu0  ;;  %v6265_v21 = vpop.f32.mrf.mxu1 }
0x12b3   :  { %14857 = vpow2.f32 %v12335_v16 }
0x12b4   :  { %14859 = vtanh.f32 %v6269_v8 }
0x12b5   :  { %14861 = vpow2.f32 %v12336_v57 }
0x12be   :  { %v14856_v4 = vpop.eup %14855 }
0x12bf   :  { %v6274_v10 = vadd.f32 1.0, %v14856_v4  ;;  %v14295_v4 = vld [vmem:[%s18973_s10 + $0x38] sm:$0xff]  }
0x12c0   :  { %v14858_v1 = vpop.eup %14857 }
0x12c1   :  { %14863 = vrcp.f32 %v6274_v10  ;;  %v6280_v25 = vadd.f32 1.0, %v14858_v1  ;;  %v14860_v13 = vpop.eup %14859  ;;  %v14296_v10 = vld [vmem:[%s18973_s10 + $0x30] sm:$0xff]   ;;  %v14297_v1 = vld [vmem:[%s18973_s10 + $0x28] sm:$0xff]  }
0x12c2   :  { %v14862_v56 = vpop.eup %14861 }
0x12c3   :  { %14865 = vrcp.f32 %v6280_v25  ;;  %v6287_v41 = vadd.f32 1.0, %v14862_v56  ;;  %v14298_v25 = vld [vmem:[%s18973_s10 + $0x20] sm:$0xff]   ;;  %v14300_v56 = vld [vmem:[%s18973_s10 + $0x10] sm:$0xff]  }
0x12c5   :  { %14867 = vrcp.f32 %v6287_v41 }
0x12ce   :  { %v14864_v31 = vpop.eup %14863 }
0x12cf   :  { %v6291_v63 = vmul.f32 %v14864_v31, %v14860_v13  ;;  %v14299_v13 = vld [vmem:[%s18973_s10 + $0x18] sm:$0xff]   ;;  %v14301_v31 = vld [vmem:[%s18973_s10 + $0x8] sm:$0xff]  }
0x12d0   :  { %v14866_v36 = vpop.eup %14865 }
0x12d1   :  { %v6290_v43 = vmul.f32 %v14866_v36, %v16989_v3 }
0x12d2   :  { %v14868_v34 = vpop.eup %14867 }
0x12d3   :  { %v17320_v12 = vadd.f32 %v6291_v63, %v6290_v43  ;;  %v14287_v43 = vld [vmem:[%s18974_s11 + $0x38] sm:$0xff]  }
0x12d5   :  { %14869 = vtanh.f32 %v17320_v12 }
0x12e2   :  { %v14870_v48 = vpop.eup %14869 }
0x12e3   :  { %v6294_v24 = vmul.f32 %v14870_v48, %v14868_v34  ;;  %v14288_v48 = vld [vmem:[%s18974_s11 + $0x30] sm:$0xff]  }
0x12e5   :  { %v17323_v33 = vpack.c.bf16 %v6294_v24, %v6294_v24  ;;  %v14289_v24 = vld [vmem:[%s18974_s11 + $0x28] sm:$0xff]  }
0x12e7   :  { %13346 = vmatmul.mubr.bf16.vlgmr.msra.gmra.mxu0 %v17323_v33 }
0x12e8   :  { %13397 = vmatprep.mubr.msk.bf16.mxu0 %vm15041_vm0, %v15040_v2  ;;  %13382 = vmatpush3.bf16.msra.mxu0 %v14295_v4  ;;  %v17438_v4 = vld [vmem:[%s18969_s6 + $0x84] ss:$16 sps:$4 sm:$0xff]  }
0x12e9   :  { %13383 = vmatprep.subr.bf16.mxu0 %v15040_v2 }
0x12ec   :  { %13384 = vmatpush3.bf16.msra.mxu0 %v14296_v10  ;;  %v17444_v10 = vld [vmem:[%s18969_s6 + $0x80] ss:$16 sps:$4 sm:$0xff]  }
0x12ed   :  { %13385 = vmatprep.subr.bf16.mxu0 %v15040_v2 }
0x12f0   :  { %13386 = vmatpush3.bf16.msra.mxu0 %v14297_v1 }
0x12f1   :  { %13387 = vmatprep.subr.bf16.mxu0 %v15040_v2 }
0x12f4   :  { %13388 = vmatpush3.bf16.msra.mxu0 %v14298_v25 }
0x12f5   :  { %13389 = vmatprep.subr.bf16.mxu0 %v15040_v2 }
0x12f8   :  { %13390 = vmatpush3.bf16.msra.mxu0 %v14299_v13 }
0x12f9   :  { %13391 = vmatprep.subr.bf16.mxu0 %v15040_v2 }
0x12fc   :  { %13392 = vmatpush3.bf16.msra.mxu0 %v14300_v56 }
0x12fd   :  { %13393 = vmatprep.subr.bf16.mxu0 %v15040_v2 }
0x1300   :  { %13394 = vmatpush3.bf16.msra.mxu0 %v14301_v31 }
0x1301   :  { %13395 = vmatprep.subr.bf16.mxu0 %v15040_v2 }
0x13a7   :  { %v6394_v16 = vpop.f32.mrf.mxu0 }
0x13a8   :  { %v6400_v52 = vsel %vm16690_vm2, %v6394_v16, -1.7014117e+38  ;;  %v14290_v16 = vld [vmem:[%s18974_s11 + $0x20] sm:$0xff]  }
0x13a9   :  { %v13347_v3 = vpop.f32.mrf.mxu0  ;;  %v6401_v21 = vsel %vm4417_vm3, %v6400_v52, -inf }
0x13aa   :  { %6402 = vmax.xlane.f32.xlu0 %v6401_v21  ;;  %v14292_v3 = vld [vmem:[%s18974_s11 + $0x10] sm:$0xff]   ;;  %v14293_v21 = vld [vmem:[%s18974_s11 + $0x8] sm:$0xff]  }
0x13ab   :  { %v6397_v7 = vpop.f32.mrf.mxu0 }
0x13ac   :  { %v14294_v7 = vld [vmem:[%s18974_s11] sm:$0xff]  }
0x13ad   :  { %v13348_v26 = vpop.f32.mrf.mxu0 }
0x13ae   :  { %v14302_v26 = vld [vmem:[%s18973_s10] sm:$0xff]  }
0x13af   :  { %13396 = vmatpush3.bf16.msra.mxu0 %v14302_v26  ;;  %v14360_v26 = vld [vmem:[#allocation6 + $0x10] sm:$0xff]  }
0x13b0   :  { %6940 = vmatprep.subr.bf16.mxu0 %v17088_v18  ;;  %v17420_v18 = vld [vmem:[%s18969_s6 + $0xc0] ss:$16 sps:$4 sm:$0xff]  }
0x1433   :  { %v6403_v61 = vpop.xlane.xlu0 %6402 }
0x1434   :  { %v6404_v51 = vsub.f32 %v6400_v52, %v6403_v61  ;;  %v14291_v52 = vld [vmem:[%s18974_s11 + $0x18] sm:$0xff]   ;;  %v17403_v61 = vld [vmem:[%s18969_s6 + $0xe0] ss:$16 sps:$4 sm:$0xff]  }
0x1436   :  { %v6405_v37 = vmul.f32 1.442695, %v6404_v51  ;;  %v17408_v51 = vld [vmem:[%s18969_s6 + $0xe4] ss:$16 sps:$4 sm:$0xff]  }
0x1438   :  { %14871 = vpow2.f32 %v6405_v37  ;;  %v17413_v37 = vld [vmem:[%s18969_s6 + $0xc4] ss:$16 sps:$4 sm:$0xff]  }
0x1445   :  { %v14872_v8 = vpop.eup %14871 }
0x1446   :  { %v6407_v57 = vsel %vm4417_vm3, %v14872_v8, 0.0 }
0x1447   :  { %6408 = vadd.xlane.f32.xlu1 %v6407_v57  ;;  %v17432_v57 = vld [vmem:[%s18969_s6 + $0xa0] ss:$16 sps:$4 sm:$0xff]  }
0x14d0   :  { %v6409_v63 = vpop.xlane.xlu1 %6408 }
0x14d1   :  { %14873 = vrcp.f32 %v6409_v63 }
0x14de   :  { %v14874_v36 = vpop.eup %14873 }
0x14df   :  { %v6411_v41 = vmul.f32 %v14874_v36, %v14872_v8  ;;  %v17426_v8 = vld [vmem:[%s18969_s6 + $0xa4] ss:$16 sps:$4 sm:$0xff]  }
0x14e1   :  { %v6412_v34 = vpack.c.bf16 %v6411_v41, %v6411_v41 }
0x14e3   :  { %13358 = vmatmul.mubr.msk.bf16.vlgmr.msra.gmra.mxu1 %vm4417_vm3, %v6412_v34 }
0x14e4   :  { %13362 = vmatpush3.bf16.msra.mxu1 %v14287_v43  ;;  %13377 = vmatprep.mubr.msk.bf16.mxu1 %vm15041_vm0, %v15040_v2  ;;  %v17522_v43 = vld [vmem:[%s18970_s7 + $0xe0] ss:$16 sps:$4 sm:$0xff]  }
0x14e5   :  { %13363 = vmatprep.subr.bf16.mxu1 %v15040_v2 }
0x14e8   :  { %13364 = vmatpush3.bf16.msra.mxu1 %v14288_v48  ;;  %v17527_v48 = vld [vmem:[%s18970_s7 + $0xc4] ss:$16 sps:$4 sm:$0xff]  }
0x14e9   :  { %13365 = vmatprep.subr.bf16.mxu1 %v15040_v2 }
0x14ec   :  { %13366 = vmatpush3.bf16.msra.mxu1 %v14289_v24  ;;  %v17534_v24 = vld [vmem:[%s18970_s7 + $0xc0] ss:$16 sps:$4 sm:$0xff]  }
0x14ed   :  { %13367 = vmatprep.subr.bf16.mxu1 %v15040_v2 }
0x14f0   :  { %13368 = vmatpush3.bf16.msra.mxu1 %v14290_v16  ;;  %v17541_v16 = vld [vmem:[%s18970_s7 + $0xa4] ss:$16 sps:$4 sm:$0xff]  }
0x14f1   :  { %13369 = vmatprep.subr.bf16.mxu1 %v15040_v2 }
0x14f4   :  { %13370 = vmatpush3.bf16.msra.mxu1 %v14291_v52  ;;  %v14352_v52 = vld [vmem:[#allocation5 + $0x18] sm:$0xff]  }
0x14f5   :  { %13371 = vmatprep.subr.bf16.mxu1 %v15040_v2 }
0x14f8   :  { %13372 = vmatpush3.bf16.msra.mxu1 %v14292_v3  ;;  %v14357_v3 = vld [vmem:[#allocation6 + $0x20] sm:$0xff]  }
0x14f9   :  { %13373 = vmatprep.subr.bf16.mxu1 %v15040_v2 }
0x14fc   :  { %13374 = vmatpush3.bf16.msra.mxu1 %v14293_v21  ;;  %v14358_v21 = vld [vmem:[#allocation5] sm:$0xff]  }
0x14fd   :  { %13375 = vmatprep.subr.bf16.mxu1 %v15040_v2 }
0x1500   :  { %13376 = vmatpush3.bf16.msra.mxu1 %v14294_v7  ;;  %v14359_v7 = vld [vmem:[#allocation6 + $0x18] sm:$0xff]  }
0x1501   :  { %6899 = vmatprep.subr.bf16.mxu1 %v17408_v51 }
0x1503   :  { %13378 = vmatmul.mubr.bf16.vlgmr.msra.gmra.mxu1 %v17323_v33 }
0x1504   :  { %6931 = vmatprep.mubr.bf16.mxu1 %v19032_v54  ;;  %6900 = vmatpush1.bf16.msra.mxu1 %v17403_v61 }
0x1505   :  { %6901 = vmatprep.subr.bf16.mxu1 %v17413_v37 }
0x1508   :  { %6902 = vmatpush1.bf16.msra.mxu1 %v17420_v18 }
0x1509   :  { %6903 = vmatprep.subr.bf16.mxu1 %v17426_v8 }
0x150c   :  { %6904 = vmatpush1.bf16.msra.mxu1 %v17432_v57 }
0x150d   :  { %6905 = vmatprep.subr.bf16.mxu1 %v17438_v4 }
0x1510   :  { %6906 = vmatpush1.bf16.msra.mxu1 %v17444_v10 }
0x15a3   :  { %v6482_v1 = vpop.f32.mrf.mxu1 }
0x15a4   :  { %v6488_v25 = vpack.c.bf16 %v6482_v1, %v6482_v1  ;;  %v14361_v1 = vld [vmem:[#allocation6 + $0x8] sm:$0xff]  }
0x15a5   :  { %v13359_v13 = vpop.f32.mrf.mxu1 }
0x15a6   :  { %13398 = vmatmul.mubr.bf16.vlgmr.msra.gmra.mxu0 %v6488_v25  ;;  %v14362_v25 = vld [vmem:[#allocation6] sm:$0xff]  }
0x15a7   :  { %v6485_v56 = vpop.f32.mrf.mxu1  ;;  %6941 = vmatpush1.bf16.msra.mxu0 %v17094_v17  ;;  %6972 = vmatprep.mubr.bf16.mxu0 %v19032_v54 }
0x15a8   :  { %6942 = vmatprep.subr.bf16.mxu0 %v17099_v32 }
0x15a9   :  { %v13360_v31 = vpop.f32.mrf.mxu1 }
0x15ab   :  { %6943 = vmatpush1.bf16.msra.mxu0 %v17105_v50 }
0x15ac   :  { %6944 = vmatprep.subr.bf16.mxu0 %v17112_v23 }
0x15af   :  { %6945 = vmatpush1.bf16.msra.mxu0 %v17118_v62  ;;  %v17468_v62 = vld [vmem:[%s18969_s6 + $0x64] ss:$16 sps:$4 sm:$0xff]  }
0x15b0   :  { %6946 = vmatprep.subr.bf16.mxu0 %v17124_v47  ;;  %v17473_v47 = vld [vmem:[%s18969_s6 + $0x60] ss:$16 sps:$4 sm:$0xff]   ;;  %6907 = vmatprep.subr.bf16.mxu1 %v17468_v62 }
0x15b1   :  { %6908 = vmatpush1.bf16.msra.mxu1 %v17473_v47 }
0x15b3   :  { %6947 = vmatpush1.bf16.msra.mxu0 %v17130_v28  ;;  %v17480_v28 = vld [vmem:[%s18969_s6 + $0x44] ss:$16 sps:$4 sm:$0xff]  }
0x15b4   :  { %6948 = vmatprep.subr.bf16.mxu0 %v17137_v0  ;;  %v17485_v0 = vld [vmem:[%s18969_s6 + $0x40] ss:$16 sps:$4 sm:$0xff]   ;;  %6909 = vmatprep.subr.bf16.mxu1 %v17480_v28 }
0x15b5   :  { %6910 = vmatpush1.bf16.msra.mxu1 %v17485_v0 }
0x15b7   :  { %6949 = vmatpush1.bf16.msra.mxu0 %v17142_v30  ;;  %v17492_v30 = vld [vmem:[%s18969_s6 + $0x24] ss:$16 sps:$4 sm:$0xff]  }
0x15b8   :  { %6950 = vmatprep.subr.bf16.mxu0 %v17149_v14  ;;  %v17497_v14 = vld [vmem:[%s18969_s6 + $0x20] ss:$16 sps:$4 sm:$0xff]   ;;  %6911 = vmatprep.subr.bf16.mxu1 %v17492_v30 }
0x15b9   :  { %6912 = vmatpush1.bf16.msra.mxu1 %v17497_v14 }
0x15bb   :  { %6951 = vmatpush1.bf16.msra.mxu0 %v17154_v44  ;;  %v17504_v44 = vld [vmem:[%s18969_s6 + $0x4] ss:$16 sps:$4 sm:$0xff]  }
0x15bc   :  { %6952 = vmatprep.subr.bf16.mxu0 %v17161_v53  ;;  %v17509_v53 = vld [vmem:[%s18969_s6] ss:$16 sps:$4 sm:$0xff]   ;;  %6913 = vmatprep.subr.bf16.mxu1 %v17504_v44 }
0x15bd   :  { %6914 = vmatpush1.bf16.msra.mxu1 %v17509_v53 }
0x15bf   :  { %6953 = vmatpush1.bf16.msra.mxu0 %v17166_v5  ;;  %v17516_v5 = vld [vmem:[%s18970_s7 + $0xe4] ss:$16 sps:$4 sm:$0xff]  }
0x15c0   :  { %6954 = vmatprep.subr.bf16.mxu0 %v17173_v49  ;;  %7177 = vmatprep.subr.bf16.mxu1 %v17516_v5 }
0x15c3   :  { %v6603_v17 = vpop.f32.mrf.mxu1  ;;  %6955 = vmatpush1.bf16.msra.mxu0 %v17178_v60 }
0x15c4   :  { %7218 = vmatprep.subr.bf16.mxu0 %v17185_v58 }
0x15c5   :  { %v13379_v32 = vpop.f32.mrf.mxu1 }
0x15c7   :  { %v6606_v50 = vpop.f32.mrf.mxu1 }
0x15c9   :  { %v13380_v23 = vpop.f32.mrf.mxu1 }
0x1666   :  { %v6691_v49 = vpop.f32.mrf.mxu0 }
0x1667   :  { %v6692_v60 = vadd.f32 %v6691_v49, %v6603_v17 }
0x1668   :  { %v13399_v58 = vpop.f32.mrf.mxu0 }
0x1669   :  { %14875 = vtanh.f32 %v6692_v60  ;;  %v19064_v60 = vld [vmem:[#allocation40_spill] sm:$0xff] }
0x166a   :  { %v6694_v63 = vpop.f32.mrf.mxu0  ;;  %v764_v58 = vadd.f32 %v19064_v60, %v19054_v59 }
0x166b   :  { %v19065_v63 = vld [vmem:[#allocation38_spill] sm:$0xff] }
0x166c   :  { %v13400_v36 = vpop.f32.mrf.mxu0 }
0x1676   :  { %v14876_v41 = vpop.eup %14875 }
0x1677   :  { %6699 = vst [vmem:[#allocation7 + $0x10] sm:$0xff] %v14876_v41  ;;  %v6700_v34 = vpack.c.bf16 %v14876_v41, %v14876_v41 }
0x1679   :  { %6932 = vmatmul.mubr.bf16.vlgmr.msra.gmra.mxu1 %v6700_v34  ;;  %6973 = vmatmul.mubr.bf16.vlgmr.msra.gmra.mxu0 %v6700_v34 }
0x167a   :  { %7178 = vmatpush1.bf16.msra.mxu1 %v17522_v43  ;;  %7219 = vmatpush1.bf16.msra.mxu0 %v17191_v11  ;;  %v17550_v11 = vld [vmem:[%s18970_s7 + $0xa0] ss:$16 sps:$4 sm:$0xff]  }
0x167b   :  { %7179 = vmatprep.subr.bf16.mxu1 %v17527_v48  ;;  %7220 = vmatprep.subr.bf16.mxu0 %v17196_v38  ;;  %v17557_v38 = vld [vmem:[%s18970_s7 + $0x84] ss:$16 sps:$4 sm:$0xff]  }
0x167c   :  { %7209 = vmatprep.mubr.bf16.mxu1 %v19032_v54  ;;  %7250 = vmatprep.mubr.bf16.mxu0 %v19032_v54 }
0x167e   :  { %7180 = vmatpush1.bf16.msra.mxu1 %v17534_v24  ;;  %7221 = vmatpush1.bf16.msra.mxu0 %v17203_v15  ;;  %v17564_v15 = vld [vmem:[%s18970_s7 + $0x80] ss:$16 sps:$4 sm:$0xff]  }
0x167f   :  { %7181 = vmatprep.subr.bf16.mxu1 %v17541_v16  ;;  %7222 = vmatprep.subr.bf16.mxu0 %v17210_v29  ;;  %v17571_v29 = vld [vmem:[%s18970_s7 + $0x64] ss:$16 sps:$4 sm:$0xff]  }
0x1682   :  { %7182 = vmatpush1.bf16.msra.mxu1 %v17550_v11  ;;  %7223 = vmatpush1.bf16.msra.mxu0 %v17219_v42  ;;  %v17578_v42 = vld [vmem:[%s18970_s7 + $0x60] ss:$16 sps:$4 sm:$0xff]  }
0x1683   :  { %7183 = vmatprep.subr.bf16.mxu1 %v17557_v38  ;;  %7224 = vmatprep.subr.bf16.mxu0 %v17226_v22  ;;  %v17585_v22 = vld [vmem:[%s18970_s7 + $0x44] ss:$16 sps:$4 sm:$0xff]  }
0x1686   :  { %7184 = vmatpush1.bf16.msra.mxu1 %v17564_v15  ;;  %7225 = vmatpush1.bf16.msra.mxu0 %v17233_v46  ;;  %v17592_v46 = vld [vmem:[%s18970_s7 + $0x40] ss:$16 sps:$4 sm:$0xff]  }
0x1687   :  { %7185 = vmatprep.subr.bf16.mxu1 %v17571_v29  ;;  %7226 = vmatprep.subr.bf16.mxu0 %v17240_v20  ;;  %v17599_v20 = vld [vmem:[%s18970_s7 + $0x24] ss:$16 sps:$4 sm:$0xff]  }
0x168a   :  { %7186 = vmatpush1.bf16.msra.mxu1 %v17578_v42  ;;  %7227 = vmatpush1.bf16.msra.mxu0 %v17247_v45  ;;  %v17606_v45 = vld [vmem:[%s18970_s7 + $0x20] ss:$16 sps:$4 sm:$0xff]  }
0x168b   :  { %7187 = vmatprep.subr.bf16.mxu1 %v17585_v22  ;;  %7228 = vmatprep.subr.bf16.mxu0 %v17254_v19  ;;  %v17613_v19 = vld [vmem:[%s18970_s7 + $0x4] ss:$16 sps:$4 sm:$0xff]  }
0x168e   :  { %7188 = vmatpush1.bf16.msra.mxu1 %v17592_v46  ;;  %7229 = vmatpush1.bf16.msra.mxu0 %v17261_v9  ;;  %v17620_v9 = vld [vmem:[%s18970_s7] ss:$16 sps:$4 sm:$0xff]  }
0x168f   :  { %7189 = vmatprep.subr.bf16.mxu1 %v17599_v20  ;;  %7230 = vmatprep.subr.bf16.mxu0 %v17268_v6  ;;  %v14351_v6 = vld [vmem:[#allocation6 + $0x38] sm:$0xff]  }
0x1692   :  { %7190 = vmatpush1.bf16.msra.mxu1 %v17606_v45  ;;  %7231 = vmatpush1.bf16.msra.mxu0 %v17275_v55  ;;  %v14353_v55 = vld [vmem:[#allocation6 + $0x30] sm:$0xff]  }
0x1693   :  { %7191 = vmatprep.subr.bf16.mxu1 %v17613_v19  ;;  %7232 = vmatprep.subr.bf16.mxu0 %v17282_v39  ;;  %v14354_v39 = vld [vmem:[#allocation5 + $0x10] sm:$0xff]  }
0x1696   :  { %7192 = vmatpush1.bf16.msra.mxu1 %v17620_v9  ;;  %7233 = vmatpush1.bf16.msra.mxu0 %v17289_v35  ;;  %v14355_v35 = vld [vmem:[#allocation6 + $0x28] sm:$0xff]  }
0x1697   :  { %13401 = vmatprep.subr.bf16.mxu1 %v15040_v2  ;;  %13421 = vmatprep.subr.bf16.mxu0 %v15040_v2 }
0x1699   :  { %7210 = vmatmul.mubr.bf16.vlgmr.msra.gmra.mxu1 %v17323_v33  ;;  %7251 = vmatmul.mubr.bf16.vlgmr.msra.gmra.mxu0 %v17323_v33  ;;  %v14356_v33 = vld [vmem:[#allocation5 + $0x8] sm:$0xff]  }
0x169a   :  { %13402 = vmatpush3.bf16.msra.mxu1 %v14351_v6  ;;  %13422 = vmatpush3.bf16.msra.mxu0 %v14352_v52 }
0x169b   :  { %13403 = vmatprep.subr.bf16.mxu1 %v15040_v2  ;;  %13423 = vmatprep.subr.bf16.mxu0 %v15040_v2 }
0x169c   :  { %13417 = vmatprep.mubr.msk.bf16.mxu1 %vm15041_vm0, %v15040_v2  ;;  %13429 = vmatprep.mubr.msk.bf16.mxu0 %vm15041_vm0, %v15040_v2 }
0x169e   :  { %13404 = vmatpush3.bf16.msra.mxu1 %v14353_v55  ;;  %13424 = vmatpush3.bf16.msra.mxu0 %v14354_v39 }
0x169f   :  { %13405 = vmatprep.subr.bf16.mxu1 %v15040_v2  ;;  %13425 = vmatprep.subr.bf16.mxu0 %v15040_v2 }
0x16a2   :  { %13406 = vmatpush3.bf16.msra.mxu1 %v14355_v35  ;;  %13426 = vmatpush3.bf16.msra.mxu0 %v14356_v33 }
0x16a3   :  { %13407 = vmatprep.subr.bf16.mxu1 %v15040_v2  ;;  %13427 = vmatprep.subr.bf16.mxu0 %v15040_v2 }
0x16a6   :  { %13408 = vmatpush3.bf16.msra.mxu1 %v14357_v3  ;;  %13428 = vmatpush3.bf16.msra.mxu0 %v14358_v21 }
0x16a7   :  { %13409 = vmatprep.subr.bf16.mxu1 %v15040_v2  ;;  %13433 = vmatprep.subr.bf16.mxu0 %v15040_v2 }
0x16aa   :  { %13410 = vmatpush3.bf16.msra.mxu1 %v14359_v7 }
0x16ab   :  { %13411 = vmatprep.subr.bf16.mxu1 %v15040_v2 }
0x16ae   :  { %13412 = vmatpush3.bf16.msra.mxu1 %v14360_v26 }
0x16af   :  { %13413 = vmatprep.subr.bf16.mxu1 %v15040_v2 }
0x16b2   :  { %13414 = vmatpush3.bf16.msra.mxu1 %v14361_v1 }
0x16b3   :  { %13415 = vmatprep.subr.bf16.mxu1 %v15040_v2 }
0x16b6   :  { %13416 = vmatpush3.bf16.msra.mxu1 %v14362_v25  ;;  %v19066_v25 = vld [vmem:[#allocation41_spill] sm:$0xff] }
0x16b7   :  { %13453 = vmatprep.subr.bf16.mxu1 %v15040_v2 }
0x1739   :  { %v6933_v13 = vpop.f32.mrf.mxu1  ;;  %v6974_v56 = vpop.f32.mrf.mxu0 }
0x173a   :  { %v6981_v36 = vadd.f32 %v6933_v13, %v19065_v63 }
0x173b   :  { %v6935_v31 = vpop.f32.mrf.mxu1  ;;  %v6976_v17 = vpop.f32.mrf.mxu0 }
0x173c   :  { %v6982_v6 = vadd.f32 %v6935_v31, %v764_v58 }
0x173d   :  { %v6937_v32 = vpop.f32.mrf.mxu1  ;;  %v6978_v50 = vpop.f32.mrf.mxu0 }
0x173e   :  { %v837_v32 = vadd.f32 %v19066_v25, %v19057_v40 }
0x173f   :  { %v6938_v23 = vpop.f32.mrf.mxu1  ;;  %v6979_v49 = vpop.f32.mrf.mxu0 }
0x1740   :  { %v6984_v50 = vadd.f32 %v6976_v17, %v837_v32  ;;  %v19067_v23 = vld [vmem:[#allocation39_spill] sm:$0xff] }
0x1741   :  { %v6983_v49 = vadd.f32 %v6974_v56, %v19067_v23 }
0x1759   :  { %v7211_v41 = vpop.f32.mrf.mxu1  ;;  %v7252_v34 = vpop.f32.mrf.mxu0 }
0x175a   :  { %v7259_v52 = vadd.f32 %v7211_v41, %v6981_v36  ;;  %v7261_v31 = vadd.f32 %v7252_v34, %v6983_v49 }
0x175b   :  { %v7213_v55 = vpop.f32.mrf.mxu1  ;;  %v7254_v39 = vpop.f32.mrf.mxu0 }
0x175c   :  { %v12430_v35 = vmul.f32 -1.442695, %v7259_v52  ;;  %v7260_v33 = vadd.f32 %v7213_v55, %v6982_v6  ;;  %v7262_v13 = vadd.f32 %v7254_v39, %v6984_v50 }
0x175d   :  { %v7215_v3 = vpop.f32.mrf.mxu1  ;;  %v7256_v21 = vpop.f32.mrf.mxu0 }
0x175e   :  { %14877 = vpow2.f32 %v12430_v35  ;;  %v12431_v7 = vmul.f32 -1.442695, %v7260_v33  ;;  %v12432_v60 = vmul.f32 -1.442695, %v7262_v13 }
0x175f   :  { %v7216_v26 = vpop.f32.mrf.mxu1  ;;  %v7257_v1 = vpop.f32.mrf.mxu0 }
0x1760   :  { %14879 = vpow2.f32 %v12431_v7 }
0x1761   :  { %14881 = vtanh.f32 %v7261_v31 }
0x1762   :  { %14883 = vpow2.f32 %v12432_v60 }
0x176b   :  { %v14878_v58 = vpop.eup %14877 }
0x176c   :  { %v7266_v63 = vadd.f32 1.0, %v14878_v58  ;;  %v14371_v58 = vld [vmem:[%s18973_s10 + $0x38] sm:$0xff]  }
0x176d   :  { %v14880_v36 = vpop.eup %14879 }
0x176e   :  { %14885 = vrcp.f32 %v7266_v63  ;;  %v7272_v41 = vadd.f32 1.0, %v14880_v36  ;;  %v14882_v6 = vpop.eup %14881  ;;  %v14372_v63 = vld [vmem:[%s18973_s10 + $0x30] sm:$0xff]   ;;  %v14373_v36 = vld [vmem:[%s18973_s10 + $0x28] sm:$0xff]  }
0x176f   :  { %v14884_v52 = vpop.eup %14883 }
0x1770   :  { %14887 = vrcp.f32 %v7272_v41  ;;  %v7279_v3 = vadd.f32 1.0, %v14884_v52  ;;  %v14374_v41 = vld [vmem:[%s18973_s10 + $0x20] sm:$0xff]   ;;  %v14376_v52 = vld [vmem:[%s18973_s10 + $0x10] sm:$0xff]  }
0x1772   :  { %14889 = vrcp.f32 %v7279_v3 }
0x177b   :  { %v14886_v55 = vpop.eup %14885 }
0x177c   :  { %v7283_v35 = vmul.f32 %v14886_v55, %v14882_v6  ;;  %v14375_v6 = vld [vmem:[%s18973_s10 + $0x18] sm:$0xff]   ;;  %v14377_v55 = vld [vmem:[%s18973_s10 + $0x8] sm:$0xff]  }
0x177d   :  { %v14888_v33 = vpop.eup %14887 }
0x177e   :  { %v7282_v17 = vmul.f32 %v14888_v33, %v17320_v12 }
0x177f   :  { %v14890_v56 = vpop.eup %14889 }
0x1780   :  { %v17653_v39 = vadd.f32 %v7283_v35, %v7282_v17  ;;  %v14363_v17 = vld [vmem:[%s18974_s11 + $0x38] sm:$0xff]  }
0x1782   :  { %14891 = vtanh.f32 %v17653_v39 }
0x178f   :  { %v14892_v34 = vpop.eup %14891 }
0x1790   :  { %v7286_v21 = vmul.f32 %v14892_v34, %v14890_v56  ;;  %v14364_v34 = vld [vmem:[%s18974_s11 + $0x30] sm:$0xff]  }
0x1792   :  { %v17656_v7 = vpack.c.bf16 %v7286_v21, %v7286_v21  ;;  %v14365_v21 = vld [vmem:[%s18974_s11 + $0x28] sm:$0xff]  }
0x1794   :  { %13418 = vmatmul.mubr.bf16.vlgmr.msra.gmra.mxu1 %v17656_v7 }
0x1795   :  { %13469 = vmatprep.mubr.msk.bf16.mxu1 %vm15041_vm0, %v15040_v2  ;;  %13454 = vmatpush3.bf16.msra.mxu1 %v14371_v58  ;;  %v17830_v58 = vld [vmem:[%s18969_s6 + $0x28] ss:$16 sps:$4 sm:$0xff]  }
0x1796   :  { %13455 = vmatprep.subr.bf16.mxu1 %v15040_v2 }
0x1799   :  { %13456 = vmatpush3.bf16.msra.mxu1 %v14372_v63  ;;  %v17837_v63 = vld [vmem:[%s18969_s6 + $0xc] ss:$16 sps:$4 sm:$0xff]  }
0x179a   :  { %13457 = vmatprep.subr.bf16.mxu1 %v15040_v2 }
0x179d   :  { %13458 = vmatpush3.bf16.msra.mxu1 %v14373_v36  ;;  %v17842_v36 = vld [vmem:[%s18969_s6 + $0x8] ss:$16 sps:$4 sm:$0xff]  }
0x179e   :  { %13459 = vmatprep.subr.bf16.mxu1 %v15040_v2 }
0x17a1   :  { %13460 = vmatpush3.bf16.msra.mxu1 %v14374_v41  ;;  %v17849_v41 = vld [vmem:[%s18970_s7 + $0xec] ss:$16 sps:$4 sm:$0xff]  }
0x17a2   :  { %13461 = vmatprep.subr.bf16.mxu1 %v15040_v2 }
0x17a5   :  { %13462 = vmatpush3.bf16.msra.mxu1 %v14375_v6 }
0x17a6   :  { %13463 = vmatprep.subr.bf16.mxu1 %v15040_v2 }
0x17a9   :  { %13464 = vmatpush3.bf16.msra.mxu1 %v14376_v52 }
0x17aa   :  { %13465 = vmatprep.subr.bf16.mxu1 %v15040_v2 }
0x17ad   :  { %13466 = vmatpush3.bf16.msra.mxu1 %v14377_v55 }
0x17ae   :  { %13467 = vmatprep.subr.bf16.mxu1 %v15040_v2 }
0x1854   :  { %v7386_v26 = vpop.f32.mrf.mxu1 }
0x1855   :  { %v7392_v1 = vsel %vm16690_vm2, %v7386_v26, -1.7014117e+38  ;;  %v14366_v26 = vld [vmem:[%s18974_s11 + $0x20] sm:$0xff]  }
0x1856   :  { %v13419_v12 = vpop.f32.mrf.mxu1  ;;  %v7393_v25 = vsel %vm4417_vm3, %v7392_v1, -inf }
0x1857   :  { %7394 = vmax.xlane.f32.xlu0 %v7393_v25  ;;  %v14368_v12 = vld [vmem:[%s18974_s11 + $0x10] sm:$0xff]   ;;  %v14369_v25 = vld [vmem:[%s18974_s11 + $0x8] sm:$0xff]  }
0x1858   :  { %v7389_v32 = vpop.f32.mrf.mxu1 }
0x1859   :  { %v14370_v32 = vld [vmem:[%s18974_s11] sm:$0xff]  }
0x185a   :  { %v13420_v50 = vpop.f32.mrf.mxu1 }
0x18e0   :  { %v7395_v13 = vpop.xlane.xlu0 %7394 }
0x18e1   :  { %v7396_v23 = vsub.f32 %v7392_v1, %v7395_v13  ;;  %v14367_v1 = vld [vmem:[%s18974_s11 + $0x18] sm:$0xff]  }
0x18e2   :  { %v17801_v13 = vld [vmem:[%s18969_s6 + $0x6c] ss:$16 sps:$4 sm:$0xff]  }
0x18e3   :  { %v7397_v49 = vmul.f32 1.442695, %v7396_v23  ;;  %v17806_v23 = vld [vmem:[%s18969_s6 + $0x68] ss:$16 sps:$4 sm:$0xff]  }
0x18e5   :  { %14893 = vpow2.f32 %v7397_v49  ;;  %v17813_v49 = vld [vmem:[%s18969_s6 + $0x4c] ss:$16 sps:$4 sm:$0xff]  }
0x18f2   :  { %v14894_v31 = vpop.eup %14893 }
0x18f3   :  { %v7399_v60 = vsel %vm4417_vm3, %v14894_v31, 0.0 }
0x18f4   :  { %7400 = vadd.xlane.f32.xlu1 %v7399_v60  ;;  %v17825_v60 = vld [vmem:[%s18969_s6 + $0x2c] ss:$16 sps:$4 sm:$0xff]  }
0x197d   :  { %v7401_v35 = vpop.xlane.xlu1 %7400 }
0x197e   :  { %14895 = vrcp.f32 %v7401_v35 }
0x198b   :  { %v14896_v33 = vpop.eup %14895 }
0x198c   :  { %v7403_v3 = vmul.f32 %v14896_v33, %v14894_v31  ;;  %v17818_v31 = vld [vmem:[%s18969_s6 + $0x48] ss:$16 sps:$4 sm:$0xff]  }
0x198e   :  { %v7404_v56 = vpack.c.bf16 %v7403_v3, %v7403_v3 }
0x1990   :  { %13430 = vmatmul.mubr.msk.bf16.vlgmr.msra.gmra.mxu0 %vm4417_vm3, %v7404_v56 }
0x1991   :  { %13434 = vmatpush3.bf16.msra.mxu0 %v14363_v17  ;;  %13449 = vmatprep.mubr.msk.bf16.mxu0 %vm15041_vm0, %v15040_v2  ;;  %v17855_v17 = vld [vmem:[%s18970_s7 + $0xe8] ss:$16 sps:$4 sm:$0xff]  }
0x1992   :  { %13435 = vmatprep.subr.bf16.mxu0 %v15040_v2 }
0x1995   :  { %13436 = vmatpush3.bf16.msra.mxu0 %v14364_v34  ;;  %v17860_v34 = vld [vmem:[%s18970_s7 + $0xcc] ss:$16 sps:$4 sm:$0xff]  }
0x1996   :  { %13437 = vmatprep.subr.bf16.mxu0 %v15040_v2 }
0x1999   :  { %13438 = vmatpush3.bf16.msra.mxu0 %v14365_v21  ;;  %v17867_v21 = vld [vmem:[%s18970_s7 + $0xc8] ss:$16 sps:$4 sm:$0xff]  }
0x199a   :  { %13439 = vmatprep.subr.bf16.mxu0 %v15040_v2 }
0x199d   :  { %13440 = vmatpush3.bf16.msra.mxu0 %v14366_v26  ;;  %v17874_v26 = vld [vmem:[%s18970_s7 + $0xac] ss:$16 sps:$4 sm:$0xff]  }
0x199e   :  { %13441 = vmatprep.subr.bf16.mxu0 %v15040_v2 }
0x19a1   :  { %13442 = vmatpush3.bf16.msra.mxu0 %v14367_v1  ;;  %v14432_v1 = vld [vmem:[#allocation5 + $0x8] sm:$0xff]  }
0x19a2   :  { %13443 = vmatprep.subr.bf16.mxu0 %v15040_v2 }
0x19a5   :  { %13444 = vmatpush3.bf16.msra.mxu0 %v14368_v12  ;;  %v14433_v12 = vld [vmem:[#allocation6 + $0x20] sm:$0xff]  }
0x19a6   :  { %13445 = vmatprep.subr.bf16.mxu0 %v15040_v2 }
0x19a9   :  { %13446 = vmatpush3.bf16.msra.mxu0 %v14369_v25  ;;  %v14434_v25 = vld [vmem:[#allocation5] sm:$0xff]  }
0x19aa   :  { %13447 = vmatprep.subr.bf16.mxu0 %v15040_v2 }
0x19ad   :  { %13448 = vmatpush3.bf16.msra.mxu0 %v14370_v32  ;;  %v14435_v32 = vld [vmem:[#allocation6 + $0x18] sm:$0xff]  }
0x19ae   :  { %7891 = vmatprep.subr.bf16.mxu0 %v17408_v51  ;;  %v17752_v51 = vld [vmem:[%s18969_s6 + $0xec] ss:$16 sps:$4 sm:$0xff]  }
0x19b0   :  { %13450 = vmatmul.mubr.bf16.vlgmr.msra.gmra.mxu0 %v17656_v7 }
0x19b1   :  { %7892 = vmatpush1.bf16.msra.mxu0 %v17403_v61  ;;  %7923 = vmatprep.mubr.bf16.mxu0 %v19032_v54  ;;  %v14378_v61 = vld [vmem:[%s18973_s10] sm:$0xff]  }
0x19b2   :  { %7893 = vmatprep.subr.bf16.mxu0 %v17413_v37  ;;  %13468 = vmatpush3.bf16.msra.mxu1 %v14378_v61  ;;  %v14436_v61 = vld [vmem:[#allocation6 + $0x10] sm:$0xff]  }
0x19b3   :  { %7932 = vmatprep.subr.bf16.mxu1 %v17752_v51 }
0x19b5   :  { %7894 = vmatpush1.bf16.msra.mxu0 %v17420_v18  ;;  %v17758_v18 = vld [vmem:[%s18969_s6 + $0xe8] ss:$16 sps:$4 sm:$0xff]  }
0x19b6   :  { %7895 = vmatprep.subr.bf16.mxu0 %v17426_v8 }
0x19b9   :  { %7896 = vmatpush1.bf16.msra.mxu0 %v17432_v57  ;;  %v17763_v57 = vld [vmem:[%s18969_s6 + $0xcc] ss:$16 sps:$4 sm:$0xff]  }
0x19ba   :  { %7897 = vmatprep.subr.bf16.mxu0 %v17438_v4 }
0x19bd   :  { %7898 = vmatpush1.bf16.msra.mxu0 %v17444_v10 }
0x19be   :  { %7899 = vmatprep.subr.bf16.mxu0 %v17468_v62  ;;  %v17769_v62 = vld [vmem:[%s18969_s6 + $0xc8] ss:$16 sps:$4 sm:$0xff]  }
0x19c1   :  { %7900 = vmatpush1.bf16.msra.mxu0 %v17473_v47  ;;  %v17776_v47 = vld [vmem:[%s18969_s6 + $0xac] ss:$16 sps:$4 sm:$0xff]  }
0x19c2   :  { %7901 = vmatprep.subr.bf16.mxu0 %v17480_v28 }
0x19c5   :  { %7902 = vmatpush1.bf16.msra.mxu0 %v17485_v0  ;;  %v17782_v0 = vld [vmem:[%s18969_s6 + $0xa8] ss:$16 sps:$4 sm:$0xff]  }
0x19c6   :  { %7903 = vmatprep.subr.bf16.mxu0 %v17492_v30  ;;  %v17788_v30 = vld [vmem:[%s18969_s6 + $0x8c] ss:$16 sps:$4 sm:$0xff]  }
0x19c9   :  { %7904 = vmatpush1.bf16.msra.mxu0 %v17497_v14  ;;  %v17794_v14 = vld [vmem:[%s18969_s6 + $0x88] ss:$16 sps:$4 sm:$0xff]  }
0x19ca   :  { %7905 = vmatprep.subr.bf16.mxu0 %v17504_v44 }
0x19cd   :  { %7906 = vmatpush1.bf16.msra.mxu0 %v17509_v53 }
0x19ce   :  { %8169 = vmatprep.subr.bf16.mxu0 %v17516_v5 }
0x1a50   :  { %v7474_v37 = vpop.f32.mrf.mxu0 }
0x1a51   :  { %v7480_v8 = vpack.c.bf16 %v7474_v37, %v7474_v37  ;;  %v14437_v37 = vld [vmem:[#allocation6 + $0x8] sm:$0xff]  }
0x1a52   :  { %v13431_v4 = vpop.f32.mrf.mxu0 }
0x1a53   :  { %13470 = vmatmul.mubr.bf16.vlgmr.msra.gmra.mxu1 %v7480_v8  ;;  %v14438_v8 = vld [vmem:[#allocation6] sm:$0xff]  }
0x1a54   :  { %v7477_v10 = vpop.f32.mrf.mxu0  ;;  %7933 = vmatpush1.bf16.msra.mxu1 %v17758_v18  ;;  %7964 = vmatprep.mubr.bf16.mxu1 %v19032_v54 }
0x1a55   :  { %7934 = vmatprep.subr.bf16.mxu1 %v17763_v57 }
0x1a56   :  { %v13432_v28 = vpop.f32.mrf.mxu0 }
0x1a58   :  { %7935 = vmatpush1.bf16.msra.mxu1 %v17769_v62 }
0x1a59   :  { %7936 = vmatprep.subr.bf16.mxu1 %v17776_v47 }
0x1a5c   :  { %7937 = vmatpush1.bf16.msra.mxu1 %v17782_v0 }
0x1a5d   :  { %7938 = vmatprep.subr.bf16.mxu1 %v17788_v30 }
0x1a60   :  { %7939 = vmatpush1.bf16.msra.mxu1 %v17794_v14 }
0x1a61   :  { %7940 = vmatprep.subr.bf16.mxu1 %v17801_v13 }
0x1a64   :  { %7941 = vmatpush1.bf16.msra.mxu1 %v17806_v23 }
0x1a65   :  { %7942 = vmatprep.subr.bf16.mxu1 %v17813_v49 }
0x1a68   :  { %7943 = vmatpush1.bf16.msra.mxu1 %v17818_v31 }
0x1a69   :  { %7944 = vmatprep.subr.bf16.mxu1 %v17825_v60 }
0x1a6c   :  { %7945 = vmatpush1.bf16.msra.mxu1 %v17830_v58 }
0x1a6d   :  { %7946 = vmatprep.subr.bf16.mxu1 %v17837_v63 }
0x1a70   :  { %v7595_v44 = vpop.f32.mrf.mxu0  ;;  %7947 = vmatpush1.bf16.msra.mxu1 %v17842_v36 }
0x1a71   :  { %8210 = vmatprep.subr.bf16.mxu1 %v17849_v41 }
0x1a72   :  { %v13451_v53 = vpop.f32.mrf.mxu0 }
0x1a74   :  { %v7598_v5 = vpop.f32.mrf.mxu0 }
0x1a76   :  { %v13452_v50 = vpop.f32.mrf.mxu0 }
0x1b13   :  { %v7683_v6 = vpop.f32.mrf.mxu1 }
0x1b14   :  { %v7684_v52 = vadd.f32 %v7683_v6, %v7595_v44 }
0x1b15   :  { %v13471_v55 = vpop.f32.mrf.mxu1 }
0x1b16   :  { %14897 = vtanh.f32 %v7684_v52  ;;  %v19068_v52 = vld [vmem:[#allocation42_spill] sm:$0xff] }
0x1b17   :  { %v7686_v35 = vpop.f32.mrf.mxu1 }
0x1b19   :  { %v13472_v33 = vpop.f32.mrf.mxu1 }
0x1b23   :  { %v14898_v3 = vpop.eup %14897 }
0x1b24   :  { %7691 = vst [vmem:[#allocation7 + $0x18] sm:$0xff] %v14898_v3  ;;  %v7692_v56 = vpack.c.bf16 %v14898_v3, %v14898_v3  ;;  %v19069_v3 = vld [vmem:[#allocation44_spill] sm:$0xff] }
0x1b26   :  { %7924 = vmatmul.mubr.bf16.vlgmr.msra.gmra.mxu0 %v7692_v56  ;;  %7965 = vmatmul.mubr.bf16.vlgmr.msra.gmra.mxu1 %v7692_v56 }
0x1b27   :  { %8170 = vmatpush1.bf16.msra.mxu0 %v17522_v43  ;;  %8211 = vmatpush1.bf16.msra.mxu1 %v17855_v17  ;;  %v17883_v43 = vld [vmem:[%s18970_s7 + $0xa8] ss:$16 sps:$4 sm:$0xff]  }
0x1b28   :  { %8171 = vmatprep.subr.bf16.mxu0 %v17527_v48  ;;  %8212 = vmatprep.subr.bf16.mxu1 %v17860_v34  ;;  %v17890_v48 = vld [vmem:[%s18970_s7 + $0x8c] ss:$16 sps:$4 sm:$0xff]  }
0x1b29   :  { %8201 = vmatprep.mubr.bf16.mxu0 %v19032_v54  ;;  %8242 = vmatprep.mubr.bf16.mxu1 %v19032_v54 }
0x1b2b   :  { %8172 = vmatpush1.bf16.msra.mxu0 %v17534_v24  ;;  %8213 = vmatpush1.bf16.msra.mxu1 %v17867_v21  ;;  %v17897_v24 = vld [vmem:[%s18970_s7 + $0x88] ss:$16 sps:$4 sm:$0xff]  }
0x1b2c   :  { %8173 = vmatprep.subr.bf16.mxu0 %v17541_v16  ;;  %8214 = vmatprep.subr.bf16.mxu1 %v17874_v26  ;;  %v17904_v16 = vld [vmem:[%s18970_s7 + $0x6c] ss:$16 sps:$4 sm:$0xff]  }
0x1b2f   :  { %8174 = vmatpush1.bf16.msra.mxu0 %v17550_v11  ;;  %8215 = vmatpush1.bf16.msra.mxu1 %v17883_v43  ;;  %v17911_v11 = vld [vmem:[%s18970_s7 + $0x68] ss:$16 sps:$4 sm:$0xff]  }
0x1b30   :  { %8175 = vmatprep.subr.bf16.mxu0 %v17557_v38  ;;  %8216 = vmatprep.subr.bf16.mxu1 %v17890_v48  ;;  %v17918_v38 = vld [vmem:[%s18970_s7 + $0x4c] ss:$16 sps:$4 sm:$0xff]  }
0x1b33   :  { %8176 = vmatpush1.bf16.msra.mxu0 %v17564_v15  ;;  %8217 = vmatpush1.bf16.msra.mxu1 %v17897_v24  ;;  %v17925_v15 = vld [vmem:[%s18970_s7 + $0x48] ss:$16 sps:$4 sm:$0xff]  }
0x1b34   :  { %8177 = vmatprep.subr.bf16.mxu0 %v17571_v29  ;;  %8218 = vmatprep.subr.bf16.mxu1 %v17904_v16  ;;  %v17932_v29 = vld [vmem:[%s18970_s7 + $0x2c] ss:$16 sps:$4 sm:$0xff]  }
0x1b37   :  { %8178 = vmatpush1.bf16.msra.mxu0 %v17578_v42  ;;  %8219 = vmatpush1.bf16.msra.mxu1 %v17911_v11  ;;  %v17939_v42 = vld [vmem:[%s18970_s7 + $0x28] ss:$16 sps:$4 sm:$0xff]  }
0x1b38   :  { %8179 = vmatprep.subr.bf16.mxu0 %v17585_v22  ;;  %8220 = vmatprep.subr.bf16.mxu1 %v17918_v38  ;;  %v17946_v22 = vld [vmem:[%s18970_s7 + $0xc] ss:$16 sps:$4 sm:$0xff]  }
0x1b3b   :  { %8180 = vmatpush1.bf16.msra.mxu0 %v17592_v46  ;;  %8221 = vmatpush1.bf16.msra.mxu1 %v17925_v15  ;;  %v17953_v46 = vld [vmem:[%s18970_s7 + $0x8] ss:$16 sps:$4 sm:$0xff]  }
0x1b3c   :  { %8181 = vmatprep.subr.bf16.mxu0 %v17599_v20  ;;  %8222 = vmatprep.subr.bf16.mxu1 %v17932_v29  ;;  %v14427_v20 = vld [vmem:[#allocation6 + $0x38] sm:$0xff]  }
0x1b3f   :  { %8182 = vmatpush1.bf16.msra.mxu0 %v17606_v45  ;;  %8223 = vmatpush1.bf16.msra.mxu1 %v17939_v42  ;;  %v14428_v45 = vld [vmem:[#allocation5 + $0x18] sm:$0xff]  }
0x1b40   :  { %8183 = vmatprep.subr.bf16.mxu0 %v17613_v19  ;;  %8224 = vmatprep.subr.bf16.mxu1 %v17946_v22  ;;  %v14429_v19 = vld [vmem:[#allocation6 + $0x30] sm:$0xff]  }
0x1b43   :  { %8184 = vmatpush1.bf16.msra.mxu0 %v17620_v9  ;;  %8225 = vmatpush1.bf16.msra.mxu1 %v17953_v46  ;;  %v14430_v9 = vld [vmem:[#allocation5 + $0x10] sm:$0xff]  }
0x1b44   :  { %13473 = vmatprep.subr.bf16.mxu0 %v15040_v2  ;;  %13493 = vmatprep.subr.bf16.mxu1 %v15040_v2 }
0x1b46   :  { %8202 = vmatmul.mubr.bf16.vlgmr.msra.gmra.mxu0 %v17656_v7  ;;  %8243 = vmatmul.mubr.bf16.vlgmr.msra.gmra.mxu1 %v17656_v7  ;;  %v14431_v7 = vld [vmem:[#allocation6 + $0x28] sm:$0xff]  }
0x1b47   :  { %13474 = vmatpush3.bf16.msra.mxu0 %v14427_v20  ;;  %13494 = vmatpush3.bf16.msra.mxu1 %v14428_v45 }
0x1b48   :  { %13475 = vmatprep.subr.bf16.mxu0 %v15040_v2  ;;  %13495 = vmatprep.subr.bf16.mxu1 %v15040_v2 }
0x1b49   :  { %13489 = vmatprep.mubr.msk.bf16.mxu0 %vm15041_vm0, %v15040_v2  ;;  %13501 = vmatprep.mubr.msk.bf16.mxu1 %vm15041_vm0, %v15040_v2 }
0x1b4b   :  { %13476 = vmatpush3.bf16.msra.mxu0 %v14429_v19  ;;  %13496 = vmatpush3.bf16.msra.mxu1 %v14430_v9 }
0x1b4c   :  { %13477 = vmatprep.subr.bf16.mxu0 %v15040_v2  ;;  %13497 = vmatprep.subr.bf16.mxu1 %v15040_v2 }
0x1b4f   :  { %13478 = vmatpush3.bf16.msra.mxu0 %v14431_v7  ;;  %13498 = vmatpush3.bf16.msra.mxu1 %v14432_v1 }
0x1b50   :  { %13479 = vmatprep.subr.bf16.mxu0 %v15040_v2  ;;  %13499 = vmatprep.subr.bf16.mxu1 %v15040_v2 }
0x1b53   :  { %13480 = vmatpush3.bf16.msra.mxu0 %v14433_v12  ;;  %13500 = vmatpush3.bf16.msra.mxu1 %v14434_v25 }
0x1b54   :  { %13481 = vmatprep.subr.bf16.mxu0 %v15040_v2  ;;  %13505 = vmatprep.subr.bf16.mxu1 %v15040_v2 }
0x1b57   :  { %13482 = vmatpush3.bf16.msra.mxu0 %v14435_v32 }
0x1b58   :  { %13483 = vmatprep.subr.bf16.mxu0 %v15040_v2 }
0x1b5b   :  { %13484 = vmatpush3.bf16.msra.mxu0 %v14436_v61 }
0x1b5c   :  { %13485 = vmatprep.subr.bf16.mxu0 %v15040_v2 }
0x1b5f   :  { %13486 = vmatpush3.bf16.msra.mxu0 %v14437_v37  ;;  %v19070_v37 = vld [vmem:[#allocation45_spill] sm:$0xff] }
0x1b60   :  { %13487 = vmatprep.subr.bf16.mxu0 %v15040_v2 }
0x1b63   :  { %13488 = vmatpush3.bf16.msra.mxu0 %v14438_v8 }
0x1b64   :  { %13525 = vmatprep.subr.bf16.mxu0 %v15040_v2 }
0x1be6   :  { %v7925_v4 = vpop.f32.mrf.mxu0  ;;  %v7966_v10 = vpop.f32.mrf.mxu1 }
0x1be7   :  { %v7973_v55 = vadd.f32 %v7925_v4, %v19068_v52  ;;  %v19071_v4 = vld [vmem:[#allocation43_spill] sm:$0xff] }
0x1be8   :  { %v7927_v28 = vpop.f32.mrf.mxu0  ;;  %v7968_v44 = vpop.f32.mrf.mxu1 }
0x1be9   :  { %v7974_v56 = vadd.f32 %v7927_v28, %v19069_v3  ;;  %v7976_v8 = vadd.f32 %v7968_v44, %v19070_v37 }
0x1bea   :  { %v7929_v53 = vpop.f32.mrf.mxu0  ;;  %v7970_v5 = vpop.f32.mrf.mxu1 }
0x1beb   :  { %v7975_v5 = vadd.f32 %v7966_v10, %v19071_v4 }
0x1bec   :  { %v7930_v50 = vpop.f32.mrf.mxu0  ;;  %v7971_v6 = vpop.f32.mrf.mxu1 }
0x1c06   :  { %v8203_v35 = vpop.f32.mrf.mxu0  ;;  %v8244_v33 = vpop.f32.mrf.mxu1 }
0x1c07   :  { %v8251_v20 = vadd.f32 %v8203_v35, %v7973_v55  ;;  %v8253_v50 = vadd.f32 %v8244_v33, %v7975_v5 }
0x1c08   :  { %v8205_v45 = vpop.f32.mrf.mxu0  ;;  %v8246_v19 = vpop.f32.mrf.mxu1 }
0x1c09   :  { %v12526_v9 = vmul.f32 -1.442695, %v8251_v20  ;;  %v8252_v7 = vadd.f32 %v8205_v45, %v7974_v56  ;;  %v8254_v53 = vadd.f32 %v8246_v19, %v7976_v8 }
0x1c0a   :  { %v8207_v1 = vpop.f32.mrf.mxu0  ;;  %v8248_v12 = vpop.f32.mrf.mxu1 }
0x1c0b   :  { %14899 = vpow2.f32 %v12526_v9  ;;  %v12527_v25 = vmul.f32 -1.442695, %v8252_v7  ;;  %v12528_v6 = vmul.f32 -1.442695, %v8254_v53 }
0x1c0c   :  { %v8208_v32 = vpop.f32.mrf.mxu0  ;;  %v8249_v61 = vpop.f32.mrf.mxu1 }
0x1c0d   :  { %14901 = vpow2.f32 %v12527_v25 }
0x1c0e   :  { %14903 = vtanh.f32 %v8253_v50 }
0x1c0f   :  { %14905 = vpow2.f32 %v12528_v6 }
0x1c18   :  { %v14900_v28 = vpop.eup %14899 }
0x1c19   :  { %v8258_v52 = vadd.f32 1.0, %v14900_v28  ;;  %v14447_v28 = vld [vmem:[%s18973_s10 + $0x38] sm:$0xff]  }
0x1c1a   :  { %v14902_v55 = vpop.eup %14901 }
0x1c1b   :  { %14907 = vrcp.f32 %v8258_v52  ;;  %v8264_v35 = vadd.f32 1.0, %v14902_v55  ;;  %v14904_v3 = vpop.eup %14903  ;;  %v14448_v52 = vld [vmem:[%s18973_s10 + $0x30] sm:$0xff]   ;;  %v14449_v55 = vld [vmem:[%s18973_s10 + $0x28] sm:$0xff]  }
0x1c1c   :  { %v14906_v56 = vpop.eup %14905 }
0x1c1d   :  { %14909 = vrcp.f32 %v8264_v35  ;;  %v8271_v7 = vadd.f32 1.0, %v14906_v56  ;;  %v14450_v35 = vld [vmem:[%s18973_s10 + $0x20] sm:$0xff]   ;;  %v14452_v56 = vld [vmem:[%s18973_s10 + $0x10] sm:$0xff]  }
0x1c1f   :  { %14911 = vrcp.f32 %v8271_v7 }
0x1c28   :  { %v14908_v20 = vpop.eup %14907 }
0x1c29   :  { %v8275_v45 = vmul.f32 %v14908_v20, %v14904_v3  ;;  %v14451_v3 = vld [vmem:[%s18973_s10 + $0x18] sm:$0xff]   ;;  %v14453_v20 = vld [vmem:[%s18973_s10 + $0x8] sm:$0xff]  }
0x1c2a   :  { %v14910_v9 = vpop.eup %14909 }
0x1c2b   :  { %v8274_v44 = vmul.f32 %v14910_v9, %v17653_v39 }
0x1c2c   :  { %v14912_v10 = vpop.eup %14911 }
0x1c2d   :  { %v17984_v19 = vadd.f32 %v8275_v45, %v8274_v44  ;;  %v14439_v44 = vld [vmem:[%s18974_s11 + $0x38] sm:$0xff]  }
0x1c2f   :  { %14913 = vtanh.f32 %v17984_v19 }
0x1c3c   :  { %v14914_v33 = vpop.eup %14913 }
0x1c3d   :  { %v8278_v1 = vmul.f32 %v14914_v33, %v14912_v10  ;;  %v14440_v33 = vld [vmem:[%s18974_s11 + $0x30] sm:$0xff]  }
0x1c3f   :  { %v17987_v12 = vpack.c.bf16 %v8278_v1, %v8278_v1  ;;  %v14441_v1 = vld [vmem:[%s18974_s11 + $0x28] sm:$0xff]  }
0x1c41   :  { %13490 = vmatmul.mubr.bf16.vlgmr.msra.gmra.mxu0 %v17987_v12 }
0x1c42   :  { %13541 = vmatprep.mubr.msk.bf16.mxu0 %vm15041_vm0, %v15040_v2  ;;  %13526 = vmatpush3.bf16.msra.mxu0 %v14447_v28  ;;  %v18102_v28 = vld [vmem:[%s18969_s6 + $0x84] ss:$16 sps:$4 sm:$0xff]  }
0x1c43   :  { %13527 = vmatprep.subr.bf16.mxu0 %v15040_v2 }
0x1c46   :  { %13528 = vmatpush3.bf16.msra.mxu0 %v14448_v52  ;;  %v18108_v52 = vld [vmem:[%s18969_s6 + $0x80] ss:$16 sps:$4 sm:$0xff]  }
0x1c47   :  { %13529 = vmatprep.subr.bf16.mxu0 %v15040_v2 }
0x1c4a   :  { %13530 = vmatpush3.bf16.msra.mxu0 %v14449_v55 }
0x1c4b   :  { %13531 = vmatprep.subr.bf16.mxu0 %v15040_v2 }
0x1c4e   :  { %13532 = vmatpush3.bf16.msra.mxu0 %v14450_v35 }
0x1c4f   :  { %13533 = vmatprep.subr.bf16.mxu0 %v15040_v2 }
0x1c52   :  { %13534 = vmatpush3.bf16.msra.mxu0 %v14451_v3 }
0x1c53   :  { %13535 = vmatprep.subr.bf16.mxu0 %v15040_v2 }
0x1c56   :  { %13536 = vmatpush3.bf16.msra.mxu0 %v14452_v56 }
0x1c57   :  { %13537 = vmatprep.subr.bf16.mxu0 %v15040_v2 }
0x1c5a   :  { %13538 = vmatpush3.bf16.msra.mxu0 %v14453_v20 }
0x1c5b   :  { %13539 = vmatprep.subr.bf16.mxu0 %v15040_v2 }
0x1d01   :  { %v8378_v25 = vpop.f32.mrf.mxu0 }
0x1d02   :  { %v8384_v32 = vsel %vm16690_vm2, %v8378_v25, -1.7014117e+38  ;;  %v14442_v25 = vld [vmem:[%s18974_s11 + $0x20] sm:$0xff]  }
0x1d03   :  { %v13491_v39 = vpop.f32.mrf.mxu0  ;;  %v8385_v61 = vsel %vm4417_vm3, %v8384_v32, -inf }
0x1d04   :  { %8386 = vmax.xlane.f32.xlu0 %v8385_v61  ;;  %v14444_v39 = vld [vmem:[%s18974_s11 + $0x10] sm:$0xff]   ;;  %v14445_v61 = vld [vmem:[%s18974_s11 + $0x8] sm:$0xff]  }
0x1d05   :  { %v8381_v37 = vpop.f32.mrf.mxu0 }
0x1d06   :  { %v14446_v37 = vld [vmem:[%s18974_s11] sm:$0xff]  }
0x1d07   :  { %v13492_v8 = vpop.f32.mrf.mxu0 }
0x1d08   :  { %v14454_v8 = vld [vmem:[%s18973_s10] sm:$0xff]  }
0x1d09   :  { %13540 = vmatpush3.bf16.msra.mxu0 %v14454_v8  ;;  %v14512_v8 = vld [vmem:[#allocation6 + $0x10] sm:$0xff]  }
0x1d0a   :  { %8924 = vmatprep.subr.bf16.mxu0 %v17752_v51  ;;  %v18084_v51 = vld [vmem:[%s18969_s6 + $0xc0] ss:$16 sps:$4 sm:$0xff]  }
0x1d8d   :  { %v8387_v53 = vpop.xlane.xlu0 %8386 }
0x1d8e   :  { %v8388_v4 = vsub.f32 %v8384_v32, %v8387_v53  ;;  %v14443_v32 = vld [vmem:[%s18974_s11 + $0x18] sm:$0xff]   ;;  %v18067_v53 = vld [vmem:[%s18969_s6 + $0xe0] ss:$16 sps:$4 sm:$0xff]  }
0x1d90   :  { %v8389_v5 = vmul.f32 1.442695, %v8388_v4  ;;  %v18072_v4 = vld [vmem:[%s18969_s6 + $0xe4] ss:$16 sps:$4 sm:$0xff]  }
0x1d92   :  { %14915 = vpow2.f32 %v8389_v5  ;;  %v18077_v5 = vld [vmem:[%s18969_s6 + $0xc4] ss:$16 sps:$4 sm:$0xff]  }
0x1d9f   :  { %v14916_v50 = vpop.eup %14915 }
0x1da0   :  { %v8391_v6 = vsel %vm4417_vm3, %v14916_v50, 0.0 }
0x1da1   :  { %8392 = vadd.xlane.f32.xlu1 %v8391_v6  ;;  %v18096_v6 = vld [vmem:[%s18969_s6 + $0xa0] ss:$16 sps:$4 sm:$0xff]  }
0x1e2a   :  { %v8393_v45 = vpop.xlane.xlu1 %8392 }
0x1e2b   :  { %14917 = vrcp.f32 %v8393_v45 }
0x1e38   :  { %v14918_v9 = vpop.eup %14917 }
0x1e39   :  { %v8395_v7 = vmul.f32 %v14918_v9, %v14916_v50  ;;  %v18090_v50 = vld [vmem:[%s18969_s6 + $0xa4] ss:$16 sps:$4 sm:$0xff]  }
0x1e3b   :  { %v8396_v10 = vpack.c.bf16 %v8395_v7, %v8395_v7 }
0x1e3d   :  { %13502 = vmatmul.mubr.msk.bf16.vlgmr.msra.gmra.mxu1 %vm4417_vm3, %v8396_v10 }
0x1e3e   :  { %13506 = vmatpush3.bf16.msra.mxu1 %v14439_v44  ;;  %13521 = vmatprep.mubr.msk.bf16.mxu1 %vm15041_vm0, %v15040_v2  ;;  %v18186_v44 = vld [vmem:[%s18970_s7 + $0xe0] ss:$16 sps:$4 sm:$0xff]  }
0x1e3f   :  { %13507 = vmatprep.subr.bf16.mxu1 %v15040_v2 }
0x1e42   :  { %13508 = vmatpush3.bf16.msra.mxu1 %v14440_v33  ;;  %v18191_v33 = vld [vmem:[%s18970_s7 + $0xc4] ss:$16 sps:$4 sm:$0xff]  }
0x1e43   :  { %13509 = vmatprep.subr.bf16.mxu1 %v15040_v2 }
0x1e46   :  { %13510 = vmatpush3.bf16.msra.mxu1 %v14441_v1  ;;  %v18198_v1 = vld [vmem:[%s18970_s7 + $0xc0] ss:$16 sps:$4 sm:$0xff]  }
0x1e47   :  { %13511 = vmatprep.subr.bf16.mxu1 %v15040_v2 }
0x1e4a   :  { %13512 = vmatpush3.bf16.msra.mxu1 %v14442_v25  ;;  %v18205_v25 = vld [vmem:[%s18970_s7 + $0xa4] ss:$16 sps:$4 sm:$0xff]  }
0x1e4b   :  { %13513 = vmatprep.subr.bf16.mxu1 %v15040_v2 }
0x1e4e   :  { %13514 = vmatpush3.bf16.msra.mxu1 %v14443_v32  ;;  %v14504_v32 = vld [vmem:[#allocation5 + $0x18] sm:$0xff]  }
0x1e4f   :  { %13515 = vmatprep.subr.bf16.mxu1 %v15040_v2 }
0x1e52   :  { %13516 = vmatpush3.bf16.msra.mxu1 %v14444_v39  ;;  %v14509_v39 = vld [vmem:[#allocation6 + $0x20] sm:$0xff]  }
0x1e53   :  { %13517 = vmatprep.subr.bf16.mxu1 %v15040_v2 }
0x1e56   :  { %13518 = vmatpush3.bf16.msra.mxu1 %v14445_v61  ;;  %v14510_v61 = vld [vmem:[#allocation5] sm:$0xff]  }
0x1e57   :  { %13519 = vmatprep.subr.bf16.mxu1 %v15040_v2 }
0x1e5a   :  { %13520 = vmatpush3.bf16.msra.mxu1 %v14446_v37  ;;  %v14511_v37 = vld [vmem:[#allocation6 + $0x18] sm:$0xff]  }
0x1e5b   :  { %8883 = vmatprep.subr.bf16.mxu1 %v18072_v4 }
0x1e5d   :  { %13522 = vmatmul.mubr.bf16.vlgmr.msra.gmra.mxu1 %v17987_v12 }
0x1e5e   :  { %8915 = vmatprep.mubr.bf16.mxu1 %v19032_v54  ;;  %8884 = vmatpush1.bf16.msra.mxu1 %v18067_v53 }
0x1e5f   :  { %8885 = vmatprep.subr.bf16.mxu1 %v18077_v5 }
0x1e62   :  { %8886 = vmatpush1.bf16.msra.mxu1 %v18084_v51 }
0x1e63   :  { %8887 = vmatprep.subr.bf16.mxu1 %v18090_v50 }
0x1e66   :  { %8888 = vmatpush1.bf16.msra.mxu1 %v18096_v6 }
0x1e67   :  { %8889 = vmatprep.subr.bf16.mxu1 %v18102_v28 }
0x1e6a   :  { %8890 = vmatpush1.bf16.msra.mxu1 %v18108_v52 }
0x1efd   :  { %v8466_v55 = vpop.f32.mrf.mxu1 }
0x1efe   :  { %v8472_v35 = vpack.c.bf16 %v8466_v55, %v8466_v55  ;;  %v14513_v55 = vld [vmem:[#allocation6 + $0x8] sm:$0xff]  }
0x1eff   :  { %v13503_v3 = vpop.f32.mrf.mxu1 }
0x1f00   :  { %13542 = vmatmul.mubr.bf16.vlgmr.msra.gmra.mxu0 %v8472_v35  ;;  %v14514_v35 = vld [vmem:[#allocation6] sm:$0xff]  }
0x1f01   :  { %v8469_v56 = vpop.f32.mrf.mxu1  ;;  %8925 = vmatpush1.bf16.msra.mxu0 %v17758_v18  ;;  %8956 = vmatprep.mubr.bf16.mxu0 %v19032_v54 }
0x1f02   :  { %8926 = vmatprep.subr.bf16.mxu0 %v17763_v57 }
0x1f03   :  { %v13504_v20 = vpop.f32.mrf.mxu1 }
0x1f05   :  { %8927 = vmatpush1.bf16.msra.mxu0 %v17769_v62 }
0x1f06   :  { %8928 = vmatprep.subr.bf16.mxu0 %v17776_v47 }
0x1f09   :  { %8929 = vmatpush1.bf16.msra.mxu0 %v17782_v0  ;;  %v18132_v0 = vld [vmem:[%s18969_s6 + $0x60] ss:$16 sps:$4 sm:$0xff]  }
0x1f0a   :  { %8930 = vmatprep.subr.bf16.mxu0 %v17788_v30  ;;  %v18137_v30 = vld [vmem:[%s18969_s6 + $0x64] ss:$16 sps:$4 sm:$0xff]  }
0x1f0b   :  { %8891 = vmatprep.subr.bf16.mxu1 %v18137_v30 }
0x1f0c   :  { %8892 = vmatpush1.bf16.msra.mxu1 %v18132_v0 }
0x1f0d   :  { %8931 = vmatpush1.bf16.msra.mxu0 %v17794_v14  ;;  %v18142_v14 = vld [vmem:[%s18969_s6 + $0x44] ss:$16 sps:$4 sm:$0xff]  }
0x1f0e   :  { %8932 = vmatprep.subr.bf16.mxu0 %v17801_v13  ;;  %v18149_v13 = vld [vmem:[%s18969_s6 + $0x40] ss:$16 sps:$4 sm:$0xff]   ;;  %8893 = vmatprep.subr.bf16.mxu1 %v18142_v14 }
0x1f10   :  { %8894 = vmatpush1.bf16.msra.mxu1 %v18149_v13 }
0x1f11   :  { %8933 = vmatpush1.bf16.msra.mxu0 %v17806_v23  ;;  %v18155_v23 = vld [vmem:[%s18969_s6 + $0x24] ss:$16 sps:$4 sm:$0xff]  }
0x1f12   :  { %8934 = vmatprep.subr.bf16.mxu0 %v17813_v49  ;;  %v18161_v49 = vld [vmem:[%s18969_s6 + $0x20] ss:$16 sps:$4 sm:$0xff]   ;;  %8895 = vmatprep.subr.bf16.mxu1 %v18155_v23 }
0x1f14   :  { %8896 = vmatpush1.bf16.msra.mxu1 %v18161_v49 }
0x1f15   :  { %8935 = vmatpush1.bf16.msra.mxu0 %v17818_v31  ;;  %v18167_v31 = vld [vmem:[%s18969_s6 + $0x4] ss:$16 sps:$4 sm:$0xff]  }
0x1f16   :  { %8936 = vmatprep.subr.bf16.mxu0 %v17825_v60  ;;  %v18173_v60 = vld [vmem:[%s18969_s6] ss:$16 sps:$4 sm:$0xff]   ;;  %8897 = vmatprep.subr.bf16.mxu1 %v18167_v31 }
0x1f18   :  { %8898 = vmatpush1.bf16.msra.mxu1 %v18173_v60 }
0x1f19   :  { %8937 = vmatpush1.bf16.msra.mxu0 %v17830_v58  ;;  %v18179_v58 = vld [vmem:[%s18970_s7 + $0xe4] ss:$16 sps:$4 sm:$0xff]  }
0x1f1a   :  { %8938 = vmatprep.subr.bf16.mxu0 %v17837_v63  ;;  %9161 = vmatprep.subr.bf16.mxu1 %v18179_v58 }
0x1f1d   :  { %v8587_v18 = vpop.f32.mrf.mxu1  ;;  %8939 = vmatpush1.bf16.msra.mxu0 %v17842_v36 }
0x1f1e   :  { %9202 = vmatprep.subr.bf16.mxu0 %v17849_v41 }
0x1f1f   :  { %v13523_v57 = vpop.f32.mrf.mxu1 }
0x1f21   :  { %v8590_v62 = vpop.f32.mrf.mxu1 }
0x1f23   :  { %v13524_v47 = vpop.f32.mrf.mxu1 }
0x1fc0   :  { %v8675_v63 = vpop.f32.mrf.mxu0 }
0x1fc1   :  { %v8676_v36 = vadd.f32 %v8675_v63, %v8587_v18 }
0x1fc2   :  { %v13543_v41 = vpop.f32.mrf.mxu0 }
0x1fc3   :  { %14919 = vtanh.f32 %v8676_v36  ;;  %v19072_v36 = vld [vmem:[#allocation48_spill] sm:$0xff] }
0x1fc4   :  { %v8678_v45 = vpop.f32.mrf.mxu0  ;;  %v774_v41 = vadd.f32 %v19072_v36, %v19054_v59 }
0x1fc5   :  { %v19073_v45 = vld [vmem:[#allocation46_spill] sm:$0xff] }
0x1fc6   :  { %v13544_v9 = vpop.f32.mrf.mxu0 }
0x1fd0   :  { %v14920_v7 = vpop.eup %14919 }
0x1fd1   :  { %8683 = vst [vmem:[#allocation7 + $0x20] sm:$0xff] %v14920_v7  ;;  %v8684_v10 = vpack.c.bf16 %v14920_v7, %v14920_v7 }
0x1fd3   :  { %8916 = vmatmul.mubr.bf16.vlgmr.msra.gmra.mxu1 %v8684_v10  ;;  %8957 = vmatmul.mubr.bf16.vlgmr.msra.gmra.mxu0 %v8684_v10 }
0x1fd4   :  { %9162 = vmatpush1.bf16.msra.mxu1 %v18186_v44  ;;  %9203 = vmatpush1.bf16.msra.mxu0 %v17855_v17  ;;  %v18214_v17 = vld [vmem:[%s18970_s7 + $0xa0] ss:$16 sps:$4 sm:$0xff]  }
0x1fd5   :  { %9163 = vmatprep.subr.bf16.mxu1 %v18191_v33  ;;  %9204 = vmatprep.subr.bf16.mxu0 %v17860_v34  ;;  %v18221_v34 = vld [vmem:[%s18970_s7 + $0x84] ss:$16 sps:$4 sm:$0xff]  }
0x1fd6   :  { %9193 = vmatprep.mubr.bf16.mxu1 %v19032_v54  ;;  %9234 = vmatprep.mubr.bf16.mxu0 %v19032_v54 }
0x1fd8   :  { %9164 = vmatpush1.bf16.msra.mxu1 %v18198_v1  ;;  %9205 = vmatpush1.bf16.msra.mxu0 %v17867_v21  ;;  %v18228_v21 = vld [vmem:[%s18970_s7 + $0x80] ss:$16 sps:$4 sm:$0xff]  }
0x1fd9   :  { %9165 = vmatprep.subr.bf16.mxu1 %v18205_v25  ;;  %9206 = vmatprep.subr.bf16.mxu0 %v17874_v26  ;;  %v18235_v26 = vld [vmem:[%s18970_s7 + $0x64] ss:$16 sps:$4 sm:$0xff]  }
0x1fdc   :  { %9166 = vmatpush1.bf16.msra.mxu1 %v18214_v17  ;;  %9207 = vmatpush1.bf16.msra.mxu0 %v17883_v43  ;;  %v18242_v43 = vld [vmem:[%s18970_s7 + $0x60] ss:$16 sps:$4 sm:$0xff]  }
0x1fdd   :  { %9167 = vmatprep.subr.bf16.mxu1 %v18221_v34  ;;  %9208 = vmatprep.subr.bf16.mxu0 %v17890_v48  ;;  %v18249_v48 = vld [vmem:[%s18970_s7 + $0x44] ss:$16 sps:$4 sm:$0xff]  }
0x1fe0   :  { %9168 = vmatpush1.bf16.msra.mxu1 %v18228_v21  ;;  %9209 = vmatpush1.bf16.msra.mxu0 %v17897_v24  ;;  %v18256_v24 = vld [vmem:[%s18970_s7 + $0x40] ss:$16 sps:$4 sm:$0xff]  }
0x1fe1   :  { %9169 = vmatprep.subr.bf16.mxu1 %v18235_v26  ;;  %9210 = vmatprep.subr.bf16.mxu0 %v17904_v16  ;;  %v18263_v16 = vld [vmem:[%s18970_s7 + $0x24] ss:$16 sps:$4 sm:$0xff]  }
0x1fe4   :  { %9170 = vmatpush1.bf16.msra.mxu1 %v18242_v43  ;;  %9211 = vmatpush1.bf16.msra.mxu0 %v17911_v11  ;;  %v18270_v11 = vld [vmem:[%s18970_s7 + $0x20] ss:$16 sps:$4 sm:$0xff]  }
0x1fe5   :  { %9171 = vmatprep.subr.bf16.mxu1 %v18249_v48  ;;  %9212 = vmatprep.subr.bf16.mxu0 %v17918_v38  ;;  %v18277_v38 = vld [vmem:[%s18970_s7 + $0x4] ss:$16 sps:$4 sm:$0xff]  }
0x1fe8   :  { %9172 = vmatpush1.bf16.msra.mxu1 %v18256_v24  ;;  %9213 = vmatpush1.bf16.msra.mxu0 %v17925_v15  ;;  %v18284_v15 = vld [vmem:[%s18970_s7] ss:$16 sps:$4 sm:$0xff]  }
0x1fe9   :  { %9173 = vmatprep.subr.bf16.mxu1 %v18263_v16  ;;  %9214 = vmatprep.subr.bf16.mxu0 %v17932_v29  ;;  %v14503_v29 = vld [vmem:[#allocation6 + $0x38] sm:$0xff]  }
0x1fec   :  { %9174 = vmatpush1.bf16.msra.mxu1 %v18270_v11  ;;  %9215 = vmatpush1.bf16.msra.mxu0 %v17939_v42  ;;  %v14505_v42 = vld [vmem:[#allocation6 + $0x30] sm:$0xff]  }
0x1fed   :  { %9175 = vmatprep.subr.bf16.mxu1 %v18277_v38  ;;  %9216 = vmatprep.subr.bf16.mxu0 %v17946_v22  ;;  %v14506_v22 = vld [vmem:[#allocation5 + $0x10] sm:$0xff]  }
0x1ff0   :  { %9176 = vmatpush1.bf16.msra.mxu1 %v18284_v15  ;;  %9217 = vmatpush1.bf16.msra.mxu0 %v17953_v46  ;;  %v14507_v46 = vld [vmem:[#allocation6 + $0x28] sm:$0xff]  }
0x1ff1   :  { %13545 = vmatprep.subr.bf16.mxu1 %v15040_v2  ;;  %13565 = vmatprep.subr.bf16.mxu0 %v15040_v2 }
0x1ff3   :  { %9194 = vmatmul.mubr.bf16.vlgmr.msra.gmra.mxu1 %v17987_v12  ;;  %9235 = vmatmul.mubr.bf16.vlgmr.msra.gmra.mxu0 %v17987_v12  ;;  %v14508_v12 = vld [vmem:[#allocation5 + $0x8] sm:$0xff]  }
0x1ff4   :  { %13546 = vmatpush3.bf16.msra.mxu1 %v14503_v29  ;;  %13566 = vmatpush3.bf16.msra.mxu0 %v14504_v32 }
0x1ff5   :  { %13547 = vmatprep.subr.bf16.mxu1 %v15040_v2  ;;  %13567 = vmatprep.subr.bf16.mxu0 %v15040_v2 }
0x1ff6   :  { %13561 = vmatprep.mubr.msk.bf16.mxu1 %vm15041_vm0, %v15040_v2  ;;  %13573 = vmatprep.mubr.msk.bf16.mxu0 %vm15041_vm0, %v15040_v2 }
0x1ff8   :  { %13548 = vmatpush3.bf16.msra.mxu1 %v14505_v42  ;;  %13568 = vmatpush3.bf16.msra.mxu0 %v14506_v22 }
0x1ff9   :  { %13549 = vmatprep.subr.bf16.mxu1 %v15040_v2  ;;  %13569 = vmatprep.subr.bf16.mxu0 %v15040_v2 }
0x1ffc   :  { %13550 = vmatpush3.bf16.msra.mxu1 %v14507_v46  ;;  %13570 = vmatpush3.bf16.msra.mxu0 %v14508_v12 }
0x1ffd   :  { %13551 = vmatprep.subr.bf16.mxu1 %v15040_v2  ;;  %13571 = vmatprep.subr.bf16.mxu0 %v15040_v2 }
0x2000   :  { %13552 = vmatpush3.bf16.msra.mxu1 %v14509_v39  ;;  %13572 = vmatpush3.bf16.msra.mxu0 %v14510_v61 }
0x2001   :  { %13553 = vmatprep.subr.bf16.mxu1 %v15040_v2  ;;  %13577 = vmatprep.subr.bf16.mxu0 %v15040_v2 }
0x2004   :  { %13554 = vmatpush3.bf16.msra.mxu1 %v14511_v37 }
0x2005   :  { %13555 = vmatprep.subr.bf16.mxu1 %v15040_v2 }
0x2008   :  { %13556 = vmatpush3.bf16.msra.mxu1 %v14512_v8 }
0x2009   :  { %13557 = vmatprep.subr.bf16.mxu1 %v15040_v2 }
0x200c   :  { %13558 = vmatpush3.bf16.msra.mxu1 %v14513_v55 }
0x200d   :  { %13559 = vmatprep.subr.bf16.mxu1 %v15040_v2 }
0x2010   :  { %13560 = vmatpush3.bf16.msra.mxu1 %v14514_v35  ;;  %v19074_v35 = vld [vmem:[#allocation49_spill] sm:$0xff] }
0x2011   :  { %13597 = vmatprep.subr.bf16.mxu1 %v15040_v2 }
0x2093   :  { %v8917_v3 = vpop.f32.mrf.mxu1  ;;  %v8958_v56 = vpop.f32.mrf.mxu0 }
0x2094   :  { %v8965_v9 = vadd.f32 %v8917_v3, %v19073_v45 }
0x2095   :  { %v8919_v20 = vpop.f32.mrf.mxu1  ;;  %v8960_v18 = vpop.f32.mrf.mxu0 }
0x2096   :  { %v8966_v29 = vadd.f32 %v8919_v20, %v774_v41 }
0x2097   :  { %v8921_v57 = vpop.f32.mrf.mxu1  ;;  %v8962_v62 = vpop.f32.mrf.mxu0 }
0x2098   :  { %v847_v57 = vadd.f32 %v19074_v35, %v19057_v40 }
0x2099   :  { %v8922_v47 = vpop.f32.mrf.mxu1  ;;  %v8963_v63 = vpop.f32.mrf.mxu0 }
0x209a   :  { %v8968_v62 = vadd.f32 %v8960_v18, %v847_v57  ;;  %v19075_v47 = vld [vmem:[#allocation47_spill] sm:$0xff] }
0x209b   :  { %v8967_v63 = vadd.f32 %v8958_v56, %v19075_v47 }
0x20b3   :  { %v9195_v7 = vpop.f32.mrf.mxu1  ;;  %v9236_v10 = vpop.f32.mrf.mxu0 }
0x20b4   :  { %v9243_v32 = vadd.f32 %v9195_v7, %v8965_v9  ;;  %v9245_v20 = vadd.f32 %v9236_v10, %v8967_v63 }
0x20b5   :  { %v9197_v42 = vpop.f32.mrf.mxu1  ;;  %v9238_v22 = vpop.f32.mrf.mxu0 }
0x20b6   :  { %v12622_v46 = vmul.f32 -1.442695, %v9243_v32  ;;  %v9244_v12 = vadd.f32 %v9197_v42, %v8966_v29  ;;  %v9246_v3 = vadd.f32 %v9238_v22, %v8968_v62 }
0x20b7   :  { %v9199_v39 = vpop.f32.mrf.mxu1  ;;  %v9240_v61 = vpop.f32.mrf.mxu0 }
0x20b8   :  { %14921 = vpow2.f32 %v12622_v46  ;;  %v12623_v37 = vmul.f32 -1.442695, %v9244_v12  ;;  %v12624_v36 = vmul.f32 -1.442695, %v9246_v3 }
0x20b9   :  { %v9200_v8 = vpop.f32.mrf.mxu1  ;;  %v9241_v55 = vpop.f32.mrf.mxu0 }
0x20ba   :  { %14923 = vpow2.f32 %v12623_v37 }
0x20bb   :  { %14925 = vtanh.f32 %v9245_v20 }
0x20bc   :  { %14927 = vpow2.f32 %v12624_v36 }
0x20c5   :  { %v14922_v41 = vpop.eup %14921 }
0x20c6   :  { %v9250_v45 = vadd.f32 1.0, %v14922_v41  ;;  %v14523_v41 = vld [vmem:[%s18973_s10 + $0x38] sm:$0xff]  }
0x20c7   :  { %v14924_v9 = vpop.eup %14923 }
0x20c8   :  { %14929 = vrcp.f32 %v9250_v45  ;;  %v9256_v7 = vadd.f32 1.0, %v14924_v9  ;;  %v14926_v29 = vpop.eup %14925  ;;  %v14524_v45 = vld [vmem:[%s18973_s10 + $0x30] sm:$0xff]   ;;  %v14525_v9 = vld [vmem:[%s18973_s10 + $0x28] sm:$0xff]  }
0x20c9   :  { %v14928_v32 = vpop.eup %14927 }
0x20ca   :  { %14931 = vrcp.f32 %v9256_v7  ;;  %v9263_v39 = vadd.f32 1.0, %v14928_v32  ;;  %v14526_v7 = vld [vmem:[%s18973_s10 + $0x20] sm:$0xff]   ;;  %v14528_v32 = vld [vmem:[%s18973_s10 + $0x10] sm:$0xff]  }
0x20cc   :  { %14933 = vrcp.f32 %v9263_v39 }
0x20d5   :  { %v14930_v42 = vpop.eup %14929 }
0x20d6   :  { %v9267_v46 = vmul.f32 %v14930_v42, %v14926_v29  ;;  %v14527_v29 = vld [vmem:[%s18973_s10 + $0x18] sm:$0xff]   ;;  %v14529_v42 = vld [vmem:[%s18973_s10 + $0x8] sm:$0xff]  }
0x20d7   :  { %v14932_v12 = vpop.eup %14931 }
0x20d8   :  { %v9266_v18 = vmul.f32 %v14932_v12, %v17984_v19 }
0x20d9   :  { %v14934_v56 = vpop.eup %14933 }
0x20da   :  { %v18317_v22 = vadd.f32 %v9267_v46, %v9266_v18  ;;  %v14515_v18 = vld [vmem:[%s18974_s11 + $0x38] sm:$0xff]  }
0x20dc   :  { %14935 = vtanh.f32 %v18317_v22 }
0x20e9   :  { %v14936_v10 = vpop.eup %14935 }
0x20ea   :  { %v9270_v61 = vmul.f32 %v14936_v10, %v14934_v56  ;;  %v14516_v10 = vld [vmem:[%s18974_s11 + $0x30] sm:$0xff]  }
0x20ec   :  { %v18320_v37 = vpack.c.bf16 %v9270_v61, %v9270_v61  ;;  %v14517_v61 = vld [vmem:[%s18974_s11 + $0x28] sm:$0xff]  }
0x20ee   :  { %13562 = vmatmul.mubr.bf16.vlgmr.msra.gmra.mxu1 %v18320_v37 }
0x20ef   :  { %13613 = vmatprep.mubr.msk.bf16.mxu1 %vm15041_vm0, %v15040_v2  ;;  %13598 = vmatpush3.bf16.msra.mxu1 %v14523_v41  ;;  %v18494_v41 = vld [vmem:[%s18969_s6 + $0x28] ss:$16 sps:$4 sm:$0xff]  }
0x20f0   :  { %13599 = vmatprep.subr.bf16.mxu1 %v15040_v2 }
0x20f3   :  { %13600 = vmatpush3.bf16.msra.mxu1 %v14524_v45  ;;  %v18500_v45 = vld [vmem:[%s18969_s6 + $0xc] ss:$16 sps:$4 sm:$0xff]  }
0x20f4   :  { %13601 = vmatprep.subr.bf16.mxu1 %v15040_v2 }
0x20f7   :  { %13602 = vmatpush3.bf16.msra.mxu1 %v14525_v9  ;;  %v18506_v9 = vld [vmem:[%s18969_s6 + $0x8] ss:$16 sps:$4 sm:$0xff]  }
0x20f8   :  { %13603 = vmatprep.subr.bf16.mxu1 %v15040_v2 }
0x20fb   :  { %13604 = vmatpush3.bf16.msra.mxu1 %v14526_v7  ;;  %v18512_v7 = vld [vmem:[%s18970_s7 + $0xec] ss:$16 sps:$4 sm:$0xff]  }
0x20fc   :  { %13605 = vmatprep.subr.bf16.mxu1 %v15040_v2 }
0x20ff   :  { %13606 = vmatpush3.bf16.msra.mxu1 %v14527_v29 }
0x2100   :  { %13607 = vmatprep.subr.bf16.mxu1 %v15040_v2 }
0x2103   :  { %13608 = vmatpush3.bf16.msra.mxu1 %v14528_v32 }
0x2104   :  { %13609 = vmatprep.subr.bf16.mxu1 %v15040_v2 }
0x2107   :  { %13610 = vmatpush3.bf16.msra.mxu1 %v14529_v42 }
0x2108   :  { %13611 = vmatprep.subr.bf16.mxu1 %v15040_v2 }
0x21ae   :  { %v9370_v8 = vpop.f32.mrf.mxu1 }
0x21af   :  { %v9376_v55 = vsel %vm16690_vm2, %v9370_v8, -1.7014117e+38  ;;  %v14518_v8 = vld [vmem:[%s18974_s11 + $0x20] sm:$0xff]  }
0x21b0   :  { %v13563_v19 = vpop.f32.mrf.mxu1  ;;  %v9377_v35 = vsel %vm4417_vm3, %v9376_v55, -inf }
0x21b1   :  { %9378 = vmax.xlane.f32.xlu0 %v9377_v35  ;;  %v14520_v19 = vld [vmem:[%s18974_s11 + $0x10] sm:$0xff]   ;;  %v14521_v35 = vld [vmem:[%s18974_s11 + $0x8] sm:$0xff]  }
0x21b2   :  { %v9373_v57 = vpop.f32.mrf.mxu1 }
0x21b3   :  { %v14522_v57 = vld [vmem:[%s18974_s11] sm:$0xff]  }
0x21b4   :  { %v13564_v62 = vpop.f32.mrf.mxu1 }
0x223a   :  { %v9379_v3 = vpop.xlane.xlu0 %9378 }
0x223b   :  { %v9380_v47 = vsub.f32 %v9376_v55, %v9379_v3  ;;  %v14519_v55 = vld [vmem:[%s18974_s11 + $0x18] sm:$0xff]  }
0x223c   :  { %v18465_v3 = vld [vmem:[%s18969_s6 + $0x68] ss:$16 sps:$4 sm:$0xff]  }
0x223d   :  { %v9381_v63 = vmul.f32 1.442695, %v9380_v47  ;;  %v18470_v47 = vld [vmem:[%s18969_s6 + $0x6c] ss:$16 sps:$4 sm:$0xff]  }
0x223f   :  { %14937 = vpow2.f32 %v9381_v63  ;;  %v18475_v63 = vld [vmem:[%s18969_s6 + $0x4c] ss:$16 sps:$4 sm:$0xff]  }
0x224c   :  { %v14938_v20 = vpop.eup %14937 }
0x224d   :  { %v9383_v36 = vsel %vm4417_vm3, %v14938_v20, 0.0 }
0x224e   :  { %9384 = vadd.xlane.f32.xlu1 %v9383_v36  ;;  %v18488_v36 = vld [vmem:[%s18969_s6 + $0x2c] ss:$16 sps:$4 sm:$0xff]  }
0x22d7   :  { %v9385_v46 = vpop.xlane.xlu1 %9384 }
0x22d8   :  { %14939 = vrcp.f32 %v9385_v46 }
0x22e5   :  { %v14940_v12 = vpop.eup %14939 }
0x22e6   :  { %v9387_v39 = vmul.f32 %v14940_v12, %v14938_v20  ;;  %v18482_v20 = vld [vmem:[%s18969_s6 + $0x48] ss:$16 sps:$4 sm:$0xff]  }
0x22e8   :  { %v9388_v56 = vpack.c.bf16 %v9387_v39, %v9387_v39 }
0x22ea   :  { %13574 = vmatmul.mubr.msk.bf16.vlgmr.msra.gmra.mxu0 %vm4417_vm3, %v9388_v56 }
0x22eb   :  { %13578 = vmatpush3.bf16.msra.mxu0 %v14515_v18  ;;  %13593 = vmatprep.mubr.msk.bf16.mxu0 %vm15041_vm0, %v15040_v2  ;;  %v18519_v18 = vld [vmem:[%s18970_s7 + $0xe8] ss:$16 sps:$4 sm:$0xff]  }
0x22ec   :  { %13579 = vmatprep.subr.bf16.mxu0 %v15040_v2 }
0x22ef   :  { %13580 = vmatpush3.bf16.msra.mxu0 %v14516_v10  ;;  %v18524_v10 = vld [vmem:[%s18970_s7 + $0xcc] ss:$16 sps:$4 sm:$0xff]  }
0x22f0   :  { %13581 = vmatprep.subr.bf16.mxu0 %v15040_v2 }
0x22f3   :  { %13582 = vmatpush3.bf16.msra.mxu0 %v14517_v61  ;;  %v18531_v61 = vld [vmem:[%s18970_s7 + $0xc8] ss:$16 sps:$4 sm:$0xff]  }
0x22f4   :  { %13583 = vmatprep.subr.bf16.mxu0 %v15040_v2 }
0x22f7   :  { %13584 = vmatpush3.bf16.msra.mxu0 %v14518_v8  ;;  %v18538_v8 = vld [vmem:[%s18970_s7 + $0xac] ss:$16 sps:$4 sm:$0xff]  }
0x22f8   :  { %13585 = vmatprep.subr.bf16.mxu0 %v15040_v2 }
0x22fb   :  { %13586 = vmatpush3.bf16.msra.mxu0 %v14519_v55  ;;  %v14584_v55 = vld [vmem:[#allocation5 + $0x8] sm:$0xff]  }
0x22fc   :  { %13587 = vmatprep.subr.bf16.mxu0 %v15040_v2 }
0x22ff   :  { %13588 = vmatpush3.bf16.msra.mxu0 %v14520_v19  ;;  %v14585_v19 = vld [vmem:[#allocation6 + $0x20] sm:$0xff]  }
0x2300   :  { %13589 = vmatprep.subr.bf16.mxu0 %v15040_v2 }
0x2303   :  { %13590 = vmatpush3.bf16.msra.mxu0 %v14521_v35  ;;  %v14586_v35 = vld [vmem:[#allocation5] sm:$0xff]  }
0x2304   :  { %13591 = vmatprep.subr.bf16.mxu0 %v15040_v2 }
0x2307   :  { %13592 = vmatpush3.bf16.msra.mxu0 %v14522_v57  ;;  %v14587_v57 = vld [vmem:[#allocation6 + $0x18] sm:$0xff]  }
0x2308   :  { %9875 = vmatprep.subr.bf16.mxu0 %v18072_v4  ;;  %v18416_v4 = vld [vmem:[%s18969_s6 + $0xec] ss:$16 sps:$4 sm:$0xff]  }
0x230a   :  { %13594 = vmatmul.mubr.bf16.vlgmr.msra.gmra.mxu0 %v18320_v37 }
0x230b   :  { %9876 = vmatpush1.bf16.msra.mxu0 %v18067_v53  ;;  %9907 = vmatprep.mubr.bf16.mxu0 %v19032_v54  ;;  %v14530_v53 = vld [vmem:[%s18973_s10] sm:$0xff]  }
0x230c   :  { %9877 = vmatprep.subr.bf16.mxu0 %v18077_v5  ;;  %13612 = vmatpush3.bf16.msra.mxu1 %v14530_v53  ;;  %v14588_v53 = vld [vmem:[#allocation6 + $0x10] sm:$0xff]  }
0x230d   :  { %9916 = vmatprep.subr.bf16.mxu1 %v18416_v4 }
0x230f   :  { %9878 = vmatpush1.bf16.msra.mxu0 %v18084_v51  ;;  %v18422_v51 = vld [vmem:[%s18969_s6 + $0xe8] ss:$16 sps:$4 sm:$0xff]  }
0x2310   :  { %9879 = vmatprep.subr.bf16.mxu0 %v18090_v50 }
0x2313   :  { %9880 = vmatpush1.bf16.msra.mxu0 %v18096_v6  ;;  %v18427_v6 = vld [vmem:[%s18969_s6 + $0xcc] ss:$16 sps:$4 sm:$0xff]  }
0x2314   :  { %9881 = vmatprep.subr.bf16.mxu0 %v18102_v28 }
0x2317   :  { %9882 = vmatpush1.bf16.msra.mxu0 %v18108_v52 }
0x2318   :  { %9883 = vmatprep.subr.bf16.mxu0 %v18137_v30  ;;  %v18440_v30 = vld [vmem:[%s18969_s6 + $0xac] ss:$16 sps:$4 sm:$0xff]  }
0x231b   :  { %9884 = vmatpush1.bf16.msra.mxu0 %v18132_v0  ;;  %v18433_v0 = vld [vmem:[%s18969_s6 + $0xc8] ss:$16 sps:$4 sm:$0xff]  }
0x231c   :  { %9885 = vmatprep.subr.bf16.mxu0 %v18142_v14 }
0x231f   :  { %9886 = vmatpush1.bf16.msra.mxu0 %v18149_v13  ;;  %v18446_v13 = vld [vmem:[%s18969_s6 + $0xa8] ss:$16 sps:$4 sm:$0xff]  }
0x2320   :  { %9887 = vmatprep.subr.bf16.mxu0 %v18155_v23  ;;  %v18452_v23 = vld [vmem:[%s18969_s6 + $0x8c] ss:$16 sps:$4 sm:$0xff]  }
0x2323   :  { %9888 = vmatpush1.bf16.msra.mxu0 %v18161_v49  ;;  %v18458_v49 = vld [vmem:[%s18969_s6 + $0x88] ss:$16 sps:$4 sm:$0xff]  }
0x2324   :  { %9889 = vmatprep.subr.bf16.mxu0 %v18167_v31 }
0x2327   :  { %9890 = vmatpush1.bf16.msra.mxu0 %v18173_v60 }
0x2328   :  { %10153 = vmatprep.subr.bf16.mxu0 %v18179_v58 }
0x23aa   :  { %v9458_v5 = vpop.f32.mrf.mxu0 }
0x23ab   :  { %v9464_v50 = vpack.c.bf16 %v9458_v5, %v9458_v5  ;;  %v14589_v5 = vld [vmem:[#allocation6 + $0x8] sm:$0xff]  }
0x23ac   :  { %v13575_v28 = vpop.f32.mrf.mxu0 }
0x23ad   :  { %13614 = vmatmul.mubr.bf16.vlgmr.msra.gmra.mxu1 %v9464_v50  ;;  %v14590_v50 = vld [vmem:[#allocation6] sm:$0xff]  }
0x23ae   :  { %v9461_v52 = vpop.f32.mrf.mxu0  ;;  %9917 = vmatpush1.bf16.msra.mxu1 %v18422_v51  ;;  %9948 = vmatprep.mubr.bf16.mxu1 %v19032_v54 }
0x23af   :  { %9918 = vmatprep.subr.bf16.mxu1 %v18427_v6 }
0x23b0   :  { %v13576_v14 = vpop.f32.mrf.mxu0 }
0x23b2   :  { %9919 = vmatpush1.bf16.msra.mxu1 %v18433_v0 }
0x23b3   :  { %9920 = vmatprep.subr.bf16.mxu1 %v18440_v30 }
0x23b6   :  { %9921 = vmatpush1.bf16.msra.mxu1 %v18446_v13 }
0x23b7   :  { %9922 = vmatprep.subr.bf16.mxu1 %v18452_v23 }
0x23ba   :  { %9923 = vmatpush1.bf16.msra.mxu1 %v18458_v49 }
0x23bb   :  { %9924 = vmatprep.subr.bf16.mxu1 %v18470_v47 }
0x23be   :  { %9925 = vmatpush1.bf16.msra.mxu1 %v18465_v3 }
0x23bf   :  { %9926 = vmatprep.subr.bf16.mxu1 %v18475_v63 }
0x23c2   :  { %9927 = vmatpush1.bf16.msra.mxu1 %v18482_v20 }
0x23c3   :  { %9928 = vmatprep.subr.bf16.mxu1 %v18488_v36 }
0x23c6   :  { %9929 = vmatpush1.bf16.msra.mxu1 %v18494_v41 }
0x23c7   :  { %9930 = vmatprep.subr.bf16.mxu1 %v18500_v45 }
0x23ca   :  { %v9579_v31 = vpop.f32.mrf.mxu0  ;;  %9931 = vmatpush1.bf16.msra.mxu1 %v18506_v9 }
0x23cb   :  { %10194 = vmatprep.subr.bf16.mxu1 %v18512_v7 }
0x23cc   :  { %v13595_v60 = vpop.f32.mrf.mxu0 }
0x23ce   :  { %v9582_v58 = vpop.f32.mrf.mxu0 }
0x23d0   :  { %v13596_v62 = vpop.f32.mrf.mxu0 }
0x246d   :  { %v9667_v29 = vpop.f32.mrf.mxu1 }
0x246e   :  { %v9668_v32 = vadd.f32 %v9667_v29, %v9579_v31 }
0x246f   :  { %v13615_v42 = vpop.f32.mrf.mxu1 }
0x2470   :  { %14941 = vtanh.f32 %v9668_v32  ;;  %v19076_v32 = vld [vmem:[#allocation50_spill] sm:$0xff] }
0x2471   :  { %v9670_v46 = vpop.f32.mrf.mxu1 }
0x2473   :  { %v13616_v12 = vpop.f32.mrf.mxu1 }
0x247d   :  { %v14942_v39 = vpop.eup %14941 }
0x247e   :  { %9675 = vst [vmem:[#allocation7 + $0x28] sm:$0xff] %v14942_v39  ;;  %v9676_v56 = vpack.c.bf16 %v14942_v39, %v14942_v39  ;;  %v19077_v39 = vld [vmem:[#allocation52_spill] sm:$0xff] }
0x2480   :  { %9908 = vmatmul.mubr.bf16.vlgmr.msra.gmra.mxu0 %v9676_v56  ;;  %9949 = vmatmul.mubr.bf16.vlgmr.msra.gmra.mxu1 %v9676_v56 }
0x2481   :  { %10154 = vmatpush1.bf16.msra.mxu0 %v18186_v44  ;;  %10195 = vmatpush1.bf16.msra.mxu1 %v18519_v18  ;;  %v18547_v44 = vld [vmem:[%s18970_s7 + $0xa8] ss:$16 sps:$4 sm:$0xff]  }
0x2482   :  { %10155 = vmatprep.subr.bf16.mxu0 %v18191_v33  ;;  %10196 = vmatprep.subr.bf16.mxu1 %v18524_v10  ;;  %v18554_v33 = vld [vmem:[%s18970_s7 + $0x8c] ss:$16 sps:$4 sm:$0xff]  }
0x2483   :  { %10185 = vmatprep.mubr.bf16.mxu0 %v19032_v54  ;;  %10226 = vmatprep.mubr.bf16.mxu1 %v19032_v54 }
0x2485   :  { %10156 = vmatpush1.bf16.msra.mxu0 %v18198_v1  ;;  %10197 = vmatpush1.bf16.msra.mxu1 %v18531_v61  ;;  %v18561_v1 = vld [vmem:[%s18970_s7 + $0x88] ss:$16 sps:$4 sm:$0xff]  }
0x2486   :  { %10157 = vmatprep.subr.bf16.mxu0 %v18205_v25  ;;  %10198 = vmatprep.subr.bf16.mxu1 %v18538_v8  ;;  %v18568_v25 = vld [vmem:[%s18970_s7 + $0x6c] ss:$16 sps:$4 sm:$0xff]  }
0x2489   :  { %10158 = vmatpush1.bf16.msra.mxu0 %v18214_v17  ;;  %10199 = vmatpush1.bf16.msra.mxu1 %v18547_v44  ;;  %v18575_v17 = vld [vmem:[%s18970_s7 + $0x68] ss:$16 sps:$4 sm:$0xff]  }
0x248a   :  { %10159 = vmatprep.subr.bf16.mxu0 %v18221_v34  ;;  %10200 = vmatprep.subr.bf16.mxu1 %v18554_v33  ;;  %v18582_v34 = vld [vmem:[%s18970_s7 + $0x4c] ss:$16 sps:$4 sm:$0xff]  }
0x248d   :  { %10160 = vmatpush1.bf16.msra.mxu0 %v18228_v21  ;;  %10201 = vmatpush1.bf16.msra.mxu1 %v18561_v1  ;;  %v18589_v21 = vld [vmem:[%s18970_s7 + $0x48] ss:$16 sps:$4 sm:$0xff]  }
0x248e   :  { %10161 = vmatprep.subr.bf16.mxu0 %v18235_v26  ;;  %10202 = vmatprep.subr.bf16.mxu1 %v18568_v25  ;;  %v18596_v26 = vld [vmem:[%s18970_s7 + $0x2c] ss:$16 sps:$4 sm:$0xff]  }
0x2491   :  { %10162 = vmatpush1.bf16.msra.mxu0 %v18242_v43  ;;  %10203 = vmatpush1.bf16.msra.mxu1 %v18575_v17  ;;  %v18603_v43 = vld [vmem:[%s18970_s7 + $0x28] ss:$16 sps:$4 sm:$0xff]  }
0x2492   :  { %10163 = vmatprep.subr.bf16.mxu0 %v18249_v48  ;;  %10204 = vmatprep.subr.bf16.mxu1 %v18582_v34  ;;  %v18610_v48 = vld [vmem:[%s18970_s7 + $0xc] ss:$16 sps:$4 sm:$0xff]  }
0x2495   :  { %10164 = vmatpush1.bf16.msra.mxu0 %v18256_v24  ;;  %10205 = vmatpush1.bf16.msra.mxu1 %v18589_v21  ;;  %v18617_v24 = vld [vmem:[%s18970_s7 + $0x8] ss:$16 sps:$4 sm:$0xff]  }
0x2496   :  { %10165 = vmatprep.subr.bf16.mxu0 %v18263_v16  ;;  %10206 = vmatprep.subr.bf16.mxu1 %v18596_v26  ;;  %v14579_v16 = vld [vmem:[#allocation6 + $0x38] sm:$0xff]  }
0x2499   :  { %10166 = vmatpush1.bf16.msra.mxu0 %v18270_v11  ;;  %10207 = vmatpush1.bf16.msra.mxu1 %v18603_v43  ;;  %v14580_v11 = vld [vmem:[#allocation5 + $0x18] sm:$0xff]  }
0x249a   :  { %10167 = vmatprep.subr.bf16.mxu0 %v18277_v38  ;;  %10208 = vmatprep.subr.bf16.mxu1 %v18610_v48  ;;  %v14581_v38 = vld [vmem:[#allocation6 + $0x30] sm:$0xff]  }
0x249d   :  { %10168 = vmatpush1.bf16.msra.mxu0 %v18284_v15  ;;  %10209 = vmatpush1.bf16.msra.mxu1 %v18617_v24  ;;  %v14582_v15 = vld [vmem:[#allocation5 + $0x10] sm:$0xff]  }
0x249e   :  { %13617 = vmatprep.subr.bf16.mxu0 %v15040_v2  ;;  %13637 = vmatprep.subr.bf16.mxu1 %v15040_v2 }
0x24a0   :  { %10186 = vmatmul.mubr.bf16.vlgmr.msra.gmra.mxu0 %v18320_v37  ;;  %10227 = vmatmul.mubr.bf16.vlgmr.msra.gmra.mxu1 %v18320_v37  ;;  %v14583_v37 = vld [vmem:[#allocation6 + $0x28] sm:$0xff]  }
0x24a1   :  { %13618 = vmatpush3.bf16.msra.mxu0 %v14579_v16  ;;  %13638 = vmatpush3.bf16.msra.mxu1 %v14580_v11 }
0x24a2   :  { %13619 = vmatprep.subr.bf16.mxu0 %v15040_v2  ;;  %13639 = vmatprep.subr.bf16.mxu1 %v15040_v2 }
0x24a3   :  { %13633 = vmatprep.mubr.msk.bf16.mxu0 %vm15041_vm0, %v15040_v2  ;;  %13645 = vmatprep.mubr.msk.bf16.mxu1 %vm15041_vm0, %v15040_v2 }
0x24a5   :  { %13620 = vmatpush3.bf16.msra.mxu0 %v14581_v38  ;;  %13640 = vmatpush3.bf16.msra.mxu1 %v14582_v15 }
0x24a6   :  { %13621 = vmatprep.subr.bf16.mxu0 %v15040_v2  ;;  %13641 = vmatprep.subr.bf16.mxu1 %v15040_v2 }
0x24a9   :  { %13622 = vmatpush3.bf16.msra.mxu0 %v14583_v37  ;;  %13642 = vmatpush3.bf16.msra.mxu1 %v14584_v55 }
0x24aa   :  { %13623 = vmatprep.subr.bf16.mxu0 %v15040_v2  ;;  %13643 = vmatprep.subr.bf16.mxu1 %v15040_v2 }
0x24ad   :  { %13624 = vmatpush3.bf16.msra.mxu0 %v14585_v19  ;;  %13644 = vmatpush3.bf16.msra.mxu1 %v14586_v35 }
0x24ae   :  { %13625 = vmatprep.subr.bf16.mxu0 %v15040_v2  ;;  %13649 = vmatprep.subr.bf16.mxu1 %v15040_v2 }
0x24b1   :  { %13626 = vmatpush3.bf16.msra.mxu0 %v14587_v57 }
0x24b2   :  { %13627 = vmatprep.subr.bf16.mxu0 %v15040_v2 }
0x24b5   :  { %13628 = vmatpush3.bf16.msra.mxu0 %v14588_v53 }
0x24b6   :  { %13629 = vmatprep.subr.bf16.mxu0 %v15040_v2 }
0x24b9   :  { %13630 = vmatpush3.bf16.msra.mxu0 %v14589_v5  ;;  %v19078_v5 = vld [vmem:[#allocation53_spill] sm:$0xff] }
0x24ba   :  { %13631 = vmatprep.subr.bf16.mxu0 %v15040_v2 }
0x24bd   :  { %13632 = vmatpush3.bf16.msra.mxu0 %v14590_v50 }
0x24be   :  { %13669 = vmatprep.subr.bf16.mxu0 %v15040_v2 }
0x2540   :  { %v9909_v28 = vpop.f32.mrf.mxu0  ;;  %v9950_v52 = vpop.f32.mrf.mxu1 }
0x2541   :  { %v9957_v42 = vadd.f32 %v9909_v28, %v19076_v32  ;;  %v19079_v28 = vld [vmem:[#allocation51_spill] sm:$0xff] }
0x2542   :  { %v9911_v14 = vpop.f32.mrf.mxu0  ;;  %v9952_v31 = vpop.f32.mrf.mxu1 }
0x2543   :  { %v9958_v56 = vadd.f32 %v9911_v14, %v19077_v39  ;;  %v9960_v50 = vadd.f32 %v9952_v31, %v19078_v5 }
0x2544   :  { %v9913_v60 = vpop.f32.mrf.mxu0  ;;  %v9954_v58 = vpop.f32.mrf.mxu1 }
0x2545   :  { %v9959_v58 = vadd.f32 %v9950_v52, %v19079_v28 }
0x2546   :  { %v9914_v62 = vpop.f32.mrf.mxu0  ;;  %v9955_v29 = vpop.f32.mrf.mxu1 }
0x2560   :  { %v10187_v46 = vpop.f32.mrf.mxu0  ;;  %v10228_v12 = vpop.f32.mrf.mxu1 }
0x2561   :  { %v10235_v16 = vadd.f32 %v10187_v46, %v9957_v42  ;;  %v10237_v62 = vadd.f32 %v10228_v12, %v9959_v58 }
0x2562   :  { %v10189_v11 = vpop.f32.mrf.mxu0  ;;  %v10230_v38 = vpop.f32.mrf.mxu1 }
0x2563   :  { %v12718_v15 = vmul.f32 -1.442695, %v10235_v16  ;;  %v10236_v37 = vadd.f32 %v10189_v11, %v9958_v56  ;;  %v10238_v60 = vadd.f32 %v10230_v38, %v9960_v50 }
0x2564   :  { %v10191_v55 = vpop.f32.mrf.mxu0  ;;  %v10232_v19 = vpop.f32.mrf.mxu1 }
0x2565   :  { %14943 = vpow2.f32 %v12718_v15  ;;  %v12719_v35 = vmul.f32 -1.442695, %v10236_v37  ;;  %v12720_v29 = vmul.f32 -1.442695, %v10238_v60 }
0x2566   :  { %v10192_v57 = vpop.f32.mrf.mxu0  ;;  %v10233_v53 = vpop.f32.mrf.mxu1 }
0x2567   :  { %14945 = vpow2.f32 %v12719_v35 }
0x2568   :  { %14947 = vtanh.f32 %v10237_v62 }
0x2569   :  { %14949 = vpow2.f32 %v12720_v29 }
0x2572   :  { %v14944_v14 = vpop.eup %14943 }
0x2573   :  { %v10242_v32 = vadd.f32 1.0, %v14944_v14  ;;  %v14599_v14 = vld [vmem:[%s18973_s10 + $0x38] sm:$0xff]  }
0x2574   :  { %v14946_v42 = vpop.eup %14945 }
0x2575   :  { %14951 = vrcp.f32 %v10242_v32  ;;  %v10248_v46 = vadd.f32 1.0, %v14946_v42  ;;  %v14948_v39 = vpop.eup %14947  ;;  %v14600_v32 = vld [vmem:[%s18973_s10 + $0x30] sm:$0xff]   ;;  %v14601_v42 = vld [vmem:[%s18973_s10 + $0x28] sm:$0xff]  }
0x2576   :  { %v14950_v56 = vpop.eup %14949 }
0x2577   :  { %14953 = vrcp.f32 %v10248_v46  ;;  %v10255_v37 = vadd.f32 1.0, %v14950_v56  ;;  %v14602_v46 = vld [vmem:[%s18973_s10 + $0x20] sm:$0xff]   ;;  %v14604_v56 = vld [vmem:[%s18973_s10 + $0x10] sm:$0xff]  }
0x2579   :  { %14955 = vrcp.f32 %v10255_v37 }
0x2582   :  { %v14952_v16 = vpop.eup %14951 }
0x2583   :  { %v10259_v11 = vmul.f32 %v14952_v16, %v14948_v39  ;;  %v14603_v39 = vld [vmem:[%s18973_s10 + $0x18] sm:$0xff]   ;;  %v14605_v16 = vld [vmem:[%s18973_s10 + $0x8] sm:$0xff]  }
0x2584   :  { %v14954_v15 = vpop.eup %14953 }
0x2585   :  { %v10258_v31 = vmul.f32 %v14954_v15, %v18317_v22 }
0x2586   :  { %v14956_v52 = vpop.eup %14955 }
0x2587   :  { %v18648_v38 = vadd.f32 %v10259_v11, %v10258_v31  ;;  %v14591_v31 = vld [vmem:[%s18974_s11 + $0x38] sm:$0xff]  }
0x2589   :  { %14957 = vtanh.f32 %v18648_v38 }
0x2596   :  { %v14958_v12 = vpop.eup %14957 }
0x2597   :  { %v10262_v55 = vmul.f32 %v14958_v12, %v14956_v52  ;;  %v14592_v12 = vld [vmem:[%s18974_s11 + $0x30] sm:$0xff]  }
0x2599   :  { %v18651_v19 = vpack.c.bf16 %v10262_v55, %v10262_v55  ;;  %v14593_v55 = vld [vmem:[%s18974_s11 + $0x28] sm:$0xff]  }
0x259b   :  { %13634 = vmatmul.mubr.bf16.vlgmr.msra.gmra.mxu0 %v18651_v19 }
0x259c   :  { %13685 = vmatprep.mubr.msk.bf16.mxu0 %vm15041_vm0, %v15040_v2  ;;  %13670 = vmatpush3.bf16.msra.mxu0 %v14599_v14  ;;  %v14618_v14 = vld [vmem:[%s18969_s6 + $0x84] ss:$16 sps:$4 sm:$0xff]  }
0x259d   :  { %13671 = vmatprep.subr.bf16.mxu0 %v15040_v2 }
0x25a0   :  { %13672 = vmatpush3.bf16.msra.mxu0 %v14600_v32  ;;  %v14616_v32 = vld [vmem:[%s18969_s6 + $0x80] ss:$16 sps:$4 sm:$0xff]  }
0x25a1   :  { %13673 = vmatprep.subr.bf16.mxu0 %v15040_v2 }
0x25a4   :  { %13674 = vmatpush3.bf16.msra.mxu0 %v14601_v42 }
0x25a5   :  { %13675 = vmatprep.subr.bf16.mxu0 %v15040_v2 }
0x25a8   :  { %13676 = vmatpush3.bf16.msra.mxu0 %v14602_v46 }
0x25a9   :  { %13677 = vmatprep.subr.bf16.mxu0 %v15040_v2 }
0x25ac   :  { %13678 = vmatpush3.bf16.msra.mxu0 %v14603_v39 }
0x25ad   :  { %13679 = vmatprep.subr.bf16.mxu0 %v15040_v2 }
0x25b0   :  { %13680 = vmatpush3.bf16.msra.mxu0 %v14604_v56 }
0x25b1   :  { %13681 = vmatprep.subr.bf16.mxu0 %v15040_v2 }
0x25b4   :  { %13682 = vmatpush3.bf16.msra.mxu0 %v14605_v16 }
0x25b5   :  { %13683 = vmatprep.subr.bf16.mxu0 %v15040_v2 }
0x265b   :  { %v10362_v35 = vpop.f32.mrf.mxu0 }
0x265c   :  { %v10368_v57 = vsel %vm16690_vm2, %v10362_v35, -1.7014117e+38  ;;  %v14594_v35 = vld [vmem:[%s18974_s11 + $0x20] sm:$0xff]  }
0x265d   :  { %v13635_v22 = vpop.f32.mrf.mxu0  ;;  %v10369_v53 = vsel %vm4417_vm3, %v10368_v57, -inf }
0x265e   :  { %10370 = vmax.xlane.f32.xlu0 %v10369_v53  ;;  %v14596_v22 = vld [vmem:[%s18974_s11 + $0x10] sm:$0xff]   ;;  %v14597_v53 = vld [vmem:[%s18974_s11 + $0x8] sm:$0xff]  }
0x265f   :  { %v10365_v5 = vpop.f32.mrf.mxu0 }
0x2660   :  { %v14598_v5 = vld [vmem:[%s18974_s11] sm:$0xff]  }
0x2661   :  { %v13636_v50 = vpop.f32.mrf.mxu0 }
0x2662   :  { %v14606_v50 = vld [vmem:[%s18973_s10] sm:$0xff]  }
0x2663   :  { %13684 = vmatpush3.bf16.msra.mxu0 %v14606_v50  ;;  %v14665_v50 = vld [vmem:[#allocation6 + $0x8] sm:$0xff]  }
0x2664   :  { %10908 = vmatprep.subr.bf16.mxu0 %v18416_v4  ;;  %v14615_v4 = vld [vmem:[%s18969_s6 + $0xa4] ss:$16 sps:$4 sm:$0xff]  }
0x26e7   :  { %v10371_v60 = vpop.xlane.xlu0 %10370 }
0x26e8   :  { %v10372_v28 = vsub.f32 %v10368_v57, %v10371_v60  ;;  %v14595_v57 = vld [vmem:[%s18974_s11 + $0x18] sm:$0xff]   ;;  %v14607_v60 = vld [vmem:[%s18969_s6 + $0xe0] ss:$16 sps:$4 sm:$0xff]  }
0x26ea   :  { %v10373_v58 = vmul.f32 1.442695, %v10372_v28  ;;  %v14609_v28 = vld [vmem:[%s18969_s6 + $0xe4] ss:$16 sps:$4 sm:$0xff]  }
0x26ec   :  { %14959 = vpow2.f32 %v10373_v58  ;;  %v14612_v58 = vld [vmem:[%s18969_s6 + $0xc4] ss:$16 sps:$4 sm:$0xff]  }
0x26f9   :  { %v14960_v62 = vpop.eup %14959 }
0x26fa   :  { %v10375_v29 = vsel %vm4417_vm3, %v14960_v62, 0.0 }
0x26fb   :  { %10376 = vadd.xlane.f32.xlu1 %v10375_v29  ;;  %v14613_v29 = vld [vmem:[%s18969_s6 + $0xa0] ss:$16 sps:$4 sm:$0xff]  }
0x2784   :  { %v10377_v11 = vpop.xlane.xlu1 %10376 }
0x2785   :  { %14961 = vrcp.f32 %v10377_v11 }
0x2792   :  { %v14962_v15 = vpop.eup %14961 }
0x2793   :  { %v10379_v37 = vmul.f32 %v14962_v15, %v14960_v62  ;;  %v14610_v62 = vld [vmem:[%s18969_s6 + $0xc0] ss:$16 sps:$4 sm:$0xff]  }
0x2795   :  { %v10380_v52 = vpack.c.bf16 %v10379_v37, %v10379_v37 }
0x2797   :  { %13646 = vmatmul.mubr.msk.bf16.vlgmr.msra.gmra.mxu1 %vm4417_vm3, %v10380_v52 }
0x2798   :  { %13650 = vmatpush3.bf16.msra.mxu1 %v14591_v31  ;;  %13665 = vmatprep.mubr.msk.bf16.mxu1 %vm15041_vm0, %v15040_v2  ;;  %v14631_v31 = vld [vmem:[%s18970_s7 + $0xe0] ss:$16 sps:$4 sm:$0xff]  }
0x2799   :  { %13651 = vmatprep.subr.bf16.mxu1 %v15040_v2 }
0x279c   :  { %13652 = vmatpush3.bf16.msra.mxu1 %v14592_v12  ;;  %v14636_v12 = vld [vmem:[%s18970_s7 + $0xc4] ss:$16 sps:$4 sm:$0xff]  }
0x279d   :  { %13653 = vmatprep.subr.bf16.mxu1 %v15040_v2 }
0x27a0   :  { %13654 = vmatpush3.bf16.msra.mxu1 %v14593_v55  ;;  %v14634_v55 = vld [vmem:[%s18970_s7 + $0xc0] ss:$16 sps:$4 sm:$0xff]  }
0x27a1   :  { %13655 = vmatprep.subr.bf16.mxu1 %v15040_v2 }
0x27a4   :  { %13656 = vmatpush3.bf16.msra.mxu1 %v14594_v35  ;;  %v14639_v35 = vld [vmem:[%s18970_s7 + $0xa4] ss:$16 sps:$4 sm:$0xff]  }
0x27a5   :  { %13657 = vmatprep.subr.bf16.mxu1 %v15040_v2 }
0x27a8   :  { %13658 = vmatpush3.bf16.msra.mxu1 %v14595_v57  ;;  %v14661_v57 = vld [vmem:[#allocation6 + $0x20] sm:$0xff]  }
0x27a9   :  { %13659 = vmatprep.subr.bf16.mxu1 %v15040_v2 }
0x27ac   :  { %13660 = vmatpush3.bf16.msra.mxu1 %v14596_v22  ;;  %v14662_v22 = vld [vmem:[#allocation5] sm:$0xff]  }
0x27ad   :  { %13661 = vmatprep.subr.bf16.mxu1 %v15040_v2 }
0x27b0   :  { %13662 = vmatpush3.bf16.msra.mxu1 %v14597_v53  ;;  %v14663_v53 = vld [vmem:[#allocation6 + $0x18] sm:$0xff]  }
0x27b1   :  { %13663 = vmatprep.subr.bf16.mxu1 %v15040_v2 }
0x27b4   :  { %13664 = vmatpush3.bf16.msra.mxu1 %v14598_v5  ;;  %v14664_v5 = vld [vmem:[#allocation6 + $0x10] sm:$0xff]  }
0x27b5   :  { %10867 = vmatprep.subr.bf16.mxu1 %v14609_v28 }
0x27b7   :  { %13666 = vmatmul.mubr.bf16.vlgmr.msra.gmra.mxu1 %v18651_v19 }
0x27b8   :  { %10899 = vmatprep.mubr.bf16.mxu1 %v19032_v54  ;;  %10868 = vmatpush1.bf16.msra.mxu1 %v14607_v60  ;;  %v14666_v60 = vld [vmem:[#allocation6] sm:$0xff]  }
0x27b9   :  { %10869 = vmatprep.subr.bf16.mxu1 %v14612_v58 }
0x27bc   :  { %10870 = vmatpush1.bf16.msra.mxu1 %v14610_v62 }
0x27bd   :  { %10871 = vmatprep.subr.bf16.mxu1 %v14615_v4 }
0x27c0   :  { %10872 = vmatpush1.bf16.msra.mxu1 %v14613_v29 }
0x27c1   :  { %10873 = vmatprep.subr.bf16.mxu1 %v14618_v14 }
0x27c4   :  { %10874 = vmatpush1.bf16.msra.mxu1 %v14616_v32 }
0x2857   :  { %v10450_v42 = vpop.f32.mrf.mxu1 }
0x2858   :  { %v10456_v46 = vpack.c.bf16 %v10450_v42, %v10450_v42 }
0x2859   :  { %v13647_v39 = vpop.f32.mrf.mxu1 }
0x285a   :  { %13686 = vmatmul.mubr.bf16.vlgmr.msra.gmra.mxu0 %v10456_v46  ;;  %v19080_v46 = vld [vmem:[#allocation56_spill] sm:$0xff] }
0x285b   :  { %v10453_v56 = vpop.f32.mrf.mxu1  ;;  %10909 = vmatpush1.bf16.msra.mxu0 %v18422_v51  ;;  %10940 = vmatprep.mubr.bf16.mxu0 %v19032_v54  ;;  %v784_v39 = vadd.f32 %v19080_v46, %v19054_v59 }
0x285c   :  { %10910 = vmatprep.subr.bf16.mxu0 %v18427_v6  ;;  %v19081_v56 = vld [vmem:[#allocation54_spill] sm:$0xff] }
0x285d   :  { %v13648_v16 = vpop.f32.mrf.mxu1 }
0x285f   :  { %10911 = vmatpush1.bf16.msra.mxu0 %v18433_v0 }
0x2860   :  { %10912 = vmatprep.subr.bf16.mxu0 %v18440_v30 }
0x2863   :  { %10913 = vmatpush1.bf16.msra.mxu0 %v18446_v13  ;;  %v14619_v13 = vld [vmem:[%s18969_s6 + $0x60] ss:$16 sps:$4 sm:$0xff]  }
0x2864   :  { %10914 = vmatprep.subr.bf16.mxu0 %v18452_v23  ;;  %v14621_v23 = vld [vmem:[%s18969_s6 + $0x64] ss:$16 sps:$4 sm:$0xff]  }
0x2865   :  { %10875 = vmatprep.subr.bf16.mxu1 %v14621_v23 }
0x2866   :  { %10876 = vmatpush1.bf16.msra.mxu1 %v14619_v13 }
0x2867   :  { %10915 = vmatpush1.bf16.msra.mxu0 %v18458_v49  ;;  %v14624_v49 = vld [vmem:[%s18969_s6 + $0x44] ss:$16 sps:$4 sm:$0xff]  }
0x2868   :  { %10916 = vmatprep.subr.bf16.mxu0 %v18470_v47  ;;  %10877 = vmatprep.subr.bf16.mxu1 %v14624_v49  ;;  %v14627_v47 = vld [vmem:[%s18969_s6 + $0x24] ss:$16 sps:$4 sm:$0xff]  }
0x286b   :  { %10917 = vmatpush1.bf16.msra.mxu0 %v18465_v3  ;;  %v14622_v3 = vld [vmem:[%s18969_s6 + $0x40] ss:$16 sps:$4 sm:$0xff]  }
0x286c   :  { %10918 = vmatprep.subr.bf16.mxu0 %v18475_v63  ;;  %10878 = vmatpush1.bf16.msra.mxu1 %v14622_v3  ;;  %v14625_v63 = vld [vmem:[%s18969_s6 + $0x20] ss:$16 sps:$4 sm:$0xff]  }
0x286d   :  { %10879 = vmatprep.subr.bf16.mxu1 %v14627_v47 }
0x286f   :  { %10919 = vmatpush1.bf16.msra.mxu0 %v18482_v20  ;;  %v14630_v20 = vld [vmem:[%s18969_s6 + $0x4] ss:$16 sps:$4 sm:$0xff]  }
0x2870   :  { %10920 = vmatprep.subr.bf16.mxu0 %v18488_v36  ;;  %10880 = vmatpush1.bf16.msra.mxu1 %v14625_v63  ;;  %v14628_v36 = vld [vmem:[%s18969_s6] ss:$16 sps:$4 sm:$0xff]  }
0x2871   :  { %10881 = vmatprep.subr.bf16.mxu1 %v14630_v20 }
0x2873   :  { %10921 = vmatpush1.bf16.msra.mxu0 %v18494_v41  ;;  %v14633_v41 = vld [vmem:[%s18970_s7 + $0xe4] ss:$16 sps:$4 sm:$0xff]  }
0x2874   :  { %10922 = vmatprep.subr.bf16.mxu0 %v18500_v45  ;;  %10882 = vmatpush1.bf16.msra.mxu1 %v14628_v36 }
0x2875   :  { %11145 = vmatprep.subr.bf16.mxu1 %v14633_v41 }
0x2877   :  { %v10571_v51 = vpop.f32.mrf.mxu1  ;;  %10923 = vmatpush1.bf16.msra.mxu0 %v18506_v9 }
0x2878   :  { %11186 = vmatprep.subr.bf16.mxu0 %v18512_v7 }
0x2879   :  { %v13667_v6 = vpop.f32.mrf.mxu1 }
0x287b   :  { %v10574_v0 = vpop.f32.mrf.mxu1 }
0x287d   :  { %v13668_v30 = vpop.f32.mrf.mxu1 }
0x291a   :  { %v10659_v45 = vpop.f32.mrf.mxu0 }
0x291b   :  { %v10660_v9 = vadd.f32 %v10659_v45, %v10571_v51  ;;  %v19082_v45 = vld [vmem:[#allocation57_spill] sm:$0xff] }
0x291c   :  { %v13687_v7 = vpop.f32.mrf.mxu0  ;;  %v857_v59 = vadd.f32 %v19082_v45, %v19057_v40 }
0x291d   :  { %14963 = vtanh.f32 %v10660_v9 }
0x291e   :  { %v10662_v11 = vpop.f32.mrf.mxu0 }
0x291f   :  { %v19083_v11 = vld [vmem:[#allocation55_spill] sm:$0xff] }
0x2920   :  { %v13688_v15 = vpop.f32.mrf.mxu0 }
0x292a   :  { %v14964_v37 = vpop.eup %14963 }
0x292b   :  { %10667 = vst [vmem:[#allocation7 + $0x30] sm:$0xff] %v14964_v37  ;;  %v10668_v52 = vpack.c.bf16 %v14964_v37, %v14964_v37 }
0x292d   :  { %10900 = vmatmul.mubr.bf16.vlgmr.msra.gmra.mxu1 %v10668_v52  ;;  %10941 = vmatmul.mubr.bf16.vlgmr.msra.gmra.mxu0 %v10668_v52 }
0x292e   :  { %11146 = vmatpush1.bf16.msra.mxu1 %v14631_v31  ;;  %11187 = vmatpush1.bf16.msra.mxu0 %v18519_v18  ;;  %v14637_v18 = vld [vmem:[%s18970_s7 + $0xa0] ss:$16 sps:$4 sm:$0xff]  }
0x292f   :  { %11147 = vmatprep.subr.bf16.mxu1 %v14636_v12  ;;  %11188 = vmatprep.subr.bf16.mxu0 %v18524_v10  ;;  %v14642_v10 = vld [vmem:[%s18970_s7 + $0x84] ss:$16 sps:$4 sm:$0xff]  }
0x2930   :  { %11177 = vmatprep.mubr.bf16.mxu1 %v19032_v54  ;;  %11218 = vmatprep.mubr.bf16.mxu0 %v19032_v54  ;;  %v14640_v54 = vld [vmem:[%s18970_s7 + $0x80] ss:$16 sps:$4 sm:$0xff]  }
0x2932   :  { %11148 = vmatpush1.bf16.msra.mxu1 %v14634_v55  ;;  %11189 = vmatpush1.bf16.msra.mxu0 %v18531_v61  ;;  %v14645_v61 = vld [vmem:[%s18970_s7 + $0x64] ss:$16 sps:$4 sm:$0xff]  }
0x2933   :  { %11149 = vmatprep.subr.bf16.mxu1 %v14639_v35  ;;  %11190 = vmatprep.subr.bf16.mxu0 %v18538_v8  ;;  %v14643_v8 = vld [vmem:[%s18970_s7 + $0x60] ss:$16 sps:$4 sm:$0xff]  }
0x2936   :  { %11150 = vmatpush1.bf16.msra.mxu1 %v14637_v18  ;;  %11191 = vmatpush1.bf16.msra.mxu0 %v18547_v44  ;;  %v14648_v44 = vld [vmem:[%s18970_s7 + $0x44] ss:$16 sps:$4 sm:$0xff]  }
0x2937   :  { %11151 = vmatprep.subr.bf16.mxu1 %v14642_v10  ;;  %11192 = vmatprep.subr.bf16.mxu0 %v18554_v33  ;;  %v14646_v33 = vld [vmem:[%s18970_s7 + $0x40] ss:$16 sps:$4 sm:$0xff]  }
0x293a   :  { %11152 = vmatpush1.bf16.msra.mxu1 %v14640_v54  ;;  %11193 = vmatpush1.bf16.msra.mxu0 %v18561_v1  ;;  %v14651_v1 = vld [vmem:[%s18970_s7 + $0x24] ss:$16 sps:$4 sm:$0xff]  }
0x293b   :  { %11153 = vmatprep.subr.bf16.mxu1 %v14645_v61  ;;  %11194 = vmatprep.subr.bf16.mxu0 %v18568_v25  ;;  %v14649_v25 = vld [vmem:[%s18970_s7 + $0x20] ss:$16 sps:$4 sm:$0xff]  }
0x293e   :  { %11154 = vmatpush1.bf16.msra.mxu1 %v14643_v8  ;;  %11195 = vmatpush1.bf16.msra.mxu0 %v18575_v17  ;;  %v14654_v17 = vld [vmem:[%s18970_s7 + $0x4] ss:$16 sps:$4 sm:$0xff]  }
0x293f   :  { %11155 = vmatprep.subr.bf16.mxu1 %v14648_v44  ;;  %11196 = vmatprep.subr.bf16.mxu0 %v18582_v34  ;;  %v14652_v34 = vld [vmem:[%s18970_s7] ss:$16 sps:$4 sm:$0xff]  }
0x2942   :  { %11156 = vmatpush1.bf16.msra.mxu1 %v14646_v33  ;;  %11197 = vmatpush1.bf16.msra.mxu0 %v18589_v21  ;;  %v14655_v21 = vld [vmem:[#allocation6 + $0x38] sm:$0xff]  }
0x2943   :  { %11157 = vmatprep.subr.bf16.mxu1 %v14651_v1  ;;  %11198 = vmatprep.subr.bf16.mxu0 %v18596_v26  ;;  %v14656_v26 = vld [vmem:[#allocation5 + $0x18] sm:$0xff]  }
0x2946   :  { %11158 = vmatpush1.bf16.msra.mxu1 %v14649_v25  ;;  %11199 = vmatpush1.bf16.msra.mxu0 %v18603_v43  ;;  %v14657_v43 = vld [vmem:[#allocation6 + $0x30] sm:$0xff]  }
0x2947   :  { %11159 = vmatprep.subr.bf16.mxu1 %v14654_v17  ;;  %11200 = vmatprep.subr.bf16.mxu0 %v18610_v48  ;;  %v14658_v48 = vld [vmem:[#allocation5 + $0x10] sm:$0xff]  }
0x294a   :  { %11160 = vmatpush1.bf16.msra.mxu1 %v14652_v34  ;;  %11201 = vmatpush1.bf16.msra.mxu0 %v18617_v24  ;;  %v14659_v24 = vld [vmem:[#allocation6 + $0x28] sm:$0xff]  }
0x294b   :  { %13689 = vmatprep.subr.bf16.mxu1 %v15040_v2  ;;  %13709 = vmatprep.subr.bf16.mxu0 %v15040_v2 }
0x294d   :  { %11178 = vmatmul.mubr.bf16.vlgmr.msra.gmra.mxu1 %v18651_v19  ;;  %11219 = vmatmul.mubr.bf16.vlgmr.msra.gmra.mxu0 %v18651_v19  ;;  %v14660_v19 = vld [vmem:[#allocation5 + $0x8] sm:$0xff]  }
0x294e   :  { %13690 = vmatpush3.bf16.msra.mxu1 %v14655_v21  ;;  %13710 = vmatpush3.bf16.msra.mxu0 %v14656_v26 }
0x294f   :  { %13691 = vmatprep.subr.bf16.mxu1 %v15040_v2  ;;  %13711 = vmatprep.subr.bf16.mxu0 %v15040_v2 }
0x2950   :  { %13705 = vmatprep.mubr.msk.bf16.mxu1 %vm15041_vm0, %v15040_v2  ;;  %13717 = vmatprep.mubr.msk.bf16.mxu0 %vm15041_vm0, %v15040_v2 }
0x2952   :  { %13692 = vmatpush3.bf16.msra.mxu1 %v14657_v43  ;;  %13712 = vmatpush3.bf16.msra.mxu0 %v14658_v48 }
0x2953   :  { %13693 = vmatprep.subr.bf16.mxu1 %v15040_v2  ;;  %13713 = vmatprep.subr.bf16.mxu0 %v15040_v2 }
0x2956   :  { %13694 = vmatpush3.bf16.msra.mxu1 %v14659_v24  ;;  %13714 = vmatpush3.bf16.msra.mxu0 %v14660_v19 }
0x2957   :  { %13695 = vmatprep.subr.bf16.mxu1 %v15040_v2  ;;  %13715 = vmatprep.subr.bf16.mxu0 %v15040_v2 }
0x295a   :  { %13696 = vmatpush3.bf16.msra.mxu1 %v14661_v57  ;;  %13716 = vmatpush3.bf16.msra.mxu0 %v14662_v22 }
0x295b   :  { %13697 = vmatprep.subr.bf16.mxu1 %v15040_v2  ;;  %13721 = vmatprep.subr.bf16.mxu0 %v15040_v2 }
0x295e   :  { %13698 = vmatpush3.bf16.msra.mxu1 %v14663_v53 }
0x295f   :  { %13699 = vmatprep.subr.bf16.mxu1 %v15040_v2 }
0x2962   :  { %13700 = vmatpush3.bf16.msra.mxu1 %v14664_v5 }
0x2963   :  { %13701 = vmatprep.subr.bf16.mxu1 %v15040_v2 }
0x2966   :  { %13702 = vmatpush3.bf16.msra.mxu1 %v14665_v50  ;;  %v14675_v50 = vld [vmem:[%s18973_s10 + $0x38] sm:$0xff]  }
0x2967   :  { %13703 = vmatprep.subr.bf16.mxu1 %v15040_v2 }
0x296a   :  { %13704 = vmatpush3.bf16.msra.mxu1 %v14666_v60  ;;  %v14677_v60 = vld [vmem:[%s18973_s10 + $0x28] sm:$0xff]  }
0x296b   :  { %13741 = vmatprep.subr.bf16.mxu1 %v15040_v2 }
0x29ed   :  { %v10901_v28 = vpop.f32.mrf.mxu1  ;;  %v10942_v58 = vpop.f32.mrf.mxu0 }
0x29ee   :  { %v10949_v16 = vadd.f32 %v10901_v28, %v19081_v56  ;;  %v10951_v15 = vadd.f32 %v10942_v58, %v19083_v11  ;;  %v14678_v28 = vld [vmem:[%s18973_s10 + $0x20] sm:$0xff]   ;;  %v14679_v58 = vld [vmem:[%s18973_s10 + $0x18] sm:$0xff]   ;;  %v14669_v56 = vld [vmem:[%s18974_s11 + $0x28] sm:$0xff]  }
0x29ef   :  { %v10903_v62 = vpop.f32.mrf.mxu1  ;;  %v10944_v4 = vpop.f32.mrf.mxu0 }
0x29f0   :  { %v10950_v0 = vadd.f32 %v10903_v62, %v784_v39  ;;  %v10952_v9 = vadd.f32 %v10944_v4, %v857_v59  ;;  %v14680_v62 = vld [vmem:[%s18973_s10 + $0x10] sm:$0xff]   ;;  %v14681_v4 = vld [vmem:[%s18973_s10 + $0x8] sm:$0xff]  }
0x29f1   :  { %v10905_v29 = vpop.f32.mrf.mxu1  ;;  %v10946_v14 = vpop.f32.mrf.mxu0  ;;  %v14668_v39 = vld [vmem:[%s18974_s11 + $0x30] sm:$0xff]  }
0x29f3   :  { %v10906_v32 = vpop.f32.mrf.mxu1  ;;  %v10947_v42 = vpop.f32.mrf.mxu0 }
0x29f4   :  { %v14667_v42 = vld [vmem:[%s18974_s11 + $0x38] sm:$0xff]  }
0x2a0d   :  { %v11179_v51 = vpop.f32.mrf.mxu1  ;;  %v11220_v6 = vpop.f32.mrf.mxu0 }
0x2a0e   :  { %v11227_v30 = vadd.f32 %v11179_v51, %v10949_v16  ;;  %v11229_v37 = vadd.f32 %v11220_v6, %v10951_v15  ;;  %v14670_v16 = vld [vmem:[%s18974_s11 + $0x20] sm:$0xff]   ;;  %v14671_v51 = vld [vmem:[%s18974_s11 + $0x18] sm:$0xff]   ;;  %v14672_v6 = vld [vmem:[%s18974_s11 + $0x10] sm:$0xff]  }
0x2a0f   :  { %v11181_v13 = vpop.f32.mrf.mxu1  ;;  %v11222_v23 = vpop.f32.mrf.mxu0 }
0x2a10   :  { %v12814_v49 = vmul.f32 -1.442695, %v11227_v30  ;;  %v11228_v3 = vadd.f32 %v11181_v13, %v10950_v0  ;;  %v11230_v7 = vadd.f32 %v11222_v23, %v10952_v9  ;;  %v14673_v0 = vld [vmem:[%s18974_s11 + $0x8] sm:$0xff]   ;;  %v14674_v30 = vld [vmem:[%s18974_s11] sm:$0xff]   ;;  %s15042_s11 = smov [#allocation7]  }
0x2a11   :  { %v11183_v47 = vpop.f32.mrf.mxu1  ;;  %v11224_v63 = vpop.f32.mrf.mxu0  ;;  %v14682_v13 = vld [vmem:[%s18973_s10] sm:$0xff]   ;;  %s11665_s24 = sshll.u32 %s15042_s11, 4  ;;  %s11666_s24 = int_to_ptr.vmem [resolvable:$true] %s11665_s24 }
0x2a12   :  { %14965 = vpow2.f32 %v12814_v49  ;;  %v12815_v20 = vmul.f32 -1.442695, %v11228_v3  ;;  %v12816_v31 = vmul.f32 -1.442695, %v11230_v7  ;;  %s15017_s10 = scalar_lea.vmem %s11666_s24, 1024  ;;  %p15022_p1 = scmp.lt.s32.totalorder %s11666_s24, %s11666_s24 }
0x2a13   :  { %v11184_v36 = vpop.f32.mrf.mxu1  ;;  %v11225_v41 = vpop.f32.mrf.mxu0  ;;  %p15018_p0 = scmp.ne.s32.totalorder %s11666_s24, %s15017_s10  ;;  %p15023_p2 = scmp.lt.s32.totalorder %s15017_s10, %s15017_s10 }
0x2a14   :  { %14967 = vpow2.f32 %v12815_v20 }
0x2a15   :  { %14969 = vtanh.f32 %v11229_v37  ;;  %p15024_p3 = por %p15023_p2, %p15022_p1 }
0x2a16   :  { %14971 = vpow2.f32 %v12816_v31 }
0x2a17   :  { %p15025_p4 = pnand %p15024_p3, %p15018_p0 }
0x2a1f   :  { %v14966_v52 = vpop.eup %14965 }
0x2a20   :  { %v11234_v12 = vadd.f32 1.0, %v14966_v52 }
0x2a21   :  { %v14968_v55 = vpop.eup %14967 }
0x2a22   :  { %14973 = vrcp.f32 %v11234_v12  ;;  %v11240_v35 = vadd.f32 1.0, %v14968_v55  ;;  %v14970_v18 = vpop.eup %14969 }
0x2a23   :  { %v14972_v10 = vpop.eup %14971 }
0x2a24   :  { %14975 = vrcp.f32 %v11240_v35  ;;  %v11247_v40 = vadd.f32 1.0, %v14972_v10 }
0x2a26   :  { %14977 = vrcp.f32 %v11247_v40 }
0x2a2f   :  { %v14974_v54 = vpop.eup %14973 }
0x2a30   :  { %v11251_v61 = vmul.f32 %v14974_v54, %v14970_v18 }
0x2a31   :  { %v14976_v8 = vpop.eup %14975 }
0x2a32   :  { %v11250_v44 = vmul.f32 %v14976_v8, %v18648_v38 }
0x2a33   :  { %v14978_v1 = vpop.eup %14977 }
0x2a34   :  { %v11252_v33 = vadd.f32 %v11251_v61, %v11250_v44 }
0x2a36   :  { %14979 = vtanh.f32 %v11252_v33 }
0x2a43   :  { %v14980_v25 = vpop.eup %14979 }
0x2a44   :  { %v11254_v17 = vmul.f32 %v14980_v25, %v14978_v1 }
0x2a46   :  { %v18885_v34 = vpack.c.bf16 %v11254_v17, %v11254_v17 }
0x2a48   :  { %13706 = vmatmul.mubr.bf16.vlgmr.msra.gmra.mxu1 %v18885_v34 }
0x2a49   :  { %13757 = vmatprep.mubr.msk.bf16.mxu1 %vm15041_vm0, %v15040_v2  ;;  %13742 = vmatpush3.bf16.msra.mxu1 %v14675_v50 }
0x2a4a   :  { %13743 = vmatprep.subr.bf16.mxu1 %v15040_v2 }
0x2a4d   :  { %13744 = vmatpush3.bf16.msra.mxu1 %v14676_v27 }
0x2a4e   :  { %13745 = vmatprep.subr.bf16.mxu1 %v15040_v2 }
0x2a51   :  { %13746 = vmatpush3.bf16.msra.mxu1 %v14677_v60 }
0x2a52   :  { %13747 = vmatprep.subr.bf16.mxu1 %v15040_v2 }
0x2a55   :  { %13748 = vmatpush3.bf16.msra.mxu1 %v14678_v28 }
0x2a56   :  { %13749 = vmatprep.subr.bf16.mxu1 %v15040_v2 }
0x2a59   :  { %13750 = vmatpush3.bf16.msra.mxu1 %v14679_v58 }
0x2a5a   :  { %13751 = vmatprep.subr.bf16.mxu1 %v15040_v2 }
0x2a5d   :  { %13752 = vmatpush3.bf16.msra.mxu1 %v14680_v62 }
0x2a5e   :  { %13753 = vmatprep.subr.bf16.mxu1 %v15040_v2 }
0x2a61   :  { %13754 = vmatpush3.bf16.msra.mxu1 %v14681_v4 }
0x2a62   :  { %13755 = vmatprep.subr.bf16.mxu1 %v15040_v2 }
0x2a65   :  { %13756 = vmatpush3.bf16.msra.mxu1 %v14682_v13 }
0x2b08   :  { %v11354_v21 = vpop.f32.mrf.mxu1 }
0x2b09   :  { %v11360_v26 = vsel %vm16690_vm2, %v11354_v21, -1.7014117e+38 }
0x2b0a   :  { %v13707_v43 = vpop.f32.mrf.mxu1  ;;  %v11361_v38 = vsel %vm4417_vm3, %v11360_v26, -inf }
0x2b0b   :  { %11362 = vmax.xlane.f32.xlu0 %v11361_v38 }
0x2b0c   :  { %v11357_v48 = vpop.f32.mrf.mxu1 }
0x2b0e   :  { %v13708_v24 = vpop.f32.mrf.mxu1 }
0x2b94   :  { %v11363_v19 = vpop.xlane.xlu0 %11362 }
0x2b95   :  { %v11364_v57 = vsub.f32 %v11360_v26, %v11363_v19 }
0x2b97   :  { %v11365_v22 = vmul.f32 1.442695, %v11364_v57 }
0x2b99   :  { %14981 = vpow2.f32 %v11365_v22 }
0x2ba6   :  { %v14982_v53 = vpop.eup %14981 }
0x2ba7   :  { %v11367_v5 = vsel %vm4417_vm3, %v14982_v53, 0.0 }
0x2ba8   :  { %11368 = vadd.xlane.f32.xlu1 %v11367_v5 }
0x2c31   :  { %v11369_v29 = vpop.xlane.xlu1 %11368 }
0x2c32   :  { %14983 = vrcp.f32 %v11369_v29 }
0x2c3f   :  { %v14984_v14 = vpop.eup %14983 }
0x2c40   :  { %v11371_v32 = vmul.f32 %v14984_v14, %v14982_v53 }
0x2c42   :  { %v11372_v46 = vpack.c.bf16 %v11371_v32, %v11371_v32 }
0x2c44   :  { %13718 = vmatmul.mubr.msk.bf16.vlgmr.msra.gmra.mxu0 %vm4417_vm3, %v11372_v46 }
0x2c45   :  { %13722 = vmatpush3.bf16.msra.mxu0 %v14667_v42  ;;  %13737 = vmatprep.mubr.msk.bf16.mxu0 %vm15041_vm0, %v15040_v2 }
0x2c46   :  { %13723 = vmatprep.subr.bf16.mxu0 %v15040_v2 }
0x2c49   :  { %13724 = vmatpush3.bf16.msra.mxu0 %v14668_v39 }
0x2c4a   :  { %13725 = vmatprep.subr.bf16.mxu0 %v15040_v2 }
0x2c4d   :  { %13726 = vmatpush3.bf16.msra.mxu0 %v14669_v56 }
0x2c4e   :  { %13727 = vmatprep.subr.bf16.mxu0 %v15040_v2 }
0x2c51   :  { %13728 = vmatpush3.bf16.msra.mxu0 %v14670_v16 }
0x2c52   :  { %13729 = vmatprep.subr.bf16.mxu0 %v15040_v2 }
0x2c55   :  { %13730 = vmatpush3.bf16.msra.mxu0 %v14671_v51 }
0x2c56   :  { %13731 = vmatprep.subr.bf16.mxu0 %v15040_v2 }
0x2c59   :  { %13732 = vmatpush3.bf16.msra.mxu0 %v14672_v6 }
0x2c5a   :  { %13733 = vmatprep.subr.bf16.mxu0 %v15040_v2 }
0x2c5d   :  { %13734 = vmatpush3.bf16.msra.mxu0 %v14673_v0 }
0x2c5e   :  { %13735 = vmatprep.subr.bf16.mxu0 %v15040_v2 }
0x2c61   :  { %13736 = vmatpush3.bf16.msra.mxu0 %v14674_v30 }
0x2c64   :  { %13738 = vmatmul.mubr.bf16.vlgmr.msra.gmra.mxu0 %v18885_v34 }
0x2d04   :  { %v11442_v23 = vpop.f32.mrf.mxu0 }
0x2d05   :  { %v11448_v49 = vpack.c.bf16 %v11442_v23, %v11442_v23 }
0x2d06   :  { %v13719_v3 = vpop.f32.mrf.mxu0 }
0x2d07   :  { %13758 = vmatmul.mubr.bf16.vlgmr.msra.gmra.mxu1 %v11448_v49 }
0x2d08   :  { %v11445_v47 = vpop.f32.mrf.mxu0 }
0x2d0a   :  { %v13720_v63 = vpop.f32.mrf.mxu0 }
0x2d24   :  { %v11563_v20 = vpop.f32.mrf.mxu0 }
0x2d26   :  { %v13739_v36 = vpop.f32.mrf.mxu0 }
0x2d28   :  { %v11566_v41 = vpop.f32.mrf.mxu0 }
0x2d2a   :  { %v13740_v45 = vpop.f32.mrf.mxu0 }
0x2dc7   :  { %v11651_v59 = vpop.f32.mrf.mxu1 }
0x2dc8   :  { %v11652_v2 = vadd.f32 %v11651_v59, %v11563_v20 }
0x2dc9   :  { %v13759_v9 = vpop.f32.mrf.mxu1 }
0x2dca   :  { %14985 = vtanh.f32 %v11652_v2 }
0x2dcb   :  { %v11654_v7 = vpop.f32.mrf.mxu1 }
0x2dcd   :  { %v13760_v11 = vpop.f32.mrf.mxu1 }
0x2dd7   :  { %v14986_v15 = vpop.eup %14985 }
0x2dd8   :  { %11659 = vst [vmem:[#allocation7 + $0x38] sm:$0xff] %v14986_v15 }
0x2dd9   :  { %15028 = shalt.err (!%p15025_p4)
}
0x2dda   :  { %s15043_s25 = smov 128   ;;  %s15044_s26 = smov 8  }
0x2ddb   :  { %11671 = dma.vmem_to_hbm [thread:$0]  %s11666_s24, 1024, %s18975_s12, [#allocation8], %s15043_s25, %s15043_s25, %s15044_s26  }
0x2ddc   :  { %15037 = dma.done.wait [#allocation8], 1024  }
0x2ddd   :  { %15038 = vsyncadd [#allocation8], 4294966272 }
0x2dde   :  { %11675 = vsyncpa [#allocation8], 1 }

</bundles_post_ra>
